<compile_context>
chip_gen: v6e
topology: v6e:2x2x1
jax: 0.10.0
libtpu: 0.0.40
codegen_flags: <defaults>
</compile_context>

<pallas_src>
import functools

import jax
import jax.numpy as jnp
from jax import lax
from jax.experimental import pallas as pl
from jax.experimental.pallas import tpu as pltpu


def _pick_tile(n, target):
    """Largest divisor of n that is <= target and (multiple of 8 or == n)."""
    for t in range(min(target, n), 0, -1):
        if n % t == 0 and (t % 8 == 0 or t == n):
            return t
    return n


# ---------------- Kernel A: fused channel-LayerNorm + QKV projection ----------------

def _ln_qkv_kernel(x_ref, g_ref, b_ref, w_ref, q_ref, k_ref, v_ref, *, C, eps):
    x = x_ref[...].astype(jnp.float32)                       # (TM, C)
    mu = jnp.mean(x, axis=-1, keepdims=True)
    xc = x - mu
    var = jnp.mean(xc * xc, axis=-1, keepdims=True)
    y = xc * lax.rsqrt(var + eps) * g_ref[...] + b_ref[...]  # LayerNorm over channels
    qkv = jnp.dot(y, w_ref[...], preferred_element_type=jnp.float32)   # (TM, 3C)
    q_ref[...] = qkv[:, 0:C].astype(q_ref.dtype)
    k_ref[...] = qkv[:, C:2 * C].astype(k_ref.dtype)
    v_ref[...] = qkv[:, 2 * C:3 * C].astype(v_ref.dtype)


def ln_qkv(x_flat, ln_g, ln_b, w_qkv, *, eps=1e-5, row_tile=512):
    N, C = x_flat.shape
    TM = _pick_tile(N, min(row_tile, max(8, N // 2)))        # >=2 grid steps when possible
    kern = functools.partial(_ln_qkv_kernel, C=C, eps=eps)
    sds = jax.ShapeDtypeStruct((N, C), jnp.float32)
    return pl.pallas_call(
        kern,
        out_shape=(sds, sds, sds),
        grid=(N // TM,),
        in_specs=[
            pl.BlockSpec((TM, C), lambda i: (i, 0)),
            pl.BlockSpec((1, C), lambda i: (0, 0)),          # gamma, resident
            pl.BlockSpec((1, C), lambda i: (0, 0)),          # beta, resident
            pl.BlockSpec((C, 3 * C), lambda i: (0, 0)),      # fused Wqkv, resident
        ],
        out_specs=(
            pl.BlockSpec((TM, C), lambda i: (i, 0)),
            pl.BlockSpec((TM, C), lambda i: (i, 0)),
            pl.BlockSpec((TM, C), lambda i: (i, 0)),
        ),
        compiler_params=pltpu.CompilerParams(
            dimension_semantics=("parallel",),
            vmem_limit_bytes=64 * 1024 * 1024),
    )(x_flat, ln_g.reshape(1, C), ln_b.reshape(1, C), w_qkv)


# ---------------- Kernel B: neighborhood attention core ----------------

def _na_attn_kernel(q_ref, k_ref, v_ref, bias_ref, o_ref, *, num_heads, head_dim, scale):
    q = q_ref[...] * scale                                   # (TQ, C)
    k = k_ref[...]                                           # (S,  C)
    v = v_ref[...]                                           # (S,  C)
    outs = []
    for h in range(num_heads):                               # small static head loop
        sl = slice(h * head_dim, (h + 1) * head_dim)
        qh, kh, vh = q[:, sl], k[:, sl], v[:, sl]
        # contraction on the last dims -> no in-kernel k transpose
        s = lax.dot_general(qh, kh, (((1,), (1,)), ((), ())),
                            preferred_element_type=jnp.float32)        # (TQ, S)
        s = s + bias_ref[h]                                  # rpb inside window, -1e30 outside
        m = jnp.max(s, axis=-1, keepdims=True)
        p = jnp.exp(s - m)                                   # masked entries -> exactly 0
        l = jnp.sum(p, axis=-1, keepdims=True)
        oh = jnp.dot(p, vh, preferred_element_type=jnp.float32)        # (TQ, hd)
        outs.append(oh * pl.reciprocal(l, approx=True))      # normalize output, EUP recip
    # single lane-dense store of all heads
    o_ref[...] = jnp.concatenate(outs, axis=-1).astype(o_ref.dtype)


def neighborhood_attention_core(q, k, v, bias, *, num_heads, scale, q_tile=256):
    B, S, C = q.shape
    hd = C // num_heads
    TQ = _pick_tile(S, min(q_tile, max(8, S // 2)))
    kern = functools.partial(_na_attn_kernel, num_heads=num_heads, head_dim=hd, scale=scale)
    return pl.pallas_call(
        kern,
        out_shape=jax.ShapeDtypeStruct((B, S, C), jnp.float32),
        grid=(B, S // TQ),
        in_specs=[
            pl.BlockSpec((None, TQ, C), lambda b, i: (b, i, 0)),       # q tile
            pl.BlockSpec((None, S, C), lambda b, i: (b, 0, 0)),        # all keys (resident per b)
            pl.BlockSpec((None, S, C), lambda b, i: (b, 0, 0)),        # all values
            pl.BlockSpec((num_heads, TQ, S), lambda b, i: (0, i, 0)),  # batch-independent bias
        ],
        out_specs=pl.BlockSpec((None, TQ, C), lambda b, i: (b, i, 0)),
        compiler_params=pltpu.CompilerParams(
            dimension_semantics=("parallel", "parallel"),
            vmem_limit_bytes=64 * 1024 * 1024),
    )(q, k, v, bias)


# ---------------- Kernel C: output projection + bias + residual ----------------

def _proj_residual_kernel(a_ref, x_ref, w_ref, b_ref, o_ref):
    acc = jnp.dot(a_ref[...], w_ref[...], preferred_element_type=jnp.float32)
    o_ref[...] = (x_ref[...] + acc + b_ref[...]).astype(o_ref.dtype)


def proj_residual(attn_flat, x_flat, w_o, b_o, *, row_tile=512):
    N, C = attn_flat.shape
    TM = _pick_tile(N, min(row_tile, max(8, N // 2)))
    return pl.pallas_call(
        _proj_residual_kernel,
        out_shape=jax.ShapeDtypeStruct((N, C), jnp.float32),
        grid=(N // TM,),
        in_specs=[
            pl.BlockSpec((TM, C), lambda i: (i, 0)),
            pl.BlockSpec((TM, C), lambda i: (i, 0)),
            pl.BlockSpec((C, C), lambda i: (0, 0)),
            pl.BlockSpec((1, C), lambda i: (0, 0)),
        ],
        out_specs=pl.BlockSpec((TM, C), lambda i: (i, 0)),
        compiler_params=pltpu.CompilerParams(
            dimension_semantics=("parallel",),
            vmem_limit_bytes=64 * 1024 * 1024),
    )(attn_flat, x_flat, w_o, b_o.reshape(1, C))


# ---------------- NATTEN neighborhood bias (plain JAX, tiny, batch-independent) ----------------

def build_neighborhood_bias(rpb, H, W, kernel_size, mask_value=-1e30):
    """rpb: (nh, 2K-1, 2K-1) -> (nh, H*W, H*W) additive attention bias.

    Inside pixel (qi,qj)'s clamped KxK NATTEN window: rpb[h, K-1+ki-qi, K-1+kj-qj];
    outside: mask_value (so exp() underflows to exactly 0).  dilation == 1 only.
    """
    K = kernel_size
    ns = K // 2
    nh = rpb.shape[0]

    def axis_terms(L):
        q = jnp.arange(L)[:, None]
        kk = jnp.arange(L)[None, :]
        start = jnp.clip(q - ns, 0, L - K)                   # NATTEN clamped window start
        inwin = (kk >= start) & (kk < start + K)
        idx = jnp.clip(kk - q + (K - 1), 0, 2 * K - 2)
        return inwin, idx

    in_i, ridx = axis_terms(H)
    in_j, cidx = axis_terms(W)
    inwin = in_i[:, None, :, None] & in_j[None, :, None, :]                  # (H,W,H,W)
    flat_idx = ridx[:, None, :, None] * (2 * K - 1) + cidx[None, :, None, :]
    flat_idx = jnp.broadcast_to(flat_idx, (H, W, H, W))
    rpb_flat = rpb.reshape(nh, (2 * K - 1) ** 2)
    bias = jnp.take(rpb_flat, flat_idx.reshape(-1), axis=1).reshape(nh, H, W, H, W)
    bias = jnp.where(inwin[None], bias, mask_value)
    return bias.reshape(nh, H * W, H * W).astype(jnp.float32)


# ---------------- Block forward (exact PyTorch semantics, eval mode) ----------------

def neighborhood_attention_block_forward(hidden, params, cfg):
    B, C, H, W = hidden.shape
    nh = cfg['num_heads']
    hd = C // nh
    K = cfg['kernel_size']
    dil = cfg.get('dilation', 1)
    assert dil == 1  # TODO(synk): dilation > 1 neighborhood indexing not implemented.
    window = K * dil
    scale = cfg.get('qk_scale') or hd ** (-0.5)

    # NCHW -> flat (pixels, channels); stays flat/lane-dense until the end.
    x_flat = jnp.transpose(hidden, (0, 2, 3, 1)).reshape(B * H * W, C)

    # Kernel A: LayerNormProxy fused with the (bias-free) qkv projection.
    q, k, v = ln_qkv(x_flat, params['ln_g'], params['ln_b'], params['w_qkv'])

    # Spatial zero-padding when the image is smaller than the attention window.
    # (Padding q/k/v with zeros after the projection equals the reference, which pads
    #  the normed input before a bias-free qkv linear.)
    Hp, Wp = max(H, window), max(W, window)
    if (Hp, Wp) != (H, W):
        def pad_spatial(t):
            t = t.reshape(B, H, W, C)
            t = jnp.pad(t, ((0, 0), (0, Hp - H), (0, Wp - W), (0, 0)))
            return t.reshape(B, Hp * Wp, C)
        q3, k3, v3 = pad_spatial(q), pad_spatial(k), pad_spatial(v)
    else:
        q3 = q.reshape(B, H * W, C)
        k3 = k.reshape(B, H * W, C)
        v3 = v.reshape(B, H * W, C)

    bias = build_neighborhood_bias(params['rpb'], Hp, Wp, K)

    # Kernel B: neighborhood attention (dense masked; exact).
    attn = neighborhood_attention_core(q3, k3, v3, bias, num_heads=nh, scale=scale)

    if (Hp, Wp) != (H, W):
        attn = attn.reshape(B, Hp, Wp, C)[:, :H, :W, :]
    attn_flat = attn.reshape(B * H * W, C)

    # Kernel C: output projection + bias + residual (dropouts are identity).
    out_flat = proj_residual(attn_flat, x_flat, params['w_o'], params['b_o'])
    return jnp.transpose(out_flat.reshape(B, H, W, C), (0, 3, 1, 2))


# ---------------- parameter init + main ----------------

def init_params(key, cfg):
    C = cfg['dim']
    nh = cfg['num_heads']
    K = cfg['kernel_size']
    ks = jax.random.split(key, 4)

    def nrm(k, shape, std=0.05):
        return (std * jax.random.normal(k, shape)).astype(jnp.float32)

    return dict(
        ln_g=jnp.ones((C,), jnp.float32),
        ln_b=jnp.zeros((C,), jnp.float32),
        w_qkv=nrm(ks[0], (C, 3 * C)),        # torch qkv.weight.T (qkv_bias=False)
        w_o=nrm(ks[1], (C, C)),              # torch proj.weight.T
        b_o=nrm(ks[2], (C,)),
        rpb=(0.02 * jax.random.normal(ks[3], (nh, 2 * K - 1, 2 * K - 1))).astype(jnp.float32),
    )


if __name__ == "__main__":
    cfg = dict(dim=32, num_heads=4, kernel_size=3, dilation=1, qk_scale=None)
    B, H, W = 2, 16, 16

    key = jax.random.PRNGKey(0)
    k_in, k_par = jax.random.split(key)
    x = jax.random.normal(k_in, (B, cfg['dim'], H, W), dtype=jnp.float32)
    params = init_params(k_par, cfg)

    fwd = jax.jit(functools.partial(neighborhood_attention_block_forward, cfg=cfg))
    y = fwd(x, params)
    y = jax.block_until_ready(y)
    assert y.shape == x.shape and bool(jnp.all(jnp.isfinite(y)))
    print("KERNEL_OK")
</pallas_src>

<mosaic_0001>
module attributes {stable_mosaic.version = 11 : i64} {
  func.func @_ln_qkv_kernel(%arg0: i32, %arg1: memref<256x32xf32, #tpu.memory_space<vmem>>, %arg2: memref<1x32xf32, #tpu.memory_space<vmem>>, %arg3: memref<1x32xf32, #tpu.memory_space<vmem>>, %arg4: memref<32x96xf32, #tpu.memory_space<vmem>>, %arg5: memref<256x32xf32, #tpu.memory_space<vmem>>, %arg6: memref<256x32xf32, #tpu.memory_space<vmem>>, %arg7: memref<256x32xf32, #tpu.memory_space<vmem>>) attributes {dimension_semantics = [#tpu.dimension_semantics<parallel>], iteration_bounds = array<i64: 2>, scalar_prefetch = 0 : i64, scratch_operands = 0 : i64, tpu.core_type = #tpu.core_type<tc>, window_params = [{transform_indices = @transform_0, window_bounds = array<i64: 256, 32>}, {pipeline_mode = #tpu.pipeline_mode<synchronous>, transform_indices = @transform_1, window_bounds = array<i64: 1, 32>}, {pipeline_mode = #tpu.pipeline_mode<synchronous>, transform_indices = @transform_2, window_bounds = array<i64: 1, 32>}, {pipeline_mode = #tpu.pipeline_mode<synchronous>, transform_indices = @transform_3, window_bounds = array<i64: 32, 96>}, {transform_indices = @transform_4, window_bounds = array<i64: 256, 32>}, {transform_indices = @transform_5, window_bounds = array<i64: 256, 32>}, {transform_indices = @transform_6, window_bounds = array<i64: 256, 32>}]} {
    %c0 = arith.constant 0 : index
    %c0_0 = arith.constant 0 : index
    %0 = vector.load %arg1[%c0, %c0_0] : memref<256x32xf32, #tpu.memory_space<vmem>>, vector<256x32xf32>
    %cst = arith.constant dense<0.000000e+00> : vector<256xf32>
    %1 = vector.multi_reduction <add>, %0, %cst [1] : vector<256x32xf32> to vector<256xf32>
    %2 = vector.shape_cast %1 : vector<256xf32> to vector<256x1xf32>
    %cst_1 = arith.constant 3.200000e+01 : f32
    %3 = vector.broadcast %cst_1 : f32 to vector<256x1xf32>
    %4 = arith.divf %2, %3 : vector<256x1xf32>
    %5 = vector.broadcast %4 : vector<256x1xf32> to vector<256x32xf32>
    %6 = arith.subf %0, %5 : vector<256x32xf32>
    %7 = arith.mulf %6, %6 : vector<256x32xf32>
    %cst_2 = arith.constant dense<0.000000e+00> : vector<256xf32>
    %8 = vector.multi_reduction <add>, %7, %cst_2 [1] : vector<256x32xf32> to vector<256xf32>
    %9 = vector.shape_cast %8 : vector<256xf32> to vector<256x1xf32>
    %cst_3 = arith.constant 3.200000e+01 : f32
    %10 = vector.broadcast %cst_3 : f32 to vector<256x1xf32>
    %11 = arith.divf %9, %10 : vector<256x1xf32>
    %cst_4 = arith.constant 9.99999974E-6 : f32
    %12 = vector.broadcast %cst_4 : f32 to vector<256x1xf32>
    %13 = arith.addf %11, %12 : vector<256x1xf32>
    %14 = math.rsqrt %13 : vector<256x1xf32>
    %15 = vector.broadcast %14 : vector<256x1xf32> to vector<256x32xf32>
    %16 = arith.mulf %6, %15 : vector<256x32xf32>
    %c0_5 = arith.constant 0 : index
    %c0_6 = arith.constant 0 : index
    %17 = vector.load %arg2[%c0_5, %c0_6] : memref<1x32xf32, #tpu.memory_space<vmem>>, vector<1x32xf32>
    %18 = vector.broadcast %17 : vector<1x32xf32> to vector<256x32xf32>
    %19 = arith.mulf %16, %18 : vector<256x32xf32>
    %c0_7 = arith.constant 0 : index
    %c0_8 = arith.constant 0 : index
    %20 = vector.load %arg3[%c0_7, %c0_8] : memref<1x32xf32, #tpu.memory_space<vmem>>, vector<1x32xf32>
    %21 = vector.broadcast %20 : vector<1x32xf32> to vector<256x32xf32>
    %22 = arith.addf %19, %21 : vector<256x32xf32>
    %c0_9 = arith.constant 0 : index
    %c0_10 = arith.constant 0 : index
    %23 = vector.load %arg4[%c0_9, %c0_10] : memref<32x96xf32, #tpu.memory_space<vmem>>, vector<32x96xf32>
    %cst_11 = arith.constant dense<0.000000e+00> : vector<256x96xf32>
    %24 = tpu.matmul %22, %23, %cst_11 {dimension_numbers = #tpu.dot_dimension_numbers<[1], [0], [0], [1], [0, 0, 1, 1], [], []>} : vector<256x32xf32>, vector<32x96xf32>, vector<256x96xf32> -> vector<256x96xf32>
    %25 = vector.extract_strided_slice %24 {offsets = [0, 0], sizes = [256, 32], strides = [1, 1]} : vector<256x96xf32> to vector<256x32xf32>
    %c0_12 = arith.constant 0 : index
    %c0_13 = arith.constant 0 : index
    %26 = vector.load %arg5[%c0_12, %c0_13] : memref<256x32xf32, #tpu.memory_space<vmem>>, vector<256x32xf32>
    tpu.vector_store %arg5[%c0_12, %c0_13], %25 {strides = array<i32>} : memref<256x32xf32, #tpu.memory_space<vmem>>, vector<256x32xf32>,
    %27 = vector.extract_strided_slice %24 {offsets = [0, 32], sizes = [256, 32], strides = [1, 1]} : vector<256x96xf32> to vector<256x32xf32>
    %c0_14 = arith.constant 0 : index
    %c0_15 = arith.constant 0 : index
    %28 = vector.load %arg6[%c0_14, %c0_15] : memref<256x32xf32, #tpu.memory_space<vmem>>, vector<256x32xf32>
    tpu.vector_store %arg6[%c0_14, %c0_15], %27 {strides = array<i32>} : memref<256x32xf32, #tpu.memory_space<vmem>>, vector<256x32xf32>,
    %29 = vector.extract_strided_slice %24 {offsets = [0, 64], sizes = [256, 32], strides = [1, 1]} : vector<256x96xf32> to vector<256x32xf32>
    %c0_16 = arith.constant 0 : index
    %c0_17 = arith.constant 0 : index
    %30 = vector.load %arg7[%c0_16, %c0_17] : memref<256x32xf32, #tpu.memory_space<vmem>>, vector<256x32xf32>
    tpu.vector_store %arg7[%c0_16, %c0_17], %29 {strides = array<i32>} : memref<256x32xf32, #tpu.memory_space<vmem>>, vector<256x32xf32>,
    return
  }
  func.func @transform_0(%arg0: i32) -> (i32, i32) {
    %c0_i32 = arith.constant 0 : i32
    %c0_i32_0 = arith.constant 0 : i32
    return %arg0, %c0_i32 : i32, i32
  }
  func.func @transform_1(%arg0: i32) -> (i32, i32) {
    %c0_i32 = arith.constant 0 : i32
    %c0_i32_0 = arith.constant 0 : i32
    %c0_i32_1 = arith.constant 0 : i32
    return %c0_i32, %c0_i32_0 : i32, i32
  }
  func.func @transform_2(%arg0: i32) -> (i32, i32) {
    %c0_i32 = arith.constant 0 : i32
    %c0_i32_0 = arith.constant 0 : i32
    %c0_i32_1 = arith.constant 0 : i32
    return %c0_i32, %c0_i32_0 : i32, i32
  }
  func.func @transform_3(%arg0: i32) -> (i32, i32) {
    %c0_i32 = arith.constant 0 : i32
    %c0_i32_0 = arith.constant 0 : i32
    %c0_i32_1 = arith.constant 0 : i32
    return %c0_i32, %c0_i32_0 : i32, i32
  }
  func.func @transform_4(%arg0: i32) -> (i32, i32) {
    %c0_i32 = arith.constant 0 : i32
    %c0_i32_0 = arith.constant 0 : i32
    return %arg0, %c0_i32 : i32, i32
  }
  func.func @transform_5(%arg0: i32) -> (i32, i32) {
    %c0_i32 = arith.constant 0 : i32
    %c0_i32_0 = arith.constant 0 : i32
    return %arg0, %c0_i32 : i32, i32
  }
  func.func @transform_6(%arg0: i32) -> (i32, i32) {
    %c0_i32 = arith.constant 0 : i32
    %c0_i32_0 = arith.constant 0 : i32
    return %arg0, %c0_i32 : i32, i32
  }
}

module attributes {stable_mosaic.version = 11 : i64} {
  func.func @_na_attn_kernel(%arg0: i32, %arg1: i32, %arg2: memref<1x128x32xf32, #tpu.memory_space<vmem>>, %arg3: memref<1x256x32xf32, #tpu.memory_space<vmem>>, %arg4: memref<1x256x32xf32, #tpu.memory_space<vmem>>, %arg5: memref<4x128x256xf32, #tpu.memory_space<vmem>>, %arg6: memref<1x128x32xf32, #tpu.memory_space<vmem>>) attributes {dimension_semantics = [#tpu.dimension_semantics<parallel>, #tpu.dimension_semantics<parallel>], iteration_bounds = array<i64: 2, 2>, scalar_prefetch = 0 : i64, scratch_operands = 0 : i64, tpu.core_type = #tpu.core_type<tc>, window_params = [{transform_indices = @transform_0, window_bounds = array<i64: 1, 128, 32>}, {transform_indices = @transform_1, window_bounds = array<i64: 1, 256, 32>}, {transform_indices = @transform_2, window_bounds = array<i64: 1, 256, 32>}, {transform_indices = @transform_3, window_bounds = array<i64: 4, 128, 256>}, {transform_indices = @transform_4, window_bounds = array<i64: 1, 128, 32>}]} {
    %c0 = arith.constant 0 : index
    %c0_0 = arith.constant 0 : index
    %c0_1 = arith.constant 0 : index
    %0 = vector.load %arg2[%c0, %c0_0, %c0_1] : memref<1x128x32xf32, #tpu.memory_space<vmem>>, vector<1x128x32xf32>
    %1 = vector.shape_cast %0 : vector<1x128x32xf32> to vector<128x32xf32>
    %cst = arith.constant 0.353553385 : f32
    %2 = vector.broadcast %cst : f32 to vector<128x32xf32>
    %3 = arith.mulf %1, %2 : vector<128x32xf32>
    %c0_2 = arith.constant 0 : index
    %c0_3 = arith.constant 0 : index
    %c0_4 = arith.constant 0 : index
    %4 = vector.load %arg3[%c0_2, %c0_3, %c0_4] : memref<1x256x32xf32, #tpu.memory_space<vmem>>, vector<1x256x32xf32>
    %5 = vector.shape_cast %4 : vector<1x256x32xf32> to vector<256x32xf32>
    %c0_5 = arith.constant 0 : index
    %c0_6 = arith.constant 0 : index
    %c0_7 = arith.constant 0 : index
    %6 = vector.load %arg4[%c0_5, %c0_6, %c0_7] : memref<1x256x32xf32, #tpu.memory_space<vmem>>, vector<1x256x32xf32>
    %7 = vector.shape_cast %6 : vector<1x256x32xf32> to vector<256x32xf32>
    %8 = vector.extract_strided_slice %3 {offsets = [0, 0], sizes = [128, 8], strides = [1, 1]} : vector<128x32xf32> to vector<128x8xf32>
    %9 = vector.extract_strided_slice %5 {offsets = [0, 0], sizes = [256, 8], strides = [1, 1]} : vector<256x32xf32> to vector<256x8xf32>
    %10 = vector.extract_strided_slice %7 {offsets = [0, 0], sizes = [256, 8], strides = [1, 1]} : vector<256x32xf32> to vector<256x8xf32>
    %cst_8 = arith.constant dense<0.000000e+00> : vector<128x256xf32>
    %11 = tpu.matmul %8, %9, %cst_8 {dimension_numbers = #tpu.dot_dimension_numbers<[1], [1], [0], [0], [0, 0, 1, 0], [], []>} : vector<128x8xf32>, vector<256x8xf32>, vector<128x256xf32> -> vector<128x256xf32>
    %c0_9 = arith.constant 0 : index
    %c0_10 = arith.constant 0 : index
    %c0_11 = arith.constant 0 : index
    %12 = vector.load %arg5[%c0_9, %c0_10, %c0_11] : memref<4x128x256xf32, #tpu.memory_space<vmem>>, vector<1x128x256xf32>
    %13 = vector.shape_cast %12 : vector<1x128x256xf32> to vector<128x256xf32>
    %14 = arith.addf %11, %13 : vector<128x256xf32>
    %cst_12 = arith.constant dense<0xFF800000> : vector<128xf32>
    %15 = vector.multi_reduction <maximumf>, %14, %cst_12 [1] : vector<128x256xf32> to vector<128xf32>
    %16 = vector.shape_cast %15 : vector<128xf32> to vector<128x1xf32>
    %17 = vector.broadcast %16 : vector<128x1xf32> to vector<128x256xf32>
    %18 = arith.subf %14, %17 : vector<128x256xf32>
    %19 = math.exp %18 : vector<128x256xf32>
    %cst_13 = arith.constant dense<0.000000e+00> : vector<128xf32>
    %20 = vector.multi_reduction <add>, %19, %cst_13 [1] : vector<128x256xf32> to vector<128xf32>
    %21 = vector.shape_cast %20 : vector<128xf32> to vector<128x1xf32>
    %cst_14 = arith.constant dense<0.000000e+00> : vector<128x8xf32>
    %22 = tpu.matmul %19, %10, %cst_14 {dimension_numbers = #tpu.dot_dimension_numbers<[1], [0], [0], [1], [0, 0, 1, 1], [], []>} : vector<128x256xf32>, vector<256x8xf32>, vector<128x8xf32> -> vector<128x8xf32>
    %23 = tpu.reciprocal %21 {approx = true} : vector<128x1xf32> -> vector<128x1xf32>
    %24 = vector.broadcast %23 : vector<128x1xf32> to vector<128x8xf32>
    %25 = arith.mulf %22, %24 : vector<128x8xf32>
    %26 = vector.extract_strided_slice %3 {offsets = [0, 8], sizes = [128, 8], strides = [1, 1]} : vector<128x32xf32> to vector<128x8xf32>
    %27 = vector.extract_strided_slice %5 {offsets = [0, 8], sizes = [256, 8], strides = [1, 1]} : vector<256x32xf32> to vector<256x8xf32>
    %28 = vector.extract_strided_slice %7 {offsets = [0, 8], sizes = [256, 8], strides = [1, 1]} : vector<256x32xf32> to vector<256x8xf32>
    %cst_15 = arith.constant dense<0.000000e+00> : vector<128x256xf32>
    %29 = tpu.matmul %26, %27, %cst_15 {dimension_numbers = #tpu.dot_dimension_numbers<[1], [1], [0], [0], [0, 0, 1, 0], [], []>} : vector<128x8xf32>, vector<256x8xf32>, vector<128x256xf32> -> vector<128x256xf32>
    %c1 = arith.constant 1 : index
    %c0_16 = arith.constant 0 : index
    %c0_17 = arith.constant 0 : index
    %30 = vector.load %arg5[%c1, %c0_16, %c0_17] : memref<4x128x256xf32, #tpu.memory_space<vmem>>, vector<1x128x256xf32>
    %31 = vector.shape_cast %30 : vector<1x128x256xf32> to vector<128x256xf32>
    %32 = arith.addf %29, %31 : vector<128x256xf32>
    %cst_18 = arith.constant dense<0xFF800000> : vector<128xf32>
    %33 = vector.multi_reduction <maximumf>, %32, %cst_18 [1] : vector<128x256xf32> to vector<128xf32>
    %34 = vector.shape_cast %33 : vector<128xf32> to vector<128x1xf32>
    %35 = vector.broadcast %34 : vector<128x1xf32> to vector<128x256xf32>
    %36 = arith.subf %32, %35 : vector<128x256xf32>
    %37 = math.exp %36 : vector<128x256xf32>
    %cst_19 = arith.constant dense<0.000000e+00> : vector<128xf32>
    %38 = vector.multi_reduction <add>, %37, %cst_19 [1] : vector<128x256xf32> to vector<128xf32>
    %39 = vector.shape_cast %38 : vector<128xf32> to vector<128x1xf32>
    %cst_20 = arith.constant dense<0.000000e+00> : vector<128x8xf32>
    %40 = tpu.matmul %37, %28, %cst_20 {dimension_numbers = #tpu.dot_dimension_numbers<[1], [0], [0], [1], [0, 0, 1, 1], [], []>} : vector<128x256xf32>, vector<256x8xf32>, vector<128x8xf32> -> vector<128x8xf32>
    %41 = tpu.reciprocal %39 {approx = true} : vector<128x1xf32> -> vector<128x1xf32>
    %42 = vector.broadcast %41 : vector<128x1xf32> to vector<128x8xf32>
    %43 = arith.mulf %40, %42 : vector<128x8xf32>
    %44 = vector.extract_strided_slice %3 {offsets = [0, 16], sizes = [128, 8], strides = [1, 1]} : vector<128x32xf32> to vector<128x8xf32>
    %45 = vector.extract_strided_slice %5 {offsets = [0, 16], sizes = [256, 8], strides = [1, 1]} : vector<256x32xf32> to vector<256x8xf32>
    %46 = vector.extract_strided_slice %7 {offsets = [0, 16], sizes = [256, 8], strides = [1, 1]} : vector<256x32xf32> to vector<256x8xf32>
    %cst_21 = arith.constant dense<0.000000e+00> : vector<128x256xf32>
    %47 = tpu.matmul %44, %45, %cst_21 {dimension_numbers = #tpu.dot_dimension_numbers<[1], [1], [0], [0], [0, 0, 1, 0], [], []>} : vector<128x8xf32>, vector<256x8xf32>, vector<128x256xf32> -> vector<128x256xf32>
    %c2 = arith.constant 2 : index
    %c0_22 = arith.constant 0 : index
    %c0_23 = arith.constant 0 : index
    %48 = vector.load %arg5[%c2, %c0_22, %c0_23] : memref<4x128x256xf32, #tpu.memory_space<vmem>>, vector<1x128x256xf32>
    %49 = vector.shape_cast %48 : vector<1x128x256xf32> to vector<128x256xf32>
    %50 = arith.addf %47, %49 : vector<128x256xf32>
    %cst_24 = arith.constant dense<0xFF800000> : vector<128xf32>
    %51 = vector.multi_reduction <maximumf>, %50, %cst_24 [1] : vector<128x256xf32> to vector<128xf32>
    %52 = vector.shape_cast %51 : vector<128xf32> to vector<128x1xf32>
    %53 = vector.broadcast %52 : vector<128x1xf32> to vector<128x256xf32>
    %54 = arith.subf %50, %53 : vector<128x256xf32>
    %55 = math.exp %54 : vector<128x256xf32>
    %cst_25 = arith.constant dense<0.000000e+00> : vector<128xf32>
    %56 = vector.multi_reduction <add>, %55, %cst_25 [1] : vector<128x256xf32> to vector<128xf32>
    %57 = vector.shape_cast %56 : vector<128xf32> to vector<128x1xf32>
    %cst_26 = arith.constant dense<0.000000e+00> : vector<128x8xf32>
    %58 = tpu.matmul %55, %46, %cst_26 {dimension_numbers = #tpu.dot_dimension_numbers<[1], [0], [0], [1], [0, 0, 1, 1], [], []>} : vector<128x256xf32>, vector<256x8xf32>, vector<128x8xf32> -> vector<128x8xf32>
    %59 = tpu.reciprocal %57 {approx = true} : vector<128x1xf32> -> vector<128x1xf32>
    %60 = vector.broadcast %59 : vector<128x1xf32> to vector<128x8xf32>
    %61 = arith.mulf %58, %60 : vector<128x8xf32>
    %62 = vector.extract_strided_slice %3 {offsets = [0, 24], sizes = [128, 8], strides = [1, 1]} : vector<128x32xf32> to vector<128x8xf32>
    %63 = vector.extract_strided_slice %5 {offsets = [0, 24], sizes = [256, 8], strides = [1, 1]} : vector<256x32xf32> to vector<256x8xf32>
    %64 = vector.extract_strided_slice %7 {offsets = [0, 24], sizes = [256, 8], strides = [1, 1]} : vector<256x32xf32> to vector<256x8xf32>
    %cst_27 = arith.constant dense<0.000000e+00> : vector<128x256xf32>
    %65 = tpu.matmul %62, %63, %cst_27 {dimension_numbers = #tpu.dot_dimension_numbers<[1], [1], [0], [0], [0, 0, 1, 0], [], []>} : vector<128x8xf32>, vector<256x8xf32>, vector<128x256xf32> -> vector<128x256xf32>
    %c3 = arith.constant 3 : index
    %c0_28 = arith.constant 0 : index
    %c0_29 = arith.constant 0 : index
    %66 = vector.load %arg5[%c3, %c0_28, %c0_29] : memref<4x128x256xf32, #tpu.memory_space<vmem>>, vector<1x128x256xf32>
    %67 = vector.shape_cast %66 : vector<1x128x256xf32> to vector<128x256xf32>
    %68 = arith.addf %65, %67 : vector<128x256xf32>
    %cst_30 = arith.constant dense<0xFF800000> : vector<128xf32>
    %69 = vector.multi_reduction <maximumf>, %68, %cst_30 [1] : vector<128x256xf32> to vector<128xf32>
    %70 = vector.shape_cast %69 : vector<128xf32> to vector<128x1xf32>
    %71 = vector.broadcast %70 : vector<128x1xf32> to vector<128x256xf32>
    %72 = arith.subf %68, %71 : vector<128x256xf32>
    %73 = math.exp %72 : vector<128x256xf32>
    %cst_31 = arith.constant dense<0.000000e+00> : vector<128xf32>
    %74 = vector.multi_reduction <add>, %73, %cst_31 [1] : vector<128x256xf32> to vector<128xf32>
    %75 = vector.shape_cast %74 : vector<128xf32> to vector<128x1xf32>
    %cst_32 = arith.constant dense<0.000000e+00> : vector<128x8xf32>
    %76 = tpu.matmul %73, %64, %cst_32 {dimension_numbers = #tpu.dot_dimension_numbers<[1], [0], [0], [1], [0, 0, 1, 1], [], []>} : vector<128x256xf32>, vector<256x8xf32>, vector<128x8xf32> -> vector<128x8xf32>
    %77 = tpu.reciprocal %75 {approx = true} : vector<128x1xf32> -> vector<128x1xf32>
    %78 = vector.broadcast %77 : vector<128x1xf32> to vector<128x8xf32>
    %79 = arith.mulf %76, %78 : vector<128x8xf32>
    %80 = tpu.concatenate %25, %43, %61, %79 in 1 : vector<128x8xf32>, vector<128x8xf32>, vector<128x8xf32>, vector<128x8xf32> -> vector<128x32xf32>
    %c0_33 = arith.constant 0 : index
    %c0_34 = arith.constant 0 : index
    %c0_35 = arith.constant 0 : index
    %81 = vector.load %arg6[%c0_33, %c0_34, %c0_35] : memref<1x128x32xf32, #tpu.memory_space<vmem>>, vector<1x128x32xf32>
    %82 = vector.shape_cast %81 : vector<1x128x32xf32> to vector<128x32xf32>
    %83 = vector.shape_cast %80 : vector<128x32xf32> to vector<1x128x32xf32>
    tpu.vector_store %arg6[%c0_33, %c0_34, %c0_35], %83 {strides = array<i32>} : memref<1x128x32xf32, #tpu.memory_space<vmem>>, vector<1x128x32xf32>,
    return
  }
  func.func @transform_0(%arg0: i32, %arg1: i32) -> (i32, i32, i32) {
    %c0_i32 = arith.constant 0 : i32
    %c0_i32_0 = arith.constant 0 : i32
    return %arg0, %arg1, %c0_i32 : i32, i32, i32
  }
  func.func @transform_1(%arg0: i32, %arg1: i32) -> (i32, i32, i32) {
    %c0_i32 = arith.constant 0 : i32
    %c0_i32_0 = arith.constant 0 : i32
    %c0_i32_1 = arith.constant 0 : i32
    return %arg0, %c0_i32, %c0_i32_0 : i32, i32, i32
  }
  func.func @transform_2(%arg0: i32, %arg1: i32) -> (i32, i32, i32) {
    %c0_i32 = arith.constant 0 : i32
    %c0_i32_0 = arith.constant 0 : i32
    %c0_i32_1 = arith.constant 0 : i32
    return %arg0, %c0_i32, %c0_i32_0 : i32, i32, i32
  }
  func.func @transform_3(%arg0: i32, %arg1: i32) -> (i32, i32, i32) {
    %c0_i32 = arith.constant 0 : i32
    %c0_i32_0 = arith.constant 0 : i32
    %c0_i32_1 = arith.constant 0 : i32
    return %c0_i32, %arg1, %c0_i32_0 : i32, i32, i32
  }
  func.func @transform_4(%arg0: i32, %arg1: i32) -> (i32, i32, i32) {
    %c0_i32 = arith.constant 0 : i32
    %c0_i32_0 = arith.constant 0 : i32
    return %arg0, %arg1, %c0_i32 : i32, i32, i32
  }
}

module attributes {stable_mosaic.version = 11 : i64} {
  func.func @_proj_residual_kernel(%arg0: i32, %arg1: memref<256x32xf32, #tpu.memory_space<vmem>>, %arg2: memref<256x32xf32, #tpu.memory_space<vmem>>, %arg3: memref<32x32xf32, #tpu.memory_space<vmem>>, %arg4: memref<1x32xf32, #tpu.memory_space<vmem>>, %arg5: memref<256x32xf32, #tpu.memory_space<vmem>>) attributes {dimension_semantics = [#tpu.dimension_semantics<parallel>], iteration_bounds = array<i64: 2>, scalar_prefetch = 0 : i64, scratch_operands = 0 : i64, tpu.core_type = #tpu.core_type<tc>, window_params = [{transform_indices = @transform_0, window_bounds = array<i64: 256, 32>}, {transform_indices = @transform_1, window_bounds = array<i64: 256, 32>}, {pipeline_mode = #tpu.pipeline_mode<synchronous>, transform_indices = @transform_2, window_bounds = array<i64: 32, 32>}, {pipeline_mode = #tpu.pipeline_mode<synchronous>, transform_indices = @transform_3, window_bounds = array<i64: 1, 32>}, {transform_indices = @transform_4, window_bounds = array<i64: 256, 32>}]} {
    %c0 = arith.constant 0 : index
    %c0_0 = arith.constant 0 : index
    %0 = vector.load %arg1[%c0, %c0_0] : memref<256x32xf32, #tpu.memory_space<vmem>>, vector<256x32xf32>
    %c0_1 = arith.constant 0 : index
    %c0_2 = arith.constant 0 : index
    %1 = vector.load %arg3[%c0_1, %c0_2] : memref<32x32xf32, #tpu.memory_space<vmem>>, vector<32x32xf32>
    %cst = arith.constant dense<0.000000e+00> : vector<256x32xf32>
    %2 = tpu.matmul %0, %1, %cst {dimension_numbers = #tpu.dot_dimension_numbers<[1], [0], [0], [1], [0, 0, 1, 1], [], []>} : vector<256x32xf32>, vector<32x32xf32>, vector<256x32xf32> -> vector<256x32xf32>
    %c0_3 = arith.constant 0 : index
    %c0_4 = arith.constant 0 : index
    %3 = vector.load %arg2[%c0_3, %c0_4] : memref<256x32xf32, #tpu.memory_space<vmem>>, vector<256x32xf32>
    %4 = arith.addf %3, %2 : vector<256x32xf32>
    %c0_5 = arith.constant 0 : index
    %c0_6 = arith.constant 0 : index
    %5 = vector.load %arg4[%c0_5, %c0_6] : memref<1x32xf32, #tpu.memory_space<vmem>>, vector<1x32xf32>
    %6 = vector.broadcast %5 : vector<1x32xf32> to vector<256x32xf32>
    %7 = arith.addf %4, %6 : vector<256x32xf32>
    %c0_7 = arith.constant 0 : index
    %c0_8 = arith.constant 0 : index
    %8 = vector.load %arg5[%c0_7, %c0_8] : memref<256x32xf32, #tpu.memory_space<vmem>>, vector<256x32xf32>
    tpu.vector_store %arg5[%c0_7, %c0_8], %7 {strides = array<i32>} : memref<256x32xf32, #tpu.memory_space<vmem>>, vector<256x32xf32>,
    return
  }
  func.func @transform_0(%arg0: i32) -> (i32, i32) {
    %c0_i32 = arith.constant 0 : i32
    %c0_i32_0 = arith.constant 0 : i32
    return %arg0, %c0_i32 : i32, i32
  }
  func.func @transform_1(%arg0: i32) -> (i32, i32) {
    %c0_i32 = arith.constant 0 : i32
    %c0_i32_0 = arith.constant 0 : i32
    return %arg0, %c0_i32 : i32, i32
  }
  func.func @transform_2(%arg0: i32) -> (i32, i32) {
    %c0_i32 = arith.constant 0 : i32
    %c0_i32_0 = arith.constant 0 : i32
    %c0_i32_1 = arith.constant 0 : i32
    return %c0_i32, %c0_i32_0 : i32, i32
  }
  func.func @transform_3(%arg0: i32) -> (i32, i32) {
    %c0_i32 = arith.constant 0 : i32
    %c0_i32_0 = arith.constant 0 : i32
    %c0_i32_1 = arith.constant 0 : i32
    return %c0_i32, %c0_i32_0 : i32, i32
  }
  func.func @transform_4(%arg0: i32) -> (i32, i32) {
    %c0_i32 = arith.constant 0 : i32
    %c0_i32_0 = arith.constant 0 : i32
    return %arg0, %c0_i32 : i32, i32
  }
}

</mosaic_0001>

<bundles_post_ra>
// kernel: neighborhood_attention_block_forward.3
= control target key start
LH: loop header
LB: loop body
LE: loop exit
PB: predicated region body
PF: predicated region fallthrough
CT: control target
= control target key end

     0   :  { %12 = vsyncpa [#allocation3], 0  ;;  %s3091_s0 = inlined_call_operand.hbm [shape: f32[512,32], index: 0, kind: input, shape index: {}]   ;;  %s3092_s1 = inlined_call_operand.hbm [shape: f32[1,32], index: 1, kind: input, shape index: {}]   ;;  %s3093_s2 = inlined_call_operand.hbm [shape: f32[1,32], index: 2, kind: input, shape index: {}]   ;;  %s3094_s3 = inlined_call_operand.hbm [shape: f32[32,96], index: 3, kind: input, shape index: {}]   ;;  %s3095_s4 = inlined_call_operand.vmem [shape: f32[512,32], index: 4, kind: output, shape index: {0}]   ;;  %s3096_s5 = inlined_call_operand.vmem [shape: f32[512,32], index: 5, kind: output, shape index: {1}]   ;;  %s3097_s6 = inlined_call_operand.vmem [shape: f32[512,32], index: 6, kind: output, shape index: {2}]  }
   0x1   :  { %14 = vsyncpa [#allocation3 + $0x1], 0 }
   0x2   :  { %15 = vsyncpa [#allocation5], 0 }
   0x3   :  { %16 = vsyncpa [#allocation8], 0  ;;  %s2167_s21 = smov 0   ;;  %s2169_s22 = smov 0  }
   0x4   :  { %s2171_s23 = smov 0   ;;  %s2173_s24 = smov 0  }
   0x5 LB: > { %s1678_s25 = sadd.s32 4294967295, %s2122_s24   ;;  %p42_p0 = scmp.ne.s32.totalorder %s2114_s22, %s2110_s21  ;;  %s2122_s24 = sphi %s2173_s24, %s3113_s24   ;;  %s2118_s23 = sphi %s2171_s23, %s3112_s23   ;;  %s2114_s22 = sphi %s2169_s22, %s3111_s22   ;;  %s2110_s21 = sphi %s2167_s21, %s3110_s21  }
   0x6   : > { %p2189_p1 = scmp.eq.s32.totalorder %s1678_s25, 0  ;;  %p1680_p2 = scmp.ge.s32.totalorder %s2122_s24, 1 }
   0x7   : > { %p194_p3 = scmp.lt.s32.totalorder %s2122_s24, 3  ;;  %s2124_s29 = smov [#allocation4]  }
   0x8   : > { %s3102_s26 = scalar_select %p2189_p1, 1, 0 }
   0x9   : > { %p2197_p4 = por %p2189_p1, %p42_p0  ;;  %p2201_p5 = pnand %p1680_p2, %p194_p3 }
   0xa   : > { %s207_s30 = sshll.u32 %s2124_s29, 4  ;;  %s2125_s7 = smov [#allocation6]   ;;  %s208_s30 = int_to_ptr.vmem [resolvable:$true] %s207_s30 }
   0xb   : > { %s3103_s27 = scalar_select %p2197_p4, 1, 0 }
   0xc   : > { %s3104_s28 = scalar_select %p2201_p5, 1, 0 }
   0xd   : > { %p1850_p6 = pneg %p2201_p5  ;;  %s218_s8 = sshll.u32 %s2125_s7, 4  ;;  %s219_s8 = int_to_ptr.vmem [resolvable:$true] %s218_s8 }
   0xe   : > { %s2126_s10 = smov [#allocation7]   ;;  %s1985_s12 = scalar_lea.vmem %s208_s30, 16 }
   0xf   : > { %p2209_p7 = pnand %p1850_p6, %p2189_p1  ;;  %s228_s11 = sshll.u32 %s2126_s10, 4  ;;  %s2213_s11 = int_to_ptr.vmem [resolvable:$true] %s228_s11 }
  0x10   : > { %p1986_p9 = scmp.ne.s32.totalorder %s208_s30, %s1985_s12  ;;  %s1992_s13 = scalar_lea.vmem %s208_s30, 32 }
  0x11   : > { %p1976_p8 = pneg %p2209_p7  ;;  %p1993_p12 = scmp.lt.s32.totalorder %s208_s30, %s208_s30 }
  0x12   : > { %p1994_p13 = scmp.lt.s32.totalorder %s1992_s13, %s1985_s12 }
  0x13   : > { %p1988_p10 = pnand %p1986_p9, %p1976_p8 }
  0x14   : > { %p1995_p0 = por %p1994_p13, %p1993_p12 }
  0x15   : > { %p1989_p11 = pneg %p1988_p10 }
  0x17   : > { %p1996_p2 = pnand %p1995_p0, %p1989_p11 }
  0x19   : > { %1999 = shalt.err (!%p1996_p2)
}
  0x1a   : > { %1853 = dma.hbm_to_vmem [thread:$0]  (!%p2209_p7), %s3092_s1, 16, %s208_s30, [#allocation5]  }
  0x1b   : > { %s2011_s16 = scalar_lea.vmem %s219_s8, 16  ;;  %s2018_s17 = scalar_lea.vmem %s219_s8, 32 }
  0x1c   : > { %p2012_p3 = scmp.ne.s32.totalorder %s219_s8, %s2011_s16  ;;  %p2019_p10 = scmp.lt.s32.totalorder %s219_s8, %s219_s8 }
  0x1d   : > { %p2020_p1 = scmp.lt.s32.totalorder %s2018_s17, %s2011_s16 }
  0x1e   : > { %p2014_p6 = pnand %p2012_p3, %p1976_p8 }
  0x1f   : > { %p2021_p4 = por %p2020_p1, %p2019_p10 }
  0x20   : > { %p2015_p9 = pneg %p2014_p6 }
  0x22   : > { %p2022_p12 = pnand %p2021_p4, %p2015_p9 }
  0x24   : > { %2025 = shalt.err (!%p2022_p12)
}
  0x25   : > { %1856 = dma.hbm_to_vmem [thread:$0]  (!%p2209_p7), %s3093_s2, 16, %s219_s8, [#allocation5]  }
  0x26   : > { %s2037_s20 = scalar_lea.vmem %s2213_s11, 512  ;;  %p2045_p1 = scmp.lt.s32.totalorder %s2213_s11, %s2213_s11 }
  0x27   : > { %p2038_p11 = scmp.ne.s32.totalorder %s2213_s11, %s2037_s20  ;;  %p2046_p4 = scmp.lt.s32.totalorder %s2037_s20, %s2037_s20 }
  0x29   : > { %p2040_p13 = pnand %p2038_p11, %p1976_p8  ;;  %p2047_p2 = por %p2046_p4, %p2045_p1 }
  0x2b   : > { %p2041_p0 = pneg %p2040_p13 }
  0x2d   : > { %p2048_p3 = pnand %p2047_p2, %p2041_p0 }
  0x2f   : > { %2051 = shalt.err (!%p2048_p3)
}
  0x30   : > { %s2127_s21 = smov 128   ;;  %s2128_s29 = smov 8  }
  0x31   : > { %1859 = dma.hbm_to_vmem [thread:$0]  (!%p2209_p7), %s3094_s3, 512, %s2213_s11, [#allocation8], %s2127_s21, %s2127_s21, %s2128_s29  }
  0x32   : > { %s2250_s8 = sadd.s32 1, %s2122_s24   ;;  %s29_s12 = sadd.s32 1, %s2118_s23 }
  0x33   : > { %s26_s10 = ssub.s32 %s2122_s24, %s2250_s8  ;;  %p36_p6 = scmp.ne.s32.totalorder %s2118_s23, %s2114_s22 }
  0x34   : > { %p27_p8 = scmp.eq.s32.totalorder %s26_s10, 0  ;;  %p37_p9 = scmp.eq.s32.totalorder %s2122_s24, 0 }
  0x35   : > { %p1867_p10 = scmp.lt.s32.totalorder %s2122_s24, 2  ;;  %s242_s9 = sand.u32 1, %s2118_s23  }
  0x36   : > { %s2260_s13 = scalar_select %p27_p8, %s2118_s23, %s29_s12  }
  0x37   : > { %p38_p12 = por %p37_p9, %p36_p6  ;;  %s1685_s14 = sshll.u32 %s242_s9, 8 }
  0x38   : > { %s1735_s15 = sshll.u32 %s2122_s24, 12  ;;  %s246_s11 = scalar_lea.vmem [#allocation2], %s1685_s14 }
  0x39   : > { %s2267_s18 = scalar_lea.hbm %s3091_s0, %s1735_s15  ;;  %s253_s19 = sshll.u32 %s246_s11, 4  ;;  %s2269_s19 = int_to_ptr.vmem [resolvable:$true] %s253_s19 }
  0x3a   : > { %p2271_p7 = pnand %p1867_p10, %p38_p12  ;;  %s2275_s30 = scalar_lea.sflag [#allocation3], %s242_s9 }
  0x3b   : > { %s2052_s7 = scalar_lea.hbm %s2267_s18, 4096  ;;  %s2057_s14 = scalar_lea.hbm %s3091_s0, 8192 }
  0x3c   : > { %p2053_p11 = scmp.ne.s32.totalorder %s2267_s18, %s2052_s7  ;;  %p2054_p13 = pneg %p2271_p7 }
  0x3d   : > { %p2058_p4 = scmp.lt.s32.totalorder %s2267_s18, %s3091_s0  ;;  %p2059_p2 = scmp.lt.s32.totalorder %s2057_s14, %s2052_s7 }
  0x3e   : > { %p2055_p0 = pnand %p2054_p13, %p2053_p11 }
  0x3f   : > { %p2060_p3 = por %p2059_p2, %p2058_p4 }
  0x40   : > { %p2056_p1 = pneg %p2055_p0 }
  0x42   : > { %p2061_p8 = pnand %p2060_p3, %p2056_p1 }
  0x44   : > { %2064 = shalt.err (!%p2061_p8)
}
  0x45   : > { %s2065_s9 = scalar_lea.vmem %s2269_s19, 4096  ;;  %s2129_s17 = smov [#allocation2]  }
  0x46   : > { %p2066_p6 = scmp.ne.s32.totalorder %s2269_s19, %s2065_s9  ;;  %s2070_s11 = sshll.u32 %s2129_s17, 4  ;;  %s2071_s11 = int_to_ptr.vmem [resolvable:$false] %s2070_s11 }
  0x47   : > { %s2072_s10 = scalar_lea.vmem %s2071_s11, 8192  ;;  %p2073_p12 = scmp.lt.s32.totalorder %s2269_s19, %s2071_s11 }
  0x48   : > { %p2068_p9 = pnand %p2066_p6, %p2054_p13  ;;  %p2074_p11 = scmp.lt.s32.totalorder %s2072_s10, %s2065_s9 }
  0x4a   : > { %p2069_p10 = pneg %p2068_p9  ;;  %p2075_p0 = por %p2074_p11, %p2073_p12 }
  0x4c   : > { %p2076_p5 = pnand %p2075_p0, %p2069_p10 }
  0x4e   : > { %2079 = shalt.err (!%p2076_p5)
}
  0x4f   : > { %1863 = dma.hbm_to_vmem [thread:$0]  (!%p2271_p7), %s2267_s18, 4096, %s2269_s19, %s2275_s30, %s2127_s21, %s2127_s21, %s2128_s29  }
  0x50   : > { %p3107_p13 = scmp.ne.s32.totalorder %s3104_s28, 0 }
  0x51   : > { %s267_s7 = sand.u32 (!%p3107_p13), 1, %s2114_s22   ;;  %p3108_p5 = scmp.ne.s32.totalorder (!%p3107_p13), %s3103_s27, 0 }
  0x52   : > { %265 = sbr.rel (%p3107_p13) target bundleno = 844 (0x34c), region = 36  ;;  %s1689_s12 = sshll.u32 (!%p3107_p13), %s267_s7, 8 }
  0x53   : > { %s268_s14 = scalar_lea.sflag (!%p3107_p13), [#allocation3], %s267_s7  ;;  %s2302_s15 = scalar_lea.vmem (!%p3107_p13), [#allocation2], %s1689_s12 }
  0x57   : > { %2097 = dma.done.wait (%p3108_p5), %s268_s14, 4096  }
  0x58   : > { %2099 = vsyncadd (%p3108_p5), %s268_s14, 4294963200  ;;  %p3109_p1 = scmp.ne.s32.totalorder %s3102_s26, 0 }
  0x5a   : > { %2101 = dma.done.wait (%p3109_p1), [#allocation5], 32  }
  0x5b   : > { %2103 = vsyncadd (%p3109_p1), [#allocation5], 4294967264 }
  0x5c   : > { %2105 = dma.done.wait (%p3109_p1), [#allocation8], 512  }
  0x5d   : > { %2107 = vsyncadd (%p3109_p1), [#allocation8], 4294966784  ;;  %vm373_vm0 = vcmask 261120   ;;  %v2317_v0 = vld [vmem:[%s2302_s15] sm:$0xff]  ;;  %v2320_v1 = vld [vmem:[%s2302_s15 + $0x8] sm:$0xff]  ;;  %s1693_s26 = sshll.u32 %s1678_s25, 5 }
  0x5e   : > { %v2323_v2 = vld [vmem:[%s2302_s15 + $0x80] sm:$0xff]  ;;  %v374_v3 = vsel %vm373_vm0, %v2317_v0, 0.0  ;;  %v377_v4 = vsel %vm373_vm0, %v2320_v1, 0.0  ;;  %v2330_v5 = vld [vmem:[%s2302_s15 + $0x88] sm:$0xff]  ;;  %v2337_v8 = vld [vmem:[%s2302_s15 + $0x10] sm:$0xff]  ;;  %p324_p7 = scmp.lt.s32.totalorder %s1693_s26, 63 }
  0x5f   : > { %375 = vadd.xlane.f32.xlu0 %v374_v3  ;;  %378 = vadd.xlane.f32.xlu1 %v377_v4  ;;  %v422_v6 = vsel %vm373_vm0, %v2323_v2, 0.0  ;;  %v425_v7 = vsel %vm373_vm0, %v2330_v5, 0.0  ;;  %v2340_v9 = vld [vmem:[%s2302_s15 + $0x90] sm:$0xff]  ;;  %v380_v10 = vsel %vm373_vm0, %v2337_v8, 0.0  ;;  %v2347_v12 = vld [vmem:[%s2302_s15 + $0x18] sm:$0xff]  ;;  %v2357_v16 = vld [vmem:[%s2302_s15 + $0x20] sm:$0xff] }
  0x60   : > { %v428_v11 = vsel %vm373_vm0, %v2340_v9, 0.0  ;;  %v2350_v13 = vld [vmem:[%s2302_s15 + $0x98] sm:$0xff]  ;;  %v383_v14 = vsel %vm373_vm0, %v2347_v12, 0.0  ;;  %v2360_v17 = vld [vmem:[%s2302_s15 + $0xa0] sm:$0xff]  ;;  %v386_v18 = vsel %vm373_vm0, %v2357_v16, 0.0  ;;  %v2367_v20 = vld [vmem:[%s2302_s15 + $0x28] sm:$0xff] }
  0x61   : > { %v431_v15 = vsel %vm373_vm0, %v2350_v13, 0.0  ;;  %v434_v19 = vsel %vm373_vm0, %v2360_v17, 0.0  ;;  %v2370_v21 = vld [vmem:[%s2302_s15 + $0xa8] sm:$0xff]  ;;  %v389_v22 = vsel %vm373_vm0, %v2367_v20, 0.0  ;;  %v2377_v24 = vld [vmem:[%s2302_s15 + $0x30] sm:$0xff]  ;;  %v2387_v28 = vld [vmem:[%s2302_s15 + $0x38] sm:$0xff] }
  0x62   : > { %v437_v23 = vsel %vm373_vm0, %v2370_v21, 0.0  ;;  %v2380_v25 = vld [vmem:[%s2302_s15 + $0xb0] sm:$0xff]  ;;  %v392_v26 = vsel %vm373_vm0, %v2377_v24, 0.0  ;;  %v2390_v29 = vld [vmem:[%s2302_s15 + $0xb8] sm:$0xff]  ;;  %v395_v30 = vsel %vm373_vm0, %v2387_v28, 0.0  ;;  %v2397_v32 = vld [vmem:[%s2302_s15 + $0x40] sm:$0xff] }
  0x63   : > { %423 = vadd.xlane.f32.xlu0 %v422_v6  ;;  %426 = vadd.xlane.f32.xlu1 %v425_v7  ;;  %v440_v27 = vsel %vm373_vm0, %v2380_v25, 0.0  ;;  %v443_v31 = vsel %vm373_vm0, %v2390_v29, 0.0  ;;  %v2400_v33 = vld [vmem:[%s2302_s15 + $0xc0] sm:$0xff]  ;;  %v398_v34 = vsel %vm373_vm0, %v2397_v32, 0.0  ;;  %v2407_v36 = vld [vmem:[%s2302_s15 + $0x48] sm:$0xff]  ;;  %v2417_v40 = vld [vmem:[%s2302_s15 + $0x50] sm:$0xff] }
  0x64   : > { %v446_v35 = vsel %vm373_vm0, %v2400_v33, 0.0  ;;  %v2410_v37 = vld [vmem:[%s2302_s15 + $0xc8] sm:$0xff]  ;;  %v401_v38 = vsel %vm373_vm0, %v2407_v36, 0.0  ;;  %v2420_v41 = vld [vmem:[%s2302_s15 + $0xd0] sm:$0xff]  ;;  %v404_v42 = vsel %vm373_vm0, %v2417_v40, 0.0  ;;  %v2427_v44 = vld [vmem:[%s2302_s15 + $0x58] sm:$0xff] }
  0x65   : > { %v449_v39 = vsel %vm373_vm0, %v2410_v37, 0.0  ;;  %v452_v43 = vsel %vm373_vm0, %v2420_v41, 0.0  ;;  %v2430_v45 = vld [vmem:[%s2302_s15 + $0xd8] sm:$0xff]  ;;  %v407_v46 = vsel %vm373_vm0, %v2427_v44, 0.0  ;;  %v2437_v48 = vld [vmem:[%s2302_s15 + $0x60] sm:$0xff]  ;;  %v2447_v52 = vld [vmem:[%s2302_s15 + $0x68] sm:$0xff] }
  0x66   : > { %v455_v47 = vsel %vm373_vm0, %v2430_v45, 0.0  ;;  %v2440_v49 = vld [vmem:[%s2302_s15 + $0xe0] sm:$0xff]  ;;  %v410_v50 = vsel %vm373_vm0, %v2437_v48, 0.0  ;;  %v2450_v53 = vld [vmem:[%s2302_s15 + $0xe8] sm:$0xff]  ;;  %v413_v54 = vsel %vm373_vm0, %v2447_v52, 0.0  ;;  %v2457_v56 = vld [vmem:[%s2302_s15 + $0x70] sm:$0xff] }
  0x67   : > { %381 = vadd.xlane.f32.xlu0 %v380_v10  ;;  %429 = vadd.xlane.f32.xlu1 %v428_v11  ;;  %v458_v51 = vsel %vm373_vm0, %v2440_v49, 0.0  ;;  %v461_v55 = vsel %vm373_vm0, %v2450_v53, 0.0  ;;  %v2460_v57 = vld [vmem:[%s2302_s15 + $0xf0] sm:$0xff]  ;;  %v416_v58 = vsel %vm373_vm0, %v2457_v56, 0.0  ;;  %v2467_v60 = vld [vmem:[%s2302_s15 + $0x78] sm:$0xff]  ;;  %s3115_s26 = smov (!%p324_p7, %s1693_s26), 63 }
  0x68   : > { %v464_v59 = vsel %vm373_vm0, %v2460_v57, 0.0  ;;  %v2470_v61 = vld [vmem:[%s2302_s15 + $0xf8] sm:$0xff]  ;;  %v419_v62 = vsel %vm373_vm0, %v2467_v60, 0.0  ;;  %s2802_s27 = sshll.u32 %s3115_s26, 3  ;;  %s2130_s24 = smov 96  }
  0x69   : > { %v467_v63 = vsel %vm373_vm0, %v2470_v61, 0.0  ;;  %s2808_s29 = scalar_lea.vmem %s3095_s4, %s2802_s27  ;;  %s2131_s25 = smov 64  }
  0x6a   : > { %s2935_s20 = scalar_lea.vmem %s3096_s5, %s2802_s27  ;;  %s2951_s9 = scalar_lea.vmem %s3097_s6, %s2802_s27 }
  0x6b   : > { %384 = vadd.xlane.f32.xlu0 %v383_v14  ;;  %432 = vadd.xlane.f32.xlu1 %v431_v15 }
  0x6f   : > { %387 = vadd.xlane.f32.xlu0 %v386_v18  ;;  %435 = vadd.xlane.f32.xlu1 %v434_v19 }
  0x73   : > { %390 = vadd.xlane.f32.xlu0 %v389_v22  ;;  %438 = vadd.xlane.f32.xlu1 %v437_v23 }
  0x77   : > { %393 = vadd.xlane.f32.xlu0 %v392_v26  ;;  %441 = vadd.xlane.f32.xlu1 %v440_v27 }
  0x7b   : > { %396 = vadd.xlane.f32.xlu0 %v395_v30  ;;  %444 = vadd.xlane.f32.xlu1 %v443_v31 }
  0x7f   : > { %399 = vadd.xlane.f32.xlu0 %v398_v34  ;;  %447 = vadd.xlane.f32.xlu1 %v446_v35 }
  0x83   : > { %402 = vadd.xlane.f32.xlu0 %v401_v38  ;;  %450 = vadd.xlane.f32.xlu1 %v449_v39 }
  0x87   : > { %405 = vadd.xlane.f32.xlu0 %v404_v42  ;;  %453 = vadd.xlane.f32.xlu1 %v452_v43 }
  0x8b   : > { %408 = vadd.xlane.f32.xlu0 %v407_v46  ;;  %456 = vadd.xlane.f32.xlu1 %v455_v47 }
  0x8f   : > { %411 = vadd.xlane.f32.xlu0 %v410_v50  ;;  %459 = vadd.xlane.f32.xlu1 %v458_v51 }
  0x93   : > { %414 = vadd.xlane.f32.xlu0 %v413_v54  ;;  %462 = vadd.xlane.f32.xlu1 %v461_v55 }
  0x97   : > { %417 = vadd.xlane.f32.xlu0 %v416_v58  ;;  %465 = vadd.xlane.f32.xlu1 %v464_v59 }
  0x9b   : > { %420 = vadd.xlane.f32.xlu0 %v419_v62  ;;  %468 = vadd.xlane.f32.xlu1 %v467_v63 }
  0xe8   : > { %v376_v3 = vpop.xlane.xlu0 %375  ;;  %v379_v4 = vpop.xlane.xlu1 %378 }
  0xe9   : > { %v471_v6 = vmul.f32 0.03125, %v376_v3  ;;  %v472_v7 = vmul.f32 0.03125, %v379_v4 }
  0xeb   : > { %v2477_v10 = vsub.f32 %v2317_v0, %v471_v6  ;;  %v2480_v11 = vsub.f32 %v2320_v1, %v472_v7 }
  0xec   : > { %v424_v14 = vpop.xlane.xlu0 %423  ;;  %v427_v15 = vpop.xlane.xlu1 %426 }
  0xed   : > { %v487_v18 = vmul.f32 0.03125, %v424_v14  ;;  %v488_v19 = vmul.f32 0.03125, %v427_v15  ;;  %v535_v22 = vmul.f32 %v2477_v10, %v2477_v10  ;;  %v536_v23 = vmul.f32 %v2480_v11, %v2480_v11 }
  0xef   : > { %v2487_v26 = vsub.f32 %v2323_v2, %v487_v18  ;;  %v2490_v27 = vsub.f32 %v2330_v5, %v488_v19  ;;  %v567_v0 = vsel %vm373_vm0, %v535_v22, 0.0  ;;  %v570_v31 = vsel %vm373_vm0, %v536_v23, 0.0 }
  0xf0   : > { %568 = vadd.xlane.f32.xlu0 %v567_v0  ;;  %v382_v1 = vpop.xlane.xlu0 %381  ;;  %v430_v30 = vpop.xlane.xlu1 %429 }
  0xf1   : > { %v473_v34 = vmul.f32 0.03125, %v382_v1  ;;  %v489_v35 = vmul.f32 0.03125, %v430_v30  ;;  %v551_v38 = vmul.f32 %v2487_v26, %v2487_v26  ;;  %v552_v39 = vmul.f32 %v2490_v27, %v2490_v27 }
  0xf3   : > { %v2499_v2 = vsub.f32 %v2337_v8, %v473_v34  ;;  %v2502_v5 = vsub.f32 %v2340_v9, %v489_v35  ;;  %v615_v42 = vsel %vm373_vm0, %v551_v38, 0.0  ;;  %v618_v47 = vsel %vm373_vm0, %v552_v39, 0.0 }
  0xf4   : > { %571 = vadd.xlane.f32.xlu0 %v570_v31  ;;  %616 = vadd.xlane.f32.xlu1 %v615_v42  ;;  %v385_v43 = vpop.xlane.xlu0 %384  ;;  %v433_v46 = vpop.xlane.xlu1 %432 }
  0xf5   : > { %v474_v50 = vmul.f32 0.03125, %v385_v43  ;;  %v490_v51 = vmul.f32 0.03125, %v433_v46  ;;  %v537_v54 = vmul.f32 %v2499_v2, %v2499_v2  ;;  %v553_v8 = vmul.f32 %v2502_v5, %v2502_v5 }
  0xf7   : > { %v2511_v55 = vsub.f32 %v2347_v12, %v474_v50  ;;  %v2514_v9 = vsub.f32 %v2350_v13, %v490_v51  ;;  %v573_v58 = vsel %vm373_vm0, %v537_v54, 0.0  ;;  %v621_v63 = vsel %vm373_vm0, %v553_v8, 0.0 }
  0xf8   : > { %619 = vadd.xlane.f32.xlu1 %v618_v47  ;;  %574 = vadd.xlane.f32.xlu0 %v573_v58  ;;  %v388_v59 = vpop.xlane.xlu0 %387  ;;  %v436_v62 = vpop.xlane.xlu1 %435 }
  0xf9   : > { %v475_v3 = vmul.f32 0.03125, %v388_v59  ;;  %v491_v4 = vmul.f32 0.03125, %v436_v62  ;;  %v538_v6 = vmul.f32 %v2511_v55, %v2511_v55  ;;  %v554_v12 = vmul.f32 %v2514_v9, %v2514_v9 }
  0xfb   : > { %v2523_v7 = vsub.f32 %v2357_v16, %v475_v3  ;;  %v2526_v13 = vsub.f32 %v2360_v17, %v491_v4  ;;  %v576_v14 = vsel %vm373_vm0, %v538_v6, 0.0  ;;  %v624_v19 = vsel %vm373_vm0, %v554_v12, 0.0 }
  0xfc   : > { %622 = vadd.xlane.f32.xlu1 %v621_v63  ;;  %577 = vadd.xlane.f32.xlu0 %v576_v14  ;;  %v391_v15 = vpop.xlane.xlu0 %390  ;;  %v439_v18 = vpop.xlane.xlu1 %438 }
  0xfd   : > { %v476_v22 = vmul.f32 0.03125, %v391_v15  ;;  %v492_v23 = vmul.f32 0.03125, %v439_v18  ;;  %v539_v0 = vmul.f32 %v2523_v7, %v2523_v7  ;;  %v555_v16 = vmul.f32 %v2526_v13, %v2526_v13 }
  0xff   : > { %v2535_v1 = vsub.f32 %v2367_v20, %v476_v22  ;;  %v2538_v17 = vsub.f32 %v2370_v21, %v492_v23  ;;  %v579_v30 = vsel %vm373_vm0, %v539_v0, 0.0  ;;  %v627_v35 = vsel %vm373_vm0, %v555_v16, 0.0 }
 0x100   : > { %625 = vadd.xlane.f32.xlu1 %v624_v19  ;;  %580 = vadd.xlane.f32.xlu0 %v579_v30  ;;  %v394_v31 = vpop.xlane.xlu0 %393  ;;  %v442_v34 = vpop.xlane.xlu1 %441 }
 0x101   : > { %v477_v38 = vmul.f32 0.03125, %v394_v31  ;;  %v493_v39 = vmul.f32 0.03125, %v442_v34  ;;  %v540_v42 = vmul.f32 %v2535_v1, %v2535_v1  ;;  %v556_v20 = vmul.f32 %v2538_v17, %v2538_v17  ;;  %v872_v31 = vld [vmem:[#allocation7 + $0x18] sm:$0xff] }
 0x102   : > { %1772 = vmatprep.subr.mxu0 %v872_v31  ;;  %1828 = vmatprep.subr.mxu1 %v872_v31 }
 0x103   : > { %v2547_v43 = vsub.f32 %v2377_v24, %v477_v38  ;;  %v2550_v21 = vsub.f32 %v2380_v25, %v493_v39  ;;  %v582_v46 = vsel %vm373_vm0, %v540_v42, 0.0  ;;  %v630_v51 = vsel %vm373_vm0, %v556_v20, 0.0  ;;  %v871_v20 = vld [vmem:[#allocation7 + $0x10] sm:$0xff]  ;;  %1773 = vmatpush3.msra.mxu0 %v872_v31  ;;  %1832 = vmatpush3.msra.mxu1 %v872_v31 }
 0x104   : > { %628 = vadd.xlane.f32.xlu1 %v627_v35  ;;  %583 = vadd.xlane.f32.xlu0 %v582_v46  ;;  %v397_v47 = vpop.xlane.xlu0 %396  ;;  %v445_v50 = vpop.xlane.xlu1 %444 }
 0x105   : > { %v478_v54 = vmul.f32 0.03125, %v397_v47  ;;  %v494_v8 = vmul.f32 0.03125, %v445_v50  ;;  %v541_v58 = vmul.f32 %v2547_v43, %v2547_v43  ;;  %v557_v24 = vmul.f32 %v2550_v21, %v2550_v21  ;;  %1774 = vmatprep.subr.mxu0 %v871_v20  ;;  %v870_v50 = vld [vmem:[#allocation7 + $0x8] sm:$0xff]  ;;  %1829 = vmatprep.subr.mxu1 %v871_v20 }
 0x106   : > { %1775 = vmatpush3.msra.mxu0 %v871_v20  ;;  %1833 = vmatpush3.msra.mxu1 %v871_v20 }
 0x107   : > { %v2559_v59 = vsub.f32 %v2387_v28, %v478_v54  ;;  %v2562_v25 = vsub.f32 %v2390_v29, %v494_v8  ;;  %v585_v62 = vsel %vm373_vm0, %v541_v58, 0.0  ;;  %v633_v4 = vsel %vm373_vm0, %v557_v24, 0.0  ;;  %1776 = vmatprep.subr.mxu0 %v870_v50  ;;  %1830 = vmatprep.subr.mxu1 %v870_v50 }
 0x108   : > { %631 = vadd.xlane.f32.xlu1 %v630_v51  ;;  %586 = vadd.xlane.f32.xlu0 %v585_v62  ;;  %v400_v63 = vpop.xlane.xlu0 %399  ;;  %v448_v3 = vpop.xlane.xlu1 %447 }
 0x109   : > { %v479_v6 = vmul.f32 0.03125, %v400_v63  ;;  %v495_v12 = vmul.f32 0.03125, %v448_v3  ;;  %v542_v14 = vmul.f32 %v2559_v59, %v2559_v59  ;;  %v558_v28 = vmul.f32 %v2562_v25, %v2562_v25  ;;  %v869_v63 = vld [vmem:[#allocation7] sm:$0xff]  ;;  %1777 = vmatpush3.msra.mxu0 %v870_v50  ;;  %1834 = vmatpush3.msra.mxu1 %v870_v50 }
 0x10a   : > { %1778 = vmatprep.subr.mxu0 %v869_v63  ;;  %1831 = vmatprep.subr.mxu1 %v869_v63 }
 0x10b   : > { %v2571_v15 = vsub.f32 %v2397_v32, %v479_v6  ;;  %v2574_v29 = vsub.f32 %v2400_v33, %v495_v12  ;;  %v588_v18 = vsel %vm373_vm0, %v542_v14, 0.0  ;;  %v636_v23 = vsel %vm373_vm0, %v558_v28, 0.0  ;;  %1779 = vmatpush3.msra.mxu0 %v869_v63  ;;  %1835 = vmatpush3.msra.mxu1 %v869_v63 }
 0x10c   : > { %634 = vadd.xlane.f32.xlu1 %v633_v4  ;;  %589 = vadd.xlane.f32.xlu0 %v588_v18  ;;  %v403_v19 = vpop.xlane.xlu0 %402  ;;  %v451_v22 = vpop.xlane.xlu1 %450 }
 0x10d   : > { %v480_v0 = vmul.f32 0.03125, %v403_v19  ;;  %v496_v16 = vmul.f32 0.03125, %v451_v22  ;;  %v543_v30 = vmul.f32 %v2571_v15, %v2571_v15  ;;  %v559_v32 = vmul.f32 %v2574_v29, %v2574_v29 }
 0x10f   : > { %v2583_v33 = vsub.f32 %v2407_v36, %v480_v0  ;;  %v2586_v34 = vsub.f32 %v2410_v37, %v496_v16  ;;  %v591_v35 = vsel %vm373_vm0, %v543_v30, 0.0  ;;  %v639_v42 = vsel %vm373_vm0, %v559_v32, 0.0 }
 0x110   : > { %637 = vadd.xlane.f32.xlu1 %v636_v23  ;;  %592 = vadd.xlane.f32.xlu0 %v591_v35  ;;  %v406_v38 = vpop.xlane.xlu0 %405  ;;  %v454_v39 = vpop.xlane.xlu1 %453 }
 0x111   : > { %v481_v46 = vmul.f32 0.03125, %v406_v38  ;;  %v497_v47 = vmul.f32 0.03125, %v454_v39  ;;  %v544_v36 = vmul.f32 %v2583_v33, %v2583_v33  ;;  %v560_v37 = vmul.f32 %v2586_v34, %v2586_v34 }
 0x113   : > { %v2595_v51 = vsub.f32 %v2417_v40, %v481_v46  ;;  %v2598_v54 = vsub.f32 %v2420_v41, %v497_v47  ;;  %v594_v8 = vsel %vm373_vm0, %v544_v36, 0.0  ;;  %v642_v62 = vsel %vm373_vm0, %v560_v37, 0.0 }
 0x114   : > { %640 = vadd.xlane.f32.xlu1 %v639_v42  ;;  %595 = vadd.xlane.f32.xlu0 %v594_v8  ;;  %v409_v58 = vpop.xlane.xlu0 %408  ;;  %v457_v24 = vpop.xlane.xlu1 %456 }
 0x115   : > { %v482_v3 = vmul.f32 0.03125, %v409_v58  ;;  %v498_v4 = vmul.f32 0.03125, %v457_v24  ;;  %v545_v40 = vmul.f32 %v2595_v51, %v2595_v51  ;;  %v561_v41 = vmul.f32 %v2598_v54, %v2598_v54 }
 0x117   : > { %v2607_v6 = vsub.f32 %v2427_v44, %v482_v3  ;;  %v2610_v12 = vsub.f32 %v2430_v45, %v498_v4  ;;  %v597_v14 = vsel %vm373_vm0, %v545_v40, 0.0  ;;  %v645_v19 = vsel %vm373_vm0, %v561_v41, 0.0 }
 0x118   : > { %643 = vadd.xlane.f32.xlu1 %v642_v62  ;;  %598 = vadd.xlane.f32.xlu0 %v597_v14  ;;  %v412_v28 = vpop.xlane.xlu0 %411  ;;  %v460_v18 = vpop.xlane.xlu1 %459 }
 0x119   : > { %v483_v22 = vmul.f32 0.03125, %v412_v28  ;;  %v499_v23 = vmul.f32 0.03125, %v460_v18  ;;  %v546_v0 = vmul.f32 %v2607_v6, %v2607_v6  ;;  %v562_v44 = vmul.f32 %v2610_v12, %v2610_v12 }
 0x11b   : > { %v2619_v45 = vsub.f32 %v2437_v48, %v483_v22  ;;  %v2622_v16 = vsub.f32 %v2440_v49, %v499_v23  ;;  %v600_v30 = vsel %vm373_vm0, %v546_v0, 0.0  ;;  %v648_v35 = vsel %vm373_vm0, %v562_v44, 0.0 }
 0x11c   : > { %646 = vadd.xlane.f32.xlu1 %v645_v19  ;;  %601 = vadd.xlane.f32.xlu0 %v600_v30  ;;  %v415_v32 = vpop.xlane.xlu0 %414  ;;  %v463_v31 = vpop.xlane.xlu1 %462 }
 0x11d   : > { %v484_v38 = vmul.f32 0.03125, %v415_v32  ;;  %v500_v39 = vmul.f32 0.03125, %v463_v31  ;;  %v547_v42 = vmul.f32 %v2619_v45, %v2619_v45  ;;  %v563_v48 = vmul.f32 %v2622_v16, %v2622_v16 }
 0x11f   : > { %v2631_v20 = vsub.f32 %v2447_v52, %v484_v38  ;;  %v2634_v49 = vsub.f32 %v2450_v53, %v500_v39  ;;  %v603_v46 = vsel %vm373_vm0, %v547_v42, 0.0  ;;  %v651_v37 = vsel %vm373_vm0, %v563_v48, 0.0 }
 0x120   : > { %649 = vadd.xlane.f32.xlu1 %v648_v35  ;;  %604 = vadd.xlane.f32.xlu0 %v603_v46  ;;  %v418_v47 = vpop.xlane.xlu0 %417  ;;  %v466_v36 = vpop.xlane.xlu1 %465 }
 0x121   : > { %v485_v50 = vmul.f32 0.03125, %v418_v47  ;;  %v501_v8 = vmul.f32 0.03125, %v466_v36  ;;  %v548_v58 = vmul.f32 %v2631_v20, %v2631_v20  ;;  %v564_v52 = vmul.f32 %v2634_v49, %v2634_v49 }
 0x123   : > { %v2643_v24 = vsub.f32 %v2457_v56, %v485_v50  ;;  %v2646_v53 = vsub.f32 %v2460_v57, %v501_v8  ;;  %v606_v62 = vsel %vm373_vm0, %v548_v58, 0.0  ;;  %v654_v4 = vsel %vm373_vm0, %v564_v52, 0.0 }
 0x124   : > { %652 = vadd.xlane.f32.xlu1 %v651_v37  ;;  %607 = vadd.xlane.f32.xlu0 %v606_v62  ;;  %v421_v63 = vpop.xlane.xlu0 %420  ;;  %v469_v3 = vpop.xlane.xlu1 %468 }
 0x125   : > { %v486_v40 = vmul.f32 0.03125, %v421_v63  ;;  %v502_v41 = vmul.f32 0.03125, %v469_v3  ;;  %v549_v14 = vmul.f32 %v2643_v24, %v2643_v24  ;;  %v565_v56 = vmul.f32 %v2646_v53, %v2646_v53 }
 0x127   : > { %v2655_v28 = vsub.f32 %v2467_v60, %v486_v40  ;;  %v2658_v57 = vsub.f32 %v2470_v61, %v502_v41  ;;  %v609_v18 = vsel %vm373_vm0, %v549_v14, 0.0  ;;  %v657_v19 = vsel %vm373_vm0, %v565_v56, 0.0 }
 0x128   : > { %655 = vadd.xlane.f32.xlu1 %v654_v4  ;;  %610 = vadd.xlane.f32.xlu0 %v609_v18  ;;  %v2668_v18 = vld [vmem:[#allocation4] ss:$0 sm:$0xff] }
 0x129   : > { %v550_v22 = vmul.f32 %v2655_v28, %v2655_v28  ;;  %v566_v23 = vmul.f32 %v2658_v57, %v2658_v57 }
 0x12b   : > { %v612_v0 = vsel %vm373_vm0, %v550_v22, 0.0  ;;  %v660_v60 = vsel %vm373_vm0, %v566_v23, 0.0 }
 0x12c   : > { %658 = vadd.xlane.f32.xlu1 %v657_v19  ;;  %613 = vadd.xlane.f32.xlu0 %v612_v0 }
 0x130   : > { %661 = vadd.xlane.f32.xlu1 %v660_v60 }
 0x179   : > { %v569_v61 = vpop.xlane.xlu0 %568 }
 0x17a   : > { %v663_v44 = vmul.f32 0.03125, %v569_v61  ;;  %v2671_v61 = vld [vmem:[#allocation6] ss:$0 sm:$0xff] }
 0x17c   : > { %v695_v30 = vadd.f32 1e-05, %v663_v44 }
 0x17d   : > { %v617_v32 = vpop.xlane.xlu1 %616  ;;  %v572_v31 = vpop.xlane.xlu0 %571 }
 0x17e   : > { %1910 = vrsqrt.f32 %v695_v30  ;;  %v679_v35 = vmul.f32 0.03125, %v617_v32  ;;  %v664_v38 = vmul.f32 0.03125, %v572_v31 }
 0x180   : > { %v711_v39 = vadd.f32 1e-05, %v679_v35  ;;  %v696_v42 = vadd.f32 1e-05, %v664_v38 }
 0x181   : > { %v620_v48 = vpop.xlane.xlu1 %619  ;;  %v575_v46 = vpop.xlane.xlu0 %574 }
 0x182   : > { %1912 = vrsqrt.f32 %v711_v39  ;;  %v680_v47 = vmul.f32 0.03125, %v620_v48  ;;  %v665_v36 = vmul.f32 0.03125, %v575_v46 }
 0x183   : > { %1914 = vrsqrt.f32 %v696_v42 }
 0x184   : > { %v712_v37 = vadd.f32 1e-05, %v680_v47  ;;  %v697_v50 = vadd.f32 1e-05, %v665_v36 }
 0x185   : > { %v623_v8 = vpop.xlane.xlu1 %622  ;;  %v578_v58 = vpop.xlane.xlu0 %577 }
 0x186   : > { %1916 = vrsqrt.f32 %v712_v37  ;;  %v681_v52 = vmul.f32 0.03125, %v623_v8  ;;  %v666_v62 = vmul.f32 0.03125, %v578_v58 }
 0x187   : > { %1918 = vrsqrt.f32 %v697_v50 }
 0x188   : > { %v713_v63 = vadd.f32 1e-05, %v681_v52  ;;  %v698_v3 = vadd.f32 1e-05, %v666_v62 }
 0x189   : > { %v626_v4 = vpop.xlane.xlu1 %625  ;;  %v581_v40 = vpop.xlane.xlu0 %580 }
 0x18a   : > { %1920 = vrsqrt.f32 %v713_v63  ;;  %v682_v41 = vmul.f32 0.03125, %v626_v4  ;;  %v667_v14 = vmul.f32 0.03125, %v581_v40 }
 0x18b   : > { %v1911_v56 = vpop.eup %1910  ;;  %1922 = vrsqrt.f32 %v698_v3 }
 0x18c   : > { %v714_v19 = vadd.f32 1e-05, %v682_v41  ;;  %v699_v22 = vadd.f32 1e-05, %v667_v14  ;;  %v759_v23 = vmul.f32 %v1911_v56, %v2477_v10 }
 0x18d   : > { %v629_v0 = vpop.xlane.xlu1 %628  ;;  %v584_v60 = vpop.xlane.xlu0 %583 }
 0x18e   : > { %1924 = vrsqrt.f32 %v714_v19  ;;  %v683_v44 = vmul.f32 0.03125, %v629_v0  ;;  %v668_v30 = vmul.f32 0.03125, %v584_v60  ;;  %v798_v32 = vmul.f32 %v2668_v18, %v759_v23 }
 0x18f   : > { %v1913_v31 = vpop.eup %1912  ;;  %1926 = vrsqrt.f32 %v699_v22 }
 0x190   : > { %v1915_v35 = vpop.eup %1914  ;;  %v715_v38 = vadd.f32 1e-05, %v683_v44  ;;  %v700_v39 = vadd.f32 1e-05, %v668_v30  ;;  %v837_v42 = vadd.f32 %v2671_v61, %v798_v32  ;;  %v775_v48 = vmul.f32 %v1913_v31, %v2487_v26 }
 0x191   : > { %v632_v46 = vpop.xlane.xlu1 %631  ;;  %v587_v10 = vpop.xlane.xlu0 %586  ;;  %v760_v47 = vmul.f32 %v1915_v35, %v2480_v11 }
 0x192   : > { %1928 = vrsqrt.f32 %v715_v38  ;;  %v684_v36 = vmul.f32 0.03125, %v632_v46  ;;  %v669_v37 = vmul.f32 0.03125, %v587_v10  ;;  %1780 = vmatprep.mubr.msk.f32.mxu0 %vm373_vm0, %v837_v42  ;;  %v814_v50 = vmul.f32 %v2668_v18, %v775_v48 }
 0x193   : > { %v1917_v8 = vpop.eup %1916  ;;  %1930 = vrsqrt.f32 %v700_v39  ;;  %v799_v58 = vmul.f32 %v2668_v18, %v760_v47 }
 0x194   : > { %v1919_v52 = vpop.eup %1918  ;;  %v716_v62 = vadd.f32 1e-05, %v684_v36  ;;  %v701_v63 = vadd.f32 1e-05, %v669_v37  ;;  %v853_v26 = vadd.f32 %v2671_v61, %v814_v50  ;;  %v776_v3 = vmul.f32 %v1917_v8, %v2490_v27 }
 0x195   : > { %v635_v4 = vpop.xlane.xlu1 %634  ;;  %v590_v11 = vpop.xlane.xlu0 %589  ;;  %v838_v40 = vadd.f32 %v2671_v61, %v799_v58  ;;  %v761_v41 = vmul.f32 %v1919_v52, %v2499_v2 }
 0x196   : > { %1932 = vrsqrt.f32 %v716_v62  ;;  %v685_v14 = vmul.f32 0.03125, %v635_v4  ;;  %v670_v56 = vmul.f32 0.03125, %v590_v11  ;;  %1804 = vmatprep.mubr.msk.f32.mxu1 %vm373_vm0, %v853_v26  ;;  %v815_v19 = vmul.f32 %v2668_v18, %v776_v3 }
 0x197   : > { %v1921_v22 = vpop.eup %1920  ;;  %1934 = vrsqrt.f32 %v701_v63  ;;  %1781 = vmatmul.mubr.msk.f32.vlgmr.msra.gmra.mxu0 %vm373_vm0, %v838_v40  ;;  %v800_v23 = vmul.f32 %v2668_v18, %v761_v41 }
 0x198   : > { %v1923_v27 = vpop.eup %1922  ;;  %v717_v0 = vadd.f32 1e-05, %v685_v14  ;;  %v702_v60 = vadd.f32 1e-05, %v670_v56  ;;  %v854_v44 = vadd.f32 %v2671_v61, %v815_v19  ;;  %v777_v2 = vmul.f32 %v1921_v22, %v2502_v5 }
 0x199   : > { %v638_v30 = vpop.xlane.xlu1 %637  ;;  %v593_v32 = vpop.xlane.xlu0 %592  ;;  %v839_v31 = vadd.f32 %v2671_v61, %v800_v23  ;;  %v762_v35 = vmul.f32 %v1923_v27, %v2511_v55 }
 0x19a   : > { %1936 = vrsqrt.f32 %v717_v0  ;;  %v686_v38 = vmul.f32 0.03125, %v638_v30  ;;  %v671_v39 = vmul.f32 0.03125, %v593_v32  ;;  %1805 = vmatmul.mubr.msk.f32.vlgmr.msra.gmra.mxu1 %vm373_vm0, %v854_v44  ;;  %v816_v42 = vmul.f32 %v2668_v18, %v777_v2 }
 0x19b   : > { %v1925_v48 = vpop.eup %1924  ;;  %1938 = vrsqrt.f32 %v702_v60  ;;  %1783 = vmatprep.mubr.msk.f32.mxu0 %vm373_vm0, %v839_v31  ;;  %v801_v46 = vmul.f32 %v2668_v18, %v762_v35 }
 0x19c   : > { %v1927_v5 = vpop.eup %1926  ;;  %v718_v10 = vadd.f32 1e-05, %v686_v38  ;;  %v703_v47 = vadd.f32 1e-05, %v671_v39  ;;  %v855_v36 = vadd.f32 %v2671_v61, %v816_v42  ;;  %v778_v55 = vmul.f32 %v1925_v48, %v2514_v9 }
 0x19d   : > { %v641_v37 = vpop.xlane.xlu1 %640  ;;  %v596_v50 = vpop.xlane.xlu0 %595  ;;  %v840_v8 = vadd.f32 %v2671_v61, %v801_v46  ;;  %v763_v58 = vmul.f32 %v1927_v5, %v2523_v7 }
 0x19e   : > { %1940 = vrsqrt.f32 %v718_v10  ;;  %v687_v52 = vmul.f32 0.03125, %v641_v37  ;;  %v672_v62 = vmul.f32 0.03125, %v596_v50  ;;  %1807 = vmatprep.mubr.msk.f32.mxu1 %vm373_vm0, %v855_v36  ;;  %v817_v63 = vmul.f32 %v2668_v18, %v778_v55 }
 0x19f   : > { %v1929_v26 = vpop.eup %1928  ;;  %1942 = vrsqrt.f32 %v703_v47  ;;  %1784 = vmatmul.mubr.msk.f32.gmra.mxu0 %vm373_vm0, %v840_v8  ;;  %v802_v3 = vmul.f32 %v2668_v18, %v763_v58 }
 0x1a0   : > { %v1931_v9 = vpop.eup %1930  ;;  %v719_v4 = vadd.f32 1e-05, %v687_v52  ;;  %v704_v11 = vadd.f32 1e-05, %v672_v62  ;;  %v856_v40 = vadd.f32 %v2671_v61, %v817_v63  ;;  %v779_v7 = vmul.f32 %v1929_v26, %v2526_v13 }
 0x1a1   : > { %v644_v41 = vpop.xlane.xlu1 %643  ;;  %v599_v14 = vpop.xlane.xlu0 %598  ;;  %v841_v56 = vadd.f32 %v2671_v61, %v802_v3  ;;  %v764_v19 = vmul.f32 %v1931_v9, %v2535_v1 }
 0x1a2   : > { %1944 = vrsqrt.f32 %v719_v4  ;;  %v688_v22 = vmul.f32 0.03125, %v644_v41  ;;  %v673_v23 = vmul.f32 0.03125, %v599_v14  ;;  %1808 = vmatmul.mubr.msk.f32.gmra.mxu1 %vm373_vm0, %v856_v40  ;;  %v818_v27 = vmul.f32 %v2668_v18, %v779_v7 }
 0x1a3   : > { %v1933_v0 = vpop.eup %1932  ;;  %1946 = vrsqrt.f32 %v704_v11  ;;  %1786 = vmatprep.mubr.msk.f32.mxu0 %vm373_vm0, %v841_v56  ;;  %v803_v60 = vmul.f32 %v2668_v18, %v764_v19 }
 0x1a4   : > { %v1935_v13 = vpop.eup %1934  ;;  %v720_v44 = vadd.f32 1e-05, %v688_v22  ;;  %v705_v2 = vadd.f32 1e-05, %v673_v23  ;;  %v857_v30 = vadd.f32 %v2671_v61, %v818_v27  ;;  %v780_v1 = vmul.f32 %v1933_v0, %v2538_v17 }
 0x1a5   : > { %v647_v32 = vpop.xlane.xlu1 %646  ;;  %v602_v31 = vpop.xlane.xlu0 %601  ;;  %v842_v35 = vadd.f32 %v2671_v61, %v803_v60  ;;  %v765_v38 = vmul.f32 %v1935_v13, %v2547_v43 }
 0x1a6   : > { %1948 = vrsqrt.f32 %v720_v44  ;;  %v689_v39 = vmul.f32 0.03125, %v647_v32  ;;  %v674_v42 = vmul.f32 0.03125, %v602_v31  ;;  %1810 = vmatprep.mubr.msk.f32.mxu1 %vm373_vm0, %v857_v30  ;;  %v819_v48 = vmul.f32 %v2668_v18, %v780_v1 }
 0x1a7   : > { %v1937_v46 = vpop.eup %1936  ;;  %1950 = vrsqrt.f32 %v705_v2  ;;  %1787 = vmatmul.mubr.msk.f32.gmra.mxu0 %vm373_vm0, %v842_v35  ;;  %v804_v5 = vmul.f32 %v2668_v18, %v765_v38 }
 0x1a8   : > { %v1939_v17 = vpop.eup %1938  ;;  %v721_v10 = vadd.f32 1e-05, %v689_v39  ;;  %v706_v47 = vadd.f32 1e-05, %v674_v42  ;;  %v858_v36 = vadd.f32 %v2671_v61, %v819_v48  ;;  %v781_v43 = vmul.f32 %v1937_v46, %v2550_v21 }
 0x1a9   : > { %v650_v55 = vpop.xlane.xlu1 %649  ;;  %v605_v37 = vpop.xlane.xlu0 %604  ;;  %v843_v50 = vadd.f32 %v2671_v61, %v804_v5  ;;  %v766_v8 = vmul.f32 %v1939_v17, %v2559_v59 }
 0x1aa   : > { %1952 = vrsqrt.f32 %v721_v10  ;;  %v690_v58 = vmul.f32 0.03125, %v650_v55  ;;  %v675_v52 = vmul.f32 0.03125, %v605_v37  ;;  %1811 = vmatmul.mubr.msk.f32.gmra.mxu1 %vm373_vm0, %v858_v36  ;;  %v820_v62 = vmul.f32 %v2668_v18, %v781_v43 }
 0x1ab   : > { %v1941_v63 = vpop.eup %1940  ;;  %1954 = vrsqrt.f32 %v706_v47  ;;  %1789 = vmatprep.mubr.msk.f32.mxu0 %vm373_vm0, %v843_v50  ;;  %v805_v26 = vmul.f32 %v2668_v18, %v766_v8 }
 0x1ac   : > { %v1943_v21 = vpop.eup %1942  ;;  %v722_v3 = vadd.f32 1e-05, %v690_v58  ;;  %v707_v9 = vadd.f32 1e-05, %v675_v52  ;;  %v859_v4 = vadd.f32 %v2671_v61, %v820_v62  ;;  %v782_v59 = vmul.f32 %v1941_v63, %v2562_v25 }
 0x1ad   : > { %v653_v11 = vpop.xlane.xlu1 %652  ;;  %v608_v40 = vpop.xlane.xlu0 %607  ;;  %v844_v7 = vadd.f32 %v2671_v61, %v805_v26  ;;  %v767_v41 = vmul.f32 %v1943_v21, %v2571_v15 }
 0x1ae   : > { %1956 = vrsqrt.f32 %v722_v3  ;;  %v691_v14 = vmul.f32 0.03125, %v653_v11  ;;  %v676_v56 = vmul.f32 0.03125, %v608_v40  ;;  %1813 = vmatprep.mubr.msk.f32.mxu1 %vm373_vm0, %v859_v4  ;;  %v821_v19 = vmul.f32 %v2668_v18, %v782_v59 }
 0x1af   : > { %v1945_v22 = vpop.eup %1944  ;;  %1958 = vrsqrt.f32 %v707_v9  ;;  %1790 = vmatmul.mubr.msk.f32.gmra.mxu0 %vm373_vm0, %v844_v7  ;;  %v806_v23 = vmul.f32 %v2668_v18, %v767_v41 }
 0x1b0   : > { %v1947_v25 = vpop.eup %1946  ;;  %v723_v27 = vadd.f32 1e-05, %v691_v14  ;;  %v708_v0 = vadd.f32 1e-05, %v676_v56  ;;  %v860_v60 = vadd.f32 %v2671_v61, %v821_v19  ;;  %v783_v15 = vmul.f32 %v1945_v22, %v2574_v29 }
 0x1b1   : > { %v656_v13 = vpop.xlane.xlu1 %655  ;;  %v611_v44 = vpop.xlane.xlu0 %610  ;;  %v845_v2 = vadd.f32 %v2671_v61, %v806_v23  ;;  %v768_v30 = vmul.f32 %v1947_v25, %v2583_v33 }
 0x1b2   : > { %1960 = vrsqrt.f32 %v723_v27  ;;  %v692_v1 = vmul.f32 0.03125, %v656_v13  ;;  %v677_v32 = vmul.f32 0.03125, %v611_v44  ;;  %1814 = vmatmul.mubr.msk.f32.gmra.mxu1 %vm373_vm0, %v860_v60  ;;  %v822_v31 = vmul.f32 %v2668_v18, %v783_v15 }
 0x1b3   : > { %v1949_v35 = vpop.eup %1948  ;;  %1962 = vrsqrt.f32 %v708_v0  ;;  %1792 = vmatprep.mubr.msk.f32.mxu0 %vm373_vm0, %v845_v2  ;;  %v807_v38 = vmul.f32 %v2668_v18, %v768_v30 }
 0x1b4   : > { %v1951_v29 = vpop.eup %1950  ;;  %v724_v39 = vadd.f32 1e-05, %v692_v1  ;;  %v709_v42 = vadd.f32 1e-05, %v677_v32  ;;  %v861_v48 = vadd.f32 %v2671_v61, %v822_v31  ;;  %v784_v33 = vmul.f32 %v1949_v35, %v2586_v34 }
 0x1b5   : > { %v659_v46 = vpop.xlane.xlu1 %658  ;;  %v614_v5 = vpop.xlane.xlu0 %613  ;;  %v846_v17 = vadd.f32 %v2671_v61, %v807_v38  ;;  %v769_v10 = vmul.f32 %v1951_v29, %v2595_v51 }
 0x1b6   : > { %1964 = vrsqrt.f32 %v724_v39  ;;  %v693_v47 = vmul.f32 0.03125, %v659_v46  ;;  %v678_v36 = vmul.f32 0.03125, %v614_v5  ;;  %1816 = vmatprep.mubr.msk.f32.mxu1 %vm373_vm0, %v861_v48  ;;  %v823_v43 = vmul.f32 %v2668_v18, %v784_v33 }
 0x1b7   : > { %v1953_v55 = vpop.eup %1952  ;;  %1966 = vrsqrt.f32 %v709_v42  ;;  %1793 = vmatmul.mubr.msk.f32.gmra.mxu0 %vm373_vm0, %v846_v17  ;;  %v808_v37 = vmul.f32 %v2668_v18, %v769_v10 }
 0x1b8   : > { %v1955_v34 = vpop.eup %1954  ;;  %v725_v50 = vadd.f32 1e-05, %v693_v47  ;;  %v710_v8 = vadd.f32 1e-05, %v678_v36  ;;  %v862_v58 = vadd.f32 %v2671_v61, %v823_v43  ;;  %v785_v51 = vmul.f32 %v1953_v55, %v2598_v54 }
 0x1b9   : > { %v662_v52 = vpop.xlane.xlu1 %661  ;;  %v847_v62 = vadd.f32 %v2671_v61, %v808_v37  ;;  %v770_v63 = vmul.f32 %v1955_v34, %v2607_v6 }
 0x1ba   : > { %1968 = vrsqrt.f32 %v725_v50  ;;  %v694_v26 = vmul.f32 0.03125, %v662_v52  ;;  %1817 = vmatmul.mubr.msk.f32.gmra.mxu1 %vm373_vm0, %v862_v58  ;;  %v824_v21 = vmul.f32 %v2668_v18, %v785_v51 }
 0x1bb   : > { %v1957_v3 = vpop.eup %1956  ;;  %1970 = vrsqrt.f32 %v710_v8  ;;  %1795 = vmatprep.mubr.msk.f32.mxu0 %vm373_vm0, %v847_v62  ;;  %v809_v9 = vmul.f32 %v2668_v18, %v770_v63 }
 0x1bc   : > { %v1959_v4 = vpop.eup %1958  ;;  %v726_v59 = vadd.f32 1e-05, %v694_v26  ;;  %v863_v54 = vadd.f32 %v2671_v61, %v824_v21  ;;  %v786_v11 = vmul.f32 %v1957_v3, %v2610_v12 }
 0x1bd   : > { %v848_v6 = vadd.f32 %v2671_v61, %v809_v9  ;;  %v771_v40 = vmul.f32 %v1959_v4, %v2619_v45 }
 0x1be   : > { %1972 = vrsqrt.f32 %v726_v59  ;;  %1819 = vmatprep.mubr.msk.f32.mxu1 %vm373_vm0, %v863_v54  ;;  %v825_v7 = vmul.f32 %v2668_v18, %v786_v11 }
 0x1bf   : > { %v1961_v41 = vpop.eup %1960  ;;  %1796 = vmatmul.mubr.msk.f32.gmra.mxu0 %vm373_vm0, %v848_v6  ;;  %v810_v14 = vmul.f32 %v2668_v18, %v771_v40 }
 0x1c0   : > { %v1963_v56 = vpop.eup %1962  ;;  %v864_v19 = vadd.f32 %v2671_v61, %v825_v7  ;;  %v787_v22 = vmul.f32 %v1961_v41, %v2622_v16 }
 0x1c1   : > { %v849_v12 = vadd.f32 %v2671_v61, %v810_v14  ;;  %v772_v23 = vmul.f32 %v1963_v56, %v2631_v20 }
 0x1c2   : > { %1820 = vmatmul.mubr.msk.f32.gmra.mxu1 %vm373_vm0, %v864_v19  ;;  %v826_v45 = vmul.f32 %v2668_v18, %v787_v22 }
 0x1c3   : > { %v1965_v25 = vpop.eup %1964  ;;  %1798 = vmatprep.mubr.msk.f32.mxu0 %vm373_vm0, %v849_v12  ;;  %v811_v27 = vmul.f32 %v2668_v18, %v772_v23 }
 0x1c4   : > { %v1967_v0 = vpop.eup %1966  ;;  %v865_v60 = vadd.f32 %v2671_v61, %v826_v45  ;;  %v788_v15 = vmul.f32 %v1965_v25, %v2634_v49 }
 0x1c5   : > { %v850_v16 = vadd.f32 %v2671_v61, %v811_v27  ;;  %v773_v13 = vmul.f32 %v1967_v0, %v2643_v24 }
 0x1c6   : > { %1822 = vmatprep.mubr.msk.f32.mxu1 %vm373_vm0, %v865_v60  ;;  %v827_v20 = vmul.f32 %v2668_v18, %v788_v15 }
 0x1c7   : > { %v1969_v44 = vpop.eup %1968  ;;  %1799 = vmatmul.mubr.msk.f32.gmra.mxu0 %vm373_vm0, %v850_v16  ;;  %v812_v2 = vmul.f32 %v2668_v18, %v773_v13 }
 0x1c8   : > { %v1971_v30 = vpop.eup %1970  ;;  %v866_v1 = vadd.f32 %v2671_v61, %v827_v20  ;;  %v789_v32 = vmul.f32 %v1969_v44, %v2646_v53 }
 0x1c9   : > { %v851_v49 = vadd.f32 %v2671_v61, %v812_v2  ;;  %v774_v31 = vmul.f32 %v1971_v30, %v2655_v28 }
 0x1ca   : > { %1823 = vmatmul.mubr.msk.f32.gmra.mxu1 %vm373_vm0, %v866_v1  ;;  %v828_v24 = vmul.f32 %v2668_v18, %v789_v32 }
 0x1cb   : > { %v1973_v35 = vpop.eup %1972  ;;  %1801 = vmatprep.mubr.msk.f32.mxu0 %vm373_vm0, %v851_v49  ;;  %v813_v38 = vmul.f32 %v2668_v18, %v774_v31 }
 0x1cc   : > { %v867_v29 = vadd.f32 %v2671_v61, %v828_v24  ;;  %v790_v39 = vmul.f32 %v1973_v35, %v2658_v57 }
 0x1cd   : > { %v852_v53 = vadd.f32 %v2671_v61, %v813_v38 }
 0x1ce   : > { %1825 = vmatprep.mubr.msk.f32.mxu1 %vm373_vm0, %v867_v29  ;;  %v829_v42 = vmul.f32 %v2668_v18, %v790_v39 }
 0x1cf   : > { %1802 = vmatmul.mubr.msk.f32.gmra.mxu0 %vm373_vm0, %v852_v53 }
 0x1d0   : > { %v868_v28 = vadd.f32 %v2671_v61, %v829_v42 }
 0x1d2   : > { %1826 = vmatmul.mubr.msk.f32.gmra.mxu1 %vm373_vm0, %v868_v28 }
 0x257   : > { %v1782_v57 = vpop.f32.mrf.mxu0 }
 0x258   : > { %1195 = vst.msk [vmem:[%s2808_s29 + $0x8] sm:$0xff] %vm373_vm0, %v1782_v57  ;;  %1260 = vrot.lane.b32.xlu1 %v1782_v57, %s2130_s24 }
 0x259   : > { %v1035_v18 = vpop.f32.mrf.mxu0 }
 0x25a   : > { %1194 = vst.msk [vmem:[%s2808_s29] sm:$0xff] %vm373_vm0, %v1035_v18  ;;  %1258 = vrot.lane.b32.xlu0 %v1035_v18, %s2130_s24  ;;  %v1806_v61 = vpop.f32.mrf.mxu1 }
 0x25b   : > { %1211 = vst.msk [vmem:[%s2808_s29 + $0x88] sm:$0xff] %vm373_vm0, %v1806_v61 }
 0x25c   : > { %1292 = vrot.lane.b32.xlu1 %v1806_v61, %s2130_s24  ;;  %v1115_v48 = vpop.f32.mrf.mxu1 }
 0x25d   : > { %1210 = vst.msk [vmem:[%s2808_s29 + $0x80] sm:$0xff] %vm373_vm0, %v1115_v48 }
 0x25e   : > { %1290 = vrot.lane.b32.xlu0 %v1115_v48, %s2130_s24 }
 0x25f   : > { %v1785_v33 = vpop.f32.mrf.mxu0 }
 0x260   : > { %1197 = vst.msk [vmem:[%s2808_s29 + $0x18] sm:$0xff] %vm373_vm0, %v1785_v33  ;;  %1388 = vrot.lane.b32.xlu1 %v1782_v57, %s2131_s25 }
 0x261   : > { %v1045_v46 = vpop.f32.mrf.mxu0 }
 0x262   : > { %1196 = vst.msk [vmem:[%s2808_s29 + $0x10] sm:$0xff] %vm373_vm0, %v1045_v46  ;;  %1386 = vrot.lane.b32.xlu0 %v1035_v18, %s2131_s25  ;;  %v1809_v5 = vpop.f32.mrf.mxu1 }
 0x263   : > { %1213 = vst.msk [vmem:[%s2808_s29 + $0x98] sm:$0xff] %vm373_vm0, %v1809_v5 }
 0x264   : > { %1420 = vrot.lane.b32.xlu1 %v1806_v61, %s2131_s25  ;;  %v1125_v17 = vpop.f32.mrf.mxu1 }
 0x265   : > { %1212 = vst.msk [vmem:[%s2808_s29 + $0x90] sm:$0xff] %vm373_vm0, %v1125_v17 }
 0x266   : > { %1418 = vrot.lane.b32.xlu0 %v1115_v48, %s2131_s25 }
 0x267   : > { %v1788_v10 = vpop.f32.mrf.mxu0 }
 0x268   : > { %1199 = vst.msk [vmem:[%s2808_s29 + $0x28] sm:$0xff] %vm373_vm0, %v1788_v10  ;;  %1264 = vrot.lane.b32.xlu1 %v1785_v33, %s2130_s24 }
 0x269   : > { %v1055_v47 = vpop.f32.mrf.mxu0 }
 0x26a   : > { %1198 = vst.msk [vmem:[%s2808_s29 + $0x20] sm:$0xff] %vm373_vm0, %v1055_v47  ;;  %1294 = vrot.lane.b32.xlu0 %v1125_v17, %s2130_s24  ;;  %v1812_v36 = vpop.f32.mrf.mxu1 }
 0x26b   : > { %1215 = vst.msk [vmem:[%s2808_s29 + $0xa8] sm:$0xff] %vm373_vm0, %v1812_v36 }
 0x26c   : > { %1296 = vrot.lane.b32.xlu1 %v1809_v5, %s2130_s24  ;;  %v1135_v43 = vpop.f32.mrf.mxu1 }
 0x26d   : > { %1214 = vst.msk [vmem:[%s2808_s29 + $0xa0] sm:$0xff] %vm373_vm0, %v1135_v43 }
 0x26e   : > { %1390 = vrot.lane.b32.xlu0 %v1045_v46, %s2131_s25 }
 0x26f   : > { %v1791_v55 = vpop.f32.mrf.mxu0 }
 0x270   : > { %1201 = vst.msk [vmem:[%s2808_s29 + $0x38] sm:$0xff] %vm373_vm0, %v1791_v55  ;;  %1392 = vrot.lane.b32.xlu1 %v1785_v33, %s2131_s25 }
 0x271   : > { %v1065_v37 = vpop.f32.mrf.mxu0 }
 0x272   : > { %1200 = vst.msk [vmem:[%s2808_s29 + $0x30] sm:$0xff] %vm373_vm0, %v1065_v37  ;;  %1422 = vrot.lane.b32.xlu0 %v1125_v17, %s2131_s25  ;;  %v1815_v34 = vpop.f32.mrf.mxu1 }
 0x273   : > { %1217 = vst.msk [vmem:[%s2808_s29 + $0xb8] sm:$0xff] %vm373_vm0, %v1815_v34 }
 0x274   : > { %1424 = vrot.lane.b32.xlu1 %v1809_v5, %s2131_s25  ;;  %v1145_v50 = vpop.f32.mrf.mxu1 }
 0x275   : > { %1216 = vst.msk [vmem:[%s2808_s29 + $0xb0] sm:$0xff] %vm373_vm0, %v1145_v50 }
 0x276   : > { %1266 = vrot.lane.b32.xlu0 %v1055_v47, %s2130_s24 }
 0x277   : > { %v1794_v8 = vpop.f32.mrf.mxu0 }
 0x278   : > { %1203 = vst.msk [vmem:[%s2808_s29 + $0x48] sm:$0xff] %vm373_vm0, %v1794_v8  ;;  %1262 = vrot.lane.b32.xlu1 %v1045_v46, %s2130_s24 }
 0x279   : > { %v1075_v58 = vpop.f32.mrf.mxu0 }
 0x27a   : > { %1202 = vst.msk [vmem:[%s2808_s29 + $0x40] sm:$0xff] %vm373_vm0, %v1075_v58  ;;  %1298 = vrot.lane.b32.xlu0 %v1135_v43, %s2130_s24  ;;  %v1818_v51 = vpop.f32.mrf.mxu1 }
 0x27b   : > { %1219 = vst.msk [vmem:[%s2808_s29 + $0xc8] sm:$0xff] %vm373_vm0, %v1818_v51 }
 0x27c   : > { %1268 = vrot.lane.b32.xlu1 %v1788_v10, %s2130_s24  ;;  %v1155_v52 = vpop.f32.mrf.mxu1 }
 0x27d   : > { %1218 = vst.msk [vmem:[%s2808_s29 + $0xc0] sm:$0xff] %vm373_vm0, %v1155_v52 }
 0x27e   : > { %1394 = vrot.lane.b32.xlu0 %v1055_v47, %s2131_s25 }
 0x27f   : > { %v1797_v62 = vpop.f32.mrf.mxu0 }
 0x280   : > { %1205 = vst.msk [vmem:[%s2808_s29 + $0x58] sm:$0xff] %vm373_vm0, %v1797_v62  ;;  %1300 = vrot.lane.b32.xlu1 %v1812_v36, %s2130_s24 }
 0x281   : > { %v1085_v63 = vpop.f32.mrf.mxu0 }
 0x282   : > { %1204 = vst.msk [vmem:[%s2808_s29 + $0x50] sm:$0xff] %vm373_vm0, %v1085_v63  ;;  %1426 = vrot.lane.b32.xlu0 %v1135_v43, %s2131_s25  ;;  %v1821_v26 = vpop.f32.mrf.mxu1 }
 0x283   : > { %1221 = vst.msk [vmem:[%s2808_s29 + $0xd8] sm:$0xff] %vm373_vm0, %v1821_v26 }
 0x284   : > { %1396 = vrot.lane.b32.xlu1 %v1788_v10, %s2131_s25  ;;  %v1165_v21 = vpop.f32.mrf.mxu1 }
 0x285   : > { %1220 = vst.msk [vmem:[%s2808_s29 + $0xd0] sm:$0xff] %vm373_vm0, %v1165_v21 }
 0x286   : > { %1270 = vrot.lane.b32.xlu0 %v1065_v37, %s2130_s24 }
 0x287   : > { %v1800_v3 = vpop.f32.mrf.mxu0 }
 0x288   : > { %1207 = vst.msk [vmem:[%s2808_s29 + $0x68] sm:$0xff] %vm373_vm0, %v1800_v3  ;;  %1428 = vrot.lane.b32.xlu1 %v1812_v36, %s2131_s25 }
 0x289   : > { %v1095_v9 = vpop.f32.mrf.mxu0 }
 0x28a   : > { %1206 = vst.msk [vmem:[%s2808_s29 + $0x60] sm:$0xff] %vm373_vm0, %v1095_v9  ;;  %1302 = vrot.lane.b32.xlu0 %v1145_v50, %s2130_s24  ;;  %v1824_v4 = vpop.f32.mrf.mxu1 }
 0x28b   : > { %1223 = vst.msk [vmem:[%s2808_s29 + $0xe8] sm:$0xff] %vm373_vm0, %v1824_v4 }
 0x28c   : > { %1272 = vrot.lane.b32.xlu1 %v1791_v55, %s2130_s24  ;;  %v1175_v59 = vpop.f32.mrf.mxu1 }
 0x28d   : > { %1222 = vst.msk [vmem:[%s2808_s29 + $0xe0] sm:$0xff] %vm373_vm0, %v1175_v59 }
 0x28e   : > { %1398 = vrot.lane.b32.xlu0 %v1065_v37, %s2131_s25 }
 0x28f   : > { %v1803_v54 = vpop.f32.mrf.mxu0 }
 0x290   : > { %1209 = vst.msk [vmem:[%s2808_s29 + $0x78] sm:$0xff] %vm373_vm0, %v1803_v54  ;;  %1304 = vrot.lane.b32.xlu1 %v1815_v34, %s2130_s24 }
 0x291   : > { %v1105_v11 = vpop.f32.mrf.mxu0 }
 0x292   : > { %1208 = vst.msk [vmem:[%s2808_s29 + $0x70] sm:$0xff] %vm373_vm0, %v1105_v11  ;;  %1430 = vrot.lane.b32.xlu0 %v1145_v50, %s2131_s25  ;;  %v1827_v6 = vpop.f32.mrf.mxu1 }
 0x293   : > { %1225 = vst.msk [vmem:[%s2808_s29 + $0xf8] sm:$0xff] %vm373_vm0, %v1827_v6 }
 0x294   : > { %1400 = vrot.lane.b32.xlu1 %v1791_v55, %s2131_s25  ;;  %v1185_v40 = vpop.f32.mrf.mxu1 }
 0x295   : > { %1224 = vst.msk [vmem:[%s2808_s29 + $0xf0] sm:$0xff] %vm373_vm0, %v1185_v40 }
 0x296   : > { %1274 = vrot.lane.b32.xlu0 %v1075_v58, %s2130_s24 }
 0x298   : > { %1432 = vrot.lane.b32.xlu1 %v1815_v34, %s2131_s25 }
 0x29a   : > { %1306 = vrot.lane.b32.xlu0 %v1155_v52, %s2130_s24 }
 0x29c   : > { %1276 = vrot.lane.b32.xlu1 %v1794_v8, %s2130_s24 }
 0x29e   : > { %1402 = vrot.lane.b32.xlu0 %v1075_v58, %s2131_s25 }
 0x2a0   : > { %1308 = vrot.lane.b32.xlu1 %v1818_v51, %s2130_s24 }
 0x2a2   : > { %1434 = vrot.lane.b32.xlu0 %v1155_v52, %s2131_s25 }
 0x2a4   : > { %1404 = vrot.lane.b32.xlu1 %v1794_v8, %s2131_s25 }
 0x2a6   : > { %1278 = vrot.lane.b32.xlu0 %v1085_v63, %s2130_s24 }
 0x2a8   : > { %1436 = vrot.lane.b32.xlu1 %v1818_v51, %s2131_s25 }
 0x2aa   : > { %1310 = vrot.lane.b32.xlu0 %v1165_v21, %s2130_s24 }
 0x2ac   : > { %1280 = vrot.lane.b32.xlu1 %v1797_v62, %s2130_s24 }
 0x2ae   : > { %1406 = vrot.lane.b32.xlu0 %v1085_v63, %s2131_s25 }
 0x2b0   : > { %1312 = vrot.lane.b32.xlu1 %v1821_v26, %s2130_s24 }
 0x2b2   : > { %1438 = vrot.lane.b32.xlu0 %v1165_v21, %s2131_s25 }
 0x2b4   : > { %1408 = vrot.lane.b32.xlu1 %v1797_v62, %s2131_s25 }
 0x2b6   : > { %1282 = vrot.lane.b32.xlu0 %v1095_v9, %s2130_s24 }
 0x2b8   : > { %1440 = vrot.lane.b32.xlu1 %v1821_v26, %s2131_s25 }
 0x2ba   : > { %1314 = vrot.lane.b32.xlu0 %v1175_v59, %s2130_s24 }
 0x2bc   : > { %1284 = vrot.lane.b32.xlu1 %v1800_v3, %s2130_s24 }
 0x2be   : > { %1410 = vrot.lane.b32.xlu0 %v1095_v9, %s2131_s25 }
 0x2c0   : > { %1316 = vrot.lane.b32.xlu1 %v1824_v4, %s2130_s24 }
 0x2c2   : > { %1442 = vrot.lane.b32.xlu0 %v1175_v59, %s2131_s25 }
 0x2c4   : > { %1412 = vrot.lane.b32.xlu1 %v1800_v3, %s2131_s25 }
 0x2c6   : > { %1286 = vrot.lane.b32.xlu0 %v1105_v11, %s2130_s24 }
 0x2c8   : > { %1444 = vrot.lane.b32.xlu1 %v1824_v4, %s2131_s25 }
 0x2ca   : > { %v1261_v7 = vpop.permute.xlu1 %1260  ;;  %1318 = vrot.lane.b32.xlu0 %v1185_v40, %s2130_s24 }
 0x2cb   : > { %1355 = vst.msk [vmem:[%s2935_s20 + $0x8] sm:$0xff] %vm373_vm0, %v1261_v7 }
 0x2cc   : > { %1288 = vrot.lane.b32.xlu1 %v1803_v54, %s2130_s24  ;;  %v1259_v41 = vpop.permute.xlu0 %1258 }
 0x2cd   : > { %1354 = vst.msk [vmem:[%s2935_s20] sm:$0xff] %vm373_vm0, %v1259_v41 }
 0x2ce   : > { %v1293_v14 = vpop.permute.xlu1 %1292  ;;  %1414 = vrot.lane.b32.xlu0 %v1105_v11, %s2131_s25 }
 0x2cf   : > { %1371 = vst.msk [vmem:[%s2935_s20 + $0x88] sm:$0xff] %vm373_vm0, %v1293_v14 }
 0x2d0   : > { %1320 = vrot.lane.b32.xlu1 %v1827_v6, %s2130_s24  ;;  %v1291_v56 = vpop.permute.xlu0 %1290 }
 0x2d1   : > { %1370 = vst.msk [vmem:[%s2935_s20 + $0x80] sm:$0xff] %vm373_vm0, %v1291_v56 }
 0x2d2   : > { %v1389_v19 = vpop.permute.xlu1 %1388  ;;  %1446 = vrot.lane.b32.xlu0 %v1185_v40, %s2131_s25 }
 0x2d3   : > { %1483 = vst.msk [vmem:[%s2951_s9 + $0x8] sm:$0xff] %vm373_vm0, %v1389_v19 }
 0x2d4   : > { %1416 = vrot.lane.b32.xlu1 %v1803_v54, %s2131_s25  ;;  %v1387_v22 = vpop.permute.xlu0 %1386 }
 0x2d5   : > { %1482 = vst.msk [vmem:[%s2951_s9] sm:$0xff] %vm373_vm0, %v1387_v22 }
 0x2d6   : > { %v1421_v12 = vpop.permute.xlu1 %1420 }
 0x2d7   : > { %1499 = vst.msk [vmem:[%s2951_s9 + $0x88] sm:$0xff] %vm373_vm0, %v1421_v12 }
 0x2d8   : > { %1448 = vrot.lane.b32.xlu1 %v1827_v6, %s2131_s25  ;;  %v1419_v23 = vpop.permute.xlu0 %1418 }
 0x2d9   : > { %1498 = vst.msk [vmem:[%s2951_s9 + $0x80] sm:$0xff] %vm373_vm0, %v1419_v23 }
 0x2da   : > { %v1265_v45 = vpop.permute.xlu1 %1264 }
 0x2db   : > { %1357 = vst.msk [vmem:[%s2935_s20 + $0x18] sm:$0xff] %vm373_vm0, %v1265_v45 }
 0x2dc   : > { %v1295_v25 = vpop.permute.xlu0 %1294 }
 0x2dd   : > { %1372 = vst.msk [vmem:[%s2935_s20 + $0x90] sm:$0xff] %vm373_vm0, %v1295_v25 }
 0x2de   : > { %v1297_v27 = vpop.permute.xlu1 %1296 }
 0x2df   : > { %1373 = vst.msk [vmem:[%s2935_s20 + $0x98] sm:$0xff] %vm373_vm0, %v1297_v27 }
 0x2e0   : > { %v1391_v0 = vpop.permute.xlu0 %1390 }
 0x2e1   : > { %1484 = vst.msk [vmem:[%s2951_s9 + $0x10] sm:$0xff] %vm373_vm0, %v1391_v0 }
 0x2e2   : > { %v1393_v60 = vpop.permute.xlu1 %1392 }
 0x2e3   : > { %1485 = vst.msk [vmem:[%s2951_s9 + $0x18] sm:$0xff] %vm373_vm0, %v1393_v60 }
 0x2e4   : > { %v1423_v15 = vpop.permute.xlu0 %1422 }
 0x2e5   : > { %1500 = vst.msk [vmem:[%s2951_s9 + $0x90] sm:$0xff] %vm373_vm0, %v1423_v15 }
 0x2e6   : > { %v1425_v16 = vpop.permute.xlu1 %1424 }
 0x2e7   : > { %1501 = vst.msk [vmem:[%s2951_s9 + $0x98] sm:$0xff] %vm373_vm0, %v1425_v16 }
 0x2e8   : > { %v1267_v13 = vpop.permute.xlu0 %1266 }
 0x2e9   : > { %1358 = vst.msk [vmem:[%s2935_s20 + $0x20] sm:$0xff] %vm373_vm0, %v1267_v13 }
 0x2ea   : > { %v1263_v20 = vpop.permute.xlu1 %1262 }
 0x2eb   : > { %1356 = vst.msk [vmem:[%s2935_s20 + $0x10] sm:$0xff] %vm373_vm0, %v1263_v20 }
 0x2ec   : > { %v1299_v44 = vpop.permute.xlu0 %1298 }
 0x2ed   : > { %1374 = vst.msk [vmem:[%s2935_s20 + $0xa0] sm:$0xff] %vm373_vm0, %v1299_v44 }
 0x2ee   : > { %v1269_v2 = vpop.permute.xlu1 %1268 }
 0x2ef   : > { %1359 = vst.msk [vmem:[%s2935_s20 + $0x28] sm:$0xff] %vm373_vm0, %v1269_v2 }
 0x2f0   : > { %v1395_v30 = vpop.permute.xlu0 %1394 }
 0x2f1   : > { %1486 = vst.msk [vmem:[%s2951_s9 + $0x20] sm:$0xff] %vm373_vm0, %v1395_v30 }
 0x2f2   : > { %v1301_v1 = vpop.permute.xlu1 %1300 }
 0x2f3   : > { %1375 = vst.msk [vmem:[%s2935_s20 + $0xa8] sm:$0xff] %vm373_vm0, %v1301_v1 }
 0x2f4   : > { %v1427_v32 = vpop.permute.xlu0 %1426 }
 0x2f5   : > { %1502 = vst.msk [vmem:[%s2951_s9 + $0xa0] sm:$0xff] %vm373_vm0, %v1427_v32 }
 0x2f6   : > { %v1397_v49 = vpop.permute.xlu1 %1396 }
 0x2f7   : > { %1487 = vst.msk [vmem:[%s2951_s9 + $0x28] sm:$0xff] %vm373_vm0, %v1397_v49 }
 0x2f8   : > { %v1271_v31 = vpop.permute.xlu0 %1270 }
 0x2f9   : > { %1360 = vst.msk [vmem:[%s2935_s20 + $0x30] sm:$0xff] %vm373_vm0, %v1271_v31 }
 0x2fa   : > { %v1429_v24 = vpop.permute.xlu1 %1428 }
 0x2fb   : > { %1503 = vst.msk [vmem:[%s2951_s9 + $0xa8] sm:$0xff] %vm373_vm0, %v1429_v24 }
 0x2fc   : > { %v1303_v35 = vpop.permute.xlu0 %1302 }
 0x2fd   : > { %1376 = vst.msk [vmem:[%s2935_s20 + $0xb0] sm:$0xff] %vm373_vm0, %v1303_v35 }
 0x2fe   : > { %v1273_v38 = vpop.permute.xlu1 %1272 }
 0x2ff   : > { %1361 = vst.msk [vmem:[%s2935_s20 + $0x38] sm:$0xff] %vm373_vm0, %v1273_v38 }
 0x300   : > { %v1399_v29 = vpop.permute.xlu0 %1398 }
 0x301   : > { %1488 = vst.msk [vmem:[%s2951_s9 + $0x30] sm:$0xff] %vm373_vm0, %v1399_v29 }
 0x302   : > { %v1305_v39 = vpop.permute.xlu1 %1304 }
 0x303   : > { %1377 = vst.msk [vmem:[%s2935_s20 + $0xb8] sm:$0xff] %vm373_vm0, %v1305_v39 }
 0x304   : > { %v1431_v53 = vpop.permute.xlu0 %1430 }
 0x305   : > { %1504 = vst.msk [vmem:[%s2951_s9 + $0xb0] sm:$0xff] %vm373_vm0, %v1431_v53 }
 0x306   : > { %v1401_v42 = vpop.permute.xlu1 %1400 }
 0x307   : > { %1489 = vst.msk [vmem:[%s2951_s9 + $0x38] sm:$0xff] %vm373_vm0, %v1401_v42 }
 0x308   : > { %v1275_v28 = vpop.permute.xlu0 %1274 }
 0x309   : > { %1362 = vst.msk [vmem:[%s2935_s20 + $0x40] sm:$0xff] %vm373_vm0, %v1275_v28 }
 0x30a   : > { %v1433_v57 = vpop.permute.xlu1 %1432 }
 0x30b   : > { %1505 = vst.msk [vmem:[%s2951_s9 + $0xb8] sm:$0xff] %vm373_vm0, %v1433_v57 }
 0x30c   : > { %v1307_v18 = vpop.permute.xlu0 %1306 }
 0x30d   : > { %1378 = vst.msk [vmem:[%s2935_s20 + $0xc0] sm:$0xff] %vm373_vm0, %v1307_v18 }
 0x30e   : > { %v1277_v61 = vpop.permute.xlu1 %1276 }
 0x30f   : > { %1363 = vst.msk [vmem:[%s2935_s20 + $0x48] sm:$0xff] %vm373_vm0, %v1277_v61 }
 0x310   : > { %v1403_v48 = vpop.permute.xlu0 %1402 }
 0x311   : > { %1490 = vst.msk [vmem:[%s2951_s9 + $0x40] sm:$0xff] %vm373_vm0, %v1403_v48 }
 0x312   : > { %v1309_v33 = vpop.permute.xlu1 %1308 }
 0x313   : > { %1379 = vst.msk [vmem:[%s2935_s20 + $0xc8] sm:$0xff] %vm373_vm0, %v1309_v33 }
 0x314   : > { %v1435_v46 = vpop.permute.xlu0 %1434 }
 0x315   : > { %1506 = vst.msk [vmem:[%s2951_s9 + $0xc0] sm:$0xff] %vm373_vm0, %v1435_v46 }
 0x316   : > { %v1405_v5 = vpop.permute.xlu1 %1404 }
 0x317   : > { %1491 = vst.msk [vmem:[%s2951_s9 + $0x48] sm:$0xff] %vm373_vm0, %v1405_v5 }
 0x318   : > { %v1279_v17 = vpop.permute.xlu0 %1278 }
 0x319   : > { %1364 = vst.msk [vmem:[%s2935_s20 + $0x50] sm:$0xff] %vm373_vm0, %v1279_v17 }
 0x31a   : > { %v1437_v10 = vpop.permute.xlu1 %1436 }
 0x31b   : > { %1507 = vst.msk [vmem:[%s2951_s9 + $0xc8] sm:$0xff] %vm373_vm0, %v1437_v10 }
 0x31c   : > { %v1311_v47 = vpop.permute.xlu0 %1310 }
 0x31d   : > { %1380 = vst.msk [vmem:[%s2935_s20 + $0xd0] sm:$0xff] %vm373_vm0, %v1311_v47 }
 0x31e   : > { %v1281_v36 = vpop.permute.xlu1 %1280 }
 0x31f   : > { %1365 = vst.msk [vmem:[%s2935_s20 + $0x58] sm:$0xff] %vm373_vm0, %v1281_v36 }
 0x320   : > { %v1407_v43 = vpop.permute.xlu0 %1406 }
 0x321   : > { %1492 = vst.msk [vmem:[%s2951_s9 + $0x50] sm:$0xff] %vm373_vm0, %v1407_v43 }
 0x322   : > { %v1313_v55 = vpop.permute.xlu1 %1312 }
 0x323   : > { %1381 = vst.msk [vmem:[%s2935_s20 + $0xd8] sm:$0xff] %vm373_vm0, %v1313_v55 }
 0x324   : > { %v1439_v37 = vpop.permute.xlu0 %1438 }
 0x325   : > { %1508 = vst.msk [vmem:[%s2951_s9 + $0xd0] sm:$0xff] %vm373_vm0, %v1439_v37 }
 0x326   : > { %v1409_v34 = vpop.permute.xlu1 %1408 }
 0x327   : > { %1493 = vst.msk [vmem:[%s2951_s9 + $0x58] sm:$0xff] %vm373_vm0, %v1409_v34 }
 0x328   : > { %v1283_v50 = vpop.permute.xlu0 %1282 }
 0x329   : > { %1366 = vst.msk [vmem:[%s2935_s20 + $0x60] sm:$0xff] %vm373_vm0, %v1283_v50 }
 0x32a   : > { %v1441_v8 = vpop.permute.xlu1 %1440 }
 0x32b   : > { %1509 = vst.msk [vmem:[%s2951_s9 + $0xd8] sm:$0xff] %vm373_vm0, %v1441_v8 }
 0x32c   : > { %v1315_v58 = vpop.permute.xlu0 %1314 }
 0x32d   : > { %1382 = vst.msk [vmem:[%s2935_s20 + $0xe0] sm:$0xff] %vm373_vm0, %v1315_v58 }
 0x32e   : > { %v1285_v51 = vpop.permute.xlu1 %1284 }
 0x32f   : > { %1367 = vst.msk [vmem:[%s2935_s20 + $0x68] sm:$0xff] %vm373_vm0, %v1285_v51 }
 0x330   : > { %v1411_v52 = vpop.permute.xlu0 %1410 }
 0x331   : > { %1494 = vst.msk [vmem:[%s2951_s9 + $0x60] sm:$0xff] %vm373_vm0, %v1411_v52 }
 0x332   : > { %v1317_v62 = vpop.permute.xlu1 %1316 }
 0x333   : > { %1383 = vst.msk [vmem:[%s2935_s20 + $0xe8] sm:$0xff] %vm373_vm0, %v1317_v62 }
 0x334   : > { %v1443_v63 = vpop.permute.xlu0 %1442 }
 0x335   : > { %1510 = vst.msk [vmem:[%s2951_s9 + $0xe0] sm:$0xff] %vm373_vm0, %v1443_v63 }
 0x336   : > { %v1413_v26 = vpop.permute.xlu1 %1412 }
 0x337   : > { %1495 = vst.msk [vmem:[%s2951_s9 + $0x68] sm:$0xff] %vm373_vm0, %v1413_v26 }
 0x338   : > { %v1287_v21 = vpop.permute.xlu0 %1286 }
 0x339   : > { %1368 = vst.msk [vmem:[%s2935_s20 + $0x70] sm:$0xff] %vm373_vm0, %v1287_v21 }
 0x33a   : > { %v1445_v3 = vpop.permute.xlu1 %1444 }
 0x33b   : > { %1511 = vst.msk [vmem:[%s2951_s9 + $0xe8] sm:$0xff] %vm373_vm0, %v1445_v3 }
 0x33c   : > { %v1319_v9 = vpop.permute.xlu0 %1318 }
 0x33d   : > { %1384 = vst.msk [vmem:[%s2935_s20 + $0xf0] sm:$0xff] %vm373_vm0, %v1319_v9 }
 0x33e   : > { %v1289_v4 = vpop.permute.xlu1 %1288 }
 0x33f   : > { %1369 = vst.msk [vmem:[%s2935_s20 + $0x78] sm:$0xff] %vm373_vm0, %v1289_v4 }
 0x340   : > { %v1415_v59 = vpop.permute.xlu0 %1414 }
 0x341   : > { %1496 = vst.msk [vmem:[%s2951_s9 + $0x70] sm:$0xff] %vm373_vm0, %v1415_v59 }
 0x342   : > { %v1321_v54 = vpop.permute.xlu1 %1320 }
 0x343   : > { %1385 = vst.msk [vmem:[%s2935_s20 + $0xf8] sm:$0xff] %vm373_vm0, %v1321_v54 }
 0x344   : > { %v1447_v11 = vpop.permute.xlu0 %1446 }
 0x345   : > { %1512 = vst.msk [vmem:[%s2951_s9 + $0xf0] sm:$0xff] %vm373_vm0, %v1447_v11 }
 0x346   : > { %v1417_v6 = vpop.permute.xlu1 %1416 }
 0x347   : > { %1497 = vst.msk [vmem:[%s2951_s9 + $0x78] sm:$0xff] %vm373_vm0, %v1417_v6 }
 0x34a   : > { %v1449_v40 = vpop.permute.xlu1 %1448 }
 0x34b   : > { %1513 = vst.msk [vmem:[%s2951_s9 + $0xf8] sm:$0xff] %vm373_vm0, %v1449_v40 }
 0x34c PF: > { %p19_p4 = scmp.ge.s32.totalorder %s2250_s8, 4   ;;  %s3110_s21 = smov %s2114_s22 }
 0x34d   : > { %s3111_s22 = smov %s2118_s23  ;;  %s3112_s23 = smov %s2260_s13 }
 0x34e   : > { %s3113_s24 = smov %s2250_s8  ;;  %21 = sbr.rel (!%p19_p4) target bundleno = 5 (0x5), region = 112 }
 0x353   :  { %1570 = vsyncpa [#allocation3], 1 }
 0x354   :  { %1572 = vsyncpa [#allocation3 + $0x1], 1 }
 0x355   :  { %1573 = vsyncpa [#allocation5], 1 }
 0x356   :  { %1574 = vsyncpa [#allocation8], 1 }

// kernel: neighborhood_attention_block_forward.5
= control target key start
LH: loop header
LB: loop body
LE: loop exit
PB: predicated region body
PF: predicated region fallthrough
CT: control target
= control target key end

     0   :  { %9 = vsyncpa [#allocation3], 0  ;;  %s1412_s0 = inlined_call_operand.vmem [shape: f32[512,32], index: 0, kind: input, shape index: {}]   ;;  %s1413_s1 = inlined_call_operand.vmem [shape: f32[512,32], index: 1, kind: input, shape index: {}]   ;;  %s1414_s2 = inlined_call_operand.vmem [shape: f32[32,32], index: 2, kind: input, shape index: {}]   ;;  %s1415_s3 = inlined_call_operand.vmem [shape: f32[1,32], index: 3, kind: input, shape index: {}]   ;;  %s1416_s4 = inlined_call_operand.hbm [shape: f32[512,32], index: 4, kind: output, shape index: {}]  }
   0x1   :  { %11 = vsyncpa [#allocation3 + $0x1], 0  ;;  %s1081_s15 = smov 0   ;;  %s1083_s16 = smov 0  }
   0x2   :  { %s1085_s17 = smov 0   ;;  %s1087_s18 = smov 0  }
   0x3 LB: > { %s1102_s19 = sadd.s32 4294967295, %s1051_s18   ;;  %s802_s20 = sadd.s32 4294967294, %s1051_s18   ;;  %s1051_s18 = sphi %s1087_s18, %s1422_s18   ;;  %s1047_s17 = sphi %s1085_s17, %s1421_s17   ;;  %s1043_s16 = sphi %s1083_s16, %s1420_s16   ;;  %s1039_s15 = sphi %s1081_s15, %s1419_s15  }
   0x4   : > { %s1106_s21 = sadd.s32 1, %s1051_s18   ;;  %s118_s22 = sadd.s32 1, %s1047_s17 }
   0x5   : > { %s115_s23 = ssub.s32 %s1051_s18, %s1106_s21  ;;  %p128_p0 = scmp.ne.s32.totalorder %s1047_s17, %s1043_s16 }
   0x6   : > { %p116_p1 = scmp.eq.s32.totalorder %s115_s23, 0  ;;  %p129_p2 = scmp.eq.s32.totalorder %s1102_s19, 1 }
   0x7   : > { %p134_p3 = scmp.ne.s32.totalorder %s1043_s16, %s1039_s15  ;;  %p135_p4 = scmp.eq.s32.totalorder %s802_s20, 1 }
   0x8   : > { %s1117_s24 = scalar_select %p116_p1, %s1047_s17, %s118_s22  }
   0x9   : > { %p1119_p5 = por %p129_p2, %p128_p0  ;;  %p1123_p6 = por %p135_p4, %p134_p3 }
   0xa   : > { %p805_p7 = scmp.ge.s32.totalorder %s1051_s18, 1  ;;  %p177_p8 = scmp.lt.s32.totalorder %s1051_s18, 3 }
   0xc   : > { %p178_p9 = pnand %p805_p7, %p177_p8 }
   0xd   : > { %s807_s5 = sshll.u32 (!%p178_p9), %s1102_s19, 5  ;;  %s205_s23 = sand.u32 (!%p178_p9), 1, %s1043_s16  }
   0xe   : > { %181 = sbr.rel (%p178_p9) target bundleno = 270 (0x10e), region = 36  ;;  %p209_p10 = scmp.lt.s32.totalorder (!%p178_p9), %s807_s5, 63 }
   0xf   : > { %s806_s27 = sshll.u32 (!%p178_p9), %s205_s23, 8  ;;  %s1372_s9 = scalar_lea.sflag (!%p178_p9), [#allocation3], %s205_s23 }
  0x10   : > { %s1241_s30 = scalar_lea.vmem (!%p178_p9), [#allocation2], %s806_s27  ;;  %s1053_s11 = smov (!%p178_p9), [#allocation2]  }
  0x11   : > { %s728_s6 = sshll.u32 (!%p178_p9), %s1241_s30, 4  ;;  %s995_s12 = sshll.u32 (!%p178_p9), %s1053_s11, 4  ;;  %s1358_s6 = int_to_ptr.vmem [resolvable:$true] %s728_s6  ;;  %s996_s12 = int_to_ptr.vmem [resolvable:$false] %s995_s12 }
  0x12   : > { %p998_p0 = scmp.lt.s32.totalorder (!%p178_p9), %s1358_s6, %s996_s12 }
  0x13   : > { %v256_v0 = vld [vmem:[%s1414_s2 + $0x18] sm:$0xff]  ;;  %v255_v1 = vld [vmem:[%s1414_s2 + $0x10] sm:$0xff]  ;;  %v254_v2 = vld [vmem:[%s1414_s2 + $0x8] sm:$0xff]  ;;  %s1424_s5 = smov (!%p209_p10, %s807_s5), 63  ;;  %vm257_vm0 = vcmask 261120  }
  0x14   : > { %886 = vmatprep.subr.mxu0 %v256_v0  ;;  %942 = vmatprep.subr.mxu1 %v256_v0  ;;  %v253_v3 = vld [vmem:[%s1414_s2] sm:$0xff]  ;;  %s808_s10 = sshll.u32 %s1424_s5, 3  ;;  %s849_s5 = sshll.u32 %s1102_s19, 12 }
  0x15   : > { %887 = vmatpush3.msra.mxu0 %v256_v0  ;;  %946 = vmatpush3.msra.mxu1 %v256_v0  ;;  %s1150_s13 = scalar_lea.vmem %s1412_s0, %s808_s10  ;;  %s1221_s22 = scalar_lea.vmem %s1413_s1, %s808_s10  ;;  %v1231_v39 = vld [vmem:[%s1415_s3] ss:$0 sm:$0xff] }
  0x16   : > { %888 = vmatprep.subr.mxu0 %v255_v1  ;;  %943 = vmatprep.subr.mxu1 %v255_v1  ;;  %v221_v4 = vld [vmem:[%s1150_s13] sm:$0xff]  ;;  %v222_v6 = vld [vmem:[%s1150_s13 + $0x8] sm:$0xff]  ;;  %v223_v8 = vld [vmem:[%s1150_s13 + $0x10] sm:$0xff]  ;;  %s1356_s19 = scalar_lea.hbm %s1416_s4, %s849_s5  ;;  %s991_s10 = scalar_lea.vmem %s1358_s6, 4096 }
  0x17   : > { %889 = vmatpush3.msra.mxu0 %v255_v1  ;;  %947 = vmatpush3.msra.mxu1 %v255_v1  ;;  %v237_v5 = vld [vmem:[%s1150_s13 + $0x80] sm:$0xff]  ;;  %v238_v7 = vld [vmem:[%s1150_s13 + $0x88] sm:$0xff]  ;;  %v239_v9 = vld [vmem:[%s1150_s13 + $0x90] sm:$0xff]  ;;  %p992_p11 = scmp.ne.s32.totalorder %s1358_s6, %s991_s10 }
  0x18   : > { %890 = vmatprep.subr.mxu0 %v254_v2  ;;  %944 = vmatprep.subr.mxu1 %v254_v2  ;;  %v224_v10 = vld [vmem:[%s1150_s13 + $0x18] sm:$0xff]  ;;  %v225_v12 = vld [vmem:[%s1150_s13 + $0x20] sm:$0xff]  ;;  %v226_v14 = vld [vmem:[%s1150_s13 + $0x28] sm:$0xff] }
  0x19   : > { %891 = vmatpush3.msra.mxu0 %v254_v2  ;;  %948 = vmatpush3.msra.mxu1 %v254_v2  ;;  %v240_v11 = vld [vmem:[%s1150_s13 + $0x98] sm:$0xff]  ;;  %v241_v13 = vld [vmem:[%s1150_s13 + $0xa0] sm:$0xff]  ;;  %v242_v15 = vld [vmem:[%s1150_s13 + $0xa8] sm:$0xff]  ;;  %p993_p12 = pnand %p992_p11, %p1119_p5 }
  0x1a   : > { %892 = vmatprep.subr.mxu0 %v253_v3  ;;  %945 = vmatprep.subr.mxu1 %v253_v3  ;;  %v227_v16 = vld [vmem:[%s1150_s13 + $0x30] sm:$0xff]  ;;  %v228_v18 = vld [vmem:[%s1150_s13 + $0x38] sm:$0xff]  ;;  %v229_v20 = vld [vmem:[%s1150_s13 + $0x40] sm:$0xff] }
  0x1b   : > { %893 = vmatpush3.msra.mxu0 %v253_v3  ;;  %949 = vmatpush3.msra.mxu1 %v253_v3  ;;  %v243_v17 = vld [vmem:[%s1150_s13 + $0xb0] sm:$0xff]  ;;  %v244_v19 = vld [vmem:[%s1150_s13 + $0xb8] sm:$0xff]  ;;  %v245_v21 = vld [vmem:[%s1150_s13 + $0xc0] sm:$0xff]  ;;  %p994_p13 = pneg %p993_p12 }
  0x1c   : > { %894 = vmatprep.mubr.msk.f32.mxu0 %vm257_vm0, %v221_v4  ;;  %918 = vmatprep.mubr.msk.f32.mxu1 %vm257_vm0, %v237_v5  ;;  %v230_v22 = vld [vmem:[%s1150_s13 + $0x48] sm:$0xff]  ;;  %v231_v24 = vld [vmem:[%s1150_s13 + $0x50] sm:$0xff]  ;;  %v232_v26 = vld [vmem:[%s1150_s13 + $0x58] sm:$0xff] }
  0x1d   : > { %895 = vmatmul.mubr.msk.f32.vlgmr.msra.gmra.mxu0 %vm257_vm0, %v222_v6  ;;  %919 = vmatmul.mubr.msk.f32.vlgmr.msra.gmra.mxu1 %vm257_vm0, %v238_v7  ;;  %v246_v23 = vld [vmem:[%s1150_s13 + $0xc8] sm:$0xff]  ;;  %v247_v25 = vld [vmem:[%s1150_s13 + $0xd0] sm:$0xff]  ;;  %v248_v27 = vld [vmem:[%s1150_s13 + $0xd8] sm:$0xff] }
  0x1e   : > { %897 = vmatprep.mubr.msk.f32.mxu0 %vm257_vm0, %v223_v8  ;;  %921 = vmatprep.mubr.msk.f32.mxu1 %vm257_vm0, %v239_v9  ;;  %v233_v28 = vld [vmem:[%s1150_s13 + $0x60] sm:$0xff]  ;;  %v234_v30 = vld [vmem:[%s1150_s13 + $0x68] sm:$0xff]  ;;  %v235_v32 = vld [vmem:[%s1150_s13 + $0x70] sm:$0xff] }
  0x1f   : > { %v249_v29 = vld [vmem:[%s1150_s13 + $0xe0] sm:$0xff]  ;;  %v250_v31 = vld [vmem:[%s1150_s13 + $0xe8] sm:$0xff]  ;;  %v251_v33 = vld [vmem:[%s1150_s13 + $0xf0] sm:$0xff] }
  0x20   : > { %v236_v34 = vld [vmem:[%s1150_s13 + $0x78] sm:$0xff]  ;;  %v580_v36 = vld [vmem:[%s1221_s22 + $0x8] sm:$0xff]  ;;  %v579_v41 = vld [vmem:[%s1221_s22] sm:$0xff] }
  0x21   : > { %898 = vmatmul.mubr.msk.f32.gmra.mxu0 %vm257_vm0, %v224_v10  ;;  %922 = vmatmul.mubr.msk.f32.gmra.mxu1 %vm257_vm0, %v240_v11  ;;  %v252_v35 = vld [vmem:[%s1150_s13 + $0xf8] sm:$0xff]  ;;  %v596_v37 = vld [vmem:[%s1221_s22 + $0x88] sm:$0xff]  ;;  %v595_v42 = vld [vmem:[%s1221_s22 + $0x80] sm:$0xff]  ;;  %s997_s13 = scalar_lea.vmem %s996_s12, 8192 }
  0x22   : > { %900 = vmatprep.mubr.msk.f32.mxu0 %vm257_vm0, %v225_v12  ;;  %924 = vmatprep.mubr.msk.f32.mxu1 %vm257_vm0, %v241_v13  ;;  %v582_v47 = vld [vmem:[%s1221_s22 + $0x18] sm:$0xff]  ;;  %v581_v55 = vld [vmem:[%s1221_s22 + $0x10] sm:$0xff]  ;;  %v584_v63 = vld [vmem:[%s1221_s22 + $0x28] sm:$0xff]  ;;  %p999_p1 = scmp.lt.s32.totalorder %s997_s13, %s991_s10 }
  0x23   : > { %v598_v48 = vld [vmem:[%s1221_s22 + $0x98] sm:$0xff]  ;;  %v597_v56 = vld [vmem:[%s1221_s22 + $0x90] sm:$0xff]  ;;  %v600_v0 = vld [vmem:[%s1221_s22 + $0xa8] sm:$0xff] }
  0x24   : > { %v583_v7 = vld [vmem:[%s1221_s22 + $0x20] sm:$0xff]  ;;  %p1000_p2 = por %p999_p1, %p998_p0 }
  0x25   : > { %901 = vmatmul.mubr.msk.f32.gmra.mxu0 %vm257_vm0, %v226_v14  ;;  %925 = vmatmul.mubr.msk.f32.gmra.mxu1 %vm257_vm0, %v242_v15  ;;  %v599_v8 = vld [vmem:[%s1221_s22 + $0xa0] sm:$0xff]  ;;  %v586_v15 = vld [vmem:[%s1221_s22 + $0x38] sm:$0xff] }
  0x26   : > { %903 = vmatprep.mubr.msk.f32.mxu0 %vm257_vm0, %v227_v16  ;;  %927 = vmatprep.mubr.msk.f32.mxu1 %vm257_vm0, %v243_v17  ;;  %v602_v16 = vld [vmem:[%s1221_s22 + $0xb8] sm:$0xff]  ;;  %p1001_p3 = pnand %p1000_p2, %p994_p13 }
  0x29   : > { %904 = vmatmul.mubr.msk.f32.gmra.mxu0 %vm257_vm0, %v228_v18  ;;  %928 = vmatmul.mubr.msk.f32.gmra.mxu1 %vm257_vm0, %v244_v19 }
  0x2a   : > { %906 = vmatprep.mubr.msk.f32.mxu0 %vm257_vm0, %v229_v20  ;;  %930 = vmatprep.mubr.msk.f32.mxu1 %vm257_vm0, %v245_v21 }
  0x2d   : > { %907 = vmatmul.mubr.msk.f32.gmra.mxu0 %vm257_vm0, %v230_v22  ;;  %931 = vmatmul.mubr.msk.f32.gmra.mxu1 %vm257_vm0, %v246_v23  ;;  %v585_v23 = vld [vmem:[%s1221_s22 + $0x30] sm:$0xff] }
  0x2e   : > { %909 = vmatprep.mubr.msk.f32.mxu0 %vm257_vm0, %v231_v24  ;;  %933 = vmatprep.mubr.msk.f32.mxu1 %vm257_vm0, %v247_v25  ;;  %v601_v24 = vld [vmem:[%s1221_s22 + $0xb0] sm:$0xff] }
  0x31   : > { %910 = vmatmul.mubr.msk.f32.gmra.mxu0 %vm257_vm0, %v232_v26  ;;  %934 = vmatmul.mubr.msk.f32.gmra.mxu1 %vm257_vm0, %v248_v27 }
  0x32   : > { %912 = vmatprep.mubr.msk.f32.mxu0 %vm257_vm0, %v233_v28  ;;  %936 = vmatprep.mubr.msk.f32.mxu1 %vm257_vm0, %v249_v29 }
  0x35   : > { %913 = vmatmul.mubr.msk.f32.gmra.mxu0 %vm257_vm0, %v234_v30  ;;  %937 = vmatmul.mubr.msk.f32.gmra.mxu1 %vm257_vm0, %v250_v31  ;;  %v588_v31 = vld [vmem:[%s1221_s22 + $0x48] sm:$0xff] }
  0x36   : > { %915 = vmatprep.mubr.msk.f32.mxu0 %vm257_vm0, %v235_v32  ;;  %939 = vmatprep.mubr.msk.f32.mxu1 %vm257_vm0, %v251_v33  ;;  %v604_v32 = vld [vmem:[%s1221_s22 + $0xc8] sm:$0xff] }
  0x39   : > { %916 = vmatmul.mubr.msk.f32.gmra.mxu0 %vm257_vm0, %v236_v34  ;;  %940 = vmatmul.mubr.msk.f32.gmra.mxu1 %vm257_vm0, %v252_v35 }
  0xdd   : > { %v896_v38 = vpop.f32.mrf.mxu0  ;;  %v920_v40 = vpop.f32.mrf.mxu1 }
  0xde   : > { %v612_v43 = vadd.f32 %v896_v38, %v580_v36  ;;  %v628_v44 = vadd.f32 %v920_v40, %v596_v37  ;;  %v587_v40 = vld [vmem:[%s1221_s22 + $0x40] sm:$0xff] }
  0xdf   : > { %v420_v45 = vpop.f32.mrf.mxu0  ;;  %v500_v46 = vpop.f32.mrf.mxu1 }
  0xe0   : > { %v651_v49 = vadd.f32 %v1231_v39, %v612_v43  ;;  %v667_v50 = vadd.f32 %v1231_v39, %v628_v44  ;;  %v611_v51 = vadd.f32 %v579_v41, %v420_v45  ;;  %v627_v52 = vadd.f32 %v595_v42, %v500_v46  ;;  %v603_v41 = vld [vmem:[%s1221_s22 + $0xc0] sm:$0xff] }
  0xe1   : > { %v899_v53 = vpop.f32.mrf.mxu0  ;;  %v923_v54 = vpop.f32.mrf.mxu1 }
  0xe2   : > { %683 = vst.msk [vmem:[%s1241_s30 + $0x8] sm:$0xff] %vm257_vm0, %v651_v49  ;;  %699 = vst.msk [vmem:[%s1241_s30 + $0x88] sm:$0xff] %vm257_vm0, %v667_v50  ;;  %v650_v57 = vadd.f32 %v1231_v39, %v611_v51  ;;  %v666_v58 = vadd.f32 %v1231_v39, %v627_v52  ;;  %v614_v59 = vadd.f32 %v899_v53, %v582_v47  ;;  %v606_v49 = vld [vmem:[%s1221_s22 + $0xd8] sm:$0xff] }
  0xe3   : > { %v630_v60 = vadd.f32 %v923_v54, %v598_v48  ;;  %v430_v61 = vpop.f32.mrf.mxu0  ;;  %v510_v62 = vpop.f32.mrf.mxu1  ;;  %v590_v48 = vld [vmem:[%s1221_s22 + $0x58] sm:$0xff] }
  0xe4   : > { %682 = vst.msk [vmem:[%s1241_s30] sm:$0xff] %vm257_vm0, %v650_v57  ;;  %698 = vst.msk [vmem:[%s1241_s30 + $0x80] sm:$0xff] %vm257_vm0, %v666_v58  ;;  %v653_v1 = vadd.f32 %v1231_v39, %v614_v59  ;;  %v613_v3 = vadd.f32 %v581_v55, %v430_v61  ;;  %v629_v4 = vadd.f32 %v597_v56, %v510_v62  ;;  %v589_v56 = vld [vmem:[%s1221_s22 + $0x50] sm:$0xff] }
  0xe5   : > { %v669_v2 = vadd.f32 %v1231_v39, %v630_v60  ;;  %v902_v5 = vpop.f32.mrf.mxu0  ;;  %v926_v6 = vpop.f32.mrf.mxu1  ;;  %v605_v57 = vld [vmem:[%s1221_s22 + $0xd0] sm:$0xff] }
  0xe6   : > { %685 = vst.msk [vmem:[%s1241_s30 + $0x18] sm:$0xff] %vm257_vm0, %v653_v1  ;;  %v652_v9 = vadd.f32 %v1231_v39, %v613_v3  ;;  %v668_v10 = vadd.f32 %v1231_v39, %v629_v4  ;;  %v616_v11 = vadd.f32 %v902_v5, %v584_v63  ;;  %v632_v12 = vadd.f32 %v926_v6, %v600_v0  ;;  %v592_v0 = vld [vmem:[%s1221_s22 + $0x68] sm:$0xff] }
  0xe7   : > { %701 = vst.msk [vmem:[%s1241_s30 + $0x98] sm:$0xff] %vm257_vm0, %v669_v2  ;;  %v440_v13 = vpop.f32.mrf.mxu0  ;;  %v520_v14 = vpop.f32.mrf.mxu1  ;;  %v608_v1 = vld [vmem:[%s1221_s22 + $0xe8] sm:$0xff] }
  0xe8   : > { %684 = vst.msk [vmem:[%s1241_s30 + $0x10] sm:$0xff] %vm257_vm0, %v652_v9  ;;  %700 = vst.msk [vmem:[%s1241_s30 + $0x90] sm:$0xff] %vm257_vm0, %v668_v10  ;;  %v655_v17 = vadd.f32 %v1231_v39, %v616_v11  ;;  %v671_v18 = vadd.f32 %v1231_v39, %v632_v12  ;;  %v615_v19 = vadd.f32 %v583_v7, %v440_v13  ;;  %v607_v9 = vld [vmem:[%s1221_s22 + $0xe0] sm:$0xff] }
  0xe9   : > { %v631_v20 = vadd.f32 %v599_v8, %v520_v14  ;;  %v905_v21 = vpop.f32.mrf.mxu0  ;;  %v929_v22 = vpop.f32.mrf.mxu1  ;;  %v591_v8 = vld [vmem:[%s1221_s22 + $0x60] sm:$0xff] }
  0xea   : > { %687 = vst.msk [vmem:[%s1241_s30 + $0x28] sm:$0xff] %vm257_vm0, %v655_v17  ;;  %703 = vst.msk [vmem:[%s1241_s30 + $0xa8] sm:$0xff] %vm257_vm0, %v671_v18  ;;  %v654_v25 = vadd.f32 %v1231_v39, %v615_v19  ;;  %v618_v27 = vadd.f32 %v905_v21, %v586_v15  ;;  %v634_v28 = vadd.f32 %v929_v22, %v602_v16  ;;  %v594_v16 = vld [vmem:[%s1221_s22 + $0x78] sm:$0xff] }
  0xeb   : > { %v670_v26 = vadd.f32 %v1231_v39, %v631_v20  ;;  %v450_v29 = vpop.f32.mrf.mxu0  ;;  %v530_v30 = vpop.f32.mrf.mxu1  ;;  %v610_v17 = vld [vmem:[%s1221_s22 + $0xf8] sm:$0xff] }
  0xec   : > { %686 = vst.msk [vmem:[%s1241_s30 + $0x20] sm:$0xff] %vm257_vm0, %v654_v25  ;;  %v657_v33 = vadd.f32 %v1231_v39, %v618_v27  ;;  %v673_v34 = vadd.f32 %v1231_v39, %v634_v28  ;;  %v617_v35 = vadd.f32 %v585_v23, %v450_v29  ;;  %v633_v36 = vadd.f32 %v601_v24, %v530_v30  ;;  %v593_v24 = vld [vmem:[%s1221_s22 + $0x70] sm:$0xff] }
  0xed   : > { %702 = vst.msk [vmem:[%s1241_s30 + $0xa0] sm:$0xff] %vm257_vm0, %v670_v26  ;;  %v908_v37 = vpop.f32.mrf.mxu0  ;;  %v932_v38 = vpop.f32.mrf.mxu1  ;;  %v609_v25 = vld [vmem:[%s1221_s22 + $0xf0] sm:$0xff] }
  0xee   : > { %689 = vst.msk [vmem:[%s1241_s30 + $0x38] sm:$0xff] %vm257_vm0, %v657_v33  ;;  %705 = vst.msk [vmem:[%s1241_s30 + $0xb8] sm:$0xff] %vm257_vm0, %v673_v34  ;;  %v656_v42 = vadd.f32 %v1231_v39, %v617_v35  ;;  %v672_v43 = vadd.f32 %v1231_v39, %v633_v36  ;;  %v620_v44 = vadd.f32 %v908_v37, %v588_v31 }
  0xef   : > { %v636_v45 = vadd.f32 %v932_v38, %v604_v32  ;;  %v460_v46 = vpop.f32.mrf.mxu0  ;;  %v540_v47 = vpop.f32.mrf.mxu1 }
  0xf0   : > { %688 = vst.msk [vmem:[%s1241_s30 + $0x30] sm:$0xff] %vm257_vm0, %v656_v42  ;;  %704 = vst.msk [vmem:[%s1241_s30 + $0xb0] sm:$0xff] %vm257_vm0, %v672_v43  ;;  %v659_v50 = vadd.f32 %v1231_v39, %v620_v44  ;;  %v619_v52 = vadd.f32 %v587_v40, %v460_v46  ;;  %v635_v53 = vadd.f32 %v603_v41, %v540_v47 }
  0xf1   : > { %v675_v51 = vadd.f32 %v1231_v39, %v636_v45  ;;  %v911_v54 = vpop.f32.mrf.mxu0  ;;  %v935_v55 = vpop.f32.mrf.mxu1 }
  0xf2   : > { %691 = vst.msk [vmem:[%s1241_s30 + $0x48] sm:$0xff] %vm257_vm0, %v659_v50  ;;  %v658_v58 = vadd.f32 %v1231_v39, %v619_v52  ;;  %v674_v59 = vadd.f32 %v1231_v39, %v635_v53  ;;  %v622_v60 = vadd.f32 %v911_v54, %v590_v48  ;;  %v638_v61 = vadd.f32 %v935_v55, %v606_v49 }
  0xf3   : > { %707 = vst.msk [vmem:[%s1241_s30 + $0xc8] sm:$0xff] %vm257_vm0, %v675_v51  ;;  %v470_v62 = vpop.f32.mrf.mxu0  ;;  %v550_v63 = vpop.f32.mrf.mxu1 }
  0xf4   : > { %690 = vst.msk [vmem:[%s1241_s30 + $0x40] sm:$0xff] %vm257_vm0, %v658_v58  ;;  %706 = vst.msk [vmem:[%s1241_s30 + $0xc0] sm:$0xff] %vm257_vm0, %v674_v59  ;;  %v661_v2 = vadd.f32 %v1231_v39, %v622_v60  ;;  %v677_v3 = vadd.f32 %v1231_v39, %v638_v61  ;;  %v621_v4 = vadd.f32 %v589_v56, %v470_v62 }
  0xf5   : > { %v637_v5 = vadd.f32 %v605_v57, %v550_v63  ;;  %v914_v6 = vpop.f32.mrf.mxu0  ;;  %v938_v7 = vpop.f32.mrf.mxu1 }
  0xf6   : > { %693 = vst.msk [vmem:[%s1241_s30 + $0x58] sm:$0xff] %vm257_vm0, %v661_v2  ;;  %709 = vst.msk [vmem:[%s1241_s30 + $0xd8] sm:$0xff] %vm257_vm0, %v677_v3  ;;  %v660_v10 = vadd.f32 %v1231_v39, %v621_v4  ;;  %v624_v12 = vadd.f32 %v914_v6, %v592_v0  ;;  %v640_v13 = vadd.f32 %v938_v7, %v608_v1 }
  0xf7   : > { %v676_v11 = vadd.f32 %v1231_v39, %v637_v5  ;;  %v480_v14 = vpop.f32.mrf.mxu0  ;;  %v560_v15 = vpop.f32.mrf.mxu1 }
  0xf8   : > { %692 = vst.msk [vmem:[%s1241_s30 + $0x50] sm:$0xff] %vm257_vm0, %v660_v10  ;;  %v663_v18 = vadd.f32 %v1231_v39, %v624_v12  ;;  %v679_v19 = vadd.f32 %v1231_v39, %v640_v13  ;;  %v623_v20 = vadd.f32 %v591_v8, %v480_v14  ;;  %v639_v21 = vadd.f32 %v607_v9, %v560_v15 }
  0xf9   : > { %708 = vst.msk [vmem:[%s1241_s30 + $0xd0] sm:$0xff] %vm257_vm0, %v676_v11  ;;  %v917_v22 = vpop.f32.mrf.mxu0  ;;  %v941_v23 = vpop.f32.mrf.mxu1 }
  0xfa   : > { %695 = vst.msk [vmem:[%s1241_s30 + $0x68] sm:$0xff] %vm257_vm0, %v663_v18  ;;  %711 = vst.msk [vmem:[%s1241_s30 + $0xe8] sm:$0xff] %vm257_vm0, %v679_v19  ;;  %v662_v26 = vadd.f32 %v1231_v39, %v623_v20  ;;  %v678_v27 = vadd.f32 %v1231_v39, %v639_v21  ;;  %v626_v28 = vadd.f32 %v917_v22, %v594_v16 }
  0xfb   : > { %v642_v29 = vadd.f32 %v941_v23, %v610_v17  ;;  %v490_v30 = vpop.f32.mrf.mxu0  ;;  %v570_v31 = vpop.f32.mrf.mxu1 }
  0xfc   : > { %694 = vst.msk [vmem:[%s1241_s30 + $0x60] sm:$0xff] %vm257_vm0, %v662_v26  ;;  %710 = vst.msk [vmem:[%s1241_s30 + $0xe0] sm:$0xff] %vm257_vm0, %v678_v27  ;;  %v665_v32 = vadd.f32 %v1231_v39, %v626_v28  ;;  %v625_v34 = vadd.f32 %v593_v24, %v490_v30  ;;  %v641_v35 = vadd.f32 %v609_v25, %v570_v31 }
  0xfd   : > { %v681_v33 = vadd.f32 %v1231_v39, %v642_v29 }
  0xfe   : > { %697 = vst.msk [vmem:[%s1241_s30 + $0x78] sm:$0xff] %vm257_vm0, %v665_v32  ;;  %v664_v36 = vadd.f32 %v1231_v39, %v625_v34  ;;  %v680_v37 = vadd.f32 %v1231_v39, %v641_v35 }
  0xff   : > { %713 = vst.msk [vmem:[%s1241_s30 + $0xf8] sm:$0xff] %vm257_vm0, %v681_v33 }
 0x100   : > { %696 = vst.msk [vmem:[%s1241_s30 + $0x70] sm:$0xff] %vm257_vm0, %v664_v36  ;;  %712 = vst.msk [vmem:[%s1241_s30 + $0xf0] sm:$0xff] %vm257_vm0, %v680_v37 }
 0x101   : > { %1004 = shalt.err (!%p1001_p3)
}
 0x102   : > { %s1005_s14 = scalar_lea.hbm %s1356_s19, 4096  ;;  %s1009_s23 = scalar_lea.hbm %s1416_s4, 8192 }
 0x103   : > { %p1006_p4 = scmp.ne.s32.totalorder %s1356_s19, %s1005_s14  ;;  %p1010_p9 = scmp.lt.s32.totalorder %s1356_s19, %s1416_s4 }
 0x104   : > { %p1011_p10 = scmp.lt.s32.totalorder %s1009_s23, %s1005_s14 }
 0x105   : > { %p1007_p7 = pnand %p1006_p4, %p1119_p5 }
 0x106   : > { %p1012_p11 = por %p1011_p10, %p1010_p9 }
 0x107   : > { %p1008_p8 = pneg %p1007_p7 }
 0x109   : > { %p1013_p12 = pnand %p1012_p11, %p1008_p8 }
 0x10b   : > { %1016 = shalt.err (!%p1013_p12)
}
 0x10c   : > { %s1054_s29 = smov 128   ;;  %s1055_s30 = smov 8  }
 0x10d   : > { %950 = dma.vmem_to_hbm [thread:$0]  (%p1119_p5), %s1358_s6, 4096, %s1356_s19, %s1372_s9, %s1054_s29, %s1054_s29, %s1055_s30  }
 0x10e PF: > { %p956_p13 = scmp.ge.s32.totalorder %s1051_s18, 2  ;;  %s743_s5 = sand.u32 1, %s1039_s15  }
 0x10f   : > { %s744_s7 = scalar_lea.sflag [#allocation3], %s743_s5 }
 0x110   : > { %p953_p0 = pnand %p956_p13, %p1123_p6 }
 0x112   : > { %p954_p1 = pneg %p953_p0 }
 0x114   : > { %1034 = dma.done.wait (%p954_p1), %s744_s7, 4096  }
 0x115   : > { %1036 = vsyncadd (%p954_p1), %s744_s7, 4294963200  ;;  %p14_p2 = scmp.ge.s32.totalorder %s1106_s21, 4   ;;  %s1419_s15 = smov %s1043_s16 }
 0x116   : > { %s1420_s16 = smov %s1047_s17  ;;  %s1421_s17 = smov %s1117_s24 }
 0x117   : > { %s1422_s18 = smov %s1106_s21  ;;  %16 = sbr.rel (!%p14_p2) target bundleno = 3 (0x3), region = 74 }
 0x11c   :  { %749 = vsyncpa [#allocation3], 1 }
 0x11d   :  { %751 = vsyncpa [#allocation3 + $0x1], 1 }

// kernel: neighborhood_attention_block_forward.4
= control target key start
LH: loop header
LB: loop body
LE: loop exit
PB: predicated region body
PF: predicated region fallthrough
CT: control target
= control target key end

     0   :  { %s5870_s15 = smov 0   ;;  %s5872_s16 = smov 0   ;;  %s9311_s0 = inlined_call_operand.vmem [shape: f32[2,256,32], index: 0, kind: input, shape index: {}]   ;;  %s9312_s1 = inlined_call_operand.vmem [shape: f32[2,256,32], index: 1, kind: input, shape index: {}]   ;;  %s9313_s2 = inlined_call_operand.vmem [shape: f32[2,256,32], index: 2, kind: input, shape index: {}]   ;;  %s9314_s3 = inlined_call_operand.vmem [shape: f32[4,256,256], index: 3, kind: input, shape index: {}]   ;;  %s9315_s4 = inlined_call_operand.vmem [shape: f32[2,256,32], index: 4, kind: output, shape index: {}]  }
   0x1   :  { %s5874_s17 = smov 0   ;;  %s5876_s18 = smov 0  }
   0x2   :  { %s5878_s19 = smov 0   ;;  %s5880_s20 = smov 0  }
   0x3   :  { %s5882_s21 = smov 0  }
   0x4 LB: > { %s23_s22 = sadd.s32 1, %s5829_s19  ;;  %s26_s23 = sadd.s32 1, %s5833_s20  ;;  %s5837_s21 = sphi %s5882_s21, %s14_s21   ;;  %s5833_s20 = sphi %s5880_s20, %s9862_s20   ;;  %s5829_s19 = sphi %s5878_s19, %s9861_s19   ;;  %s5825_s18 = sphi %s5876_s18, %s9860_s18   ;;  %s5821_s17 = sphi %s5874_s17, %s9859_s17   ;;  %s5817_s16 = sphi %s5872_s16, %s9858_s16   ;;  %s5813_s15 = sphi %s5870_s15, %s9857_s15  }
   0x5   : > { %p24_p0 = scmp.ge.s32.totalorder %s23_s22, 2  ;;  %s113_s24 = sadd.s32 1, %s5817_s16 }
   0x6   : > { %p120_p1 = scmp.ne.s32.totalorder %s5817_s16, %s5813_s15  ;;  %p121_p2 = scmp.eq.s32.totalorder %s5837_s21, 0 }
   0x7   : > { %s9864_s22 = smov (%p24_p0, %s23_s22), 0  ;;  %s9866_s23 = smov (!%p24_p0, %s26_s23), %s5833_s20 }
   0x8   : > { %s110_s25 = ssub.s32 %s5829_s19, %s9864_s22  ;;  %p122_p3 = por %p121_p2, %p120_p1 }
   0x9   : > { %p28_p4 = scmp.ge.s32.totalorder %s9866_s23, 2  ;;  %p111_p5 = scmp.eq.s32.totalorder %s110_s25, 0 }
   0xa   : > { %p4355_p6 = scmp.ge.s32.totalorder %s5837_s21, 4 }
   0xb   : > { %s9868_s23 = smov (%p28_p4, %s9866_s23), 0 }
   0xc   : > { %s5919_s26 = scalar_select %p111_p5, %s5817_s16, %s113_s24  }
   0xd   : > { %174 = sbr.rel (%p4355_p6) target bundleno = 86 (0x56), region = 16 }
  0x12   : > { %206 = sbr.rel (!%p122_p3) target bundleno = 86 (0x56), region = 32  ;;  %s208_s27 = sand.u32 (%p122_p3), 1, %s5817_s16  }
  0x13   : > { %s4663_s28 = sshll.u32 (%p122_p3), %s5829_s19, 8  ;;  %s4356_s29 = sshll.u32 (%p122_p3), %s208_s27, 10 }
  0x14   : > { %s5927_s6 = scalar_lea.vmem (%p122_p3), %s9314_s3, %s4663_s28  ;;  %s5932_s7 = scalar_lea.vmem (%p122_p3), [#allocation2], %s4356_s29 }
  0x15   : > { %v227_v0 = vld [vmem:[%s5927_s6] sm:$0xff] (%p122_p3)  ;;  %v229_v1 = vld [vmem:[%s5927_s6 + $0x8] sm:$0xff] (%p122_p3)  ;;  %v231_v2 = vld [vmem:[%s5927_s6 + $0x10] sm:$0xff] (%p122_p3) }
  0x16   : > { %228 = vst [vmem:[%s5932_s7] sm:$0xff] (%p122_p3), %v227_v0  ;;  %230 = vst [vmem:[%s5932_s7 + $0x8] sm:$0xff] (%p122_p3), %v229_v1  ;;  %v233_v3 = vld [vmem:[%s5927_s6 + $0x18] sm:$0xff] (%p122_p3)  ;;  %v235_v4 = vld [vmem:[%s5927_s6 + $0x20] sm:$0xff] (%p122_p3) }
  0x17   : > { %232 = vst [vmem:[%s5932_s7 + $0x10] sm:$0xff] %v231_v2  ;;  %v237_v5 = vld [vmem:[%s5927_s6 + $0x28] sm:$0xff]  ;;  %234 = vst [vmem:[%s5932_s7 + $0x18] sm:$0xff] %v233_v3  ;;  %v239_v6 = vld [vmem:[%s5927_s6 + $0x30] sm:$0xff] }
  0x18   : > { %236 = vst [vmem:[%s5932_s7 + $0x20] sm:$0xff] %v235_v4  ;;  %238 = vst [vmem:[%s5932_s7 + $0x28] sm:$0xff] %v237_v5  ;;  %v241_v7 = vld [vmem:[%s5927_s6 + $0x38] sm:$0xff]  ;;  %v243_v8 = vld [vmem:[%s5927_s6 + $0x40] sm:$0xff] }
  0x19   : > { %240 = vst [vmem:[%s5932_s7 + $0x30] sm:$0xff] %v239_v6  ;;  %242 = vst [vmem:[%s5932_s7 + $0x38] sm:$0xff] %v241_v7  ;;  %v245_v9 = vld [vmem:[%s5927_s6 + $0x48] sm:$0xff]  ;;  %v247_v10 = vld [vmem:[%s5927_s6 + $0x50] sm:$0xff] }
  0x1a   : > { %244 = vst [vmem:[%s5932_s7 + $0x40] sm:$0xff] %v243_v8  ;;  %v249_v11 = vld [vmem:[%s5927_s6 + $0x58] sm:$0xff]  ;;  %246 = vst [vmem:[%s5932_s7 + $0x48] sm:$0xff] %v245_v9  ;;  %v251_v12 = vld [vmem:[%s5927_s6 + $0x60] sm:$0xff] }
  0x1b   : > { %248 = vst [vmem:[%s5932_s7 + $0x50] sm:$0xff] %v247_v10  ;;  %250 = vst [vmem:[%s5932_s7 + $0x58] sm:$0xff] %v249_v11  ;;  %v253_v13 = vld [vmem:[%s5927_s6 + $0x68] sm:$0xff]  ;;  %v255_v14 = vld [vmem:[%s5927_s6 + $0x70] sm:$0xff] }
  0x1c   : > { %252 = vst [vmem:[%s5932_s7 + $0x60] sm:$0xff] %v251_v12  ;;  %254 = vst [vmem:[%s5932_s7 + $0x68] sm:$0xff] %v253_v13  ;;  %v257_v15 = vld [vmem:[%s5927_s6 + $0x78] sm:$0xff]  ;;  %v259_v16 = vld [vmem:[%s5927_s6 + $0x80] sm:$0xff] }
  0x1d   : > { %256 = vst [vmem:[%s5932_s7 + $0x70] sm:$0xff] %v255_v14  ;;  %v261_v17 = vld [vmem:[%s5927_s6 + $0x88] sm:$0xff]  ;;  %258 = vst [vmem:[%s5932_s7 + $0x78] sm:$0xff] %v257_v15  ;;  %v263_v18 = vld [vmem:[%s5927_s6 + $0x90] sm:$0xff] }
  0x1e   : > { %260 = vst [vmem:[%s5932_s7 + $0x80] sm:$0xff] %v259_v16  ;;  %262 = vst [vmem:[%s5932_s7 + $0x88] sm:$0xff] %v261_v17  ;;  %v265_v19 = vld [vmem:[%s5927_s6 + $0x98] sm:$0xff]  ;;  %v267_v20 = vld [vmem:[%s5927_s6 + $0xa0] sm:$0xff] }
  0x1f   : > { %264 = vst [vmem:[%s5932_s7 + $0x90] sm:$0xff] %v263_v18  ;;  %266 = vst [vmem:[%s5932_s7 + $0x98] sm:$0xff] %v265_v19  ;;  %v269_v21 = vld [vmem:[%s5927_s6 + $0xa8] sm:$0xff]  ;;  %v271_v22 = vld [vmem:[%s5927_s6 + $0xb0] sm:$0xff] }
  0x20   : > { %268 = vst [vmem:[%s5932_s7 + $0xa0] sm:$0xff] %v267_v20  ;;  %v273_v23 = vld [vmem:[%s5927_s6 + $0xb8] sm:$0xff]  ;;  %270 = vst [vmem:[%s5932_s7 + $0xa8] sm:$0xff] %v269_v21  ;;  %v275_v24 = vld [vmem:[%s5927_s6 + $0xc0] sm:$0xff] }
  0x21   : > { %272 = vst [vmem:[%s5932_s7 + $0xb0] sm:$0xff] %v271_v22  ;;  %274 = vst [vmem:[%s5932_s7 + $0xb8] sm:$0xff] %v273_v23  ;;  %v277_v25 = vld [vmem:[%s5927_s6 + $0xc8] sm:$0xff]  ;;  %v279_v26 = vld [vmem:[%s5927_s6 + $0xd0] sm:$0xff] }
  0x22   : > { %276 = vst [vmem:[%s5932_s7 + $0xc0] sm:$0xff] %v275_v24  ;;  %278 = vst [vmem:[%s5932_s7 + $0xc8] sm:$0xff] %v277_v25  ;;  %v281_v27 = vld [vmem:[%s5927_s6 + $0xd8] sm:$0xff]  ;;  %v283_v28 = vld [vmem:[%s5927_s6 + $0xe0] sm:$0xff] }
  0x23   : > { %280 = vst [vmem:[%s5932_s7 + $0xd0] sm:$0xff] %v279_v26  ;;  %v285_v29 = vld [vmem:[%s5927_s6 + $0xe8] sm:$0xff]  ;;  %282 = vst [vmem:[%s5932_s7 + $0xd8] sm:$0xff] %v281_v27  ;;  %v287_v30 = vld [vmem:[%s5927_s6 + $0xf0] sm:$0xff] }
  0x24   : > { %284 = vst [vmem:[%s5932_s7 + $0xe0] sm:$0xff] %v283_v28  ;;  %286 = vst [vmem:[%s5932_s7 + $0xe8] sm:$0xff] %v285_v29  ;;  %v289_v31 = vld [vmem:[%s5927_s6 + $0xf8] sm:$0xff]  ;;  %v291_v32 = vld [vmem:[%s5927_s6 + $0x200] sm:$0xff] }
  0x25   : > { %288 = vst [vmem:[%s5932_s7 + $0xf0] sm:$0xff] %v287_v30  ;;  %290 = vst [vmem:[%s5932_s7 + $0xf8] sm:$0xff] %v289_v31  ;;  %v293_v33 = vld [vmem:[%s5927_s6 + $0x208] sm:$0xff]  ;;  %v295_v34 = vld [vmem:[%s5927_s6 + $0x210] sm:$0xff] }
  0x26   : > { %292 = vst [vmem:[%s5932_s7 + $0x100] sm:$0xff] %v291_v32  ;;  %v297_v35 = vld [vmem:[%s5927_s6 + $0x218] sm:$0xff]  ;;  %294 = vst [vmem:[%s5932_s7 + $0x108] sm:$0xff] %v293_v33  ;;  %v299_v36 = vld [vmem:[%s5927_s6 + $0x220] sm:$0xff] }
  0x27   : > { %296 = vst [vmem:[%s5932_s7 + $0x110] sm:$0xff] %v295_v34  ;;  %298 = vst [vmem:[%s5932_s7 + $0x118] sm:$0xff] %v297_v35  ;;  %v301_v37 = vld [vmem:[%s5927_s6 + $0x228] sm:$0xff]  ;;  %v303_v38 = vld [vmem:[%s5927_s6 + $0x230] sm:$0xff] }
  0x28   : > { %300 = vst [vmem:[%s5932_s7 + $0x120] sm:$0xff] %v299_v36  ;;  %302 = vst [vmem:[%s5932_s7 + $0x128] sm:$0xff] %v301_v37  ;;  %v305_v39 = vld [vmem:[%s5927_s6 + $0x238] sm:$0xff]  ;;  %v307_v40 = vld [vmem:[%s5927_s6 + $0x240] sm:$0xff] }
  0x29   : > { %304 = vst [vmem:[%s5932_s7 + $0x130] sm:$0xff] %v303_v38  ;;  %v309_v41 = vld [vmem:[%s5927_s6 + $0x248] sm:$0xff]  ;;  %306 = vst [vmem:[%s5932_s7 + $0x138] sm:$0xff] %v305_v39  ;;  %v311_v42 = vld [vmem:[%s5927_s6 + $0x250] sm:$0xff] }
  0x2a   : > { %308 = vst [vmem:[%s5932_s7 + $0x140] sm:$0xff] %v307_v40  ;;  %310 = vst [vmem:[%s5932_s7 + $0x148] sm:$0xff] %v309_v41  ;;  %v313_v43 = vld [vmem:[%s5927_s6 + $0x258] sm:$0xff]  ;;  %v315_v44 = vld [vmem:[%s5927_s6 + $0x260] sm:$0xff] }
  0x2b   : > { %312 = vst [vmem:[%s5932_s7 + $0x150] sm:$0xff] %v311_v42  ;;  %314 = vst [vmem:[%s5932_s7 + $0x158] sm:$0xff] %v313_v43  ;;  %v317_v45 = vld [vmem:[%s5927_s6 + $0x268] sm:$0xff]  ;;  %v319_v46 = vld [vmem:[%s5927_s6 + $0x270] sm:$0xff] }
  0x2c   : > { %316 = vst [vmem:[%s5932_s7 + $0x160] sm:$0xff] %v315_v44  ;;  %v321_v47 = vld [vmem:[%s5927_s6 + $0x278] sm:$0xff]  ;;  %318 = vst [vmem:[%s5932_s7 + $0x168] sm:$0xff] %v317_v45  ;;  %v323_v48 = vld [vmem:[%s5927_s6 + $0x280] sm:$0xff] }
  0x2d   : > { %320 = vst [vmem:[%s5932_s7 + $0x170] sm:$0xff] %v319_v46  ;;  %322 = vst [vmem:[%s5932_s7 + $0x178] sm:$0xff] %v321_v47  ;;  %v325_v49 = vld [vmem:[%s5927_s6 + $0x288] sm:$0xff]  ;;  %v327_v50 = vld [vmem:[%s5927_s6 + $0x290] sm:$0xff] }
  0x2e   : > { %324 = vst [vmem:[%s5932_s7 + $0x180] sm:$0xff] %v323_v48  ;;  %326 = vst [vmem:[%s5932_s7 + $0x188] sm:$0xff] %v325_v49  ;;  %v329_v51 = vld [vmem:[%s5927_s6 + $0x298] sm:$0xff]  ;;  %v331_v52 = vld [vmem:[%s5927_s6 + $0x2a0] sm:$0xff] }
  0x2f   : > { %328 = vst [vmem:[%s5932_s7 + $0x190] sm:$0xff] %v327_v50  ;;  %v333_v53 = vld [vmem:[%s5927_s6 + $0x2a8] sm:$0xff]  ;;  %330 = vst [vmem:[%s5932_s7 + $0x198] sm:$0xff] %v329_v51  ;;  %v335_v54 = vld [vmem:[%s5927_s6 + $0x2b0] sm:$0xff] }
  0x30   : > { %332 = vst [vmem:[%s5932_s7 + $0x1a0] sm:$0xff] %v331_v52  ;;  %334 = vst [vmem:[%s5932_s7 + $0x1a8] sm:$0xff] %v333_v53  ;;  %v337_v55 = vld [vmem:[%s5927_s6 + $0x2b8] sm:$0xff]  ;;  %v339_v56 = vld [vmem:[%s5927_s6 + $0x2c0] sm:$0xff] }
  0x31   : > { %336 = vst [vmem:[%s5932_s7 + $0x1b0] sm:$0xff] %v335_v54  ;;  %338 = vst [vmem:[%s5932_s7 + $0x1b8] sm:$0xff] %v337_v55  ;;  %v341_v57 = vld [vmem:[%s5927_s6 + $0x2c8] sm:$0xff]  ;;  %v343_v58 = vld [vmem:[%s5927_s6 + $0x2d0] sm:$0xff] }
  0x32   : > { %340 = vst [vmem:[%s5932_s7 + $0x1c0] sm:$0xff] %v339_v56  ;;  %v345_v59 = vld [vmem:[%s5927_s6 + $0x2d8] sm:$0xff]  ;;  %342 = vst [vmem:[%s5932_s7 + $0x1c8] sm:$0xff] %v341_v57  ;;  %v347_v60 = vld [vmem:[%s5927_s6 + $0x2e0] sm:$0xff] }
  0x33   : > { %344 = vst [vmem:[%s5932_s7 + $0x1d0] sm:$0xff] %v343_v58  ;;  %346 = vst [vmem:[%s5932_s7 + $0x1d8] sm:$0xff] %v345_v59  ;;  %v349_v61 = vld [vmem:[%s5927_s6 + $0x2e8] sm:$0xff]  ;;  %v351_v62 = vld [vmem:[%s5927_s6 + $0x2f0] sm:$0xff] }
  0x34   : > { %348 = vst [vmem:[%s5932_s7 + $0x1e0] sm:$0xff] %v347_v60  ;;  %350 = vst [vmem:[%s5932_s7 + $0x1e8] sm:$0xff] %v349_v61  ;;  %v353_v63 = vld [vmem:[%s5927_s6 + $0x2f8] sm:$0xff]  ;;  %v355_v0 = vld [vmem:[%s5927_s6 + $0x400] sm:$0xff] }
  0x35   : > { %352 = vst [vmem:[%s5932_s7 + $0x1f0] sm:$0xff] %v351_v62  ;;  %v357_v1 = vld [vmem:[%s5927_s6 + $0x408] sm:$0xff]  ;;  %354 = vst [vmem:[%s5932_s7 + $0x1f8] sm:$0xff] %v353_v63  ;;  %v359_v2 = vld [vmem:[%s5927_s6 + $0x410] sm:$0xff] }
  0x36   : > { %356 = vst [vmem:[%s5932_s7 + $0x200] sm:$0xff] %v355_v0  ;;  %358 = vst [vmem:[%s5932_s7 + $0x208] sm:$0xff] %v357_v1  ;;  %v361_v3 = vld [vmem:[%s5927_s6 + $0x418] sm:$0xff]  ;;  %v363_v4 = vld [vmem:[%s5927_s6 + $0x420] sm:$0xff] }
  0x37   : > { %360 = vst [vmem:[%s5932_s7 + $0x210] sm:$0xff] %v359_v2  ;;  %362 = vst [vmem:[%s5932_s7 + $0x218] sm:$0xff] %v361_v3  ;;  %v365_v5 = vld [vmem:[%s5927_s6 + $0x428] sm:$0xff]  ;;  %v367_v6 = vld [vmem:[%s5927_s6 + $0x430] sm:$0xff] }
  0x38   : > { %364 = vst [vmem:[%s5932_s7 + $0x220] sm:$0xff] %v363_v4  ;;  %v369_v7 = vld [vmem:[%s5927_s6 + $0x438] sm:$0xff]  ;;  %366 = vst [vmem:[%s5932_s7 + $0x228] sm:$0xff] %v365_v5  ;;  %v371_v8 = vld [vmem:[%s5927_s6 + $0x440] sm:$0xff] }
  0x39   : > { %368 = vst [vmem:[%s5932_s7 + $0x230] sm:$0xff] %v367_v6  ;;  %370 = vst [vmem:[%s5932_s7 + $0x238] sm:$0xff] %v369_v7  ;;  %v373_v9 = vld [vmem:[%s5927_s6 + $0x448] sm:$0xff]  ;;  %v375_v10 = vld [vmem:[%s5927_s6 + $0x450] sm:$0xff] }
  0x3a   : > { %372 = vst [vmem:[%s5932_s7 + $0x240] sm:$0xff] %v371_v8  ;;  %374 = vst [vmem:[%s5932_s7 + $0x248] sm:$0xff] %v373_v9  ;;  %v377_v11 = vld [vmem:[%s5927_s6 + $0x458] sm:$0xff]  ;;  %v379_v12 = vld [vmem:[%s5927_s6 + $0x460] sm:$0xff] }
  0x3b   : > { %376 = vst [vmem:[%s5932_s7 + $0x250] sm:$0xff] %v375_v10  ;;  %v381_v13 = vld [vmem:[%s5927_s6 + $0x468] sm:$0xff]  ;;  %378 = vst [vmem:[%s5932_s7 + $0x258] sm:$0xff] %v377_v11  ;;  %v383_v14 = vld [vmem:[%s5927_s6 + $0x470] sm:$0xff] }
  0x3c   : > { %380 = vst [vmem:[%s5932_s7 + $0x260] sm:$0xff] %v379_v12  ;;  %382 = vst [vmem:[%s5932_s7 + $0x268] sm:$0xff] %v381_v13  ;;  %v385_v15 = vld [vmem:[%s5927_s6 + $0x478] sm:$0xff]  ;;  %v387_v16 = vld [vmem:[%s5927_s6 + $0x480] sm:$0xff] }
  0x3d   : > { %384 = vst [vmem:[%s5932_s7 + $0x270] sm:$0xff] %v383_v14  ;;  %386 = vst [vmem:[%s5932_s7 + $0x278] sm:$0xff] %v385_v15  ;;  %v389_v17 = vld [vmem:[%s5927_s6 + $0x488] sm:$0xff]  ;;  %v391_v18 = vld [vmem:[%s5927_s6 + $0x490] sm:$0xff] }
  0x3e   : > { %388 = vst [vmem:[%s5932_s7 + $0x280] sm:$0xff] %v387_v16  ;;  %v393_v19 = vld [vmem:[%s5927_s6 + $0x498] sm:$0xff]  ;;  %390 = vst [vmem:[%s5932_s7 + $0x288] sm:$0xff] %v389_v17  ;;  %v395_v20 = vld [vmem:[%s5927_s6 + $0x4a0] sm:$0xff] }
  0x3f   : > { %392 = vst [vmem:[%s5932_s7 + $0x290] sm:$0xff] %v391_v18  ;;  %394 = vst [vmem:[%s5932_s7 + $0x298] sm:$0xff] %v393_v19  ;;  %v397_v21 = vld [vmem:[%s5927_s6 + $0x4a8] sm:$0xff]  ;;  %v399_v22 = vld [vmem:[%s5927_s6 + $0x4b0] sm:$0xff] }
  0x40   : > { %396 = vst [vmem:[%s5932_s7 + $0x2a0] sm:$0xff] %v395_v20  ;;  %398 = vst [vmem:[%s5932_s7 + $0x2a8] sm:$0xff] %v397_v21  ;;  %v401_v23 = vld [vmem:[%s5927_s6 + $0x4b8] sm:$0xff]  ;;  %v403_v24 = vld [vmem:[%s5927_s6 + $0x4c0] sm:$0xff] }
  0x41   : > { %400 = vst [vmem:[%s5932_s7 + $0x2b0] sm:$0xff] %v399_v22  ;;  %v405_v25 = vld [vmem:[%s5927_s6 + $0x4c8] sm:$0xff]  ;;  %402 = vst [vmem:[%s5932_s7 + $0x2b8] sm:$0xff] %v401_v23  ;;  %v407_v26 = vld [vmem:[%s5927_s6 + $0x4d0] sm:$0xff] }
  0x42   : > { %404 = vst [vmem:[%s5932_s7 + $0x2c0] sm:$0xff] %v403_v24  ;;  %406 = vst [vmem:[%s5932_s7 + $0x2c8] sm:$0xff] %v405_v25  ;;  %v409_v27 = vld [vmem:[%s5927_s6 + $0x4d8] sm:$0xff]  ;;  %v411_v28 = vld [vmem:[%s5927_s6 + $0x4e0] sm:$0xff] }
  0x43   : > { %408 = vst [vmem:[%s5932_s7 + $0x2d0] sm:$0xff] %v407_v26  ;;  %410 = vst [vmem:[%s5932_s7 + $0x2d8] sm:$0xff] %v409_v27  ;;  %v413_v29 = vld [vmem:[%s5927_s6 + $0x4e8] sm:$0xff]  ;;  %v415_v30 = vld [vmem:[%s5927_s6 + $0x4f0] sm:$0xff] }
  0x44   : > { %412 = vst [vmem:[%s5932_s7 + $0x2e0] sm:$0xff] %v411_v28  ;;  %v417_v31 = vld [vmem:[%s5927_s6 + $0x4f8] sm:$0xff]  ;;  %414 = vst [vmem:[%s5932_s7 + $0x2e8] sm:$0xff] %v413_v29  ;;  %v419_v32 = vld [vmem:[%s5927_s6 + $0x600] sm:$0xff] }
  0x45   : > { %416 = vst [vmem:[%s5932_s7 + $0x2f0] sm:$0xff] %v415_v30  ;;  %418 = vst [vmem:[%s5932_s7 + $0x2f8] sm:$0xff] %v417_v31  ;;  %v421_v33 = vld [vmem:[%s5927_s6 + $0x608] sm:$0xff]  ;;  %v423_v34 = vld [vmem:[%s5927_s6 + $0x610] sm:$0xff] }
  0x46   : > { %420 = vst [vmem:[%s5932_s7 + $0x300] sm:$0xff] %v419_v32  ;;  %422 = vst [vmem:[%s5932_s7 + $0x308] sm:$0xff] %v421_v33  ;;  %v425_v35 = vld [vmem:[%s5927_s6 + $0x618] sm:$0xff]  ;;  %v427_v36 = vld [vmem:[%s5927_s6 + $0x620] sm:$0xff] }
  0x47   : > { %424 = vst [vmem:[%s5932_s7 + $0x310] sm:$0xff] %v423_v34  ;;  %v429_v37 = vld [vmem:[%s5927_s6 + $0x628] sm:$0xff]  ;;  %426 = vst [vmem:[%s5932_s7 + $0x318] sm:$0xff] %v425_v35  ;;  %v431_v38 = vld [vmem:[%s5927_s6 + $0x630] sm:$0xff] }
  0x48   : > { %428 = vst [vmem:[%s5932_s7 + $0x320] sm:$0xff] %v427_v36  ;;  %430 = vst [vmem:[%s5932_s7 + $0x328] sm:$0xff] %v429_v37  ;;  %v433_v39 = vld [vmem:[%s5927_s6 + $0x638] sm:$0xff]  ;;  %v435_v40 = vld [vmem:[%s5927_s6 + $0x640] sm:$0xff] }
  0x49   : > { %432 = vst [vmem:[%s5932_s7 + $0x330] sm:$0xff] %v431_v38  ;;  %434 = vst [vmem:[%s5932_s7 + $0x338] sm:$0xff] %v433_v39  ;;  %v437_v41 = vld [vmem:[%s5927_s6 + $0x648] sm:$0xff]  ;;  %v439_v42 = vld [vmem:[%s5927_s6 + $0x650] sm:$0xff] }
  0x4a   : > { %436 = vst [vmem:[%s5932_s7 + $0x340] sm:$0xff] %v435_v40  ;;  %v441_v43 = vld [vmem:[%s5927_s6 + $0x658] sm:$0xff]  ;;  %438 = vst [vmem:[%s5932_s7 + $0x348] sm:$0xff] %v437_v41  ;;  %v443_v44 = vld [vmem:[%s5927_s6 + $0x660] sm:$0xff] }
  0x4b   : > { %440 = vst [vmem:[%s5932_s7 + $0x350] sm:$0xff] %v439_v42  ;;  %442 = vst [vmem:[%s5932_s7 + $0x358] sm:$0xff] %v441_v43  ;;  %v445_v45 = vld [vmem:[%s5927_s6 + $0x668] sm:$0xff]  ;;  %v447_v46 = vld [vmem:[%s5927_s6 + $0x670] sm:$0xff] }
  0x4c   : > { %444 = vst [vmem:[%s5932_s7 + $0x360] sm:$0xff] %v443_v44  ;;  %446 = vst [vmem:[%s5932_s7 + $0x368] sm:$0xff] %v445_v45  ;;  %v449_v47 = vld [vmem:[%s5927_s6 + $0x678] sm:$0xff]  ;;  %v451_v48 = vld [vmem:[%s5927_s6 + $0x680] sm:$0xff] }
  0x4d   : > { %448 = vst [vmem:[%s5932_s7 + $0x370] sm:$0xff] %v447_v46  ;;  %v453_v49 = vld [vmem:[%s5927_s6 + $0x688] sm:$0xff]  ;;  %450 = vst [vmem:[%s5932_s7 + $0x378] sm:$0xff] %v449_v47  ;;  %v455_v50 = vld [vmem:[%s5927_s6 + $0x690] sm:$0xff] }
  0x4e   : > { %452 = vst [vmem:[%s5932_s7 + $0x380] sm:$0xff] %v451_v48  ;;  %454 = vst [vmem:[%s5932_s7 + $0x388] sm:$0xff] %v453_v49  ;;  %v457_v51 = vld [vmem:[%s5927_s6 + $0x698] sm:$0xff]  ;;  %v459_v52 = vld [vmem:[%s5927_s6 + $0x6a0] sm:$0xff] }
  0x4f   : > { %456 = vst [vmem:[%s5932_s7 + $0x390] sm:$0xff] %v455_v50  ;;  %458 = vst [vmem:[%s5932_s7 + $0x398] sm:$0xff] %v457_v51  ;;  %v461_v53 = vld [vmem:[%s5927_s6 + $0x6a8] sm:$0xff]  ;;  %v463_v54 = vld [vmem:[%s5927_s6 + $0x6b0] sm:$0xff] }
  0x50   : > { %460 = vst [vmem:[%s5932_s7 + $0x3a0] sm:$0xff] %v459_v52  ;;  %v465_v55 = vld [vmem:[%s5927_s6 + $0x6b8] sm:$0xff]  ;;  %462 = vst [vmem:[%s5932_s7 + $0x3a8] sm:$0xff] %v461_v53  ;;  %v467_v56 = vld [vmem:[%s5927_s6 + $0x6c0] sm:$0xff] }
  0x51   : > { %464 = vst [vmem:[%s5932_s7 + $0x3b0] sm:$0xff] %v463_v54  ;;  %466 = vst [vmem:[%s5932_s7 + $0x3b8] sm:$0xff] %v465_v55  ;;  %v469_v57 = vld [vmem:[%s5927_s6 + $0x6c8] sm:$0xff]  ;;  %v471_v58 = vld [vmem:[%s5927_s6 + $0x6d0] sm:$0xff] }
  0x52   : > { %468 = vst [vmem:[%s5932_s7 + $0x3c0] sm:$0xff] %v467_v56  ;;  %470 = vst [vmem:[%s5932_s7 + $0x3c8] sm:$0xff] %v469_v57  ;;  %v473_v59 = vld [vmem:[%s5927_s6 + $0x6d8] sm:$0xff]  ;;  %v475_v60 = vld [vmem:[%s5927_s6 + $0x6e0] sm:$0xff] }
  0x53   : > { %472 = vst [vmem:[%s5932_s7 + $0x3d0] sm:$0xff] %v471_v58  ;;  %v477_v61 = vld [vmem:[%s5927_s6 + $0x6e8] sm:$0xff]  ;;  %474 = vst [vmem:[%s5932_s7 + $0x3d8] sm:$0xff] %v473_v59  ;;  %v479_v62 = vld [vmem:[%s5927_s6 + $0x6f0] sm:$0xff] }
  0x54   : > { %476 = vst [vmem:[%s5932_s7 + $0x3e0] sm:$0xff] %v475_v60  ;;  %478 = vst [vmem:[%s5932_s7 + $0x3e8] sm:$0xff] %v477_v61  ;;  %v481_v63 = vld [vmem:[%s5927_s6 + $0x6f8] sm:$0xff] }
  0x55   : > { %480 = vst [vmem:[%s5932_s7 + $0x3f0] sm:$0xff] %v479_v62  ;;  %482 = vst [vmem:[%s5932_s7 + $0x3f8] sm:$0xff] %v481_v63 }
  0x56 PF: > { %p4360_p7 = scmp.ge.s32.totalorder %s5837_s21, 1  ;;  %p487_p8 = scmp.lt.s32.totalorder %s5837_s21, 5 }
  0x58   : > { %p488_p9 = pnand %p4360_p7, %p487_p8 }
  0x5a   : > { %491 = sbr.rel (%p488_p9) target bundleno = 1980 (0x7bc), region = 55 }
  0x5f   : > { %p543_p10 = scmp.lt.s32.totalorder %s5825_s18, 1  ;;  %s4362_s8 = sshll.u32 %s5821_s17, 4  ;;  %vm701_vm0 = vcmask 64512   ;;  %vm4169_vm1 = vcmask 130048   ;;  %vm4186_vm2 = vcmask 195584   ;;  %vm4203_vm3 = vcmask 261120  }
  0x60   : > { %p545_p11 = scmp.lt.s32.totalorder %s4362_s8, 31  ;;  %s5839_s13 = smov 120  }
  0x61   : > { %s9870_s18 = smov (!%p543_p10, %s5825_s18), 1  ;;  %s5841_s6 = smov 104  }
  0x62   : > { %s4664_s9 = sshll.u32 %s9870_s18, 8  ;;  %s9872_s8 = smov (!%p545_p11, %s4362_s8), 31 }
  0x63   : > { %s6200_s12 = scalar_lea.vmem %s9312_s1, %s4664_s9  ;;  %s4363_s14 = sshll.u32 %s9870_s18, 5 }
  0x64   : > { %v6203_v0 = vld [vmem:[%s6200_s12 + $0xf8] sm:$0xff]  ;;  %v6213_v2 = vld [vmem:[%s6200_s12 + $0xf0] sm:$0xff]  ;;  %v6216_v3 = vld [vmem:[%s6200_s12 + $0x68] sm:$0xff]  ;;  %s6229_s17 = sadd.s32 %s4363_s14, %s9872_s8  ;;  %s6269_s5 = scalar_lea.vmem %s9313_s2, %s4664_s9 }
  0x65   : > { %v6206_v1 = vld [vmem:[%s6200_s12 + $0x78] sm:$0xff]  ;;  %1503 = vrot.lane.b32.xlu1 %v6203_v0, %s5839_s13  ;;  %4666 = vmatprep.subr.msk.mxu0 %vm701_vm0, %v6203_v0  ;;  %v6232_v4 = vld [vmem:[%s6200_s12 + $0x70] sm:$0xff]  ;;  %v6235_v5 = vld [vmem:[%s6200_s12 + $0x60] sm:$0xff]  ;;  %s4364_s24 = sshll.u32 %s6229_s17, 3  ;;  %s5840_s18 = smov 112  }
  0x66   : > { %1471 = vrot.lane.b32.xlu0 %v6206_v1, %s5839_s13  ;;  %4667 = vmatpush3.xpose.msk.msra.mxu0 %vm701_vm0, %v6206_v1  ;;  %v6238_v6 = vld [vmem:[%s6200_s12 + $0xe8] sm:$0xff]  ;;  %v6250_v7 = vld [vmem:[%s6200_s12 + $0x58] sm:$0xff]  ;;  %v6253_v8 = vld [vmem:[%s6200_s12 + $0xe0] sm:$0xff]  ;;  %s6262_s28 = scalar_lea.vmem %s9311_s0, %s4364_s24  ;;  %s494_s7 = sand.u32 1, %s5813_s15  }
  0x67   : > { %4668 = vmatprep.subr.msk.mxu0 %vm701_vm0, %v6213_v2  ;;  %v573_v9 = vld [vmem:[%s6262_s28] sm:$0xff]  ;;  %v6281_v11 = vld [vmem:[%s6200_s12 + $0x50] sm:$0xff]  ;;  %v668_v12 = vld [vmem:[%s6269_s5 + $0xf8] sm:$0xff]  ;;  %s4361_s8 = sshll.u32 %s494_s7, 10  ;;  %s5842_s15 = smov 8  }
  0x68   : > { %v6278_v10 = vmul.f32 0.35355338, %v573_v9  ;;  %v6285_v13 = vld [vmem:[%s6200_s12 + $0xd8] sm:$0xff]  ;;  %4730 = vmatprep.subr.mxu1 %v668_v12  ;;  %v667_v15 = vld [vmem:[%s6269_s5 + $0xf0] sm:$0xff]  ;;  %v6301_v17 = vld [vmem:[%s6200_s12 + $0x48] sm:$0xff]  ;;  %s6936_s9 = scalar_lea.vmem [#allocation2], %s4361_s8  ;;  %s9207_s14 = scalar_lea.vmem %s9315_s4, %s4364_s24 }
  0x69   : > { %1501 = vrot.lane.b32.xlu1 %v6213_v2, %s5839_s13  ;;  %v652_v14 = vld [vmem:[%s6269_s5 + $0x78] sm:$0xff]  ;;  %v651_v16 = vld [vmem:[%s6269_s5 + $0x70] sm:$0xff]  ;;  %v666_v19 = vld [vmem:[%s6269_s5 + $0xe8] sm:$0xff]  ;;  %s5843_s10 = smov 16   ;;  %s5844_s11 = smov 24  }
  0x6a   : > { %1467 = vrot.lane.b32.xlu0 %v6216_v3, %s5839_s13  ;;  %4669 = vmatpush3.xpose.msk.msra.mxu0 %vm701_vm0, %v6232_v4  ;;  %v6304_v18 = vld [vmem:[%s6200_s12 + $0xd0] sm:$0xff]  ;;  %v650_v20 = vld [vmem:[%s6269_s5 + $0x68] sm:$0xff]  ;;  %v665_v21 = vld [vmem:[%s6269_s5 + $0xe0] sm:$0xff] }
  0x6b   : > { %4670 = vmatprep.subr.msk.mxu0 %vm701_vm0, %v6238_v6  ;;  %4698 = vmatprep.mubr.msk.f32.mxu0 %vm701_vm0, %v6278_v10  ;;  %v6318_v22 = vld [vmem:[%s6200_s12 + $0x40] sm:$0xff]  ;;  %v6321_v23 = vld [vmem:[%s6200_s12 + $0xc8] sm:$0xff]  ;;  %v664_v25 = vld [vmem:[%s6269_s5 + $0xd8] sm:$0xff] }
  0x6c   : > { %4731 = vmatpush3.msra.mxu1 %v652_v14  ;;  %v649_v24 = vld [vmem:[%s6269_s5 + $0x60] sm:$0xff]  ;;  %v648_v26 = vld [vmem:[%s6269_s5 + $0x58] sm:$0xff]  ;;  %v663_v29 = vld [vmem:[%s6269_s5 + $0xd0] sm:$0xff] }
  0x6d   : > { %1469 = vrot.lane.b32.xlu1 %v6232_v4, %s5839_s13  ;;  %4732 = vmatprep.subr.mxu1 %v667_v15  ;;  %v6335_v27 = vld [vmem:[%s6200_s12 + $0x38] sm:$0xff]  ;;  %v6338_v28 = vld [vmem:[%s6200_s12 + $0xc0] sm:$0xff]  ;;  %v647_v30 = vld [vmem:[%s6269_s5 + $0x50] sm:$0xff] }
  0x6e   : > { %1465 = vrot.lane.b32.xlu0 %v6235_v5, %s5839_s13  ;;  %4671 = vmatpush3.xpose.msk.msra.mxu0 %vm701_vm0, %v6216_v3  ;;  %v662_v31 = vld [vmem:[%s6269_s5 + $0xc8] sm:$0xff]  ;;  %v6352_v32 = vld [vmem:[%s6200_s12 + $0x30] sm:$0xff]  ;;  %v6355_v33 = vld [vmem:[%s6200_s12 + $0xb8] sm:$0xff] }
  0x6f   : > { %4672 = vmatprep.subr.msk.mxu0 %vm701_vm0, %v6253_v8  ;;  %4733 = vmatpush3.msra.mxu1 %v651_v16  ;;  %v646_v34 = vld [vmem:[%s6269_s5 + $0x48] sm:$0xff]  ;;  %v661_v35 = vld [vmem:[%s6269_s5 + $0xc0] sm:$0xff]  ;;  %v6372_v38 = vld [vmem:[%s6200_s12 + $0xb0] sm:$0xff] }
  0x70   : > { %4734 = vmatprep.subr.mxu1 %v666_v19  ;;  %v645_v36 = vld [vmem:[%s6269_s5 + $0x40] sm:$0xff]  ;;  %v6369_v37 = vld [vmem:[%s6200_s12 + $0x28] sm:$0xff]  ;;  %v660_v39 = vld [vmem:[%s6269_s5 + $0xb8] sm:$0xff] }
  0x71   : > { %1499 = vrot.lane.b32.xlu1 %v6238_v6, %s5839_s13  ;;  %4735 = vmatpush3.msra.mxu1 %v650_v20  ;;  %v644_v40 = vld [vmem:[%s6269_s5 + $0x38] sm:$0xff]  ;;  %v659_v41 = vld [vmem:[%s6269_s5 + $0xb0] sm:$0xff]  ;;  %v6386_v42 = vld [vmem:[%s6200_s12 + $0x20] sm:$0xff] }
  0x72   : > { %1463 = vrot.lane.b32.xlu0 %v6250_v7, %s5839_s13  ;;  %4673 = vmatpush3.xpose.msk.msra.mxu0 %vm701_vm0, %v6235_v5  ;;  %v6389_v43 = vld [vmem:[%s6200_s12 + $0xa8] sm:$0xff]  ;;  %v643_v44 = vld [vmem:[%s6269_s5 + $0x30] sm:$0xff]  ;;  %v6403_v47 = vld [vmem:[%s6200_s12 + $0x18] sm:$0xff] }
  0x73   : > { %4674 = vmatprep.subr.msk.mxu0 %vm701_vm0, %v6285_v13  ;;  %4736 = vmatprep.subr.mxu1 %v665_v21  ;;  %v658_v45 = vld [vmem:[%s6269_s5 + $0xa8] sm:$0xff]  ;;  %v6406_v48 = vld [vmem:[%s6200_s12 + $0xa0] sm:$0xff]  ;;  %v656_v51 = vld [vmem:[%s6269_s5 + $0x98] sm:$0xff] }
  0x74   : > { %4737 = vmatpush3.msra.mxu1 %v649_v24  ;;  %v642_v46 = vld [vmem:[%s6269_s5 + $0x28] sm:$0xff]  ;;  %v657_v49 = vld [vmem:[%s6269_s5 + $0xa0] sm:$0xff]  ;;  %v6420_v52 = vld [vmem:[%s6200_s12 + $0x10] sm:$0xff] }
  0x75   : > { %1497 = vrot.lane.b32.xlu1 %v6253_v8, %s5839_s13  ;;  %4738 = vmatprep.subr.mxu1 %v664_v25  ;;  %v641_v50 = vld [vmem:[%s6269_s5 + $0x20] sm:$0xff]  ;;  %v6423_v53 = vld [vmem:[%s6200_s12 + $0x98] sm:$0xff]  ;;  %v655_v55 = vld [vmem:[%s6269_s5 + $0x90] sm:$0xff] }
  0x76   : > { %1461 = vrot.lane.b32.xlu0 %v6281_v11, %s5839_s13  ;;  %4675 = vmatpush3.xpose.msk.msra.mxu0 %vm701_vm0, %v6250_v7  ;;  %v640_v54 = vld [vmem:[%s6269_s5 + $0x18] sm:$0xff]  ;;  %v639_v56 = vld [vmem:[%s6269_s5 + $0x10] sm:$0xff]  ;;  %v6437_v57 = vld [vmem:[%s6200_s12 + $0x8] sm:$0xff] }
  0x77   : > { %4676 = vmatprep.subr.msk.mxu0 %vm701_vm0, %v6304_v18  ;;  %4739 = vmatpush3.msra.mxu1 %v648_v26  ;;  %v6440_v58 = vld [vmem:[%s6200_s12 + $0x90] sm:$0xff]  ;;  %v654_v59 = vld [vmem:[%s6269_s5 + $0x88] sm:$0xff]  ;;  %v653_v61 = vld [vmem:[%s6269_s5 + $0x80] sm:$0xff] }
  0x78   : > { %4740 = vmatprep.subr.mxu1 %v663_v29  ;;  %v638_v60 = vld [vmem:[%s6269_s5 + $0x8] sm:$0xff]  ;;  %v6454_v62 = vld [vmem:[%s6200_s12] sm:$0xff]  ;;  %v575_v16 = vld [vmem:[%s6262_s28 + $0x10] sm:$0xff] }
  0x79   : > { %1495 = vrot.lane.b32.xlu1 %v6285_v13, %s5839_s13  ;;  %4741 = vmatpush3.msra.mxu1 %v647_v30  ;;  %v6457_v63 = vld [vmem:[%s6200_s12 + $0x88] sm:$0xff]  ;;  %v637_v9 = vld [vmem:[%s6269_s5] sm:$0xff]  ;;  %v6497_v19 = vmul.f32 0.35355338, %v575_v16  ;;  %v576_v20 = vld [vmem:[%s6262_s28 + $0x18] sm:$0xff] }
  0x7a   : > { %1459 = vrot.lane.b32.xlu0 %v6301_v17, %s5839_s13  ;;  %4677 = vmatpush3.xpose.msk.msra.mxu0 %vm701_vm0, %v6281_v11  ;;  %v574_v12 = vld [vmem:[%s6262_s28 + $0x8] sm:$0xff]  ;;  %v6470_v14 = vld [vmem:[%s6200_s12 + $0x80] sm:$0xff]  ;;  %v6508_v21 = vmul.f32 0.35355338, %v576_v20  ;;  %v579_v30 = vld [vmem:[%s6262_s28 + $0x30] sm:$0xff] }
  0x7b   : > { %4678 = vmatprep.subr.msk.mxu0 %vm701_vm0, %v6321_v23  ;;  %4742 = vmatprep.subr.mxu1 %v662_v31  ;;  %v6480_v15 = vmul.f32 0.35355338, %v574_v12  ;;  %v577_v24 = vld [vmem:[%s6262_s28 + $0x20] sm:$0xff]  ;;  %v578_v26 = vld [vmem:[%s6262_s28 + $0x28] sm:$0xff]  ;;  %v6541_v31 = vmul.f32 0.35355338, %v579_v30 }
  0x7c   : > { %4743 = vmatpush3.msra.mxu1 %v646_v34  ;;  %v6519_v25 = vmul.f32 0.35355338, %v577_v24  ;;  %v6530_v29 = vmul.f32 0.35355338, %v578_v26  ;;  %v580_v34 = vld [vmem:[%s6262_s28 + $0x38] sm:$0xff] }
  0x7d   : > { %1493 = vrot.lane.b32.xlu1 %v6304_v18, %s5839_s13  ;;  %4744 = vmatprep.subr.mxu1 %v661_v35  ;;  %v6552_v35 = vmul.f32 0.35355338, %v580_v34 }
  0x7e   : > { %1457 = vrot.lane.b32.xlu0 %v6318_v22, %s5839_s13  ;;  %4679 = vmatpush3.xpose.msk.msra.mxu0 %vm701_vm0, %v6301_v17 }
  0x7f   : > { %4680 = vmatprep.subr.msk.mxu0 %vm701_vm0, %v6338_v28  ;;  %4745 = vmatpush3.msra.mxu1 %v645_v36  ;;  %v581_v36 = vld [vmem:[%s6262_s28 + $0x40] sm:$0xff] }
  0x80   : > { %4746 = vmatprep.subr.mxu1 %v660_v39  ;;  %v6563_v39 = vmul.f32 0.35355338, %v581_v36 }
  0x81   : > { %1491 = vrot.lane.b32.xlu1 %v6321_v23, %s5839_s13  ;;  %4747 = vmatpush3.msra.mxu1 %v644_v40  ;;  %v582_v40 = vld [vmem:[%s6262_s28 + $0x48] sm:$0xff] }
  0x82   : > { %1455 = vrot.lane.b32.xlu0 %v6335_v27, %s5839_s13  ;;  %4681 = vmatpush3.xpose.msk.msra.mxu0 %vm701_vm0, %v6318_v22 }
  0x83   : > { %4682 = vmatprep.subr.msk.mxu0 %vm701_vm0, %v6355_v33  ;;  %4748 = vmatprep.subr.mxu1 %v659_v41  ;;  %v6574_v41 = vmul.f32 0.35355338, %v582_v40 }
  0x84   : > { %4749 = vmatpush3.msra.mxu1 %v643_v44  ;;  %v583_v44 = vld [vmem:[%s6262_s28 + $0x50] sm:$0xff] }
  0x85   : > { %1489 = vrot.lane.b32.xlu1 %v6338_v28, %s5839_s13  ;;  %4750 = vmatprep.subr.mxu1 %v658_v45  ;;  %v6585_v45 = vmul.f32 0.35355338, %v583_v44 }
  0x86   : > { %1453 = vrot.lane.b32.xlu0 %v6352_v32, %s5839_s13  ;;  %4683 = vmatpush3.xpose.msk.msra.mxu0 %vm701_vm0, %v6335_v27 }
  0x87   : > { %4684 = vmatprep.subr.msk.mxu0 %vm701_vm0, %v6372_v38  ;;  %4751 = vmatpush3.msra.mxu1 %v642_v46  ;;  %v584_v46 = vld [vmem:[%s6262_s28 + $0x58] sm:$0xff] }
  0x88   : > { %4752 = vmatprep.subr.mxu1 %v657_v49  ;;  %v6596_v49 = vmul.f32 0.35355338, %v584_v46 }
  0x89   : > { %1487 = vrot.lane.b32.xlu1 %v6355_v33, %s5839_s13  ;;  %4753 = vmatpush3.msra.mxu1 %v641_v50  ;;  %v585_v50 = vld [vmem:[%s6262_s28 + $0x60] sm:$0xff] }
  0x8a   : > { %1451 = vrot.lane.b32.xlu0 %v6369_v37, %s5839_s13  ;;  %4685 = vmatpush3.xpose.msk.msra.mxu0 %vm701_vm0, %v6352_v32 }
  0x8b   : > { %4686 = vmatprep.subr.msk.mxu0 %vm701_vm0, %v6389_v43  ;;  %4754 = vmatprep.subr.mxu1 %v656_v51  ;;  %v6607_v51 = vmul.f32 0.35355338, %v585_v50 }
  0x8c   : > { %4755 = vmatpush3.msra.mxu1 %v640_v54  ;;  %v586_v54 = vld [vmem:[%s6262_s28 + $0x68] sm:$0xff] }
  0x8d   : > { %1485 = vrot.lane.b32.xlu1 %v6372_v38, %s5839_s13  ;;  %4756 = vmatprep.subr.mxu1 %v655_v55  ;;  %v6618_v55 = vmul.f32 0.35355338, %v586_v54 }
  0x8e   : > { %1449 = vrot.lane.b32.xlu0 %v6386_v42, %s5839_s13  ;;  %4687 = vmatpush3.xpose.msk.msra.mxu0 %vm701_vm0, %v6369_v37 }
  0x8f   : > { %4688 = vmatprep.subr.msk.mxu0 %vm701_vm0, %v6406_v48  ;;  %4757 = vmatpush3.msra.mxu1 %v639_v56  ;;  %v587_v56 = vld [vmem:[%s6262_s28 + $0x70] sm:$0xff] }
  0x90   : > { %4758 = vmatprep.subr.mxu1 %v654_v59 }
  0x91   : > { %1483 = vrot.lane.b32.xlu1 %v6389_v43, %s5839_s13  ;;  %4759 = vmatpush3.msra.mxu1 %v638_v60 }
  0x92   : > { %1447 = vrot.lane.b32.xlu0 %v6403_v47, %s5839_s13  ;;  %4689 = vmatpush3.xpose.msk.msra.mxu0 %vm701_vm0, %v6386_v42 }
  0x93   : > { %4690 = vmatprep.subr.msk.mxu0 %vm701_vm0, %v6423_v53  ;;  %4760 = vmatprep.subr.mxu1 %v653_v61  ;;  %v6632_v61 = vmul.f32 0.35355338, %v587_v56 }
  0x94   : > { %4761 = vmatpush3.msra.mxu1 %v637_v9  ;;  %v588_v9 = vld [vmem:[%s6262_s28 + $0x78] sm:$0xff] }
  0x95   : > { %1481 = vrot.lane.b32.xlu1 %v6406_v48, %s5839_s13  ;;  %v6647_v20 = vmul.f32 0.35355338, %v588_v9 }
  0x96   : > { %1445 = vrot.lane.b32.xlu0 %v6420_v52, %s5839_s13  ;;  %4691 = vmatpush3.xpose.msk.msra.mxu0 %vm701_vm0, %v6403_v47 }
  0x97   : > { %4692 = vmatprep.subr.msk.mxu0 %vm701_vm0, %v6440_v58 }
  0x99   : > { %1479 = vrot.lane.b32.xlu1 %v6423_v53, %s5839_s13 }
  0x9a   : > { %1443 = vrot.lane.b32.xlu0 %v6437_v57, %s5839_s13  ;;  %4693 = vmatpush3.xpose.msk.msra.mxu0 %vm701_vm0, %v6420_v52 }
  0x9b   : > { %4694 = vmatprep.subr.msk.mxu0 %vm701_vm0, %v6457_v63 }
  0x9d   : > { %1477 = vrot.lane.b32.xlu1 %v6440_v58, %s5839_s13 }
  0x9e   : > { %1441 = vrot.lane.b32.xlu0 %v6454_v62, %s5839_s13  ;;  %4695 = vmatpush3.xpose.msk.msra.mxu0 %vm701_vm0, %v6437_v57 }
  0x9f   : > { %4696 = vmatprep.subr.msk.mxu0 %vm701_vm0, %v6470_v14 }
  0xa1   : > { %1475 = vrot.lane.b32.xlu1 %v6457_v63, %s5839_s13 }
  0xa2   : > { %2386 = vrot.lane.b32.xlu0 %v6203_v0, %s5840_s18  ;;  %4697 = vmatpush3.xpose.msk.msra.mxu0 %vm701_vm0, %v6454_v62 }
  0xa5   : > { %1473 = vrot.lane.b32.xlu1 %v6470_v14, %s5839_s13  ;;  %4699 = vmatmul.mubr.msk.f32.vlgmr.msra.gmra.mxu0 %vm701_vm0, %v6278_v10 }
  0xa6   : > { %1411 = vrot.lane.b32.xlu0 %v6480_v15, %s5839_s13  ;;  %4700 = vmatprep.mubr.msk.f32.mxu0 %vm701_vm0, %v6480_v15 }
  0xa9   : > { %1409 = vrot.lane.b32.xlu1 %v6278_v10, %s5839_s13  ;;  %4701 = vmatmul.mubr.msk.f32.gmra.mxu0 %vm701_vm0, %v6480_v15 }
  0xaa   : > { %2352 = vrot.lane.b32.xlu0 %v6232_v4, %s5840_s18  ;;  %4702 = vmatprep.mubr.msk.f32.mxu0 %vm701_vm0, %v6497_v19 }
  0xad   : > { %2354 = vrot.lane.b32.xlu1 %v6206_v1, %s5840_s18  ;;  %4703 = vmatmul.mubr.msk.f32.gmra.mxu0 %vm701_vm0, %v6497_v19 }
  0xae   : > { %2382 = vrot.lane.b32.xlu0 %v6238_v6, %s5840_s18  ;;  %4704 = vmatprep.mubr.msk.f32.mxu0 %vm701_vm0, %v6508_v21 }
  0xb1   : > { %2384 = vrot.lane.b32.xlu1 %v6213_v2, %s5840_s18  ;;  %4705 = vmatmul.mubr.msk.f32.gmra.mxu0 %vm701_vm0, %v6508_v21 }
  0xb2   : > { %1415 = vrot.lane.b32.xlu0 %v6508_v21, %s5839_s13  ;;  %4706 = vmatprep.mubr.msk.f32.mxu0 %vm701_vm0, %v6519_v25 }
  0xb5   : > { %1413 = vrot.lane.b32.xlu1 %v6497_v19, %s5839_s13  ;;  %4707 = vmatmul.mubr.msk.f32.gmra.mxu0 %vm701_vm0, %v6519_v25 }
  0xb6   : > { %2348 = vrot.lane.b32.xlu0 %v6235_v5, %s5840_s18  ;;  %4708 = vmatprep.mubr.msk.f32.mxu0 %vm701_vm0, %v6530_v29 }
  0xb9   : > { %2350 = vrot.lane.b32.xlu1 %v6216_v3, %s5840_s18  ;;  %4709 = vmatmul.mubr.msk.f32.gmra.mxu0 %vm701_vm0, %v6530_v29 }
  0xba   : > { %2378 = vrot.lane.b32.xlu0 %v6285_v13, %s5840_s18  ;;  %4710 = vmatprep.mubr.msk.f32.mxu0 %vm701_vm0, %v6541_v31 }
  0xbd   : > { %2380 = vrot.lane.b32.xlu1 %v6253_v8, %s5840_s18  ;;  %4711 = vmatmul.mubr.msk.f32.gmra.mxu0 %vm701_vm0, %v6541_v31 }
  0xbe   : > { %1419 = vrot.lane.b32.xlu0 %v6530_v29, %s5839_s13  ;;  %4712 = vmatprep.mubr.msk.f32.mxu0 %vm701_vm0, %v6552_v35 }
  0xc1   : > { %1417 = vrot.lane.b32.xlu1 %v6519_v25, %s5839_s13  ;;  %4713 = vmatmul.mubr.msk.f32.gmra.mxu0 %vm701_vm0, %v6552_v35 }
  0xc2   : > { %2344 = vrot.lane.b32.xlu0 %v6281_v11, %s5840_s18  ;;  %4714 = vmatprep.mubr.msk.f32.mxu0 %vm701_vm0, %v6563_v39 }
  0xc5   : > { %2346 = vrot.lane.b32.xlu1 %v6250_v7, %s5840_s18  ;;  %4715 = vmatmul.mubr.msk.f32.gmra.mxu0 %vm701_vm0, %v6563_v39 }
  0xc6   : > { %2374 = vrot.lane.b32.xlu0 %v6321_v23, %s5840_s18  ;;  %4716 = vmatprep.mubr.msk.f32.mxu0 %vm701_vm0, %v6574_v41 }
  0xc9   : > { %2376 = vrot.lane.b32.xlu1 %v6304_v18, %s5840_s18  ;;  %4717 = vmatmul.mubr.msk.f32.gmra.mxu0 %vm701_vm0, %v6574_v41 }
  0xca   : > { %1423 = vrot.lane.b32.xlu0 %v6552_v35, %s5839_s13  ;;  %4718 = vmatprep.mubr.msk.f32.mxu0 %vm701_vm0, %v6585_v45 }
  0xcd   : > { %1421 = vrot.lane.b32.xlu1 %v6541_v31, %s5839_s13  ;;  %4719 = vmatmul.mubr.msk.f32.gmra.mxu0 %vm701_vm0, %v6585_v45 }
  0xce   : > { %2340 = vrot.lane.b32.xlu0 %v6318_v22, %s5840_s18  ;;  %4720 = vmatprep.mubr.msk.f32.mxu0 %vm701_vm0, %v6596_v49 }
  0xd1   : > { %2342 = vrot.lane.b32.xlu1 %v6301_v17, %s5840_s18  ;;  %4721 = vmatmul.mubr.msk.f32.gmra.mxu0 %vm701_vm0, %v6596_v49 }
  0xd2   : > { %2370 = vrot.lane.b32.xlu0 %v6355_v33, %s5840_s18  ;;  %4722 = vmatprep.mubr.msk.f32.mxu0 %vm701_vm0, %v6607_v51 }
  0xd5   : > { %2372 = vrot.lane.b32.xlu1 %v6338_v28, %s5840_s18  ;;  %4723 = vmatmul.mubr.msk.f32.gmra.mxu0 %vm701_vm0, %v6607_v51 }
  0xd6   : > { %1427 = vrot.lane.b32.xlu0 %v6574_v41, %s5839_s13  ;;  %4724 = vmatprep.mubr.msk.f32.mxu0 %vm701_vm0, %v6618_v55 }
  0xd7   : > { %v1504_v59 = vpop.permute.xlu1 %1503 }
  0xd8   : > { %v6623_v60 = vpop.permute.xlu0 %1471  ;;  %4810 = vmatprep.subr.msk.mxu1 %vm701_vm0, %v1504_v59 }
  0xd9   : > { %1425 = vrot.lane.b32.xlu1 %v6563_v39, %s5839_s13  ;;  %4725 = vmatmul.mubr.msk.f32.gmra.mxu0 %vm701_vm0, %v6618_v55 }
  0xda   : > { %2336 = vrot.lane.b32.xlu0 %v6352_v32, %s5840_s18  ;;  %4726 = vmatprep.mubr.msk.f32.mxu0 %vm701_vm0, %v6632_v61 }
  0xdb   : > { %v6637_v12 = vpop.permute.xlu1 %1501 }
  0xdc   : > { %v6639_v16 = vpop.permute.xlu0 %1467 }
  0xdd   : > { %2338 = vrot.lane.b32.xlu1 %v6335_v27, %s5840_s18  ;;  %4727 = vmatmul.mubr.msk.f32.gmra.mxu0 %vm701_vm0, %v6632_v61 }
  0xde   : > { %2366 = vrot.lane.b32.xlu0 %v6389_v43, %s5840_s18  ;;  %4728 = vmatprep.mubr.msk.f32.mxu0 %vm701_vm0, %v6647_v20 }
  0xdf   : > { %v6651_v24 = vpop.permute.xlu1 %1469 }
  0xe0   : > { %v6653_v26 = vpop.permute.xlu0 %1465 }
  0xe1   : > { %2368 = vrot.lane.b32.xlu1 %v6372_v38, %s5840_s18  ;;  %4729 = vmatmul.mubr.msk.f32.gmra.mxu0 %vm701_vm0, %v6647_v20 }
  0xe2   : > { %1431 = vrot.lane.b32.xlu0 %v6596_v49, %s5839_s13 }
  0xe3   : > { %v6663_v30 = vpop.permute.xlu1 %1499 }
  0xe4   : > { %v6665_v34 = vpop.permute.xlu0 %1463 }
  0xe5   : > { %1429 = vrot.lane.b32.xlu1 %v6585_v45, %s5839_s13 }
  0xe6   : > { %2332 = vrot.lane.b32.xlu0 %v6386_v42, %s5840_s18 }
  0xe7   : > { %v6671_v36 = vpop.permute.xlu1 %1497 }
  0xe8   : > { %v6673_v40 = vpop.permute.xlu0 %1461 }
  0xe9   : > { %2334 = vrot.lane.b32.xlu1 %v6369_v37, %s5840_s18 }
  0xea   : > { %2362 = vrot.lane.b32.xlu0 %v6423_v53, %s5840_s18 }
  0xeb   : > { %v6679_v44 = vpop.permute.xlu1 %1495 }
  0xec   : > { %v6681_v46 = vpop.permute.xlu0 %1459 }
  0xed   : > { %9403 = vst [vmem:[#allocation3_spill] sm:$0xff] %v6681_v46  ;;  %2364 = vrot.lane.b32.xlu1 %v6406_v48, %s5840_s18 }
  0xee   : > { %1435 = vrot.lane.b32.xlu0 %v6618_v55, %s5839_s13 }
  0xef   : > { %v6687_v50 = vpop.permute.xlu1 %1493 }
  0xf0   : > { %v6689_v54 = vpop.permute.xlu0 %1457 }
  0xf1   : > { %9404 = vst [vmem:[#allocation4_spill] sm:$0xff] %v6689_v54  ;;  %1433 = vrot.lane.b32.xlu1 %v6607_v51, %s5839_s13 }
  0xf2   : > { %2328 = vrot.lane.b32.xlu0 %v6420_v52, %s5840_s18 }
  0xf3   : > { %v6695_v56 = vpop.permute.xlu1 %1491 }
  0xf4   : > { %9405 = vst [vmem:[#allocation5_spill] sm:$0xff] %v6695_v56  ;;  %v6697_v59 = vpop.permute.xlu0 %1455 }
  0xf5   : > { %9406 = vst [vmem:[#allocation6_spill] sm:$0xff] %v6697_v59  ;;  %2330 = vrot.lane.b32.xlu1 %v6403_v47, %s5840_s18 }
  0xf6   : > { %2358 = vrot.lane.b32.xlu0 %v6457_v63, %s5840_s18 }
  0xf7   : > { %v6703_v9 = vpop.permute.xlu1 %1489 }
  0xf8   : > { %9407 = vst [vmem:[#allocation7_spill] sm:$0xff] %v6703_v9  ;;  %v6705_v46 = vpop.permute.xlu0 %1453 }
  0xf9   : > { %9408 = vst [vmem:[#allocation8_spill] sm:$0xff] %v6705_v46  ;;  %2360 = vrot.lane.b32.xlu1 %v6440_v58, %s5840_s18 }
  0xfa   : > { %1439 = vrot.lane.b32.xlu0 %v6647_v20, %s5839_s13 }
  0xfb   : > { %v6711_v54 = vpop.permute.xlu1 %1487 }
  0xfc   : > { %v6713_v56 = vpop.permute.xlu0 %1451 }
  0xfd   : > { %9409 = vst [vmem:[#allocation9_spill] sm:$0xff] %v6713_v56  ;;  %1437 = vrot.lane.b32.xlu1 %v6632_v61, %s5839_s13 }
  0xfe   : > { %2324 = vrot.lane.b32.xlu0 %v6454_v62, %s5840_s18 }
  0xff   : > { %v6719_v59 = vpop.permute.xlu1 %1485 }
 0x100   : > { %9410 = vst [vmem:[#allocation10_spill] sm:$0xff] %v6719_v59  ;;  %v6721_v9 = vpop.permute.xlu0 %1449 }
 0x101   : > { %9411 = vst [vmem:[#allocation11_spill] sm:$0xff] %v6721_v9  ;;  %2326 = vrot.lane.b32.xlu1 %v6437_v57, %s5840_s18 }
 0x102   : > { %3237 = vrot.lane.b32.xlu0 %v6203_v0, %s5841_s6 }
 0x103   : > { %v6727_v46 = vpop.permute.xlu1 %1483 }
 0x104   : > { %9412 = vst [vmem:[#allocation12_spill] sm:$0xff] %v6727_v46  ;;  %v6729_v56 = vpop.permute.xlu0 %1447 }
 0x105   : > { %9413 = vst [vmem:[#allocation13_spill] sm:$0xff] %v6729_v56  ;;  %2356 = vrot.lane.b32.xlu1 %v6470_v14, %s5840_s18 }
 0x106   : > { %2294 = vrot.lane.b32.xlu0 %v6480_v15, %s5840_s18 }
 0x107   : > { %v6735_v59 = vpop.permute.xlu1 %1481 }
 0x108   : > { %9414 = vst [vmem:[#allocation14_spill] sm:$0xff] %v6735_v59  ;;  %v6737_v9 = vpop.permute.xlu0 %1445 }
 0x109   : > { %9415 = vst [vmem:[#allocation15_spill] sm:$0xff] %v6737_v9  ;;  %2292 = vrot.lane.b32.xlu1 %v6278_v10, %s5840_s18 }
 0x10a   : > { %3203 = vrot.lane.b32.xlu0 %v6232_v4, %s5841_s6 }
 0x10b   : > { %v6743_v0 = vpop.permute.xlu1 %1479 }
 0x10c   : > { %v6745_v46 = vpop.permute.xlu0 %1443 }
 0x10d   : > { %3205 = vrot.lane.b32.xlu1 %v6206_v1, %s5841_s6 }
 0x10e   : > { %3233 = vrot.lane.b32.xlu0 %v6238_v6, %s5841_s6 }
 0x10f   : > { %v6751_v56 = vpop.permute.xlu1 %1477 }
 0x110   : > { %v6753_v59 = vpop.permute.xlu0 %1441 }
 0x111   : > { %9416 = vst [vmem:[#allocation16_spill] sm:$0xff] %v6753_v59  ;;  %3235 = vrot.lane.b32.xlu1 %v6213_v2, %s5841_s6 }
 0x112   : > { %2298 = vrot.lane.b32.xlu0 %v6508_v21, %s5840_s18 }
 0x113   : > { %v6759_v4 = vpop.permute.xlu1 %1475 }
 0x114   : > { %v6761_v9 = vpop.permute.xlu0 %2386 }
 0x115   : > { %9417 = vst [vmem:[#allocation17_spill] sm:$0xff] %v6761_v9  ;;  %2296 = vrot.lane.b32.xlu1 %v6497_v19, %s5840_s18 }
 0x116   : > { %3199 = vrot.lane.b32.xlu0 %v6235_v5, %s5841_s6 }
 0x117   : > { %v6767_v1 = vpop.permute.xlu1 %1473 }
 0x118   : > { %v6769_v6 = vpop.permute.xlu0 %1411 }
 0x119   : > { %3201 = vrot.lane.b32.xlu1 %v6216_v3, %s5841_s6 }
 0x11a   : > { %3229 = vrot.lane.b32.xlu0 %v6285_v13, %s5841_s6 }
 0x11b   : > { %v6775_v2 = vpop.permute.xlu1 %1409 }
 0x11c   : > { %v6777_v59 = vpop.permute.xlu0 %2352 }
 0x11d   : > { %9418 = vst [vmem:[#allocation18_spill] sm:$0xff] %v6777_v59  ;;  %3231 = vrot.lane.b32.xlu1 %v6253_v8, %s5841_s6 }
 0x11e   : > { %2302 = vrot.lane.b32.xlu0 %v6530_v29, %s5840_s18 }
 0x11f   : > { %v6783_v5 = vpop.permute.xlu1 %2354 }
 0x120   : > { %v6785_v9 = vpop.permute.xlu0 %2382 }
 0x121   : > { %9419 = vst [vmem:[#allocation19_spill] sm:$0xff] %v6785_v9  ;;  %2300 = vrot.lane.b32.xlu1 %v6519_v25, %s5840_s18 }
 0x122   : > { %3195 = vrot.lane.b32.xlu0 %v6281_v11, %s5841_s6 }
 0x123   : > { %v6791_v3 = vpop.permute.xlu1 %2384 }
 0x124   : > { %v6793_v13 = vpop.permute.xlu0 %1415 }
 0x125   : > { %3197 = vrot.lane.b32.xlu1 %v6250_v7, %s5841_s6 }
 0x126   : > { %3225 = vrot.lane.b32.xlu0 %v6321_v23, %s5841_s6 }
 0x127   : > { %v6799_v8 = vpop.permute.xlu1 %1413 }
 0x128   : > { %v6801_v59 = vpop.permute.xlu0 %2348 }
 0x129   : > { %9420 = vst [vmem:[#allocation20_spill] sm:$0xff] %v6801_v59  ;;  %3227 = vrot.lane.b32.xlu1 %v6304_v18, %s5841_s6 }
 0x12a   : > { %2306 = vrot.lane.b32.xlu0 %v6552_v35, %s5840_s18 }
 0x12b   : > { %v6807_v11 = vpop.permute.xlu1 %2350 }
 0x12c   : > { %v6809_v9 = vpop.permute.xlu0 %2378 }
 0x12d   : > { %9421 = vst [vmem:[#allocation21_spill] sm:$0xff] %v6809_v9  ;;  %2304 = vrot.lane.b32.xlu1 %v6541_v31, %s5840_s18 }
 0x12e   : > { %3191 = vrot.lane.b32.xlu0 %v6318_v22, %s5841_s6 }
 0x12f   : > { %v6815_v7 = vpop.permute.xlu1 %2380 }
 0x130   : > { %v6817_v23 = vpop.permute.xlu0 %1419 }
 0x131   : > { %9422 = vst [vmem:[#allocation22_spill] sm:$0xff] %v6817_v23  ;;  %3193 = vrot.lane.b32.xlu1 %v6301_v17, %s5841_s6 }
 0x132   : > { %3221 = vrot.lane.b32.xlu0 %v6355_v33, %s5841_s6 }
 0x133   : > { %v6823_v18 = vpop.permute.xlu1 %1417 }
 0x134   : > { %v6825_v59 = vpop.permute.xlu0 %2344 }
 0x135   : > { %9423 = vst [vmem:[#allocation23_spill] sm:$0xff] %v6825_v59  ;;  %3223 = vrot.lane.b32.xlu1 %v6338_v28, %s5841_s6 }
 0x136   : > { %2310 = vrot.lane.b32.xlu0 %v6574_v41, %s5840_s18 }
 0x137   : > { %v6831_v22 = vpop.permute.xlu1 %2346 }
 0x138   : > { %v6833_v9 = vpop.permute.xlu0 %2374 }
 0x139   : > { %9424 = vst [vmem:[#allocation24_spill] sm:$0xff] %v6833_v9  ;;  %2308 = vrot.lane.b32.xlu1 %v6563_v39, %s5840_s18 }
 0x13a   : > { %3187 = vrot.lane.b32.xlu0 %v6352_v32, %s5841_s6 }
 0x13b   : > { %v6839_v17 = vpop.permute.xlu1 %2376 }
 0x13c   : > { %9425 = vst [vmem:[#allocation25_spill] sm:$0xff] %v6839_v17  ;;  %v6841_v33 = vpop.permute.xlu0 %1423  ;;  %v684_v17 = vld [vmem:[%s6936_s9 + $0x78] sm:$0xff] }
 0x13d   : > { %9426 = vst [vmem:[#allocation26_spill] sm:$0xff] %v6841_v33  ;;  %3189 = vrot.lane.b32.xlu1 %v6335_v27, %s5841_s6  ;;  %v675_v33 = vld [vmem:[%s6936_s9 + $0x30] sm:$0xff] }
 0x13e   : > { %3217 = vrot.lane.b32.xlu0 %v6389_v43, %s5841_s6 }
 0x13f   : > { %v6847_v28 = vpop.permute.xlu1 %1421 }
 0x140   : > { %9427 = vst [vmem:[#allocation27_spill] sm:$0xff] %v6847_v28  ;;  %v6849_v59 = vpop.permute.xlu0 %2340 }
 0x141   : > { %9428 = vst [vmem:[#allocation28_spill] sm:$0xff] %v6849_v59  ;;  %3219 = vrot.lane.b32.xlu1 %v6372_v38, %s5841_s6 }
 0x142   : > { %2314 = vrot.lane.b32.xlu0 %v6596_v49, %s5840_s18 }
 0x143   : > { %v6855_v32 = vpop.permute.xlu1 %2342 }
 0x144   : > { %9429 = vst [vmem:[#allocation29_spill] sm:$0xff] %v6855_v32  ;;  %v6857_v9 = vpop.permute.xlu0 %2370 }
 0x145   : > { %9430 = vst [vmem:[#allocation30_spill] sm:$0xff] %v6857_v9  ;;  %2312 = vrot.lane.b32.xlu1 %v6585_v45, %s5840_s18 }
 0x146   : > { %3183 = vrot.lane.b32.xlu0 %v6386_v42, %s5841_s6 }
 0x147   : > { %v6863_v27 = vpop.permute.xlu1 %2372 }
 0x148   : > { %9431 = vst [vmem:[#allocation31_spill] sm:$0xff] %v6863_v27  ;;  %v6865_v43 = vpop.permute.xlu0 %1427 }
 0x149   : > { %9432 = vst [vmem:[#allocation32_spill] sm:$0xff] %v6865_v43  ;;  %3185 = vrot.lane.b32.xlu1 %v6369_v37, %s5841_s6 }
 0x14a   : > { %3213 = vrot.lane.b32.xlu0 %v6423_v53, %s5841_s6 }
 0x14b   : > { %v6871_v38 = vpop.permute.xlu1 %1425 }
 0x14c   : > { %9433 = vst [vmem:[#allocation33_spill] sm:$0xff] %v6871_v38  ;;  %v6873_v59 = vpop.permute.xlu0 %2336 }
 0x14d   : > { %9434 = vst [vmem:[#allocation34_spill] sm:$0xff] %v6873_v59  ;;  %3215 = vrot.lane.b32.xlu1 %v6406_v48, %s5841_s6 }
 0x14e   : > { %2318 = vrot.lane.b32.xlu0 %v6618_v55, %s5840_s18 }
 0x14f   : > { %v6879_v42 = vpop.permute.xlu1 %2338 }
 0x150   : > { %9435 = vst [vmem:[#allocation35_spill] sm:$0xff] %v6879_v42  ;;  %v6881_v9 = vpop.permute.xlu0 %2366 }
 0x151   : > { %9436 = vst [vmem:[#allocation36_spill] sm:$0xff] %v6881_v9  ;;  %2316 = vrot.lane.b32.xlu1 %v6607_v51, %s5840_s18 }
 0x152   : > { %3179 = vrot.lane.b32.xlu0 %v6420_v52, %s5841_s6 }
 0x153   : > { %v6887_v37 = vpop.permute.xlu1 %2368 }
 0x154   : > { %9437 = vst [vmem:[#allocation37_spill] sm:$0xff] %v6887_v37  ;;  %v6889_v53 = vpop.permute.xlu0 %1431 }
 0x155   : > { %9438 = vst [vmem:[#allocation38_spill] sm:$0xff] %v6889_v53  ;;  %3181 = vrot.lane.b32.xlu1 %v6403_v47, %s5841_s6 }
 0x156   : > { %3209 = vrot.lane.b32.xlu0 %v6457_v63, %s5841_s6 }
 0x157   : > { %v6895_v48 = vpop.permute.xlu1 %1429 }
 0x158   : > { %9439 = vst [vmem:[#allocation39_spill] sm:$0xff] %v6895_v48  ;;  %v6897_v9 = vpop.permute.xlu0 %2332  ;;  %v672_v48 = vld [vmem:[%s6936_s9 + $0x18] sm:$0xff] }
 0x159   : > { %9440 = vst [vmem:[#allocation40_spill] sm:$0xff] %v6897_v9  ;;  %3211 = vrot.lane.b32.xlu1 %v6440_v58, %s5841_s6 }
 0x15a   : > { %2322 = vrot.lane.b32.xlu0 %v6647_v20, %s5840_s18 }
 0x15b   : > { %v6903_v52 = vpop.permute.xlu1 %2334 }
 0x15c   : > { %9441 = vst [vmem:[#allocation41_spill] sm:$0xff] %v6903_v52  ;;  %v6905_v53 = vpop.permute.xlu0 %2362 }
 0x15d   : > { %9442 = vst [vmem:[#allocation42_spill] sm:$0xff] %v6905_v53  ;;  %2320 = vrot.lane.b32.xlu1 %v6632_v61, %s5840_s18 }
 0x15e   : > { %3175 = vrot.lane.b32.xlu0 %v6454_v62, %s5841_s6 }
 0x15f   : > { %v6911_v47 = vpop.permute.xlu1 %2364 }
 0x160   : > { %9443 = vst [vmem:[#allocation43_spill] sm:$0xff] %v6911_v47  ;;  %v6913_v63 = vpop.permute.xlu0 %1435 }
 0x161   : > { %9444 = vst [vmem:[#allocation44_spill] sm:$0xff] %v6913_v63  ;;  %3177 = vrot.lane.b32.xlu1 %v6437_v57, %s5841_s6 }
 0x163   : > { %v6917_v9 = vpop.permute.xlu1 %1433 }
 0x164   : > { %9445 = vst [vmem:[#allocation45_spill] sm:$0xff] %v6917_v9  ;;  %v6919_v58 = vpop.permute.xlu0 %2328 }
 0x165   : > { %9446 = vst [vmem:[#allocation46_spill] sm:$0xff] %v6919_v58  ;;  %3207 = vrot.lane.b32.xlu1 %v6470_v14, %s5841_s6  ;;  %v912_v47 = vpop.f32.mrf.mxu0  ;;  %v669_v14 = vld [vmem:[%s6936_s9] sm:$0xff] }
 0x167   : > { %v6923_v53 = vpop.permute.xlu1 %2330  ;;  %v914_v57 = vpop.f32.mrf.mxu0 }
 0x168   : > { %9447 = vst [vmem:[#allocation47_spill] sm:$0xff] %v6923_v53  ;;  %v6925_v62 = vpop.permute.xlu0 %2358  ;;  %v6942_v53 = vadd.f32 %v912_v47, %v669_v14 }
 0x169   : > { %9448 = vst [vmem:[#allocation48_spill] sm:$0xff] %v6925_v62  ;;  %3143 = vrot.lane.b32.xlu1 %v6278_v10, %s5841_s6  ;;  %v670_v62 = vld [vmem:[%s6936_s9 + $0x8] sm:$0xff]  ;;  %v918_v10 = vpop.f32.mrf.mxu0 }
 0x16b   : > { %v6930_v63 = vpop.permute.xlu1 %2360  ;;  %v920_v59 = vpop.f32.mrf.mxu0 }
 0x16c   : > { %9449 = vst [vmem:[#allocation49_spill] sm:$0xff] %v6930_v63  ;;  %v6932_v52 = vpop.permute.xlu0 %1439  ;;  %v6944_v63 = vadd.f32 %v914_v57, %v670_v62 }
 0x16d   : > { %9450 = vst [vmem:[#allocation50_spill] sm:$0xff] %v6932_v52  ;;  %v671_v52 = vld [vmem:[%s6936_s9 + $0x10] sm:$0xff]  ;;  %v924_v57 = vpop.f32.mrf.mxu0 }
 0x16e   : > { %v1007_v43 = vmax.f32 %v6942_v53, %v6944_v63  ;;  %v6954_v42 = vadd.f32 %v918_v10, %v671_v52  ;;  %v673_v52 = vld [vmem:[%s6936_s9 + $0x20] sm:$0xff] }
 0x16f   : > { %v6934_v9 = vpop.permute.xlu1 %1437  ;;  %v6970_v10 = vadd.f32 %v924_v57, %v673_v52 }
 0x170   : > { %9451 = vst [vmem:[#allocation51_spill] sm:$0xff] %v6934_v9  ;;  %v6940_v58 = vpop.permute.xlu0 %2324 }
 0x171   : > { %9452 = vst [vmem:[#allocation52_spill] sm:$0xff] %v6940_v58  ;;  %v6956_v58 = vadd.f32 %v920_v59, %v672_v48  ;;  %v674_v59 = vld [vmem:[%s6936_s9 + $0x28] sm:$0xff] }
 0x173   : > { %v6948_v9 = vpop.permute.xlu1 %2326  ;;  %v1010_v62 = vmax.f32 %v6954_v42, %v6956_v58 }
 0x174   : > { %9453 = vst [vmem:[#allocation53_spill] sm:$0xff] %v6948_v9  ;;  %v6950_v37 = vpop.permute.xlu0 %3237 }
 0x175   : > { %9454 = vst [vmem:[#allocation54_spill] sm:$0xff] %v6950_v37  ;;  %v926_v37 = vpop.f32.mrf.mxu0 }
 0x177   : > { %v6958_v47 = vpop.permute.xlu1 %2356  ;;  %v930_v48 = vpop.f32.mrf.mxu0 }
 0x178   : > { %9455 = vst [vmem:[#allocation55_spill] sm:$0xff] %v6958_v47  ;;  %v6962_v14 = vpop.permute.xlu0 %2294  ;;  %v6972_v47 = vadd.f32 %v926_v37, %v674_v59 }
 0x179   : > { %9456 = vst [vmem:[#allocation56_spill] sm:$0xff] %v6962_v14  ;;  %v932_v32 = vpop.f32.mrf.mxu0  ;;  %v6982_v14 = vadd.f32 %v930_v48, %v675_v33 }
 0x17b   : > { %v6964_v9 = vpop.permute.xlu1 %2292 }
 0x17c   : > { %9457 = vst [vmem:[#allocation57_spill] sm:$0xff] %v6964_v9  ;;  %v6966_v38 = vpop.permute.xlu0 %3203 }
 0x17d   : > { %1008 = vmax.xlane.f32.xlu0 %v1007_v43  ;;  %9458 = vst [vmem:[#allocation58_spill] sm:$0xff] %v6966_v38  ;;  %v676_v43 = vld [vmem:[%s6936_s9 + $0x38] sm:$0xff] }
 0x17e   : > { %v6984_v38 = vadd.f32 %v932_v32, %v676_v43 }
 0x17f   : > { %v6974_v27 = vpop.permute.xlu1 %3205 }
 0x180   : > { %9459 = vst [vmem:[#allocation59_spill] sm:$0xff] %v6974_v27  ;;  %v6978_v28 = vpop.permute.xlu0 %3233  ;;  %v1016_v37 = vmax.f32 %v6982_v14, %v6984_v38 }
 0x181   : > { %1011 = vmax.xlane.f32.xlu0 %v1010_v62  ;;  %9460 = vst [vmem:[#allocation60_spill] sm:$0xff] %v6978_v28  ;;  %v1013_v62 = vmax.f32 %v6970_v10, %v6972_v47 }
 0x183   : > { %v6986_v9 = vpop.permute.xlu1 %3235 }
 0x184   : > { %9461 = vst [vmem:[#allocation61_spill] sm:$0xff] %v6986_v9  ;;  %v6990_v57 = vpop.permute.xlu0 %2298  ;;  %v680_v9 = vld [vmem:[%s6936_s9 + $0x58] sm:$0xff] }
 0x185   : > { %9462 = vst [vmem:[#allocation62_spill] sm:$0xff] %v6990_v57 }
 0x187   : > { %v6992_v52 = vpop.permute.xlu1 %2296 }
 0x188   : > { %9463 = vst [vmem:[#allocation63_spill] sm:$0xff] %v6992_v52  ;;  %v6994_v59 = vpop.permute.xlu0 %3199 }
 0x189   : > { %9464 = vst [vmem:[#allocation64_spill] sm:$0xff] %v6994_v59 }
 0x18b   : > { %v6998_v33 = vpop.permute.xlu1 %3201 }
 0x18c   : > { %9465 = vst [vmem:[#allocation65_spill] sm:$0xff] %v6998_v33  ;;  %v7002_v32 = vpop.permute.xlu0 %3229 }
 0x18d   : > { %1014 = vmax.xlane.f32.xlu1 %v1013_v62  ;;  %9466 = vst [vmem:[#allocation66_spill] sm:$0xff] %v7002_v32  ;;  %v678_v32 = vld [vmem:[%s6936_s9 + $0x48] sm:$0xff] }
 0x18f   : > { %v7004_v48 = vpop.permute.xlu1 %3231 }
 0x190   : > { %9467 = vst [vmem:[#allocation67_spill] sm:$0xff] %v7004_v48  ;;  %v7006_v43 = vpop.permute.xlu0 %2302 }
 0x191   : > { %1017 = vmax.xlane.f32.xlu1 %v1016_v37  ;;  %9468 = vst [vmem:[#allocation68_spill] sm:$0xff] %v7006_v43 }
 0x193   : > { %v7010_v62 = vpop.permute.xlu1 %2300 }
 0x194   : > { %9469 = vst [vmem:[#allocation69_spill] sm:$0xff] %v7010_v62  ;;  %v7012_v37 = vpop.permute.xlu0 %3195 }
 0x195   : > { %9470 = vst [vmem:[#allocation70_spill] sm:$0xff] %v7012_v37 }
 0x197   : > { %3145 = vrot.lane.b32.xlu0 %v6480_v15, %s5841_s6  ;;  %v936_v15 = vpop.f32.mrf.mxu0  ;;  %v7014_v59 = vpop.permute.xlu1 %3197 }
 0x198   : > { %9471 = vst [vmem:[#allocation71_spill] sm:$0xff] %v7014_v59  ;;  %v7016_v57 = vpop.permute.xlu0 %3225  ;;  %v679_v59 = vld [vmem:[%s6936_s9 + $0x50] sm:$0xff] }
 0x199   : > { %9472 = vst [vmem:[#allocation72_spill] sm:$0xff] %v7016_v57  ;;  %v938_v33 = vpop.f32.mrf.mxu0 }
 0x19a   : > { %v7022_v43 = vadd.f32 %v938_v33, %v678_v32 }
 0x19b   : > { %3149 = vrot.lane.b32.xlu0 %v6508_v21, %s5841_s6  ;;  %v677_v21 = vld [vmem:[%s6936_s9 + $0x40] sm:$0xff]  ;;  %v7024_v28 = vpop.permute.xlu1 %3227  ;;  %v942_v57 = vpop.f32.mrf.mxu0 }
 0x19c   : > { %v7020_v48 = vadd.f32 %v936_v15, %v677_v21  ;;  %9473 = vst [vmem:[#allocation73_spill] sm:$0xff] %v7024_v28  ;;  %v7040_v32 = vadd.f32 %v942_v57, %v679_v59 }
 0x19d   : > { %v944_v27 = vpop.f32.mrf.mxu0 }
 0x19e   : > { %v1019_v37 = vmax.f32 %v7020_v48, %v7022_v43  ;;  %v7042_v21 = vadd.f32 %v944_v27, %v680_v9 }
 0x19f   : > { %v7030_v62 = vpop.permute.xlu1 %2304 }
 0x1a0   : > { %9475 = vst [vmem:[#allocation75_spill] sm:$0xff] %v7030_v62  ;;  %v1022_v62 = vmax.f32 %v7040_v32, %v7042_v21 }
 0x1a2   : > { %3147 = vrot.lane.b32.xlu1 %v6497_v19, %s5841_s6  ;;  %v7026_v19 = vpop.permute.xlu0 %2306 }
 0x1a3   : > { %9474 = vst [vmem:[#allocation74_spill] sm:$0xff] %v7026_v19  ;;  %v7036_v15 = vpop.permute.xlu1 %3193 }
 0x1a4   : > { %9477 = vst [vmem:[#allocation77_spill] sm:$0xff] %v7036_v15 }
 0x1a6   : > { %v7032_v52 = vpop.permute.xlu0 %3191 }
 0x1a7   : > { %9476 = vst [vmem:[#allocation76_spill] sm:$0xff] %v7032_v52  ;;  %v7044_v19 = vpop.permute.xlu1 %3223 }
 0x1a8   : > { %9479 = vst [vmem:[#allocation79_spill] sm:$0xff] %v7044_v19 }
 0x1aa   : > { %v7038_v33 = vpop.permute.xlu0 %3221 }
 0x1ab   : > { %9478 = vst [vmem:[#allocation78_spill] sm:$0xff] %v7038_v33 }
 0x1ae   : > { %v7048_v52 = vpop.permute.xlu0 %2310 }
 0x1af   : > { %9480 = vst [vmem:[#allocation80_spill] sm:$0xff] %v7048_v52 }
 0x1b2   : > { %v7052_v28 = vpop.permute.xlu0 %3187 }
 0x1b3   : > { %9482 = vst [vmem:[#allocation82_spill] sm:$0xff] %v7052_v28  ;;  %v948_v28 = vpop.f32.mrf.mxu0 }
 0x1b6   : > { %v7058_v9 = vpop.permute.xlu0 %3217 }
 0x1b7   : > { %9484 = vst [vmem:[#allocation84_spill] sm:$0xff] %v7058_v9  ;;  %v682_v9 = vld [vmem:[%s6936_s9 + $0x68] sm:$0xff] }
 0x1ba   : > { %1020 = vmax.xlane.f32.xlu0 %v1019_v37  ;;  %v7050_v37 = vpop.permute.xlu1 %2308  ;;  %v7062_v59 = vpop.permute.xlu0 %2314 }
 0x1bb   : > { %9481 = vst [vmem:[#allocation81_spill] sm:$0xff] %v7050_v37  ;;  %9486 = vst [vmem:[#allocation86_spill] sm:$0xff] %v7062_v59  ;;  %v950_v37 = vpop.f32.mrf.mxu0 }
 0x1bc   : > { %v7078_v59 = vadd.f32 %v950_v37, %v682_v9 }
 0x1be   : > { %v7056_v57 = vpop.permute.xlu1 %3189 }
 0x1bf   : > { %9483 = vst [vmem:[#allocation83_spill] sm:$0xff] %v7056_v57  ;;  %v681_v57 = vld [vmem:[%s6936_s9 + $0x60] sm:$0xff] }
 0x1c2   : > { %v7060_v27 = vpop.permute.xlu1 %3219 }
 0x1c3   : > { %9485 = vst [vmem:[#allocation85_spill] sm:$0xff] %v7060_v27  ;;  %v7076_v27 = vadd.f32 %v948_v28, %v681_v57 }
 0x1c6   : > { %1023 = vmax.xlane.f32.xlu1 %v1022_v62  ;;  %v7066_v52 = vpop.permute.xlu1 %2312  ;;  %v7068_v62 = vpop.permute.xlu0 %3183 }
 0x1c7   : > { %9487 = vst [vmem:[#allocation87_spill] sm:$0xff] %v7066_v52  ;;  %9488 = vst [vmem:[#allocation88_spill] sm:$0xff] %v7068_v62  ;;  %v1025_v62 = vmax.f32 %v7076_v27, %v7078_v59 }
 0x1ca   : > { %v7070_v33 = vpop.permute.xlu1 %3185 }
 0x1cb   : > { %9489 = vst [vmem:[#allocation89_spill] sm:$0xff] %v7070_v33  ;;  %v954_v33 = vpop.f32.mrf.mxu0 }
 0x1cd   : > { %v956_v23 = vpop.f32.mrf.mxu0 }
 0x1ce   : > { %v7080_v19 = vpop.permute.xlu1 %3215  ;;  %v7098_v9 = vadd.f32 %v956_v23, %v684_v17 }
 0x1cf   : > { %9491 = vst [vmem:[#allocation91_spill] sm:$0xff] %v7080_v19 }
 0x1d0   : > { %3153 = vrot.lane.b32.xlu0 %v6530_v29, %s5841_s6  ;;  %v7072_v29 = vpop.permute.xlu0 %3213 }
 0x1d1   : > { %9490 = vst [vmem:[#allocation90_spill] sm:$0xff] %v7072_v29  ;;  %v683_v29 = vld [vmem:[%s6936_s9 + $0x70] sm:$0xff] }
 0x1d2   : > { %v7086_v52 = vpop.permute.xlu1 %2316  ;;  %v7096_v57 = vadd.f32 %v954_v33, %v683_v29 }
 0x1d3   : > { %9493 = vst [vmem:[#allocation93_spill] sm:$0xff] %v7086_v52 }
 0x1d6   : > { %v7092_v28 = vpop.permute.xlu1 %3181 }
 0x1d7   : > { %3151 = vrot.lane.b32.xlu1 %v6519_v25, %s5841_s6  ;;  %v7082_v25 = vpop.permute.xlu0 %2318  ;;  %9495 = vst [vmem:[#allocation95_spill] sm:$0xff] %v7092_v28 }
 0x1d8   : > { %9492 = vst [vmem:[#allocation92_spill] sm:$0xff] %v7082_v25  ;;  %v1028_v25 = vmax.f32 %v7096_v57, %v7098_v9 }
 0x1da   : > { %v7102_v19 = vpop.permute.xlu1 %3211 }
 0x1db   : > { %v7088_v15 = vpop.permute.xlu0 %3179  ;;  %9497 = vst [vmem:[#allocation97_spill] sm:$0xff] %v7102_v19 }
 0x1dc   : > { %9494 = vst [vmem:[#allocation94_spill] sm:$0xff] %v7088_v15 }
 0x1de   : > { %v7106_v15 = vpop.permute.xlu1 %2320 }
 0x1df   : > { %v7094_v37 = vpop.permute.xlu0 %3209  ;;  %9499 = vst [vmem:[#allocation99_spill] sm:$0xff] %v7106_v15 }
 0x1e0   : > { %9496 = vst [vmem:[#allocation96_spill] sm:$0xff] %v7094_v37 }
 0x1e2   : > { %v7112_v33 = vpop.permute.xlu1 %3177 }
 0x1e3   : > { %9501 = vst [vmem:[#allocation101_spill] sm:$0xff] %v7112_v33 }
 0x1ef   : > { %1026 = vmax.xlane.f32.xlu0 %v1025_v62  ;;  %v7104_v62 = vpop.permute.xlu0 %2322 }
 0x1f0   : > { %9498 = vst [vmem:[#allocation98_spill] sm:$0xff] %v7104_v62 }
 0x1f3   : > { %v7108_v52 = vpop.permute.xlu0 %3175 }
 0x1f4   : > { %9500 = vst [vmem:[#allocation100_spill] sm:$0xff] %v7108_v52  ;;  %v7118_v52 = vpop.permute.xlu1 %3207 }
 0x1f5   : > { %9502 = vst [vmem:[#allocation102_spill] sm:$0xff] %v7118_v52 }
 0x1fb   : > { %1029 = vmax.xlane.f32.xlu1 %v1028_v25 }
 0x205   : > { %3157 = vrot.lane.b32.xlu0 %v6552_v35, %s5841_s6 }
 0x206   : > { %v1009_v37 = vpop.xlane.xlu0 %1008 }
 0x207   : > { %v1055_v23 = vsub.f32 %v6942_v53, %v1009_v37  ;;  %v1056_v17 = vsub.f32 %v6944_v63, %v1009_v37  ;;  %v7122_v53 = vpop.permute.xlu1 %3143  ;;  %v960_v63 = vpop.f32.mrf.mxu0 }
 0x208   : > { %9503 = vst [vmem:[#allocation103_spill] sm:$0xff] %v7122_v53  ;;  %v7475_v53 = vld [vmem:[%s6269_s5 + $0x18] sm:$0xff] }
 0x209   : > { %v1087_v29 = vmul.f32 1.442695, %v1055_v23  ;;  %v1089_v28 = vmul.f32 1.442695, %v1056_v17  ;;  %v686_v17 = vld [vmem:[%s6936_s9 + $0x88] sm:$0xff] }
 0x20a   : > { %v1012_v19 = vpop.xlane.xlu0 %1011 }
 0x20b   : > { %5336 = vpow2.f32 %v1087_v29  ;;  %v1057_v25 = vsub.f32 %v6954_v42, %v1012_v19  ;;  %v1058_v62 = vsub.f32 %v6956_v58, %v1012_v19  ;;  %v685_v19 = vld [vmem:[%s6936_s9 + $0x80] sm:$0xff]  ;;  %v962_v29 = vpop.f32.mrf.mxu0 }
 0x20c   : > { %5338 = vpow2.f32 %v1089_v28  ;;  %3155 = vrot.lane.b32.xlu1 %v6541_v31, %s5841_s6 }
 0x20d   : > { %v1091_v35 = vmul.f32 1.442695, %v1057_v25  ;;  %v1093_v15 = vmul.f32 1.442695, %v1058_v62 }
 0x20f   : > { %5340 = vpow2.f32 %v1091_v35 }
 0x210   : > { %5342 = vpow2.f32 %v1093_v15  ;;  %v7130_v15 = vadd.f32 %v960_v63, %v685_v19 }
 0x216   : > { %v1015_v37 = vpop.xlane.xlu1 %1014 }
 0x217   : > { %v1059_v42 = vsub.f32 %v6970_v10, %v1015_v37  ;;  %v1060_v58 = vsub.f32 %v6972_v47, %v1015_v37  ;;  %v7136_v37 = vadd.f32 %v962_v29, %v686_v17 }
 0x218   : > { %v5337_v23 = vpop.eup %5336 }
 0x219   : > { %v5339_v28 = vpop.eup %5338  ;;  %v1095_v25 = vmul.f32 1.442695, %v1059_v42  ;;  %v1097_v62 = vmul.f32 1.442695, %v1060_v58 }
 0x21a   : > { %1263 = vmatprep.mubr.f32.mxu1 %v5339_v28  ;;  %v7128_v52 = vadd.f32 %v5339_v28, %v5337_v23  ;;  %v1018_v31 = vpop.xlane.xlu1 %1017 }
 0x21b   : > { %1264 = vmatmul.mubr.f32.vlgmr.msra.gmra.mxu1 %v5337_v23  ;;  %5344 = vpow2.f32 %v1095_v25  ;;  %v1061_v47 = vsub.f32 %v6982_v14, %v1018_v31  ;;  %v1062_v10 = vsub.f32 %v6984_v38, %v1018_v31  ;;  %v688_v14 = vld [vmem:[%s6936_s9 + $0x98] sm:$0xff]  ;;  %v9504_v25 = vld [vmem:[#allocation5_spill] sm:$0xff]  ;;  %v7182_v31 = vpop.permute.xlu0 %3145 }
 0x21c   : > { %v5341_v35 = vpop.eup %5340  ;;  %4811 = vmatpush3.xpose.msk.msra.mxu1 %vm701_vm0, %v6623_v60  ;;  %5346 = vpow2.f32 %v1097_v62  ;;  %v1031_v60 = vmax.f32 %v7130_v15, %v7136_v37  ;;  %v9506_v62 = vld [vmem:[#allocation7_spill] sm:$0xff]  ;;  %9508 = vst [vmem:[#allocation5_spill] sm:$0xff] %v7182_v31 }
 0x21d   : > { %v5343_v42 = vpop.eup %5342  ;;  %4812 = vmatprep.subr.msk.mxu1 %vm701_vm0, %v6637_v12  ;;  %v1099_v23 = vmul.f32 1.442695, %v1061_v47  ;;  %v1101_v58 = vmul.f32 1.442695, %v1062_v10  ;;  %v966_v12 = vpop.f32.mrf.mxu0  ;;  %v9512_v10 = vld [vmem:[#allocation8_spill] sm:$0xff] }
 0x21e   : > { %1268 = vmatprep.mubr.f32.mxu1 %v5343_v42  ;;  %v7140_v63 = vadd.f32 %v5343_v42, %v5341_v35  ;;  %v9513_v42 = vld [vmem:[#allocation12_spill] sm:$0xff] }
 0x21f   : > { %1269 = vmatmul.mubr.f32.gmra.mxu1 %v5341_v35  ;;  %5348 = vpow2.f32 %v1099_v23  ;;  %v968_v19 = vpop.f32.mrf.mxu0  ;;  %v9510_v35 = vld [vmem:[#allocation10_spill] sm:$0xff]  ;;  %v7192_v47 = vpop.permute.xlu0 %3149 }
 0x220   : > { %4813 = vmatpush3.xpose.msk.msra.mxu1 %vm701_vm0, %v6651_v24  ;;  %5350 = vpow2.f32 %v1101_v58  ;;  %v687_v24 = vld [vmem:[%s6936_s9 + $0x90] sm:$0xff]  ;;  %v7162_v17 = vadd.f32 %v968_v19, %v688_v14  ;;  %v7210_v14 = vpop.permute.xlu1 %3147 }
 0x221   : > { %4814 = vmatprep.subr.msk.mxu1 %vm701_vm0, %v6663_v30  ;;  %9517 = vst [vmem:[#allocation7_spill] sm:$0xff] %v7210_v14  ;;  %v9518_v19 = vld [vmem:[#allocation13_spill] sm:$0xff] }
 0x224   : > { %4815 = vmatpush3.xpose.msk.msra.mxu1 %vm701_vm0, %v6639_v16  ;;  %1032 = vmax.xlane.f32.xlu0 %v1031_v60  ;;  %v7160_v16 = vadd.f32 %v966_v12, %v687_v24  ;;  %v9515_v60 = vld [vmem:[#allocation14_spill] sm:$0xff]  ;;  %v9516_v24 = vld [vmem:[#allocation11_spill] sm:$0xff] }
 0x225   : > { %4816 = vmatprep.subr.msk.mxu1 %vm701_vm0, %v6671_v36 }
 0x226   : > { %v1034_v29 = vmax.f32 %v7160_v16, %v7162_v17 }
 0x228   : > { %4817 = vmatpush3.xpose.msk.msra.mxu1 %vm701_vm0, %v6653_v26  ;;  %v5345_v38 = vpop.eup %5344 }
 0x229   : > { %4818 = vmatprep.subr.msk.mxu1 %vm701_vm0, %v6679_v44  ;;  %v5347_v28 = vpop.eup %5346 }
 0x22a   : > { %1273 = vmatprep.mubr.f32.mxu1 %v5347_v28  ;;  %v7158_v30 = vadd.f32 %v5347_v28, %v5345_v38 }
 0x22b   : > { %1274 = vmatmul.mubr.f32.gmra.mxu1 %v5345_v38 }
 0x22c   : > { %4819 = vmatpush3.xpose.msk.msra.mxu1 %vm701_vm0, %v6665_v34  ;;  %v5349_v36 = vpop.eup %5348  ;;  %v9505_v34 = vld [vmem:[#allocation3_spill] sm:$0xff] }
 0x22d   : > { %4820 = vmatprep.subr.msk.mxu1 %vm701_vm0, %v6687_v50  ;;  %v5351_v26 = vpop.eup %5350  ;;  %v9507_v50 = vld [vmem:[#allocation4_spill] sm:$0xff]  ;;  %9511 = vst [vmem:[#allocation3_spill] sm:$0xff] %v7192_v47 }
 0x22e   : > { %1278 = vmatprep.mubr.f32.mxu1 %v5351_v26  ;;  %v7168_v44 = vadd.f32 %v5351_v26, %v5349_v36 }
 0x22f   : > { %1279 = vmatmul.mubr.f32.gmra.mxu1 %v5349_v36  ;;  %v9519_v36 = vld [vmem:[#allocation15_spill] sm:$0xff] }
 0x230   : > { %4821 = vmatpush3.xpose.msk.msra.mxu1 %vm701_vm0, %v6673_v40  ;;  %1035 = vmax.xlane.f32.xlu1 %v1034_v29  ;;  %v9509_v40 = vld [vmem:[#allocation6_spill] sm:$0xff] }
 0x231   : > { %4822 = vmatprep.subr.msk.mxu1 %vm701_vm0, %v9504_v25 }
 0x234   : > { %4823 = vmatpush3.xpose.msk.msra.mxu1 %vm701_vm0, %v9505_v34 }
 0x235   : > { %4824 = vmatprep.subr.msk.mxu1 %vm701_vm0, %v9506_v62 }
 0x238   : > { %4825 = vmatpush3.xpose.msk.msra.mxu1 %vm701_vm0, %v9507_v50 }
 0x239   : > { %4826 = vmatprep.subr.msk.mxu1 %vm701_vm0, %v6711_v54 }
 0x23a   : > { %3161 = vrot.lane.b32.xlu0 %v6574_v41, %s5841_s6  ;;  %v9514_v41 = vld [vmem:[#allocation9_spill] sm:$0xff] }
 0x23c   : > { %4827 = vmatpush3.xpose.msk.msra.mxu1 %vm701_vm0, %v9509_v40  ;;  %v9520_v40 = vld [vmem:[#allocation16_spill] sm:$0xff] }
 0x23d   : > { %4828 = vmatprep.subr.msk.mxu1 %vm701_vm0, %v9510_v35  ;;  %v9521_v35 = vld [vmem:[#allocation17_spill] sm:$0xff]  ;;  %9532 = vst [vmem:[#allocation16_spill] sm:$0xff] %v7475_v53 }
 0x240   : > { %4829 = vmatpush3.xpose.msk.msra.mxu1 %vm701_vm0, %v9512_v10  ;;  %v691_v10 = vld [vmem:[%s6936_s9 + $0xb0] sm:$0xff] }
 0x241   : > { %4830 = vmatprep.subr.msk.mxu1 %vm701_vm0, %v9513_v42  ;;  %3159 = vrot.lane.b32.xlu1 %v6563_v39, %s5841_s6  ;;  %v972_v39 = vpop.f32.mrf.mxu0  ;;  %v692_v42 = vld [vmem:[%s6936_s9 + $0xb8] sm:$0xff] }
 0x243   : > { %v1021_v54 = vpop.xlane.xlu0 %1020  ;;  %v974_v28 = vpop.f32.mrf.mxu0 }
 0x244   : > { %4831 = vmatpush3.xpose.msk.msra.mxu1 %vm701_vm0, %v9514_v41  ;;  %v1063_v23 = vsub.f32 %v7020_v48, %v1021_v54  ;;  %v1064_v58 = vsub.f32 %v7022_v43, %v1021_v54  ;;  %v689_v48 = vld [vmem:[%s6936_s9 + $0xa0] sm:$0xff]  ;;  %v690_v43 = vld [vmem:[%s6936_s9 + $0xa8] sm:$0xff] }
 0x245   : > { %4832 = vmatprep.subr.msk.mxu1 %vm701_vm0, %v9515_v60  ;;  %v7224_v25 = vadd.f32 %v972_v39, %v689_v48  ;;  %v7226_v34 = vadd.f32 %v974_v28, %v690_v43 }
 0x246   : > { %v1103_v12 = vmul.f32 1.442695, %v1063_v23  ;;  %v1105_v38 = vmul.f32 1.442695, %v1064_v58 }
 0x248   : > { %5352 = vpow2.f32 %v1103_v12  ;;  %4833 = vmatpush3.xpose.msk.msra.mxu1 %vm701_vm0, %v9516_v24 }
 0x249   : > { %5354 = vpow2.f32 %v1105_v38  ;;  %4834 = vmatprep.subr.msk.mxu1 %vm701_vm0, %v6743_v0  ;;  %v7252_v38 = vpop.permute.xlu0 %3153 }
 0x24a   : > { %9522 = vst [vmem:[#allocation4_spill] sm:$0xff] %v7252_v38  ;;  %v7463_v38 = vld [vmem:[%s6269_s5 + $0x20] sm:$0xff] }
 0x24c   : > { %4835 = vmatpush3.xpose.msk.msra.mxu1 %vm701_vm0, %v9518_v19 }
 0x24d   : > { %4836 = vmatprep.subr.msk.mxu1 %vm701_vm0, %v6751_v56 }
 0x24f   : > { %v1024_v26 = vpop.xlane.xlu1 %1023 }
 0x250   : > { %4837 = vmatpush3.xpose.msk.msra.mxu1 %vm701_vm0, %v9519_v36  ;;  %v1065_v0 = vsub.f32 %v7040_v32, %v1024_v26  ;;  %v1066_v29 = vsub.f32 %v7042_v21, %v1024_v26  ;;  %v1037_v32 = vmax.f32 %v7224_v25, %v7226_v34  ;;  %v693_v26 = vld [vmem:[%s6936_s9 + $0xc0] sm:$0xff] }
 0x251   : > { %4838 = vmatprep.subr.msk.mxu1 %vm701_vm0, %v6759_v4 }
 0x252   : > { %v1107_v62 = vmul.f32 1.442695, %v1065_v0  ;;  %v1109_v56 = vmul.f32 1.442695, %v1066_v29  ;;  %v694_v0 = vld [vmem:[%s6936_s9 + $0xc8] sm:$0xff] }
 0x253   : > { %v7258_v36 = vpop.permute.xlu1 %3151 }
 0x254   : > { %4839 = vmatpush3.xpose.msk.msra.mxu1 %vm701_vm0, %v6745_v46  ;;  %5356 = vpow2.f32 %v1107_v62  ;;  %v978_v46 = vpop.f32.mrf.mxu0  ;;  %9523 = vst [vmem:[#allocation6_spill] sm:$0xff] %v7258_v36  ;;  %v7468_v36 = vld [vmem:[%s6269_s5 + $0x80] sm:$0xff] }
 0x255   : > { %v5353_v50 = vpop.eup %5352  ;;  %4840 = vmatprep.subr.msk.mxu1 %vm701_vm0, %v6767_v1  ;;  %5358 = vpow2.f32 %v1109_v56  ;;  %v7242_v54 = vadd.f32 %v978_v46, %v691_v10  ;;  %v696_v46 = vld [vmem:[%s6936_s9 + $0xd8] sm:$0xff] }
 0x256   : > { %v5355_v4 = vpop.eup %5354  ;;  %v980_v1 = vpop.f32.mrf.mxu0 }
 0x257   : > { %1283 = vmatprep.mubr.f32.mxu1 %v5355_v4  ;;  %v7234_v21 = vadd.f32 %v5355_v4, %v5353_v50  ;;  %v7244_v41 = vadd.f32 %v980_v1, %v692_v42 }
 0x258   : > { %4841 = vmatpush3.xpose.msk.msra.mxu1 %vm701_vm0, %v9520_v40  ;;  %v984_v28 = vpop.f32.mrf.mxu0 }
 0x259   : > { %1284 = vmatmul.mubr.f32.gmra.mxu1 %v5353_v50  ;;  %4954 = vmatprep.subr.msk.mxu1 %vm701_vm0, %v9521_v35  ;;  %v1040_v12 = vmax.f32 %v7242_v54, %v7244_v41 }
 0x25a   : > { %1038 = vmax.xlane.f32.xlu0 %v1037_v32 }
 0x261   : > { %v5357_v23 = vpop.eup %5356 }
 0x262   : > { %v5359_v58 = vpop.eup %5358 }
 0x263   : > { %1288 = vmatprep.mubr.f32.mxu1 %v5359_v58  ;;  %v7246_v60 = vadd.f32 %v5359_v58, %v5357_v23 }
 0x264   : > { %1289 = vmatmul.mubr.f32.gmra.mxu1 %v5357_v23 }
 0x265   : > { %1041 = vmax.xlane.f32.xlu1 %v1040_v12 }
 0x270   : > { %3165 = vrot.lane.b32.xlu0 %v6596_v49, %s5841_s6  ;;  %v986_v49 = vpop.f32.mrf.mxu0 }
 0x276   : > { %3163 = vrot.lane.b32.xlu1 %v6585_v45, %s5841_s6 }
 0x278   : > { %v1027_v24 = vpop.xlane.xlu0 %1026 }
 0x279   : > { %v1067_v39 = vsub.f32 %v7076_v27, %v1027_v24  ;;  %v1068_v19 = vsub.f32 %v7078_v59, %v1027_v24  ;;  %v7264_v27 = vadd.f32 %v984_v28, %v693_v26  ;;  %v7266_v59 = vadd.f32 %v986_v49, %v694_v0 }
 0x27b   : > { %v1111_v48 = vmul.f32 1.442695, %v1067_v39  ;;  %v1113_v43 = vmul.f32 1.442695, %v1068_v19  ;;  %v1043_v40 = vmax.f32 %v7264_v27, %v7266_v59 }
 0x27c   : > { %v7284_v39 = vpop.permute.xlu0 %3157 }
 0x27d   : > { %5360 = vpow2.f32 %v1111_v48  ;;  %9524 = vst [vmem:[#allocation10_spill] sm:$0xff] %v7284_v39  ;;  %v7456_v39 = vld [vmem:[%s6269_s5 + $0x88] sm:$0xff] }
 0x27e   : > { %5362 = vpow2.f32 %v1113_v43  ;;  %9530 = vst [vmem:[#allocation13_spill] sm:$0xff] %v7456_v39 }
 0x284   : > { %v1030_v29 = vpop.xlane.xlu1 %1029 }
 0x285   : > { %v1069_v62 = vsub.f32 %v7096_v57, %v1030_v29  ;;  %v1070_v45 = vsub.f32 %v7098_v9, %v1030_v29  ;;  %v990_v57 = vpop.f32.mrf.mxu0  ;;  %v695_v9 = vld [vmem:[%s6936_s9 + $0xd0] sm:$0xff]  ;;  %v697_v29 = vld [vmem:[%s6936_s9 + $0xe0] sm:$0xff] }
 0x286   : > { %v7274_v42 = vadd.f32 %v990_v57, %v695_v9 }
 0x287   : > { %v1115_v56 = vmul.f32 1.442695, %v1069_v62  ;;  %v1117_v50 = vmul.f32 1.442695, %v1070_v45  ;;  %v992_v10 = vpop.f32.mrf.mxu0  ;;  %v698_v62 = vld [vmem:[%s6936_s9 + $0xe8] sm:$0xff] }
 0x288   : > { %v7276_v1 = vadd.f32 %v992_v10, %v696_v46  ;;  %v7290_v49 = vpop.permute.xlu1 %3155  ;;  %v700_v46 = vld [vmem:[%s6936_s9 + $0xf8] sm:$0xff] }
 0x289   : > { %5364 = vpow2.f32 %v1115_v56  ;;  %v996_v0 = vpop.f32.mrf.mxu0  ;;  %9525 = vst [vmem:[#allocation8_spill] sm:$0xff] %v7290_v49 }
 0x28a   : > { %v5361_v4 = vpop.eup %5360  ;;  %5366 = vpow2.f32 %v1117_v50  ;;  %v1046_v24 = vmax.f32 %v7274_v42, %v7276_v1 }
 0x28b   : > { %v5363_v32 = vpop.eup %5362 }
 0x28c   : > { %1293 = vmatprep.mubr.f32.mxu1 %v5363_v32  ;;  %v7270_v35 = vadd.f32 %v5363_v32, %v5361_v4 }
 0x28d   : > { %1294 = vmatmul.mubr.f32.gmra.mxu1 %v5361_v4 }
 0x28f   : > { %1044 = vmax.xlane.f32.xlu0 %v1043_v40 }
 0x296   : > { %v5365_v23 = vpop.eup %5364 }
 0x297   : > { %v5367_v58 = vpop.eup %5366 }
 0x298   : > { %1298 = vmatprep.mubr.f32.mxu1 %v5367_v58  ;;  %v7278_v12 = vadd.f32 %v5367_v58, %v5365_v23 }
 0x299   : > { %1299 = vmatmul.mubr.f32.gmra.mxu1 %v5365_v23 }
 0x29a   : > { %1047 = vmax.xlane.f32.xlu1 %v1046_v24 }
 0x2a5   : > { %3169 = vrot.lane.b32.xlu0 %v6618_v55, %s5841_s6  ;;  %v998_v55 = vpop.f32.mrf.mxu0 }
 0x2ab   : > { %3167 = vrot.lane.b32.xlu1 %v6607_v51, %s5841_s6 }
 0x2ad   : > { %v1033_v19 = vpop.xlane.xlu0 %1032 }
 0x2ae   : > { %v1071_v48 = vsub.f32 %v7130_v15, %v1033_v19  ;;  %v1072_v43 = vsub.f32 %v7136_v37, %v1033_v19  ;;  %v7296_v15 = vadd.f32 %v996_v0, %v697_v29  ;;  %v7298_v37 = vadd.f32 %v998_v55, %v698_v62  ;;  %v7326_v0 = vld [vmem:[%s6269_s5 + $0xe8] sm:$0xff] }
 0x2b0   : > { %v1119_v28 = vmul.f32 1.442695, %v1071_v48  ;;  %v1121_v26 = vmul.f32 1.442695, %v1072_v43  ;;  %v1049_v57 = vmax.f32 %v7296_v15, %v7298_v37 }
 0x2b2   : > { %5368 = vpow2.f32 %v1119_v28  ;;  %v7317_v28 = vld [vmem:[%s6269_s5 + $0xf8] sm:$0xff] }
 0x2b3   : > { %5370 = vpow2.f32 %v1121_v26  ;;  %v7321_v26 = vpop.permute.xlu0 %3161 }
 0x2b4   : > { %9526 = vst [vmem:[#allocation12_spill] sm:$0xff] %v7321_v26  ;;  %v7446_v26 = vld [vmem:[%s6269_s5 + $0x90] sm:$0xff] }
 0x2b5   : > { %9529 = vst [vmem:[#allocation11_spill] sm:$0xff] %v7446_v26 }
 0x2b9   : > { %v1036_v45 = vpop.xlane.xlu1 %1035 }
 0x2ba   : > { %v1073_v56 = vsub.f32 %v7160_v16, %v1036_v45  ;;  %v1074_v51 = vsub.f32 %v7162_v17, %v1036_v45  ;;  %v1002_v16 = vpop.f32.mrf.mxu0  ;;  %v699_v17 = vld [vmem:[%s6936_s9 + $0xf0] sm:$0xff] }
 0x2bb   : > { %v7306_v23 = vadd.f32 %v1002_v16, %v699_v17  ;;  %v7367_v16 = vld [vmem:[%s6269_s5 + $0x68] sm:$0xff] }
 0x2bc   : > { %v1123_v50 = vmul.f32 1.442695, %v1073_v56  ;;  %v1125_v4 = vmul.f32 1.442695, %v1074_v51  ;;  %v1004_v10 = vpop.f32.mrf.mxu0  ;;  %v7333_v56 = vld [vmem:[%s6269_s5 + $0x78] sm:$0xff]  ;;  %v7372_v17 = vld [vmem:[%s6269_s5 + $0xc8] sm:$0xff] }
 0x2bd   : > { %v7308_v58 = vadd.f32 %v1004_v10, %v700_v46  ;;  %v7352_v51 = vpop.permute.xlu1 %3159 }
 0x2be   : > { %5372 = vpow2.f32 %v1123_v50  ;;  %9527 = vst [vmem:[#allocation9_spill] sm:$0xff] %v7352_v51  ;;  %v7355_v50 = vld [vmem:[%s6269_s5 + $0x70] sm:$0xff]  ;;  %v7451_v51 = vld [vmem:[%s6269_s5 + $0x28] sm:$0xff] }
 0x2bf   : > { %v5369_v32 = vpop.eup %5368  ;;  %5374 = vpow2.f32 %v1125_v4  ;;  %v1052_v48 = vmax.f32 %v7306_v23, %v7308_v58  ;;  %v7360_v4 = vld [vmem:[%s6269_s5 + $0xd0] sm:$0xff] }
 0x2c0   : > { %v5371_v40 = vpop.eup %5370 }
 0x2c1   : > { %1303 = vmatprep.mubr.f32.mxu1 %v5371_v40  ;;  %v7302_v9 = vadd.f32 %v5371_v40, %v5369_v32 }
 0x2c2   : > { %1304 = vmatmul.mubr.f32.gmra.mxu1 %v5369_v32 }
 0x2c4   : > { %1050 = vmax.xlane.f32.xlu0 %v1049_v57 }
 0x2cb   : > { %v5373_v24 = vpop.eup %5372 }
 0x2cc   : > { %v5375_v19 = vpop.eup %5374 }
 0x2cd   : > { %1308 = vmatprep.mubr.f32.mxu1 %v5375_v19  ;;  %v7312_v43 = vadd.f32 %v5375_v19, %v5373_v24  ;;  %v7382_v19 = vld [vmem:[%s6269_s5 + $0xc0] sm:$0xff] }
 0x2ce   : > { %1309 = vmatmul.mubr.f32.gmra.mxu1 %v5373_v24 }
 0x2cf   : > { %1053 = vmax.xlane.f32.xlu1 %v1052_v48 }
 0x2da   : > { %3173 = vrot.lane.b32.xlu0 %v6647_v20, %s5841_s6 }
 0x2de   : > { %2048 = vrot.lane.b32.xlu0 %v7317_v28, %s5839_s13 }
 0x2e0   : > { %3171 = vrot.lane.b32.xlu1 %v6632_v61, %s5841_s6  ;;  %v7338_v61 = vld [vmem:[%s6269_s5 + $0xe0] sm:$0xff] }
 0x2e2   : > { %2044 = vrot.lane.b32.xlu0 %v7326_v0, %s5839_s13 }
 0x2e3   : > { %v1039_v29 = vpop.xlane.xlu0 %1038 }
 0x2e4   : > { %v1075_v20 = vsub.f32 %v7224_v25, %v1039_v29  ;;  %v1076_v62 = vsub.f32 %v7226_v34, %v1039_v29  ;;  %2016 = vrot.lane.b32.xlu1 %v7333_v56, %s5839_s13  ;;  %v7343_v25 = vld [vmem:[%s6269_s5 + $0xf0] sm:$0xff]  ;;  %v7348_v34 = vld [vmem:[%s6269_s5 + $0xd8] sm:$0xff] }
 0x2e5   : > { %v7389_v29 = vld [vmem:[%s6269_s5 + $0x58] sm:$0xff] }
 0x2e6   : > { %v1127_v55 = vmul.f32 1.442695, %v1075_v20  ;;  %v1129_v45 = vmul.f32 1.442695, %v1076_v62  ;;  %2042 = vrot.lane.b32.xlu0 %v7338_v61, %s5839_s13  ;;  %v7394_v20 = vld [vmem:[%s6269_s5 + $0xb8] sm:$0xff]  ;;  %v7399_v62 = vld [vmem:[%s6269_s5 + $0x50] sm:$0xff] }
 0x2e7   : > { %v7460_v49 = vpop.permute.xlu0 %3165 }
 0x2e8   : > { %5376 = vpow2.f32 %v1127_v55  ;;  %2046 = vrot.lane.b32.xlu1 %v7343_v25, %s5839_s13  ;;  %v7404_v55 = vld [vmem:[%s6269_s5 + $0xb0] sm:$0xff]  ;;  %9531 = vst [vmem:[#allocation15_spill] sm:$0xff] %v7460_v49 }
 0x2e9   : > { %5378 = vpow2.f32 %v1129_v45 }
 0x2ea   : > { %2040 = vrot.lane.b32.xlu0 %v7348_v34, %s5839_s13 }
 0x2ec   : > { %2014 = vrot.lane.b32.xlu1 %v7355_v50, %s5839_s13 }
 0x2ee   : > { %2038 = vrot.lane.b32.xlu0 %v7360_v4, %s5839_s13  ;;  %v1042_v32 = vpop.xlane.xlu1 %1041 }
 0x2ef   : > { %v1077_v40 = vsub.f32 %v7242_v54, %v1042_v32  ;;  %v1078_v57 = vsub.f32 %v7244_v41, %v1042_v32  ;;  %v7377_v41 = vld [vmem:[%s6269_s5 + $0x60] sm:$0xff]  ;;  %v7409_v32 = vld [vmem:[%s6269_s5 + $0x48] sm:$0xff] }
 0x2f0   : > { %2012 = vrot.lane.b32.xlu1 %v7367_v16, %s5839_s13 }
 0x2f1   : > { %v1131_v46 = vmul.f32 1.442695, %v1077_v40  ;;  %v1133_v10 = vmul.f32 1.442695, %v1078_v57  ;;  %v7414_v40 = vld [vmem:[%s6269_s5 + $0xa8] sm:$0xff] }
 0x2f2   : > { %2036 = vrot.lane.b32.xlu0 %v7372_v17, %s5839_s13 }
 0x2f3   : > { %5380 = vpow2.f32 %v1131_v46 }
 0x2f4   : > { %5382 = vpow2.f32 %v1133_v10  ;;  %2010 = vrot.lane.b32.xlu1 %v7377_v41, %s5839_s13  ;;  %v7421_v10 = vld [vmem:[%s6269_s5 + $0x40] sm:$0xff] }
 0x2f5   : > { %v5377_v24 = vpop.eup %5376 }
 0x2f6   : > { %v5379_v54 = vpop.eup %5378  ;;  %2034 = vrot.lane.b32.xlu0 %v7382_v19, %s5839_s13 }
 0x2f7   : > { %1313 = vmatprep.mubr.f32.mxu1 %v5379_v54  ;;  %v7386_v48 = vadd.f32 %v5379_v54, %v5377_v24  ;;  %v7431_v54 = vld [vmem:[%s6269_s5 + $0x38] sm:$0xff] }
 0x2f8   : > { %1314 = vmatmul.mubr.f32.gmra.mxu1 %v5377_v24  ;;  %2008 = vrot.lane.b32.xlu1 %v7389_v29, %s5839_s13  ;;  %v7426_v24 = vld [vmem:[%s6269_s5 + $0xa0] sm:$0xff] }
 0x2f9   : > { %9528 = vst [vmem:[#allocation14_spill] sm:$0xff] %v7426_v24 }
 0x2fa   : > { %2032 = vrot.lane.b32.xlu0 %v7394_v20, %s5839_s13 }
 0x2fc   : > { %2006 = vrot.lane.b32.xlu1 %v7399_v62, %s5839_s13 }
 0x2fe   : > { %2030 = vrot.lane.b32.xlu0 %v7404_v55, %s5839_s13 }
 0x300   : > { %v5381_v45 = vpop.eup %5380  ;;  %2004 = vrot.lane.b32.xlu1 %v7409_v32, %s5839_s13 }
 0x301   : > { %v5383_v57 = vpop.eup %5382 }
 0x302   : > { %2028 = vrot.lane.b32.xlu0 %v7414_v40, %s5839_s13  ;;  %1318 = vmatprep.mubr.f32.mxu1 %v5383_v57  ;;  %v7418_v46 = vadd.f32 %v5383_v57, %v5381_v45  ;;  %v7436_v57 = vld [vmem:[%s6269_s5 + $0x98] sm:$0xff] }
 0x303   : > { %1319 = vmatmul.mubr.f32.gmra.mxu1 %v5381_v45  ;;  %v7441_v45 = vld [vmem:[%s6269_s5 + $0x30] sm:$0xff] }
 0x304   : > { %2002 = vrot.lane.b32.xlu1 %v7421_v10, %s5839_s13 }
 0x306   : > { %2026 = vrot.lane.b32.xlu0 %v7426_v24, %s5839_s13 }
 0x308   : > { %2000 = vrot.lane.b32.xlu1 %v7431_v54, %s5839_s13 }
 0x30a   : > { %2024 = vrot.lane.b32.xlu0 %v7436_v57, %s5839_s13 }
 0x30c   : > { %1998 = vrot.lane.b32.xlu1 %v7441_v45, %s5839_s13 }
 0x30e   : > { %2022 = vrot.lane.b32.xlu0 %v7446_v26, %s5839_s13  ;;  %v7484_v26 = vpop.permute.xlu1 %3163 }
 0x30f   : > { %9534 = vst [vmem:[#allocation104_spill] sm:$0xff] %v7484_v26 }
 0x310   : > { %1996 = vrot.lane.b32.xlu1 %v7451_v51, %s5839_s13 }
 0x312   : > { %2020 = vrot.lane.b32.xlu0 %v7456_v39, %s5839_s13  ;;  %v7480_v39 = vld [vmem:[%s6269_s5 + $0x10] sm:$0xff] }
 0x313   : > { %9533 = vst [vmem:[#allocation17_spill] sm:$0xff] %v7480_v39 }
 0x314   : > { %1994 = vrot.lane.b32.xlu1 %v7463_v38, %s5839_s13 }
 0x316   : > { %2018 = vrot.lane.b32.xlu0 %v7468_v36, %s5839_s13 }
 0x318   : > { %v1045_v47 = vpop.xlane.xlu0 %1044  ;;  %1992 = vrot.lane.b32.xlu1 %v7475_v53, %s5839_s13 }
 0x319   : > { %v1079_v14 = vsub.f32 %v7264_v27, %v1045_v47  ;;  %v1080_v31 = vsub.f32 %v7266_v59, %v1045_v47  ;;  %v7487_v27 = vld [vmem:[%s6269_s5 + $0x8] sm:$0xff] }
 0x31b   : > { %v1135_v49 = vmul.f32 1.442695, %v1079_v14  ;;  %v1137_v33 = vmul.f32 1.442695, %v1080_v31  ;;  %v7494_v31 = vld [vmem:[%s6269_s5] sm:$0xff] }
 0x31c   : > { %1990 = vrot.lane.b32.xlu1 %v7480_v39, %s5839_s13 }
 0x31d   : > { %5384 = vpow2.f32 %v1135_v49 }
 0x31e   : > { %5386 = vpow2.f32 %v1137_v33 }
 0x320   : > { %1988 = vrot.lane.b32.xlu1 %v7487_v27, %s5839_s13 }
 0x323   : > { %v1048_v47 = vpop.xlane.xlu1 %1047 }
 0x324   : > { %v1081_v59 = vsub.f32 %v7274_v42, %v1048_v47  ;;  %v1082_v14 = vsub.f32 %v7276_v1, %v1048_v47  ;;  %1986 = vrot.lane.b32.xlu1 %v7494_v31, %s5839_s13  ;;  %v7503_v42 = vpop.permute.xlu0 %3169 }
 0x326   : > { %v1139_v33 = vmul.f32 1.442695, %v1081_v59  ;;  %v1141_v49 = vmul.f32 1.442695, %v1082_v14 }
 0x328   : > { %5388 = vpow2.f32 %v1139_v33 }
 0x329   : > { %5390 = vpow2.f32 %v1141_v49 }
 0x32a   : > { %v5385_v39 = vpop.eup %5384 }
 0x32b   : > { %v5387_v26 = vpop.eup %5386 }
 0x32c   : > { %1323 = vmatprep.mubr.f32.mxu1 %v5387_v26  ;;  %v1187_v1 = vadd.f32 %v5387_v26, %v5385_v39 }
 0x32d   : > { %1324 = vmatmul.mubr.f32.gmra.mxu1 %v5385_v39  ;;  %v7513_v39 = vpop.permute.xlu1 %3167 }
 0x335   : > { %1152 = vadd.xlane.f32.xlu0 %v7128_v52  ;;  %v5389_v53 = vpop.eup %5388 }
 0x336   : > { %v5391_v24 = vpop.eup %5390 }
 0x337   : > { %1328 = vmatprep.mubr.f32.mxu1 %v5391_v24 }
 0x338   : > { %1329 = vmatmul.mubr.f32.gmra.mxu1 %v5389_v53 }
 0x339   : > { %1158 = vadd.xlane.f32.xlu0 %v7158_v30 }
 0x33d   : > { %1164 = vadd.xlane.f32.xlu0 %v7234_v21  ;;  %v1190_v21 = vadd.f32 %v5391_v24, %v5389_v53 }
 0x341   : > { %1170 = vadd.xlane.f32.xlu0 %v7270_v35 }
 0x345   : > { %1176 = vadd.xlane.f32.xlu0 %v7302_v9 }
 0x348   : > { %1155 = vadd.xlane.f32.xlu1 %v7140_v63 }
 0x349   : > { %1182 = vadd.xlane.f32.xlu0 %v7386_v48 }
 0x34c   : > { %1161 = vadd.xlane.f32.xlu1 %v7168_v44 }
 0x34d   : > { %1188 = vadd.xlane.f32.xlu0 %v1187_v1  ;;  %v1051_v52 = vpop.xlane.xlu0 %1050 }
 0x34e   : > { %v1083_v47 = vsub.f32 %v7296_v15, %v1051_v52  ;;  %v1084_v30 = vsub.f32 %v7298_v37, %v1051_v52 }
 0x350   : > { %v1143_v59 = vmul.f32 1.442695, %v1083_v47  ;;  %v1145_v35 = vmul.f32 1.442695, %v1084_v30  ;;  %1167 = vadd.xlane.f32.xlu1 %v7246_v60 }
 0x351   : > { %1191 = vadd.xlane.f32.xlu0 %v1190_v21  ;;  %v7510_v9 = vpop.permute.xlu0 %3173 }
 0x352   : > { %5392 = vpow2.f32 %v1143_v59 }
 0x353   : > { %5394 = vpow2.f32 %v1145_v35 }
 0x354   : > { %1173 = vadd.xlane.f32.xlu1 %v7278_v12 }
 0x355   : > { %v2049_v63 = vpop.permute.xlu0 %2048 }
 0x356   : > { %4874 = vmatprep.subr.mxu0 %v2049_v63 }
 0x358   : > { %v1054_v37 = vpop.xlane.xlu1 %1053  ;;  %1179 = vadd.xlane.f32.xlu1 %v7312_v43 }
 0x359   : > { %v2045_v15 = vpop.permute.xlu0 %2044  ;;  %v1085_v53 = vsub.f32 %v7306_v23, %v1054_v37  ;;  %v1086_v44 = vsub.f32 %v7308_v58, %v1054_v37  ;;  %v9535_v37 = vld [vmem:[#allocation18_spill] sm:$0xff] }
 0x35b   : > { %v1147_v26 = vmul.f32 1.442695, %v1085_v53  ;;  %v1149_v48 = vmul.f32 1.442695, %v1086_v44  ;;  %v9540_v53 = vld [vmem:[#allocation25_spill] sm:$0xff] }
 0x35c   : > { %1185 = vadd.xlane.f32.xlu1 %v7418_v46  ;;  %v7520_v60 = vpop.permute.xlu1 %3171 }
 0x35d   : > { %v2043_v24 = vpop.permute.xlu0 %2042  ;;  %5396 = vpow2.f32 %v1147_v26  ;;  %v9545_v26 = vld [vmem:[#allocation26_spill] sm:$0xff] }
 0x35e   : > { %5398 = vpow2.f32 %v1149_v48  ;;  %v9546_v48 = vld [vmem:[#allocation31_spill] sm:$0xff] }
 0x35f   : > { %v5393_v14 = vpop.eup %5392 }
 0x360   : > { %v5395_v33 = vpop.eup %5394  ;;  %v2017_v43 = vpop.permute.xlu1 %2016 }
 0x361   : > { %1333 = vmatprep.mubr.f32.mxu1 %v5395_v33  ;;  %v1193_v12 = vadd.f32 %v5395_v33, %v5393_v14  ;;  %v2041_v49 = vpop.permute.xlu0 %2040  ;;  %4875 = vmatpush3.msra.mxu0 %v2017_v43  ;;  %v9549_v33 = vld [vmem:[#allocation30_spill] sm:$0xff] }
 0x362   : > { %1334 = vmatmul.mubr.f32.gmra.mxu1 %v5393_v14  ;;  %v9548_v14 = vld [vmem:[#allocation33_spill] sm:$0xff] }
 0x363   : > { %1194 = vadd.xlane.f32.xlu0 %v1193_v12  ;;  %v9551_v12 = vld [vmem:[#allocation32_spill] sm:$0xff] }
 0x364   : > { %v2047_v58 = vpop.permute.xlu1 %2046 }
 0x365   : > { %v2039_v23 = vpop.permute.xlu0 %2038  ;;  %4876 = vmatprep.subr.mxu0 %v2047_v58  ;;  %v9555_v58 = vld [vmem:[#allocation36_spill] sm:$0xff] }
 0x368   : > { %v2015_v1 = vpop.permute.xlu1 %2014 }
 0x369   : > { %v2037_v52 = vpop.permute.xlu0 %2036  ;;  %4877 = vmatpush3.msra.mxu0 %v2015_v1  ;;  %v9556_v1 = vld [vmem:[#allocation41_spill] sm:$0xff] }
 0x36a   : > { %v5397_v46 = vpop.eup %5396  ;;  %4878 = vmatprep.subr.mxu0 %v2045_v15 }
 0x36b   : > { %v5399_v47 = vpop.eup %5398 }
 0x36c   : > { %1338 = vmatprep.mubr.f32.mxu1 %v5399_v47  ;;  %v1196_v30 = vadd.f32 %v5399_v47, %v5397_v46  ;;  %v2013_v21 = vpop.permute.xlu1 %2012  ;;  %v9560_v47 = vld [vmem:[#allocation45_spill] sm:$0xff] }
 0x36d   : > { %1339 = vmatmul.mubr.f32.gmra.mxu1 %v5397_v46  ;;  %4879 = vmatpush3.msra.mxu0 %v2013_v21  ;;  %v2035_v59 = vpop.permute.xlu0 %2034  ;;  %v9558_v46 = vld [vmem:[#allocation43_spill] sm:$0xff]  ;;  %v9562_v21 = vld [vmem:[#allocation42_spill] sm:$0xff] }
 0x36e   : > { %1197 = vadd.xlane.f32.xlu1 %v1196_v30  ;;  %4842 = vmatprep.mubr.msk.f32.mxu1 %vm701_vm0, %v6775_v2  ;;  %v7654_v30 = vpop.f32.mrf.mxu1 }
 0x36f   : > { %4880 = vmatprep.subr.mxu0 %v2043_v24  ;;  %v9547_v24 = vld [vmem:[#allocation28_spill] sm:$0xff]  ;;  %9561 = vst [vmem:[#allocation18_spill] sm:$0xff] %v7654_v30 }
 0x370   : > { %v2011_v35 = vpop.permute.xlu1 %2010 }
 0x371   : > { %4843 = vmatmul.mubr.msk.f32.vlgmr.msra.gmra.mxu1 %vm701_vm0, %v6775_v2  ;;  %4881 = vmatpush3.msra.mxu0 %v2011_v35  ;;  %v2033_v15 = vpop.permute.xlu0 %2032  ;;  %v9536_v2 = vld [vmem:[#allocation19_spill] sm:$0xff]  ;;  %v9564_v35 = vld [vmem:[#allocation44_spill] sm:$0xff] }
 0x372   : > { %4955 = vmatpush3.xpose.msk.msra.mxu1 %vm701_vm0, %v6783_v5  ;;  %4844 = vmatprep.mubr.msk.f32.mxu1 %vm701_vm0, %v6769_v6 }
 0x373   : > { %4956 = vmatprep.subr.msk.mxu1 %vm701_vm0, %v6791_v3  ;;  %4882 = vmatprep.subr.mxu0 %v2041_v49  ;;  %v9552_v49 = vld [vmem:[#allocation37_spill] sm:$0xff] }
 0x374   : > { %v2009_v63 = vpop.permute.xlu1 %2008 }
 0x375   : > { %4845 = vmatmul.mubr.msk.f32.gmra.mxu1 %vm701_vm0, %v6769_v6  ;;  %4883 = vmatpush3.msra.mxu0 %v2009_v63  ;;  %v2031_v6 = vpop.permute.xlu0 %2030  ;;  %v7668_v63 = vpop.f32.mrf.mxu1 }
 0x376   : > { %4957 = vmatpush3.xpose.msk.msra.mxu1 %vm701_vm0, %v9535_v37  ;;  %4846 = vmatprep.mubr.msk.f32.mxu1 %vm701_vm0, %v6799_v8  ;;  %9565 = vst [vmem:[#allocation19_spill] sm:$0xff] %v7668_v63 }
 0x377   : > { %4958 = vmatprep.subr.msk.mxu1 %vm701_vm0, %v9536_v2  ;;  %4884 = vmatprep.subr.mxu0 %v2039_v23  ;;  %v9554_v23 = vld [vmem:[#allocation39_spill] sm:$0xff]  ;;  %v7682_v37 = vpop.f32.mrf.mxu1  ;;  %v9570_v2 = vld [vmem:[#allocation48_spill] sm:$0xff] }
 0x378   : > { %v2007_v5 = vpop.permute.xlu1 %2006 }
 0x379   : > { %2899 = vrot.lane.b32.xlu0 %v7317_v28, %s5840_s18  ;;  %4847 = vmatmul.mubr.msk.f32.gmra.mxu1 %vm701_vm0, %v6799_v8  ;;  %v9537_v8 = vld [vmem:[#allocation20_spill] sm:$0xff] }
 0x37a   : > { %4885 = vmatpush3.msra.mxu0 %v2007_v5  ;;  %4959 = vmatpush3.xpose.msk.msra.mxu1 %vm701_vm0, %v6807_v11  ;;  %v9538_v11 = vld [vmem:[#allocation21_spill] sm:$0xff]  ;;  %9569 = vst [vmem:[#allocation20_spill] sm:$0xff] %v7682_v37  ;;  %v7696_v5 = vpop.f32.mrf.mxu1 }
 0x37b   : > { %4848 = vmatprep.mubr.msk.f32.mxu1 %vm701_vm0, %v6793_v13  ;;  %4960 = vmatprep.subr.msk.mxu1 %vm701_vm0, %v6815_v7  ;;  %9573 = vst [vmem:[#allocation21_spill] sm:$0xff] %v7696_v5  ;;  %v4442_v37 = vld [vmem:[%s6936_s9 + $0x1b0] sm:$0xff] }
 0x37c   : > { %v2005_v3 = vpop.permute.xlu1 %2004  ;;  %4886 = vmatprep.subr.mxu0 %v2037_v52  ;;  %v9557_v52 = vld [vmem:[#allocation38_spill] sm:$0xff] }
 0x37d   : > { %2865 = vrot.lane.b32.xlu0 %v7355_v50, %s5840_s18  ;;  %4849 = vmatmul.mubr.msk.f32.gmra.mxu1 %vm701_vm0, %v6793_v13  ;;  %v2029_v13 = vpop.permute.xlu0 %2028  ;;  %v9539_v50 = vld [vmem:[#allocation22_spill] sm:$0xff] }
 0x37e   : > { %4887 = vmatpush3.msra.mxu0 %v2005_v3  ;;  %4961 = vmatpush3.xpose.msk.msra.mxu1 %vm701_vm0, %v9537_v8  ;;  %v9577_v3 = vld [vmem:[#allocation57_spill] sm:$0xff]  ;;  %v9578_v8 = vld [vmem:[#allocation54_spill] sm:$0xff] }
 0x37f   : > { %4850 = vmatprep.mubr.msk.f32.mxu1 %vm701_vm0, %v6823_v18  ;;  %4962 = vmatprep.subr.msk.mxu1 %vm701_vm0, %v9538_v11  ;;  %v9579_v11 = vld [vmem:[#allocation14_spill] sm:$0xff] }
 0x380   : > { %2867 = vrot.lane.b32.xlu1 %v7333_v56, %s5840_s18  ;;  %v2003_v7 = vpop.permute.xlu1 %2002  ;;  %4888 = vmatprep.subr.mxu0 %v2035_v59  ;;  %v9563_v59 = vld [vmem:[#allocation47_spill] sm:$0xff] }
 0x381   : > { %2859 = vrot.lane.b32.xlu0 %v7389_v29, %s5840_s18  ;;  %4851 = vmatmul.mubr.msk.f32.gmra.mxu1 %vm701_vm0, %v6823_v18  ;;  %v9541_v18 = vld [vmem:[#allocation23_spill] sm:$0xff]  ;;  %v9543_v29 = vld [vmem:[#allocation24_spill] sm:$0xff]  ;;  %v2027_v44 = vpop.permute.xlu0 %2026 }
 0x382   : > { %4889 = vmatpush3.msra.mxu0 %v2003_v7  ;;  %4963 = vmatpush3.xpose.msk.msra.mxu1 %vm701_vm0, %v6831_v22  ;;  %v9542_v22 = vld [vmem:[#allocation27_spill] sm:$0xff]  ;;  %v9582_v7 = vld [vmem:[#allocation56_spill] sm:$0xff] }
 0x383   : > { %4852 = vmatprep.mubr.msk.f32.mxu1 %vm701_vm0, %v9539_v50  ;;  %4964 = vmatprep.subr.msk.mxu1 %vm701_vm0, %v9540_v53 }
 0x384   : > { %2897 = vrot.lane.b32.xlu1 %v7343_v25, %s5840_s18  ;;  %v2001_v56 = vpop.permute.xlu1 %2000  ;;  %4890 = vmatprep.subr.mxu0 %v2033_v15  ;;  %v9566_v15 = vld [vmem:[#allocation49_spill] sm:$0xff] }
 0x385   : > { %2889 = vrot.lane.b32.xlu0 %v7360_v4, %s5840_s18  ;;  %4853 = vmatmul.mubr.msk.f32.gmra.mxu1 %vm701_vm0, %v9539_v50  ;;  %v9544_v4 = vld [vmem:[#allocation29_spill] sm:$0xff]  ;;  %v9584_v50 = vld [vmem:[#allocation16_spill] sm:$0xff] }
 0x386   : > { %4891 = vmatpush3.msra.mxu0 %v2001_v56  ;;  %4965 = vmatpush3.xpose.msk.msra.mxu1 %vm701_vm0, %v9541_v18  ;;  %v9587_v56 = vld [vmem:[#allocation63_spill] sm:$0xff]  ;;  %v9588_v18 = vld [vmem:[#allocation60_spill] sm:$0xff] }
 0x387   : > { %4854 = vmatprep.mubr.msk.f32.mxu1 %vm701_vm0, %v9542_v22  ;;  %4966 = vmatprep.subr.msk.mxu1 %vm701_vm0, %v9543_v29 }
 0x388   : > { %2895 = vrot.lane.b32.xlu1 %v7326_v0, %s5840_s18  ;;  %v1999_v25 = vpop.permute.xlu1 %1998  ;;  %4892 = vmatprep.subr.mxu0 %v2031_v6  ;;  %v9574_v6 = vld [vmem:[#allocation55_spill] sm:$0xff] }
 0x389   : > { %2887 = vrot.lane.b32.xlu0 %v7372_v17, %s5840_s18  ;;  %4855 = vmatmul.mubr.msk.f32.gmra.mxu1 %vm701_vm0, %v9542_v22  ;;  %v2025_v17 = vpop.permute.xlu0 %2024  ;;  %v9589_v22 = vld [vmem:[#allocation11_spill] sm:$0xff] }
 0x38a   : > { %4893 = vmatpush3.msra.mxu0 %v1999_v25  ;;  %4967 = vmatpush3.xpose.msk.msra.mxu1 %vm701_vm0, %v9544_v4  ;;  %v9592_v25 = vld [vmem:[#allocation62_spill] sm:$0xff] }
 0x38b   : > { %4856 = vmatprep.mubr.msk.f32.mxu1 %vm701_vm0, %v9545_v26  ;;  %4968 = vmatprep.subr.msk.mxu1 %vm701_vm0, %v9546_v48  ;;  %v9595_v48 = vld [vmem:[#allocation17_spill] sm:$0xff] }
 0x38c   : > { %2863 = vrot.lane.b32.xlu1 %v7367_v16, %s5840_s18  ;;  %v1997_v0 = vpop.permute.xlu1 %1996  ;;  %4894 = vmatprep.subr.mxu0 %v2029_v13  ;;  %v9583_v13 = vld [vmem:[#allocation61_spill] sm:$0xff] }
 0x38d   : > { %2851 = vrot.lane.b32.xlu0 %v7431_v54, %s5840_s18  ;;  %4857 = vmatmul.mubr.msk.f32.gmra.mxu1 %vm701_vm0, %v9545_v26  ;;  %v9550_v54 = vld [vmem:[#allocation35_spill] sm:$0xff]  ;;  %v2023_v43 = vpop.permute.xlu0 %2022 }
 0x38e   : > { %4895 = vmatpush3.msra.mxu0 %v1997_v0  ;;  %4969 = vmatpush3.xpose.msk.msra.mxu1 %vm701_vm0, %v9547_v24  ;;  %v9594_v26 = vld [vmem:[#allocation67_spill] sm:$0xff]  ;;  %v9596_v0 = vld [vmem:[#allocation64_spill] sm:$0xff] }
 0x38f   : > { %4858 = vmatprep.mubr.msk.f32.mxu1 %vm701_vm0, %v9548_v14  ;;  %4970 = vmatprep.subr.msk.mxu1 %vm701_vm0, %v9549_v33  ;;  %v9600_v33 = vld [vmem:[#allocation13_spill] sm:$0xff] }
 0x390   : > { %2893 = vrot.lane.b32.xlu1 %v7338_v61, %s5840_s18  ;;  %v1995_v16 = vpop.permute.xlu1 %1994  ;;  %4896 = vmatprep.subr.mxu0 %v2027_v44  ;;  %v9591_v44 = vld [vmem:[#allocation65_spill] sm:$0xff] }
 0x391   : > { %2881 = vrot.lane.b32.xlu0 %v7404_v55, %s5840_s18  ;;  %4859 = vmatmul.mubr.msk.f32.gmra.mxu1 %vm701_vm0, %v9548_v14  ;;  %v9553_v55 = vld [vmem:[#allocation34_spill] sm:$0xff] }
 0x392   : > { %4897 = vmatpush3.msra.mxu0 %v1995_v16  ;;  %4971 = vmatpush3.xpose.msk.msra.mxu1 %vm701_vm0, %v9550_v54  ;;  %v9599_v14 = vld [vmem:[#allocation66_spill] sm:$0xff]  ;;  %v9602_v54 = vld [vmem:[#allocation71_spill] sm:$0xff] }
 0x393   : > { %4860 = vmatprep.mubr.msk.f32.mxu1 %vm701_vm0, %v9551_v12  ;;  %4972 = vmatprep.subr.msk.mxu1 %vm701_vm0, %v9552_v49  ;;  %v9604_v49 = vld [vmem:[#allocation73_spill] sm:$0xff] }
 0x394   : > { %2861 = vrot.lane.b32.xlu1 %v7377_v41, %s5840_s18  ;;  %v1993_v61 = vpop.permute.xlu1 %1992  ;;  %4898 = vmatprep.subr.mxu0 %v2025_v17  ;;  %v9597_v17 = vld [vmem:[#allocation69_spill] sm:$0xff] }
 0x395   : > { %2849 = vrot.lane.b32.xlu0 %v7441_v45, %s5840_s18  ;;  %4861 = vmatmul.mubr.msk.f32.gmra.mxu1 %vm701_vm0, %v9551_v12  ;;  %v2021_v45 = vpop.permute.xlu0 %2020  ;;  %v9603_v12 = vld [vmem:[#allocation68_spill] sm:$0xff] }
 0x396   : > { %4899 = vmatpush3.msra.mxu0 %v1993_v61  ;;  %4973 = vmatpush3.xpose.msk.msra.mxu1 %vm701_vm0, %v9553_v55  ;;  %v9606_v61 = vld [vmem:[#allocation70_spill] sm:$0xff]  ;;  %v9607_v55 = vld [vmem:[#allocation75_spill] sm:$0xff] }
 0x397   : > { %4862 = vmatprep.mubr.msk.f32.mxu1 %vm701_vm0, %v9554_v23  ;;  %4974 = vmatprep.subr.msk.mxu1 %vm701_vm0, %v9555_v58  ;;  %v9609_v58 = vld [vmem:[#allocation72_spill] sm:$0xff] }
 0x398   : > { %2891 = vrot.lane.b32.xlu1 %v7348_v34, %s5840_s18  ;;  %v1991_v41 = vpop.permute.xlu1 %1990  ;;  %4900 = vmatprep.subr.mxu0 %v2023_v43 }
 0x399   : > { %2879 = vrot.lane.b32.xlu0 %v7414_v40, %s5840_s18  ;;  %4863 = vmatmul.mubr.msk.f32.gmra.mxu1 %vm701_vm0, %v9554_v23  ;;  %v9559_v40 = vld [vmem:[#allocation40_spill] sm:$0xff] }
 0x39a   : > { %4901 = vmatpush3.msra.mxu0 %v1991_v41  ;;  %4975 = vmatpush3.xpose.msk.msra.mxu1 %vm701_vm0, %v9556_v1  ;;  %v9611_v41 = vld [vmem:[#allocation74_spill] sm:$0xff]  ;;  %v9613_v1 = vld [vmem:[#allocation79_spill] sm:$0xff] }
 0x39b   : > { %4864 = vmatprep.mubr.msk.f32.mxu1 %vm701_vm0, %v9557_v52  ;;  %4976 = vmatprep.subr.msk.mxu1 %vm701_vm0, %v9558_v46  ;;  %v9615_v46 = vld [vmem:[#allocation76_spill] sm:$0xff] }
 0x39c   : > { %2857 = vrot.lane.b32.xlu1 %v7399_v62, %s5840_s18  ;;  %v1989_v34 = vpop.permute.xlu1 %1988  ;;  %4902 = vmatprep.subr.mxu0 %v2021_v45  ;;  %v2019_v62 = vpop.permute.xlu0 %2018 }
 0x39d   : > { %2847 = vrot.lane.b32.xlu0 %v7451_v51, %s5840_s18  ;;  %4865 = vmatmul.mubr.msk.f32.gmra.mxu1 %vm701_vm0, %v9557_v52 }
 0x39e   : > { %4903 = vmatpush3.msra.mxu0 %v1989_v34  ;;  %4977 = vmatpush3.xpose.msk.msra.mxu1 %vm701_vm0, %v9559_v40  ;;  %v9616_v34 = vld [vmem:[#allocation81_spill] sm:$0xff]  ;;  %v9617_v40 = vld [vmem:[#allocation78_spill] sm:$0xff] }
 0x39f   : > { %4866 = vmatprep.mubr.msk.f32.mxu1 %vm701_vm0, %v9560_v47  ;;  %4978 = vmatprep.subr.msk.mxu1 %vm701_vm0, %v9562_v21  ;;  %v9619_v21 = vld [vmem:[#allocation83_spill] sm:$0xff] }
 0x3a0   : > { %2855 = vrot.lane.b32.xlu1 %v7409_v32, %s5840_s18  ;;  %v1987_v51 = vpop.permute.xlu1 %1986  ;;  %4904 = vmatprep.subr.mxu0 %v2019_v62  ;;  %v9568_v32 = vld [vmem:[#allocation51_spill] sm:$0xff]  ;;  %v9620_v62 = vld [vmem:[#allocation80_spill] sm:$0xff] }
 0x3a1   : > { %2845 = vrot.lane.b32.xlu0 %v7463_v38, %s5840_s18  ;;  %4867 = vmatmul.mubr.msk.f32.gmra.mxu1 %vm701_vm0, %v9560_v47  ;;  %v9567_v38 = vld [vmem:[#allocation46_spill] sm:$0xff] }
 0x3a2   : > { %4905 = vmatpush3.msra.mxu0 %v1987_v51  ;;  %4979 = vmatpush3.xpose.msk.msra.mxu1 %vm701_vm0, %v9563_v59  ;;  %v9622_v59 = vld [vmem:[#allocation85_spill] sm:$0xff] }
 0x3a3   : > { %4868 = vmatprep.mubr.msk.f32.mxu1 %vm701_vm0, %v9564_v35  ;;  %4980 = vmatprep.subr.msk.mxu1 %vm701_vm0, %v9566_v15  ;;  %v9624_v15 = vld [vmem:[#allocation82_spill] sm:$0xff] }
 0x3a4   : > { %2885 = vrot.lane.b32.xlu1 %v7382_v19, %s5840_s18  ;;  %v9571_v19 = vld [vmem:[#allocation53_spill] sm:$0xff] }
 0x3a5   : > { %2875 = vrot.lane.b32.xlu0 %v7436_v57, %s5840_s18  ;;  %4869 = vmatmul.mubr.msk.f32.gmra.mxu1 %vm701_vm0, %v9564_v35  ;;  %v9572_v57 = vld [vmem:[#allocation50_spill] sm:$0xff] }
 0x3a6   : > { %4981 = vmatpush3.xpose.msk.msra.mxu1 %vm701_vm0, %v9567_v38  ;;  %4870 = vmatprep.mubr.msk.f32.mxu1 %vm701_vm0, %v9568_v32  ;;  %v9625_v38 = vld [vmem:[#allocation87_spill] sm:$0xff] }
 0x3a7   : > { %4982 = vmatprep.subr.msk.mxu1 %vm701_vm0, %v9570_v2  ;;  %v9627_v2 = vld [vmem:[#allocation84_spill] sm:$0xff] }
 0x3a8   : > { %2853 = vrot.lane.b32.xlu1 %v7421_v10, %s5840_s18  ;;  %v7704_v10 = vpop.f32.mrf.mxu1 }
 0x3a9   : > { %2839 = vrot.lane.b32.xlu0 %v7487_v27, %s5840_s18  ;;  %4871 = vmatmul.mubr.msk.f32.gmra.mxu1 %vm701_vm0, %v9568_v32  ;;  %9575 = vst [vmem:[#allocation22_spill] sm:$0xff] %v7704_v10  ;;  %v9576_v27 = vld [vmem:[#allocation52_spill] sm:$0xff]  ;;  %v4436_v10 = vld [vmem:[%s6936_s9 + $0x180] sm:$0xff] }
 0x3aa   : > { %4983 = vmatpush3.xpose.msk.msra.mxu1 %vm701_vm0, %v9571_v19  ;;  %4872 = vmatprep.mubr.msk.f32.mxu1 %vm701_vm0, %v9572_v57 }
 0x3ab   : > { %4984 = vmatprep.subr.msk.mxu1 %vm701_vm0, %v9574_v6 }
 0x3ac   : > { %2883 = vrot.lane.b32.xlu1 %v7394_v20, %s5840_s18  ;;  %v9581_v20 = vld [vmem:[#allocation59_spill] sm:$0xff] }
 0x3ad   : > { %2869 = vrot.lane.b32.xlu0 %v7468_v36, %s5840_s18  ;;  %4873 = vmatmul.mubr.msk.f32.gmra.mxu1 %vm701_vm0, %v9572_v57  ;;  %v7718_v36 = vpop.f32.mrf.mxu1 }
 0x3ae   : > { %4985 = vmatpush3.xpose.msk.msra.mxu1 %vm701_vm0, %v9576_v27  ;;  %4986 = vmatprep.mubr.msk.f32.mxu1 %vm701_vm0, %v9577_v3  ;;  %9580 = vst [vmem:[#allocation25_spill] sm:$0xff] %v7718_v36  ;;  %v9631_v27 = vld [vmem:[#allocation89_spill] sm:$0xff] }
 0x3af   : > { %5098 = vmatprep.subr.msk.mxu1 %vm701_vm0, %v9578_v8  ;;  %v7730_v53 = vpop.f32.mrf.mxu1  ;;  %v9633_v8 = vld [vmem:[#allocation91_spill] sm:$0xff] }
 0x3b0   : > { %2877 = vrot.lane.b32.xlu1 %v9579_v11, %s5840_s18  ;;  %9585 = vst [vmem:[#allocation23_spill] sm:$0xff] %v7730_v53  ;;  %v4448_v53 = vld [vmem:[%s6936_s9 + $0x1e0] sm:$0xff] }
 0x3b1   : > { %2837 = vrot.lane.b32.xlu0 %v7494_v31, %s5840_s18  ;;  %4987 = vmatmul.mubr.msk.f32.vlgmr.msra.gmra.mxu1 %vm701_vm0, %v9577_v3  ;;  %v9586_v31 = vld [vmem:[#allocation58_spill] sm:$0xff]  ;;  %v7742_v29 = vpop.f32.mrf.mxu1 }
 0x3b2   : > { %5099 = vmatpush3.xpose.msk.msra.mxu1 %vm701_vm0, %v9581_v20  ;;  %4988 = vmatprep.mubr.msk.f32.mxu1 %vm701_vm0, %v9582_v7  ;;  %9590 = vst [vmem:[#allocation27_spill] sm:$0xff] %v7742_v29  ;;  %v9632_v3 = vld [vmem:[#allocation86_spill] sm:$0xff] }
 0x3b3   : > { %5100 = vmatprep.subr.msk.mxu1 %vm701_vm0, %v9583_v13  ;;  %v7750_v4 = vpop.f32.mrf.mxu1  ;;  %v9637_v13 = vld [vmem:[#allocation93_spill] sm:$0xff] }
 0x3b4   : > { %2843 = vrot.lane.b32.xlu1 %v9584_v50, %s5840_s18  ;;  %9593 = vst [vmem:[#allocation24_spill] sm:$0xff] %v7750_v4 }
 0x3b5   : > { %4989 = vmatmul.mubr.msk.f32.gmra.mxu1 %vm701_vm0, %v9582_v7  ;;  %v7762_v24 = vpop.f32.mrf.mxu1  ;;  %v9636_v7 = vld [vmem:[#allocation88_spill] sm:$0xff] }
 0x3b6   : > { %5101 = vmatpush3.xpose.msk.msra.mxu1 %vm701_vm0, %v9586_v31  ;;  %4990 = vmatprep.mubr.msk.f32.mxu1 %vm701_vm0, %v9587_v56  ;;  %9598 = vst [vmem:[#allocation29_spill] sm:$0xff] %v7762_v24  ;;  %v9639_v31 = vld [vmem:[#allocation90_spill] sm:$0xff] }
 0x3b7   : > { %5102 = vmatprep.subr.msk.mxu1 %vm701_vm0, %v9588_v18  ;;  %v7768_v16 = vpop.f32.mrf.mxu1  ;;  %v9641_v18 = vld [vmem:[#allocation95_spill] sm:$0xff] }
 0x3b8   : > { %2873 = vrot.lane.b32.xlu1 %v9589_v22, %s5840_s18  ;;  %9601 = vst [vmem:[#allocation26_spill] sm:$0xff] %v7768_v16  ;;  %v9642_v22 = vld [vmem:[#allocation92_spill] sm:$0xff]  ;;  %v4444_v16 = vld [vmem:[%s6936_s9 + $0x1c0] sm:$0xff] }
 0x3b9   : > { %4991 = vmatmul.mubr.msk.f32.gmra.mxu1 %vm701_vm0, %v9587_v56  ;;  %v7780_v43 = vpop.f32.mrf.mxu1 }
 0x3ba   : > { %5103 = vmatpush3.xpose.msk.msra.mxu1 %vm701_vm0, %v9591_v44  ;;  %4992 = vmatprep.mubr.msk.f32.mxu1 %vm701_vm0, %v9592_v25  ;;  %9605 = vst [vmem:[#allocation31_spill] sm:$0xff] %v7780_v43 }
 0x3bb   : > { %5104 = vmatprep.subr.msk.mxu1 %vm701_vm0, %v9594_v26  ;;  %v7788_v23 = vpop.f32.mrf.mxu1 }
 0x3bc   : > { %2841 = vrot.lane.b32.xlu1 %v9595_v48, %s5840_s18  ;;  %9608 = vst [vmem:[#allocation28_spill] sm:$0xff] %v7788_v23 }
 0x3bd   : > { %4993 = vmatmul.mubr.msk.f32.gmra.mxu1 %vm701_vm0, %v9592_v25  ;;  %v7798_v45 = vpop.f32.mrf.mxu1  ;;  %v9644_v25 = vld [vmem:[#allocation97_spill] sm:$0xff] }
 0x3be   : > { %5105 = vmatpush3.xpose.msk.msra.mxu1 %vm701_vm0, %v9596_v0  ;;  %4994 = vmatprep.mubr.msk.f32.mxu1 %vm701_vm0, %v9597_v17  ;;  %9612 = vst [vmem:[#allocation33_spill] sm:$0xff] %v7798_v45  ;;  %v7824_v35 = vpop.xlane.xlu0 %1152 }
 0x3bf   : > { %5106 = vmatprep.subr.msk.mxu1 %vm701_vm0, %v9599_v14  ;;  %v7802_v52 = vpop.f32.mrf.mxu1  ;;  %9623 = vst [vmem:[#allocation37_spill] sm:$0xff] %v7824_v35  ;;  %v9649_v14 = vld [vmem:[#allocation99_spill] sm:$0xff] }
 0x3c0   : > { %2871 = vrot.lane.b32.xlu1 %v9600_v33, %s5840_s18  ;;  %9614 = vst [vmem:[#allocation30_spill] sm:$0xff] %v7802_v52  ;;  %v9650_v33 = vld [vmem:[#allocation96_spill] sm:$0xff] }
 0x3c1   : > { %4995 = vmatmul.mubr.msk.f32.gmra.mxu1 %vm701_vm0, %v9597_v17  ;;  %v7812_v47 = vpop.f32.mrf.mxu1  ;;  %v9648_v17 = vld [vmem:[#allocation94_spill] sm:$0xff] }
 0x3c2   : > { %5107 = vmatpush3.xpose.msk.msra.mxu1 %vm701_vm0, %v9602_v54  ;;  %4996 = vmatprep.mubr.msk.f32.mxu1 %vm701_vm0, %v9603_v12  ;;  %9618 = vst [vmem:[#allocation35_spill] sm:$0xff] %v7812_v47  ;;  %v7842_v6 = vpop.xlane.xlu0 %1158  ;;  %v4438_v47 = vld [vmem:[%s6936_s9 + $0x190] sm:$0xff] }
 0x3c3   : > { %5108 = vmatprep.subr.msk.mxu1 %vm701_vm0, %v9604_v49  ;;  %v7820_v51 = vpop.f32.mrf.mxu1  ;;  %9630 = vst [vmem:[#allocation41_spill] sm:$0xff] %v7842_v6  ;;  %v9653_v49 = vld [vmem:[#allocation101_spill] sm:$0xff] }
 0x3c4   : > { %3750 = vrot.lane.b32.xlu1 %v7317_v28, %s5841_s6  ;;  %v9610_v28 = vld [vmem:[#allocation77_spill] sm:$0xff]  ;;  %9621 = vst [vmem:[#allocation32_spill] sm:$0xff] %v7820_v51 }
 0x3c5   : > { %4997 = vmatmul.mubr.msk.f32.gmra.mxu1 %vm701_vm0, %v9603_v12  ;;  %v7832_v32 = vpop.f32.mrf.mxu1 }
 0x3c6   : > { %5109 = vmatpush3.xpose.msk.msra.mxu1 %vm701_vm0, %v9606_v61  ;;  %4998 = vmatprep.mubr.msk.f32.mxu1 %vm701_vm0, %v9607_v55  ;;  %9626 = vst [vmem:[#allocation34_spill] sm:$0xff] %v7832_v32  ;;  %v7864_v56 = vpop.xlane.xlu0 %1164  ;;  %v9654_v61 = vld [vmem:[#allocation98_spill] sm:$0xff] }
 0x3c7   : > { %5110 = vmatprep.subr.msk.mxu1 %vm701_vm0, %v9609_v58  ;;  %v7838_v57 = vpop.f32.mrf.mxu1  ;;  %9640 = vst [vmem:[#allocation45_spill] sm:$0xff] %v7864_v56 }
 0x3c8   : > { %9629 = vst [vmem:[#allocation36_spill] sm:$0xff] %v7838_v57 }
 0x3c9   : > { %4999 = vmatmul.mubr.msk.f32.gmra.mxu1 %vm701_vm0, %v9607_v55  ;;  %v7850_v11 = vpop.f32.mrf.mxu1  ;;  %v9655_v55 = vld [vmem:[#allocation102_spill] sm:$0xff] }
 0x3ca   : > { %5111 = vmatpush3.xpose.msk.msra.mxu1 %vm701_vm0, %v9610_v28  ;;  %5000 = vmatprep.mubr.msk.f32.mxu1 %vm701_vm0, %v9611_v41  ;;  %9634 = vst [vmem:[#allocation38_spill] sm:$0xff] %v7850_v11  ;;  %v7882_v0 = vpop.xlane.xlu0 %1170  ;;  %v4432_v11 = vld [vmem:[%s6936_s9 + $0x160] sm:$0xff] }
 0x3cb   : > { %5112 = vmatprep.subr.msk.mxu1 %vm701_vm0, %v9613_v1  ;;  %v7860_v50 = vpop.f32.mrf.mxu1  ;;  %9647 = vst [vmem:[#allocation49_spill] sm:$0xff] %v7882_v0 }
 0x3cc   : > { %9638 = vst [vmem:[#allocation40_spill] sm:$0xff] %v7860_v50 }
 0x3cd   : > { %5001 = vmatmul.mubr.msk.f32.gmra.mxu1 %vm701_vm0, %v9611_v41  ;;  %v7872_v44 = vpop.f32.mrf.mxu1 }
 0x3ce   : > { %5113 = vmatpush3.xpose.msk.msra.mxu1 %vm701_vm0, %v9615_v46  ;;  %5002 = vmatprep.mubr.msk.f32.mxu1 %vm701_vm0, %v9616_v34  ;;  %9643 = vst [vmem:[#allocation42_spill] sm:$0xff] %v7872_v44  ;;  %v7902_v28 = vpop.xlane.xlu0 %1176  ;;  %v9658_v46 = vld [vmem:[#allocation100_spill] sm:$0xff] }
 0x3cf   : > { %5114 = vmatprep.subr.msk.mxu1 %vm701_vm0, %v9617_v40  ;;  %v7878_v48 = vpop.f32.mrf.mxu1  ;;  %9656 = vst [vmem:[#allocation48_spill] sm:$0xff] %v7902_v28  ;;  %v4440_v28 = vld [vmem:[%s6936_s9 + $0x1a0] sm:$0xff] }
 0x3d0   : > { %9646 = vst [vmem:[#allocation44_spill] sm:$0xff] %v7878_v48 }
 0x3d1   : > { %5003 = vmatmul.mubr.msk.f32.gmra.mxu1 %vm701_vm0, %v9616_v34  ;;  %v7836_v19 = vpop.xlane.xlu1 %1155  ;;  %v7890_v54 = vpop.f32.mrf.mxu1  ;;  %v9659_v34 = vld [vmem:[#allocation103_spill] sm:$0xff] }
 0x3d2   : > { %5115 = vmatpush3.xpose.msk.msra.mxu1 %vm701_vm0, %v9619_v21  ;;  %5004 = vmatprep.mubr.msk.f32.mxu1 %vm701_vm0, %v9620_v62  ;;  %9628 = vst [vmem:[#allocation39_spill] sm:$0xff] %v7836_v19  ;;  %9651 = vst [vmem:[#allocation46_spill] sm:$0xff] %v7890_v54  ;;  %v7916_v21 = vpop.xlane.xlu0 %1182 }
 0x3d3   : > { %5116 = vmatprep.subr.msk.mxu1 %vm701_vm0, %v9622_v59  ;;  %9661 = vst [vmem:[#allocation55_spill] sm:$0xff] %v7916_v21  ;;  %v4434_v21 = vld [vmem:[%s6936_s9 + $0x170] sm:$0xff] }
 0x3d5   : > { %5005 = vmatmul.mubr.msk.f32.gmra.mxu1 %vm701_vm0, %v9620_v62  ;;  %v7854_v20 = vpop.xlane.xlu1 %1161  ;;  %v9662_v62 = vld [vmem:[#allocation5_spill] sm:$0xff] }
 0x3d6   : > { %5117 = vmatpush3.xpose.msk.msra.mxu1 %vm701_vm0, %v9624_v15  ;;  %5006 = vmatprep.mubr.msk.f32.mxu1 %vm701_vm0, %v9625_v38  ;;  %9635 = vst [vmem:[#allocation43_spill] sm:$0xff] %v7854_v20  ;;  %v9664_v15 = vld [vmem:[#allocation7_spill] sm:$0xff] }
 0x3d7   : > { %5118 = vmatprep.subr.msk.mxu1 %vm701_vm0, %v9627_v2 }
 0x3d9   : > { %5007 = vmatmul.mubr.msk.f32.gmra.mxu1 %vm701_vm0, %v9625_v38  ;;  %v7876_v26 = vpop.xlane.xlu1 %1167  ;;  %v7926_v38 = vpop.xlane.xlu0 %1188 }
 0x3da   : > { %5119 = vmatpush3.xpose.msk.msra.mxu1 %vm701_vm0, %v9631_v27  ;;  %5008 = vmatprep.mubr.msk.f32.mxu1 %vm701_vm0, %v9632_v3  ;;  %9645 = vst [vmem:[#allocation47_spill] sm:$0xff] %v7876_v26  ;;  %9665 = vst [vmem:[#allocation57_spill] sm:$0xff] %v7926_v38 }
 0x3db   : > { %5120 = vmatprep.subr.msk.mxu1 %vm701_vm0, %v9633_v8  ;;  %v9667_v8 = vld [vmem:[#allocation3_spill] sm:$0xff] }
 0x3dd   : > { %5009 = vmatmul.mubr.msk.f32.gmra.mxu1 %vm701_vm0, %v9632_v3  ;;  %v7894_v12 = vpop.xlane.xlu1 %1173 }
 0x3de   : > { %5121 = vmatpush3.xpose.msk.msra.mxu1 %vm701_vm0, %v9636_v7  ;;  %5010 = vmatprep.mubr.msk.f32.mxu1 %vm701_vm0, %v9637_v13  ;;  %9652 = vst [vmem:[#allocation51_spill] sm:$0xff] %v7894_v12 }
 0x3df   : > { %5122 = vmatprep.subr.msk.mxu1 %vm701_vm0, %v9639_v31  ;;  %v9670_v31 = vld [vmem:[#allocation6_spill] sm:$0xff] }
 0x3e1   : > { %5011 = vmatmul.mubr.msk.f32.gmra.mxu1 %vm701_vm0, %v9637_v13  ;;  %v7912_v40 = vpop.xlane.xlu1 %1179  ;;  %v7938_v13 = vpop.xlane.xlu0 %1191 }
 0x3e2   : > { %5123 = vmatpush3.xpose.msk.msra.mxu1 %vm701_vm0, %v9641_v18  ;;  %5012 = vmatprep.mubr.msk.f32.mxu1 %vm701_vm0, %v9642_v22  ;;  %9660 = vst [vmem:[#allocation50_spill] sm:$0xff] %v7912_v40  ;;  %9669 = vst [vmem:[#allocation59_spill] sm:$0xff] %v7938_v13  ;;  %v4450_v40 = vld [vmem:[%s6936_s9 + $0x1f0] sm:$0xff] }
 0x3e3   : > { %5124 = vmatprep.subr.msk.mxu1 %vm701_vm0, %v9644_v25  ;;  %v9672_v25 = vld [vmem:[#allocation4_spill] sm:$0xff] }
 0x3e5   : > { %5013 = vmatmul.mubr.msk.f32.gmra.mxu1 %vm701_vm0, %v9642_v22  ;;  %v7922_v59 = vpop.xlane.xlu1 %1185 }
 0x3e6   : > { %5125 = vmatpush3.xpose.msk.msra.mxu1 %vm701_vm0, %v9648_v17  ;;  %5014 = vmatprep.mubr.msk.f32.mxu1 %vm701_vm0, %v9649_v14  ;;  %9663 = vst [vmem:[#allocation52_spill] sm:$0xff] %v7922_v59  ;;  %v4446_v59 = vld [vmem:[%s6936_s9 + $0x1d0] sm:$0xff] }
 0x3e7   : > { %5126 = vmatprep.subr.msk.mxu1 %vm701_vm0, %v9650_v33 }
 0x3e9   : > { %5015 = vmatmul.mubr.msk.f32.gmra.mxu1 %vm701_vm0, %v9649_v14  ;;  %v9673_v14 = vld [vmem:[#allocation8_spill] sm:$0xff] }
 0x3ea   : > { %5127 = vmatpush3.xpose.msk.msra.mxu1 %vm701_vm0, %v9653_v49  ;;  %5016 = vmatprep.mubr.msk.f32.mxu1 %vm701_vm0, %v9654_v61 }
 0x3eb   : > { %5128 = vmatprep.subr.msk.mxu1 %vm701_vm0, %v9655_v55 }
 0x3ec   : > { %v7946_v22 = vpop.xlane.xlu0 %1194 }
 0x3ed   : > { %v4798_v58 = vpop.f32.mrf.mxu1  ;;  %5017 = vmatmul.mubr.msk.f32.gmra.mxu1 %vm701_vm0, %v9654_v61  ;;  %9671 = vst [vmem:[#allocation56_spill] sm:$0xff] %v7946_v22  ;;  %v9674_v61 = vld [vmem:[#allocation10_spill] sm:$0xff] }
 0x3ee   : > { %5129 = vmatpush3.xpose.msk.msra.mxu1 %vm701_vm0, %v9658_v46  ;;  %5130 = vmatprep.mubr.msk.f32.mxu1 %vm701_vm0, %v9659_v34  ;;  %v9676_v46 = vld [vmem:[#allocation12_spill] sm:$0xff] }
 0x3ef   : > { %v4799_v41 = vpop.f32.mrf.mxu1 }
 0x3f0   : > { %v7906_v1 = vadd.f32 %v4799_v41, %v4798_v58  ;;  %v2900_v49 = vpop.permute.xlu0 %2899  ;;  %v9675_v58 = vld [vmem:[#allocation9_spill] sm:$0xff] }
 0x3f1   : > { %5131 = vmatmul.mubr.msk.f32.vlgmr.msra.gmra.mxu1 %vm701_vm0, %v9659_v34  ;;  %5018 = vmatprep.subr.mxu0 %v2900_v49 }
 0x3f2   : > { %9657 = vst [vmem:[#allocation53_spill] sm:$0xff] %v7906_v1  ;;  %5132 = vmatprep.mubr.msk.f32.mxu1 %vm701_vm0, %v9662_v62 }
 0x3f5   : > { %5133 = vmatmul.mubr.msk.f32.gmra.mxu1 %vm701_vm0, %v9662_v62  ;;  %v9677_v62 = vld [vmem:[#allocation104_spill] sm:$0xff] }
 0x3f6   : > { %5134 = vmatprep.mubr.msk.f32.mxu1 %vm701_vm0, %v9664_v15 }
 0x3f7   : > { %v7930_v27 = vpop.xlane.xlu1 %1197 }
 0x3f8   : > { %v4801_v2 = vpop.f32.mrf.mxu1  ;;  %9666 = vst [vmem:[#allocation54_spill] sm:$0xff] %v7930_v27 }
 0x3f9   : > { %5135 = vmatmul.mubr.msk.f32.gmra.mxu1 %vm701_vm0, %v9664_v15 }
 0x3fa   : > { %v4802_v3 = vpop.f32.mrf.mxu1  ;;  %5136 = vmatprep.mubr.msk.f32.mxu1 %vm701_vm0, %v9667_v8 }
 0x3fb   : > { %v7934_v7 = vadd.f32 %v4802_v3, %v4801_v2  ;;  %v7942_v18 = vpop.permute.xlu1 %2867  ;;  %v9678_v2 = vld [vmem:[#allocation15_spill] sm:$0xff] }
 0x3fd   : > { %9668 = vst [vmem:[#allocation14_spill] sm:$0xff] %v7934_v7  ;;  %5137 = vmatmul.mubr.msk.f32.gmra.mxu1 %vm701_vm0, %v9667_v8 }
 0x3fe   : > { %5138 = vmatprep.mubr.msk.f32.mxu1 %vm701_vm0, %v9670_v31 }
 0x3ff   : > { %v7950_v17 = vpop.permute.xlu1 %2897 }
 0x401   : > { %5139 = vmatmul.mubr.msk.f32.gmra.mxu1 %vm701_vm0, %v9670_v31 }
 0x402   : > { %5140 = vmatprep.mubr.msk.f32.mxu1 %vm701_vm0, %v9672_v25 }
 0x403   : > { %v7956_v33 = vpop.permute.xlu1 %2895 }
 0x405   : > { %5141 = vmatmul.mubr.msk.f32.gmra.mxu1 %vm701_vm0, %v9672_v25 }
 0x406   : > { %5142 = vmatprep.mubr.msk.f32.mxu1 %vm701_vm0, %v9673_v14 }
 0x407   : > { %v7962_v55 = vpop.permute.xlu1 %2863 }
 0x409   : > { %5143 = vmatmul.mubr.msk.f32.gmra.mxu1 %vm701_vm0, %v9673_v14 }
 0x40a   : > { %5144 = vmatprep.mubr.msk.f32.mxu1 %vm701_vm0, %v9674_v61 }
 0x40b   : > { %v7968_v41 = vpop.permute.xlu1 %2893 }
 0x40d   : > { %5145 = vmatmul.mubr.msk.f32.gmra.mxu1 %vm701_vm0, %v9674_v61 }
 0x40e   : > { %5146 = vmatprep.mubr.msk.f32.mxu1 %vm701_vm0, %v9675_v58 }
 0x40f   : > { %v7974_v34 = vpop.permute.xlu1 %2861 }
 0x411   : > { %5147 = vmatmul.mubr.msk.f32.gmra.mxu1 %vm701_vm0, %v9675_v58 }
 0x412   : > { %5148 = vmatprep.mubr.msk.f32.mxu1 %vm701_vm0, %v9676_v46 }
 0x413   : > { %v7980_v15 = vpop.permute.xlu1 %2891 }
 0x415   : > { %5149 = vmatmul.mubr.msk.f32.gmra.mxu1 %vm701_vm0, %v9676_v46 }
 0x416   : > { %5150 = vmatprep.mubr.msk.f32.mxu1 %vm701_vm0, %v9677_v62 }
 0x417   : > { %v7986_v3 = vpop.permute.xlu1 %2857 }
 0x419   : > { %5151 = vmatmul.mubr.msk.f32.gmra.mxu1 %vm701_vm0, %v9677_v62 }
 0x41a   : > { %5152 = vmatprep.mubr.msk.f32.mxu1 %vm701_vm0, %v9678_v2 }
 0x41b   : > { %v7992_v8 = vpop.permute.xlu1 %2855 }
 0x41d   : > { %5153 = vmatmul.mubr.msk.f32.gmra.mxu1 %vm701_vm0, %v9678_v2  ;;  %v4420_v2 = vld [vmem:[%s6936_s9 + $0x100] sm:$0xff] }
 0x41e   : > { %5154 = vmatprep.mubr.msk.f32.mxu1 %vm701_vm0, %v7513_v39 }
 0x41f   : > { %v7998_v14 = vpop.permute.xlu1 %2885 }
 0x421   : > { %5155 = vmatmul.mubr.msk.f32.gmra.mxu1 %vm701_vm0, %v7513_v39 }
 0x422   : > { %v4804_v31 = vpop.f32.mrf.mxu1  ;;  %5156 = vmatprep.mubr.msk.f32.mxu1 %vm701_vm0, %v7503_v42 }
 0x423   : > { %v8006_v61 = vpop.permute.xlu1 %2853 }
 0x424   : > { %v4805_v25 = vpop.f32.mrf.mxu1 }
 0x425   : > { %v8000_v49 = vadd.f32 %v4805_v25, %v4804_v31  ;;  %5157 = vmatmul.mubr.msk.f32.gmra.mxu1 %vm701_vm0, %v7503_v42  ;;  %v4421_v25 = vld [vmem:[%s6936_s9 + $0x108] sm:$0xff] }
 0x426   : > { %5158 = vmatprep.mubr.msk.f32.mxu1 %vm701_vm0, %v7520_v60 }
 0x427   : > { %9679 = vst [vmem:[#allocation61_spill] sm:$0xff] %v8000_v49  ;;  %v8012_v39 = vpop.permute.xlu1 %2883  ;;  %v4422_v49 = vld [vmem:[%s6936_s9 + $0x110] sm:$0xff] }
 0x429   : > { %5159 = vmatmul.mubr.msk.f32.gmra.mxu1 %vm701_vm0, %v7520_v60 }
 0x42a   : > { %5160 = vmatprep.mubr.msk.f32.mxu1 %vm701_vm0, %v7510_v9 }
 0x42b   : > { %v8016_v42 = vpop.permute.xlu1 %2877 }
 0x42c   : > { %9680 = vst [vmem:[#allocation16_spill] sm:$0xff] %v8016_v42 }
 0x42d   : > { %v4807_v58 = vpop.f32.mrf.mxu1  ;;  %5161 = vmatmul.mubr.msk.f32.gmra.mxu1 %vm701_vm0, %v7510_v9  ;;  %v4423_v9 = vld [vmem:[%s6936_s9 + $0x118] sm:$0xff] }
 0x42f   : > { %v4808_v46 = vpop.f32.mrf.mxu1  ;;  %v8022_v60 = vpop.permute.xlu1 %2843 }
 0x430   : > { %v8018_v62 = vadd.f32 %v4808_v46, %v4807_v58  ;;  %9682 = vst [vmem:[#allocation63_spill] sm:$0xff] %v8022_v60 }
 0x431   : > { %v1667_v31 = vpop.f32.mrf.mxu1 }
 0x432   : > { %9681 = vst [vmem:[#allocation58_spill] sm:$0xff] %v8018_v62  ;;  %v8024_v30 = vadd.f32 %v4420_v2, %v1667_v31  ;;  %v4424_v2 = vld [vmem:[%s6936_s9 + $0x120] sm:$0xff] }
 0x433   : > { %v1669_v63 = vpop.f32.mrf.mxu1  ;;  %v8032_v46 = vpop.permute.xlu1 %2873 }
 0x434   : > { %v8026_v35 = vadd.f32 %v4421_v25, %v1669_v63  ;;  %9683 = vst [vmem:[#allocation60_spill] sm:$0xff] %v8032_v46  ;;  %v4425_v63 = vld [vmem:[%s6936_s9 + $0x128] sm:$0xff] }
 0x435   : > { %v1673_v1 = vpop.f32.mrf.mxu1 }
 0x436   : > { %v1762_v58 = vmax.f32 %v8024_v30, %v8026_v35  ;;  %v8034_v44 = vadd.f32 %v4422_v49, %v1673_v1  ;;  %v4426_v1 = vld [vmem:[%s6936_s9 + $0x130] sm:$0xff] }
 0x437   : > { %v1675_v62 = vpop.f32.mrf.mxu1  ;;  %v8042_v7 = vpop.permute.xlu1 %2841 }
 0x438   : > { %v8036_v50 = vadd.f32 %v4423_v9, %v1675_v62  ;;  %1763 = vmax.xlane.f32.xlu0 %v1762_v58  ;;  %9684 = vst [vmem:[#allocation11_spill] sm:$0xff] %v8042_v7  ;;  %v4427_v62 = vld [vmem:[%s6936_s9 + $0x138] sm:$0xff] }
 0x439   : > { %v1679_v31 = vpop.f32.mrf.mxu1 }
 0x43a   : > { %v1765_v25 = vmax.f32 %v8034_v44, %v8036_v50  ;;  %v8044_v32 = vadd.f32 %v4424_v2, %v1679_v31  ;;  %v4428_v2 = vld [vmem:[%s6936_s9 + $0x140] sm:$0xff]  ;;  %v4429_v31 = vld [vmem:[%s6936_s9 + $0x148] sm:$0xff] }
 0x43b   : > { %v1681_v22 = vpop.f32.mrf.mxu1  ;;  %v8052_v58 = vpop.permute.xlu1 %2871 }
 0x43c   : > { %v8046_v51 = vadd.f32 %v4425_v63, %v1681_v22  ;;  %1766 = vmax.xlane.f32.xlu1 %v1765_v25  ;;  %9685 = vst [vmem:[#allocation65_spill] sm:$0xff] %v8052_v58 }
 0x43d   : > { %v1685_v49 = vpop.f32.mrf.mxu1 }
 0x43e   : > { %v1768_v9 = vmax.f32 %v8044_v32, %v8046_v51  ;;  %v8054_v45 = vadd.f32 %v4426_v1, %v1685_v49 }
 0x43f   : > { %v1687_v38 = vpop.f32.mrf.mxu1  ;;  %v8062_v25 = vpop.permute.xlu1 %3750 }
 0x440   : > { %v8056_v23 = vadd.f32 %v4427_v62, %v1687_v38  ;;  %1769 = vmax.xlane.f32.xlu0 %v1768_v9  ;;  %9686 = vst [vmem:[#allocation62_spill] sm:$0xff] %v8062_v25  ;;  %5242 = vmatprep.subr.mxu1 %v8062_v25  ;;  %v4430_v38 = vld [vmem:[%s6936_s9 + $0x150] sm:$0xff]  ;;  %v4431_v62 = vld [vmem:[%s6936_s9 + $0x158] sm:$0xff] }
 0x441   : > { %v1691_v22 = vpop.f32.mrf.mxu1 }
 0x442   : > { %v1771_v63 = vmax.f32 %v8054_v45, %v8056_v23  ;;  %v8065_v48 = vadd.f32 %v4428_v2, %v1691_v22 }
 0x443   : > { %v1693_v54 = vpop.f32.mrf.mxu1 }
 0x444   : > { %v8067_v1 = vadd.f32 %v4429_v31, %v1693_v54  ;;  %1772 = vmax.xlane.f32.xlu1 %v1771_v63  ;;  %v4433_v54 = vld [vmem:[%s6936_s9 + $0x168] sm:$0xff] }
 0x445   : > { %v1697_v49 = vpop.f32.mrf.mxu1 }
 0x446   : > { %v1774_v9 = vmax.f32 %v8065_v48, %v8067_v1  ;;  %v8073_v4 = vadd.f32 %v4430_v38, %v1697_v49 }
 0x447   : > { %v1699_v24 = vpop.f32.mrf.mxu1 }
 0x448   : > { %v8075_v27 = vadd.f32 %v4431_v62, %v1699_v24  ;;  %1775 = vmax.xlane.f32.xlu0 %v1774_v9  ;;  %v4435_v24 = vld [vmem:[%s6936_s9 + $0x178] sm:$0xff] }
 0x449   : > { %v1703_v2 = vpop.f32.mrf.mxu1 }
 0x44a   : > { %v1777_v22 = vmax.f32 %v8073_v4, %v8075_v27  ;;  %v8081_v63 = vadd.f32 %v4432_v11, %v1703_v2  ;;  %v4437_v2 = vld [vmem:[%s6936_s9 + $0x188] sm:$0xff] }
 0x44b   : > { %v1705_v31 = vpop.f32.mrf.mxu1 }
 0x44c   : > { %v8083_v57 = vadd.f32 %v4433_v54, %v1705_v31  ;;  %1778 = vmax.xlane.f32.xlu1 %v1777_v22 }
 0x44d   : > { %v1709_v38 = vpop.f32.mrf.mxu1 }
 0x44e   : > { %v1780_v49 = vmax.f32 %v8081_v63, %v8083_v57  ;;  %v8089_v9 = vadd.f32 %v4434_v21, %v1709_v38  ;;  %v4439_v38 = vld [vmem:[%s6936_s9 + $0x198] sm:$0xff] }
 0x44f   : > { %v1711_v62 = vpop.f32.mrf.mxu1 }
 0x450   : > { %v8091_v36 = vadd.f32 %v4435_v24, %v1711_v62  ;;  %1781 = vmax.xlane.f32.xlu0 %v1780_v49 }
 0x451   : > { %v1715_v11 = vpop.f32.mrf.mxu1 }
 0x452   : > { %v1783_v54 = vmax.f32 %v8089_v9, %v8091_v36  ;;  %v8097_v31 = vadd.f32 %v4436_v10, %v1715_v11  ;;  %v4441_v11 = vld [vmem:[%s6936_s9 + $0x1a8] sm:$0xff] }
 0x453   : > { %v1717_v22 = vpop.f32.mrf.mxu1 }
 0x454   : > { %v8099_v13 = vadd.f32 %v4437_v2, %v1717_v22  ;;  %1784 = vmax.xlane.f32.xlu1 %v1783_v54 }
 0x455   : > { %v1721_v21 = vpop.f32.mrf.mxu1 }
 0x456   : > { %v1786_v24 = vmax.f32 %v8097_v31, %v8099_v13  ;;  %v8105_v62 = vadd.f32 %v4438_v47, %v1721_v21  ;;  %v4443_v21 = vld [vmem:[%s6936_s9 + $0x1b8] sm:$0xff] }
 0x457   : > { %v1723_v49 = vpop.f32.mrf.mxu1 }
 0x458   : > { %v8107_v52 = vadd.f32 %v4439_v38, %v1723_v49  ;;  %1787 = vmax.xlane.f32.xlu0 %v1786_v24 }
 0x459   : > { %v1727_v10 = vpop.f32.mrf.mxu1 }
 0x45a   : > { %v1789_v2 = vmax.f32 %v8105_v62, %v8107_v52  ;;  %v8113_v22 = vadd.f32 %v4440_v28, %v1727_v10  ;;  %v4445_v10 = vld [vmem:[%s6936_s9 + $0x1c8] sm:$0xff] }
 0x45b   : > { %v1729_v54 = vpop.f32.mrf.mxu1 }
 0x45c   : > { %9687 = vst [vmem:[#allocation67_spill] sm:$0xff] %v8113_v22  ;;  %v8115_v5 = vadd.f32 %v4441_v11, %v1729_v54  ;;  %1790 = vmax.xlane.f32.xlu1 %v1789_v2 }
 0x45d   : > { %v1733_v47 = vpop.f32.mrf.mxu1 }
 0x45e   : > { %9688 = vst [vmem:[#allocation17_spill] sm:$0xff] %v8115_v5  ;;  %v1792_v38 = vmax.f32 %v8113_v22, %v8115_v5  ;;  %v8121_v49 = vadd.f32 %v4442_v37, %v1733_v47  ;;  %v4447_v47 = vld [vmem:[%s6936_s9 + $0x1d8] sm:$0xff] }
 0x45f   : > { %v1735_v24 = vpop.f32.mrf.mxu1 }
 0x460   : > { %9689 = vst [vmem:[#allocation64_spill] sm:$0xff] %v8121_v49  ;;  %v8123_v43 = vadd.f32 %v4443_v21, %v1735_v24  ;;  %1793 = vmax.xlane.f32.xlu0 %v1792_v38 }
 0x461   : > { %v1739_v28 = vpop.f32.mrf.mxu1 }
 0x462   : > { %9690 = vst [vmem:[#allocation69_spill] sm:$0xff] %v8123_v43  ;;  %v1795_v11 = vmax.f32 %v8121_v49, %v8123_v43  ;;  %v8129_v54 = vadd.f32 %v4444_v16, %v1739_v28  ;;  %v4449_v28 = vld [vmem:[%s6936_s9 + $0x1e8] sm:$0xff] }
 0x463   : > { %v1741_v2 = vpop.f32.mrf.mxu1 }
 0x464   : > { %9691 = vst [vmem:[#allocation66_spill] sm:$0xff] %v8129_v54  ;;  %v8131_v0 = vadd.f32 %v4445_v10, %v1741_v2  ;;  %1796 = vmax.xlane.f32.xlu0 %v1795_v11 }
 0x465   : > { %v1745_v37 = vpop.f32.mrf.mxu1 }
 0x466   : > { %9692 = vst [vmem:[#allocation13_spill] sm:$0xff] %v8131_v0  ;;  %v1798_v21 = vmax.f32 %v8129_v54, %v8131_v0  ;;  %v8137_v24 = vadd.f32 %v4446_v59, %v1745_v37  ;;  %v4451_v37 = vld [vmem:[%s6936_s9 + $0x1f8] sm:$0xff] }
 0x467   : > { %v1747_v38 = vpop.f32.mrf.mxu1 }
 0x468   : > { %9693 = vst [vmem:[#allocation71_spill] sm:$0xff] %v8137_v24  ;;  %v8139_v29 = vadd.f32 %v4447_v47, %v1747_v38  ;;  %1799 = vmax.xlane.f32.xlu0 %v1798_v21  ;;  %v8151_v47 = vpop.permute.xlu0 %2865 }
 0x469   : > { %v1751_v16 = vpop.f32.mrf.mxu1 }
 0x46a   : > { %9694 = vst [vmem:[#allocation68_spill] sm:$0xff] %v8139_v29  ;;  %v1801_v10 = vmax.f32 %v8137_v24, %v8139_v29  ;;  %v8145_v2 = vadd.f32 %v4448_v53, %v1751_v16  ;;  %v4500_v53 = vld [vmem:[%s6936_s9 + $0x200] sm:$0xff] }
 0x46b   : > { %v1753_v11 = vpop.f32.mrf.mxu1 }
 0x46c   : > { %9695 = vst [vmem:[#allocation73_spill] sm:$0xff] %v8145_v2  ;;  %v8147_v56 = vadd.f32 %v4449_v28, %v1753_v11  ;;  %1802 = vmax.xlane.f32.xlu1 %v1801_v10  ;;  %v4501_v28 = vld [vmem:[%s6936_s9 + $0x208] sm:$0xff]  ;;  %v8163_v19 = vpop.permute.xlu0 %2859 }
 0x46d   : > { %v1757_v59 = vpop.f32.mrf.mxu1 }
 0x46e   : > { %9696 = vst [vmem:[#allocation70_spill] sm:$0xff] %v8147_v56  ;;  %v1804_v21 = vmax.f32 %v8145_v2, %v8147_v56  ;;  %v8155_v6 = vadd.f32 %v4450_v40, %v1757_v59  ;;  %v4502_v40 = vld [vmem:[%s6936_s9 + $0x210] sm:$0xff] }
 0x46f   : > { %v1759_v38 = vpop.f32.mrf.mxu1 }
 0x470   : > { %9697 = vst [vmem:[#allocation75_spill] sm:$0xff] %v8155_v6  ;;  %v8157_v12 = vadd.f32 %v4451_v37, %v1759_v38  ;;  %1805 = vmax.xlane.f32.xlu0 %v1804_v21  ;;  %v4503_v37 = vld [vmem:[%s6936_s9 + $0x218] sm:$0xff] }
 0x471   : > { %v2550_v16 = vpop.f32.mrf.mxu1 }
 0x472   : > { %9698 = vst [vmem:[#allocation72_spill] sm:$0xff] %v8157_v12  ;;  %v1807_v10 = vmax.f32 %v8155_v6, %v8157_v12  ;;  %v8165_v26 = vadd.f32 %v4500_v53, %v2550_v16  ;;  %v4504_v6 = vld [vmem:[%s6936_s9 + $0x220] sm:$0xff]  ;;  %v4505_v16 = vld [vmem:[%s6936_s9 + $0x228] sm:$0xff] }
 0x473   : > { %v2552_v11 = vpop.f32.mrf.mxu1 }
 0x474   : > { %9699 = vst [vmem:[#allocation77_spill] sm:$0xff] %v8165_v26  ;;  %v8167_v20 = vadd.f32 %v4501_v28, %v2552_v11  ;;  %1808 = vmax.xlane.f32.xlu1 %v1807_v10  ;;  %v8179_v28 = vpop.permute.xlu0 %2889 }
 0x475   : > { %v2556_v59 = vpop.f32.mrf.mxu1 }
 0x476   : > { %9700 = vst [vmem:[#allocation74_spill] sm:$0xff] %v8167_v20  ;;  %v2645_v21 = vmax.f32 %v8165_v26, %v8167_v20  ;;  %v8173_v56 = vadd.f32 %v4502_v40, %v2556_v59  ;;  %v4506_v40 = vld [vmem:[%s6936_s9 + $0x230] sm:$0xff] }
 0x477   : > { %v2558_v38 = vpop.f32.mrf.mxu1 }
 0x478   : > { %9701 = vst [vmem:[#allocation79_spill] sm:$0xff] %v8173_v56  ;;  %v8175_v12 = vadd.f32 %v4503_v37, %v2558_v38  ;;  %2646 = vmax.xlane.f32.xlu1 %v2645_v21  ;;  %v4507_v37 = vld [vmem:[%s6936_s9 + $0x238] sm:$0xff]  ;;  %v8191_v26 = vpop.permute.xlu0 %2887 }
 0x479   : > { %v2562_v53 = vpop.f32.mrf.mxu1 }
 0x47a   : > { %9702 = vst [vmem:[#allocation76_spill] sm:$0xff] %v8175_v12  ;;  %v2648_v10 = vmax.f32 %v8173_v56, %v8175_v12  ;;  %v8183_v2 = vadd.f32 %v4504_v6, %v2562_v53  ;;  %v4508_v6 = vld [vmem:[%s6936_s9 + $0x240] sm:$0xff] }
 0x47b   : > { %v2564_v11 = vpop.f32.mrf.mxu1 }
 0x47c   : > { %9703 = vst [vmem:[#allocation81_spill] sm:$0xff] %v8183_v2  ;;  %v8185_v20 = vadd.f32 %v4505_v16, %v2564_v11  ;;  %2649 = vmax.xlane.f32.xlu0 %v2648_v10  ;;  %v4509_v16 = vld [vmem:[%s6936_s9 + $0x248] sm:$0xff] }
 0x47d   : > { %v2568_v59 = vpop.f32.mrf.mxu1 }
 0x47e   : > { %9704 = vst [vmem:[#allocation78_spill] sm:$0xff] %v8185_v20  ;;  %v2651_v21 = vmax.f32 %v8183_v2, %v8185_v20  ;;  %v8193_v25 = vadd.f32 %v4506_v40, %v2568_v59  ;;  %v4510_v2 = vld [vmem:[%s6936_s9 + $0x250] sm:$0xff]  ;;  %v4511_v59 = vld [vmem:[%s6936_s9 + $0x258] sm:$0xff] }
 0x47f   : > { %v2570_v38 = vpop.f32.mrf.mxu1 }
 0x480   : > { %9705 = vst [vmem:[#allocation83_spill] sm:$0xff] %v8193_v25  ;;  %v8195_v12 = vadd.f32 %v4507_v37, %v2570_v38  ;;  %2652 = vmax.xlane.f32.xlu1 %v2651_v21  ;;  %v8207_v37 = vpop.permute.xlu0 %2851 }
 0x481   : > { %v2574_v53 = vpop.f32.mrf.mxu1 }
 0x482   : > { %9706 = vst [vmem:[#allocation80_spill] sm:$0xff] %v8195_v12  ;;  %v2654_v10 = vmax.f32 %v8193_v25, %v8195_v12  ;;  %v8201_v56 = vadd.f32 %v4508_v6, %v2574_v53  ;;  %v4512_v6 = vld [vmem:[%s6936_s9 + $0x260] sm:$0xff] }
 0x483   : > { %v2576_v11 = vpop.f32.mrf.mxu1 }
 0x484   : > { %9707 = vst [vmem:[#allocation85_spill] sm:$0xff] %v8201_v56  ;;  %v8203_v20 = vadd.f32 %v4509_v16, %v2576_v11  ;;  %2655 = vmax.xlane.f32.xlu0 %v2654_v10  ;;  %v4513_v16 = vld [vmem:[%s6936_s9 + $0x268] sm:$0xff]  ;;  %v8219_v25 = vpop.permute.xlu0 %2881 }
 0x485   : > { %v2580_v40 = vpop.f32.mrf.mxu1 }
 0x486   : > { %9708 = vst [vmem:[#allocation82_spill] sm:$0xff] %v8203_v20  ;;  %v2657_v21 = vmax.f32 %v8201_v56, %v8203_v20  ;;  %v8211_v29 = vadd.f32 %v4510_v2, %v2580_v40  ;;  %v4514_v2 = vld [vmem:[%s6936_s9 + $0x270] sm:$0xff] }
 0x487   : > { %v2582_v38 = vpop.f32.mrf.mxu1 }
 0x488   : > { %9709 = vst [vmem:[#allocation87_spill] sm:$0xff] %v8211_v29  ;;  %v8213_v12 = vadd.f32 %v4511_v59, %v2582_v38  ;;  %2658 = vmax.xlane.f32.xlu1 %v2657_v21  ;;  %v4515_v59 = vld [vmem:[%s6936_s9 + $0x278] sm:$0xff] }
 0x489   : > { %v2586_v53 = vpop.f32.mrf.mxu1 }
 0x48a   : > { %9710 = vst [vmem:[#allocation84_spill] sm:$0xff] %v8213_v12  ;;  %v2660_v10 = vmax.f32 %v8211_v29, %v8213_v12  ;;  %v8221_v24 = vadd.f32 %v4512_v6, %v2586_v53  ;;  %v4516_v29 = vld [vmem:[%s6936_s9 + $0x280] sm:$0xff]  ;;  %v4517_v53 = vld [vmem:[%s6936_s9 + $0x288] sm:$0xff] }
 0x48b   : > { %v2588_v11 = vpop.f32.mrf.mxu1 }
 0x48c   : > { %9711 = vst [vmem:[#allocation89_spill] sm:$0xff] %v8221_v24  ;;  %v8223_v20 = vadd.f32 %v4513_v16, %v2588_v11  ;;  %2661 = vmax.xlane.f32.xlu1 %v2660_v10  ;;  %v8235_v16 = vpop.permute.xlu0 %2849 }
 0x48d   : > { %v2592_v40 = vpop.f32.mrf.mxu1  ;;  %9715 = vst [vmem:[#allocation93_spill] sm:$0xff] %v8235_v16 }
 0x48e   : > { %9712 = vst [vmem:[#allocation86_spill] sm:$0xff] %v8223_v20  ;;  %v2663_v21 = vmax.f32 %v8221_v24, %v8223_v20  ;;  %v8229_v56 = vadd.f32 %v4514_v2, %v2592_v40  ;;  %v4518_v20 = vld [vmem:[%s6936_s9 + $0x290] sm:$0xff]  ;;  %v4519_v40 = vld [vmem:[%s6936_s9 + $0x298] sm:$0xff] }
 0x48f   : > { %v2594_v38 = vpop.f32.mrf.mxu1 }
 0x490   : > { %9713 = vst [vmem:[#allocation91_spill] sm:$0xff] %v8229_v56  ;;  %v8231_v12 = vadd.f32 %v4515_v59, %v2594_v38  ;;  %2664 = vmax.xlane.f32.xlu0 %v2663_v21  ;;  %v8247_v38 = vpop.permute.xlu0 %2879 }
 0x491   : > { %v2598_v6 = vpop.f32.mrf.mxu1  ;;  %9718 = vst [vmem:[#allocation92_spill] sm:$0xff] %v8247_v38 }
 0x492   : > { %9714 = vst [vmem:[#allocation88_spill] sm:$0xff] %v8231_v12  ;;  %v2666_v10 = vmax.f32 %v8229_v56, %v8231_v12  ;;  %v8239_v58 = vadd.f32 %v4516_v29, %v2598_v6  ;;  %v5754_v12 = vld [vmem:[%s6269_s5 + $0xe8] sm:$0xff]  ;;  %v5755_v56 = vld [vmem:[%s6269_s5 + $0x78] sm:$0xff] }
 0x493   : > { %v2600_v11 = vpop.f32.mrf.mxu1 }
 0x494   : > { %9716 = vst [vmem:[#allocation90_spill] sm:$0xff] %v8239_v58  ;;  %v8241_v0 = vadd.f32 %v4517_v53, %v2600_v11  ;;  %2667 = vmax.xlane.f32.xlu1 %v2666_v10  ;;  %v8259_v11 = vpop.permute.xlu0 %2847 }
 0x495   : > { %v2604_v2 = vpop.f32.mrf.mxu1  ;;  %9721 = vst [vmem:[#allocation99_spill] sm:$0xff] %v8259_v11  ;;  %v4581_v11 = vld [vmem:[%s6936_s9 + $0x308] sm:$0xff] }
 0x496   : > { %9717 = vst [vmem:[#allocation95_spill] sm:$0xff] %v8241_v0  ;;  %v2669_v59 = vmax.f32 %v8239_v58, %v8241_v0  ;;  %v8249_v24 = vadd.f32 %v4518_v20, %v2604_v2 }
 0x497   : > { %v2606_v21 = vpop.f32.mrf.mxu1 }
 0x498   : > { %9719 = vst [vmem:[#allocation97_spill] sm:$0xff] %v8249_v24  ;;  %v8251_v54 = vadd.f32 %v4519_v40, %v2606_v21  ;;  %2670 = vmax.xlane.f32.xlu1 %v2669_v59  ;;  %v8263_v20 = vpop.permute.xlu0 %2845  ;;  %v5752_v59 = vld [vmem:[%s6269_s5 + $0xf0] sm:$0xff] }
 0x499   : > { %v8253_v29 = vpop.f32.mrf.mxu1  ;;  %9722 = vst [vmem:[#allocation96_spill] sm:$0xff] %v8263_v20 }
 0x49a   : > { %9720 = vst [vmem:[#allocation94_spill] sm:$0xff] %v8251_v54  ;;  %v2672_v6 = vmax.f32 %v8249_v24, %v8251_v54 }
 0x49b   : > { %v2612_v53 = vpop.f32.mrf.mxu1 }
 0x49c   : > { %2673 = vmax.xlane.f32.xlu0 %v2672_v6  ;;  %v8271_v21 = vpop.permute.xlu0 %2875  ;;  %v5753_v6 = vld [vmem:[%s6269_s5 + $0x70] sm:$0xff] }
 0x49d   : > { %v8257_v10 = vpop.f32.mrf.mxu1  ;;  %9723 = vst [vmem:[#allocation101_spill] sm:$0xff] %v8271_v21 }
 0x49f   : > { %v8261_v0 = vpop.f32.mrf.mxu1 }
 0x4a0   : > { %v8277_v24 = vpop.permute.xlu0 %2839 }
 0x4a1   : > { %v8265_v2 = vpop.f32.mrf.mxu1  ;;  %9724 = vst [vmem:[#allocation98_spill] sm:$0xff] %v8277_v24 }
 0x4a3   : > { %v8267_v40 = vpop.f32.mrf.mxu1 }
 0x4a5   : > { %v8273_v54 = vpop.f32.mrf.mxu1 }
 0x4a7   : > { %v8279_v58 = vpop.f32.mrf.mxu1 }
 0x4a9   : > { %3748 = vrot.lane.b32.xlu1 %v5752_v59, %s5841_s6  ;;  %v8285_v7 = vpop.f32.mrf.mxu1  ;;  %v8287_v59 = vpop.permute.xlu0 %2869 }
 0x4aa   : > { %9725 = vst [vmem:[#allocation102_spill] sm:$0xff] %v8287_v59 }
 0x4ab   : > { %v8289_v46 = vpop.f32.mrf.mxu1 }
 0x4ad   : > { %3716 = vrot.lane.b32.xlu1 %v5753_v6, %s5841_s6  ;;  %v8291_v60 = vpop.permute.xlu0 %2837  ;;  %v8293_v6 = vpop.f32.mrf.mxu1 }
 0x4ae   : > { %9726 = vst [vmem:[#allocation100_spill] sm:$0xff] %v8291_v60 }
 0x4af   : > { %v8295_v24 = vpop.f32.mrf.mxu1 }
 0x4b1   : > { %3746 = vrot.lane.b32.xlu1 %v5754_v12, %s5841_s6 }
 0x4b2   : > { %3718 = vrot.lane.b32.xlu0 %v5755_v56, %s5841_s6  ;;  %v3401_v56 = vpop.f32.mrf.mxu1 }
 0x4b4   : > { %v3403_v5 = vpop.f32.mrf.mxu1 }
 0x4c1   : > { %v1764_v43 = vpop.xlane.xlu0 %1763 }
 0x4c2   : > { %v1810_v12 = vsub.f32 %v8024_v30, %v1764_v43  ;;  %v1811_v21 = vsub.f32 %v8026_v35, %v1764_v43  ;;  %v4580_v30 = vld [vmem:[%s6936_s9 + $0x300] sm:$0xff]  ;;  %v8304_v35 = vadd.f32 %v4581_v11, %v3403_v5 }
 0x4c4   : > { %v1842_v49 = vmul.f32 1.442695, %v1810_v12  ;;  %v1844_v20 = vmul.f32 1.442695, %v1811_v21  ;;  %v8308_v21 = vadd.f32 %v4580_v30, %v3401_v56  ;;  %v4520_v12 = vld [vmem:[%s6936_s9 + $0x2a0] sm:$0xff]  ;;  %v4522_v30 = vld [vmem:[%s6936_s9 + $0x2b0] sm:$0xff] }
 0x4c5   : > { %v1767_v42 = vpop.xlane.xlu1 %1766 }
 0x4c6   : > { %5400 = vpow2.f32 %v1842_v49  ;;  %v1812_v59 = vsub.f32 %v8034_v44, %v1767_v42  ;;  %v1813_v60 = vsub.f32 %v8036_v50, %v1767_v42  ;;  %v4521_v44 = vld [vmem:[%s6936_s9 + $0x2a8] sm:$0xff]  ;;  %v3496_v5 = vmax.f32 %v8308_v21, %v8304_v35 }
 0x4c7   : > { %5402 = vpow2.f32 %v1844_v20 }
 0x4c8   : > { %v1846_v38 = vmul.f32 1.442695, %v1812_v59  ;;  %v1848_v22 = vmul.f32 1.442695, %v1813_v60 }
 0x4c9   : > { %v1770_v16 = vpop.xlane.xlu0 %1769 }
 0x4ca   : > { %5404 = vpow2.f32 %v1846_v38  ;;  %v1814_v43 = vsub.f32 %v8044_v32, %v1770_v16  ;;  %v1815_v49 = vsub.f32 %v8046_v51, %v1770_v16  ;;  %v8312_v38 = vadd.f32 %v4521_v44, %v2612_v53  ;;  %v4523_v16 = vld [vmem:[%s6936_s9 + $0x2b8] sm:$0xff]  ;;  %v4525_v44 = vld [vmem:[%s6936_s9 + $0x2c8] sm:$0xff] }
 0x4cb   : > { %5406 = vpow2.f32 %v1848_v22  ;;  %v8318_v22 = vadd.f32 %v4520_v12, %v8253_v29  ;;  %v8327_v29 = vadd.f32 %v4523_v16, %v8261_v0 }
 0x4cc   : > { %v1850_v20 = vmul.f32 1.442695, %v1814_v43  ;;  %v1852_v50 = vmul.f32 1.442695, %v1815_v49 }
 0x4cd   : > { %v1773_v42 = vpop.xlane.xlu1 %1772  ;;  %v2675_v56 = vmax.f32 %v8318_v22, %v8312_v38 }
 0x4ce   : > { %5408 = vpow2.f32 %v1850_v20  ;;  %v1816_v60 = vsub.f32 %v8054_v45, %v1773_v42  ;;  %v1817_v32 = vsub.f32 %v8056_v23, %v1773_v42  ;;  %v8333_v42 = vadd.f32 %v4522_v30, %v8257_v10 }
 0x4cf   : > { %5410 = vpow2.f32 %v1852_v50 }
 0x4d0   : > { %v1854_v51 = vmul.f32 1.442695, %v1816_v60  ;;  %v1856_v11 = vmul.f32 1.442695, %v1817_v32  ;;  %v4524_v60 = vld [vmem:[%s6936_s9 + $0x2c0] sm:$0xff]  ;;  %v2678_v32 = vmax.f32 %v8333_v42, %v8327_v29 }
 0x4d1   : > { %3497 = vmax.xlane.f32.xlu0 %v3496_v5  ;;  %v1776_v59 = vpop.xlane.xlu0 %1775 }
 0x4d2   : > { %5412 = vpow2.f32 %v1854_v51  ;;  %v1818_v45 = vsub.f32 %v8065_v48, %v1776_v59  ;;  %v1819_v23 = vsub.f32 %v8067_v1, %v1776_v59  ;;  %v8342_v51 = vadd.f32 %v4525_v44, %v8267_v40 }
 0x4d3   : > { %v5401_v53 = vpop.eup %5400  ;;  %5414 = vpow2.f32 %v1856_v11 }
 0x4d4   : > { %v5403_v43 = vpop.eup %5402  ;;  %v1858_v49 = vmul.f32 1.442695, %v1818_v45  ;;  %v1860_v20 = vmul.f32 1.442695, %v1819_v23 }
 0x4d5   : > { %2146 = vmatprep.mubr.f32.mxu0 %v5403_v43  ;;  %2676 = vmax.xlane.f32.xlu1 %v2675_v56  ;;  %v1779_v50 = vpop.xlane.xlu1 %1778  ;;  %v8330_v48 = vadd.f32 %v5403_v43, %v5401_v53  ;;  %v4529_v56 = vld [vmem:[%s6936_s9 + $0x2e8] sm:$0xff]  ;;  %v4528_v43 = vld [vmem:[%s6936_s9 + $0x2e0] sm:$0xff] }
 0x4d6   : > { %5416 = vpow2.f32 %v1858_v49  ;;  %v1820_v12 = vsub.f32 %v8073_v4, %v1779_v50  ;;  %2147 = vmatmul.mubr.f32.vlgmr.msra.gmra.mxu0 %v5401_v53  ;;  %v1821_v0 = vsub.f32 %v8075_v27, %v1779_v50  ;;  %v4527_v4 = vld [vmem:[%s6936_s9 + $0x2d8] sm:$0xff]  ;;  %v8377_v44 = vadd.f32 %v4529_v56, %v8289_v46 }
 0x4d7   : > { %v5405_v1 = vpop.eup %5404  ;;  %5418 = vpow2.f32 %v1860_v20  ;;  %5019 = vmatpush3.msra.mxu0 %v7942_v18  ;;  %v8350_v18 = vadd.f32 %v4524_v60, %v8265_v2  ;;  %v8359_v2 = vadd.f32 %v4527_v4, %v8279_v58  ;;  %v3407_v20 = vpop.f32.mrf.mxu1  ;;  %v4582_v4 = vld [vmem:[%s6936_s9 + $0x310] sm:$0xff] }
 0x4d8   : > { %v5407_v5 = vpop.eup %5406  ;;  %v1862_v10 = vmul.f32 1.442695, %v1820_v12  ;;  %5020 = vmatprep.subr.mxu0 %v7950_v17  ;;  %v1864_v16 = vmul.f32 1.442695, %v1821_v0  ;;  %v4526_v17 = vld [vmem:[%s6936_s9 + $0x2d0] sm:$0xff]  ;;  %v8385_v12 = vadd.f32 %v4528_v43, %v8285_v7 }
 0x4d9   : > { %5021 = vmatpush3.msra.mxu0 %v8151_v47  ;;  %2151 = vmatprep.mubr.f32.mxu0 %v5407_v5  ;;  %v1782_v11 = vpop.xlane.xlu0 %1781  ;;  %v8347_v27 = vadd.f32 %v5407_v5, %v5405_v1  ;;  %v2681_v53 = vmax.f32 %v8350_v18, %v8342_v51  ;;  %v3409_v5 = vpop.f32.mrf.mxu1 }
 0x4da   : > { %5420 = vpow2.f32 %v1862_v10  ;;  %5022 = vmatprep.subr.mxu0 %v7956_v33  ;;  %2679 = vmax.xlane.f32.xlu1 %v2678_v32  ;;  %v1822_v40 = vsub.f32 %v8081_v63, %v1782_v11  ;;  %v1823_v47 = vsub.f32 %v8083_v57, %v1782_v11  ;;  %v8367_v57 = vadd.f32 %v4526_v17, %v8273_v54  ;;  %v9727_v17 = vld [vmem:[#allocation93_spill] sm:$0xff] }
 0x4db   : > { %v5409_v59 = vpop.eup %5408  ;;  %5422 = vpow2.f32 %v1864_v16  ;;  %2152 = vmatmul.mubr.f32.gmra.mxu0 %v5405_v1  ;;  %v4530_v1 = vld [vmem:[%s6936_s9 + $0x2f0] sm:$0xff]  ;;  %v2687_v7 = vmax.f32 %v8385_v12, %v8377_v44 }
 0x4dc   : > { %v5411_v45 = vpop.eup %5410  ;;  %5023 = vmatpush3.msra.mxu0 %v7962_v55  ;;  %v1866_v33 = vmul.f32 1.442695, %v1822_v40  ;;  %v1868_v30 = vmul.f32 1.442695, %v1823_v47  ;;  %v2684_v54 = vmax.f32 %v8367_v57, %v8359_v2  ;;  %v9728_v47 = vld [vmem:[#allocation67_spill] sm:$0xff] }
 0x4dd   : > { %5024 = vmatprep.subr.mxu0 %v7968_v41  ;;  %2156 = vmatprep.mubr.f32.mxu0 %v5411_v45  ;;  %v1785_v63 = vpop.xlane.xlu1 %1784  ;;  %v8364_v23 = vadd.f32 %v5411_v45, %v5409_v59 }
 0x4de   : > { %5424 = vpow2.f32 %v1866_v33  ;;  %5025 = vmatpush3.msra.mxu0 %v7974_v34  ;;  %2682 = vmax.xlane.f32.xlu1 %v2681_v53  ;;  %v1824_v58 = vsub.f32 %v8089_v9, %v1785_v63  ;;  %v1825_v41 = vsub.f32 %v8091_v36, %v1785_v63  ;;  %v4531_v9 = vld [vmem:[%s6936_s9 + $0x2f8] sm:$0xff]  ;;  %v9729_v53 = vld [vmem:[#allocation92_spill] sm:$0xff]  ;;  %v9730_v33 = vld [vmem:[#allocation17_spill] sm:$0xff] }
 0x4df   : > { %v5413_v55 = vpop.eup %5412  ;;  %5426 = vpow2.f32 %v1868_v30  ;;  %5026 = vmatprep.subr.mxu0 %v7980_v15  ;;  %2157 = vmatmul.mubr.f32.gmra.mxu0 %v5409_v59  ;;  %v8395_v0 = vadd.f32 %v4531_v9, %v8295_v24  ;;  %v8420_v59 = vadd.f32 %v4582_v4, %v3407_v20  ;;  %v9731_v63 = vld [vmem:[#allocation99_spill] sm:$0xff]  ;;  %v9734_v9 = vld [vmem:[#allocation64_spill] sm:$0xff]  ;;  %v9741_v4 = vld [vmem:[#allocation13_spill] sm:$0xff] }
 0x4e0   : > { %v5415_v49 = vpop.eup %5414  ;;  %v1870_v34 = vmul.f32 1.442695, %v1824_v58  ;;  %5027 = vmatpush3.msra.mxu0 %v8163_v19  ;;  %v1872_v50 = vmul.f32 1.442695, %v1825_v41  ;;  %v9732_v41 = vld [vmem:[#allocation16_spill] sm:$0xff] }
 0x4e1   : > { %5028 = vmatprep.subr.mxu0 %v8179_v28  ;;  %2161 = vmatprep.mubr.f32.mxu0 %v5415_v49  ;;  %v1788_v15 = vpop.xlane.xlu0 %1787  ;;  %v8382_v36 = vadd.f32 %v5415_v49, %v5413_v55 }
 0x4e2   : > { %5428 = vpow2.f32 %v1870_v34  ;;  %5029 = vmatpush3.msra.mxu0 %v7986_v3  ;;  %2685 = vmax.xlane.f32.xlu1 %v2684_v54  ;;  %v1826_v46 = vsub.f32 %v8097_v31, %v1788_v15  ;;  %v1827_v28 = vsub.f32 %v8099_v13, %v1788_v15  ;;  %v4583_v31 = vld [vmem:[%s6936_s9 + $0x318] sm:$0xff]  ;;  %v8403_v13 = vadd.f32 %v4530_v1, %v8293_v6  ;;  %v9733_v34 = vld [vmem:[#allocation96_spill] sm:$0xff]  ;;  %v9735_v15 = vld [vmem:[#allocation101_spill] sm:$0xff] }
 0x4e3   : > { %v5417_v19 = vpop.eup %5416  ;;  %5430 = vpow2.f32 %v1872_v50  ;;  %5030 = vmatprep.subr.mxu0 %v8191_v26  ;;  %2162 = vmatmul.mubr.f32.gmra.mxu0 %v5413_v55  ;;  %v8412_v11 = vadd.f32 %v4583_v31, %v3409_v5  ;;  %v5757_v55 = vld [vmem:[%s6269_s5 + $0xe0] sm:$0xff]  ;;  %v9738_v31 = vld [vmem:[#allocation60_spill] sm:$0xff] }
 0x4e4   : > { %v5419_v60 = vpop.eup %5418  ;;  %5031 = vmatpush3.msra.mxu0 %v7992_v8  ;;  %v1874_v3 = vmul.f32 1.442695, %v1826_v46  ;;  %v1876_v32 = vmul.f32 1.442695, %v1827_v28  ;;  %v2690_v6 = vmax.f32 %v8403_v13, %v8395_v0  ;;  %v9736_v46 = vld [vmem:[#allocation69_spill] sm:$0xff]  ;;  %v9737_v28 = vld [vmem:[#allocation63_spill] sm:$0xff] }
 0x4e5   : > { %5032 = vmatprep.subr.mxu0 %v7998_v14  ;;  %2166 = vmatprep.mubr.f32.mxu0 %v5419_v60  ;;  %v1791_v26 = vpop.xlane.xlu1 %1790  ;;  %v8400_v10 = vadd.f32 %v5419_v60, %v5417_v19  ;;  %v3499_v30 = vmax.f32 %v8420_v59, %v8412_v11 }
 0x4e6   : > { %5432 = vpow2.f32 %v1874_v3  ;;  %5033 = vmatpush3.msra.mxu0 %v8006_v61  ;;  %2688 = vmax.xlane.f32.xlu1 %v2687_v7  ;;  %v1828_v8 = vsub.f32 %v8105_v62, %v1791_v26  ;;  %v1829_v14 = vsub.f32 %v8107_v52, %v1791_v26  ;;  %v5756_v61 = vld [vmem:[%s6269_s5 + $0x68] sm:$0xff]  ;;  %v5758_v7 = vld [vmem:[%s6269_s5 + $0x60] sm:$0xff] }
 0x4e7   : > { %v5421_v24 = vpop.eup %5420  ;;  %5434 = vpow2.f32 %v1876_v32  ;;  %5034 = vmatprep.subr.mxu0 %v8012_v39  ;;  %2167 = vmatmul.mubr.f32.gmra.mxu0 %v5417_v19  ;;  %v9739_v26 = vld [vmem:[#allocation11_spill] sm:$0xff] }
 0x4e8   : > { %v5423_v16 = vpop.eup %5422  ;;  %v1878_v40 = vmul.f32 1.442695, %v1828_v8  ;;  %5035 = vmatpush3.msra.mxu0 %v8207_v37  ;;  %3714 = vrot.lane.b32.xlu0 %v5756_v61, %s5841_s6  ;;  %v1880_v62 = vmul.f32 1.442695, %v1829_v14  ;;  %v9740_v8 = vld [vmem:[#allocation66_spill] sm:$0xff] }
 0x4e9   : > { %5036 = vmatprep.subr.mxu0 %v8219_v25  ;;  %2171 = vmatprep.mubr.f32.mxu0 %v5423_v16  ;;  %v1794_v39 = vpop.xlane.xlu0 %1793  ;;  %v8418_v52 = vadd.f32 %v5423_v16, %v5421_v24  ;;  %v9743_v61 = vld [vmem:[#allocation98_spill] sm:$0xff] }
 0x4ea   : > { %5436 = vpow2.f32 %v1878_v40  ;;  %5037 = vmatpush3.msra.mxu0 %v9727_v17  ;;  %2691 = vmax.xlane.f32.xlu1 %v2690_v6  ;;  %v1830_v45 = vsub.f32 %v9728_v47, %v1794_v39  ;;  %v1831_v25 = vsub.f32 %v9730_v33, %v1794_v39  ;;  %v9742_v6 = vld [vmem:[#allocation65_spill] sm:$0xff]  ;;  %v5759_v17 = vld [vmem:[%s6269_s5 + $0xd8] sm:$0xff]  ;;  %v9746_v33 = vld [vmem:[#allocation71_spill] sm:$0xff] }
 0x4eb   : > { %v5425_v37 = vpop.eup %5424  ;;  %5438 = vpow2.f32 %v1880_v62  ;;  %5038 = vmatprep.subr.mxu0 %v9729_v53  ;;  %2172 = vmatmul.mubr.f32.gmra.mxu0 %v5421_v24  ;;  %v9744_v47 = vld [vmem:[#allocation102_spill] sm:$0xff]  ;;  %v9745_v53 = vld [vmem:[#allocation100_spill] sm:$0xff] }
 0x4ec   : > { %v5427_v56 = vpop.eup %5426  ;;  %5039 = vmatpush3.msra.mxu0 %v9731_v63  ;;  %v1882_v58 = vmul.f32 1.442695, %v1830_v45  ;;  %3744 = vrot.lane.b32.xlu0 %v5757_v55, %s5841_s6  ;;  %v1884_v43 = vmul.f32 1.442695, %v1831_v25 }
 0x4ed   : > { %5040 = vmatprep.subr.mxu0 %v9732_v41  ;;  %2176 = vmatprep.mubr.f32.mxu0 %v5427_v56  ;;  %v1797_v49 = vpop.xlane.xlu0 %1796  ;;  %v8432_v54 = vadd.f32 %v5427_v56, %v5425_v37  ;;  %v9747_v56 = vld [vmem:[#allocation68_spill] sm:$0xff] }
 0x4ee   : > { %5440 = vpow2.f32 %v1882_v58  ;;  %5041 = vmatpush3.msra.mxu0 %v9733_v34  ;;  %3500 = vmax.xlane.f32.xlu1 %v3499_v30  ;;  %v1832_v20 = vsub.f32 %v9734_v9, %v1797_v49  ;;  %v1833_v19 = vsub.f32 %v9736_v46, %v1797_v49  ;;  %v9748_v58 = vld [vmem:[#allocation62_spill] sm:$0xff]  ;;  %v9749_v9 = vld [vmem:[#allocation73_spill] sm:$0xff] }
 0x4ef   : > { %v5429_v50 = vpop.eup %5428  ;;  %5442 = vpow2.f32 %v1884_v43  ;;  %5042 = vmatprep.subr.mxu0 %v9735_v15  ;;  %2177 = vmatmul.mubr.f32.gmra.mxu0 %v5425_v37 }
 0x4f0   : > { %v5431_v1 = vpop.eup %5430  ;;  %5043 = vmatpush3.msra.mxu0 %v9737_v28  ;;  %v1886_v60 = vmul.f32 1.442695, %v1832_v20  ;;  %3712 = vrot.lane.b32.xlu0 %v5758_v7, %s5841_s6  ;;  %v1888_v3 = vmul.f32 1.442695, %v1833_v19 }
 0x4f1   : > { %5044 = vmatprep.subr.mxu0 %v9738_v31  ;;  %2181 = vmatprep.mubr.f32.mxu0 %v5431_v1  ;;  %v1800_v5 = vpop.xlane.xlu0 %1799  ;;  %v8442_v32 = vadd.f32 %v5431_v1, %v5429_v50 }
 0x4f2   : > { %5444 = vpow2.f32 %v1886_v60  ;;  %5045 = vmatpush3.msra.mxu0 %v9739_v26  ;;  %v1834_v24 = vsub.f32 %v9740_v8, %v1800_v5  ;;  %v1835_v14 = vsub.f32 %v9741_v4, %v1800_v5  ;;  %v9752_v5 = vld [vmem:[#allocation72_spill] sm:$0xff] }
 0x4f3   : > { %v5433_v16 = vpop.eup %5432  ;;  %5446 = vpow2.f32 %v1888_v3  ;;  %5046 = vmatprep.subr.mxu0 %v9742_v6  ;;  %2182 = vmatmul.mubr.f32.gmra.mxu0 %v5429_v50  ;;  %v9750_v50 = vld [vmem:[#allocation70_spill] sm:$0xff]  ;;  %v9751_v3 = vld [vmem:[#allocation75_spill] sm:$0xff] }
 0x4f4   : > { %v5435_v40 = vpop.eup %5434  ;;  %5047 = vmatpush3.msra.mxu0 %v9743_v61  ;;  %v1890_v62 = vmul.f32 1.442695, %v1834_v24  ;;  %v1892_v39 = vmul.f32 1.442695, %v1835_v14  ;;  %3742 = vrot.lane.b32.xlu0 %v5759_v17, %s5841_s6  ;;  %v5760_v24 = vld [vmem:[%s6269_s5 + $0x58] sm:$0xff]  ;;  %v9753_v61 = vld [vmem:[#allocation77_spill] sm:$0xff] }
 0x4f5   : > { %5048 = vmatprep.subr.mxu0 %v9744_v47  ;;  %2186 = vmatprep.mubr.f32.mxu0 %v5435_v40  ;;  %v1803_v45 = vpop.xlane.xlu1 %1802  ;;  %v8452_v37 = vadd.f32 %v5435_v40, %v5433_v16 }
 0x4f6   : > { %5448 = vpow2.f32 %v1890_v62  ;;  %5049 = vmatpush3.msra.mxu0 %v9745_v53  ;;  %v1836_v25 = vsub.f32 %v9746_v33, %v1803_v45  ;;  %v1837_v30 = vsub.f32 %v9747_v56, %v1803_v45  ;;  %v5761_v45 = vld [vmem:[%s6269_s5 + $0x50] sm:$0xff] }
 0x4f7   : > { %v5437_v63 = vpop.eup %5436  ;;  %5450 = vpow2.f32 %v1892_v39  ;;  %5162 = vmatprep.subr.mxu0 %v9748_v58  ;;  %2187 = vmatmul.mubr.f32.gmra.mxu0 %v5433_v16  ;;  %v9754_v39 = vld [vmem:[#allocation74_spill] sm:$0xff]  ;;  %v9755_v58 = vld [vmem:[#allocation79_spill] sm:$0xff] }
 0x4f8   : > { %v5439_v55 = vpop.eup %5438  ;;  %v1894_v43 = vmul.f32 1.442695, %v1836_v25  ;;  %v1896_v41 = vmul.f32 1.442695, %v1837_v30 }
 0x4f9   : > { %2191 = vmatprep.mubr.f32.mxu0 %v5439_v55  ;;  %v1806_v49 = vpop.xlane.xlu0 %1805  ;;  %v8458_v34 = vadd.f32 %v5439_v55, %v5437_v63 }
 0x4fa   : > { %5452 = vpow2.f32 %v1894_v43  ;;  %v1838_v20 = vsub.f32 %v9749_v9, %v1806_v49  ;;  %v1839_v15 = vsub.f32 %v9750_v50, %v1806_v49  ;;  %v9756_v43 = vld [vmem:[#allocation76_spill] sm:$0xff] }
 0x4fb   : > { %v5441_v46 = vpop.eup %5440  ;;  %5454 = vpow2.f32 %v1896_v41  ;;  %2192 = vmatmul.mubr.f32.gmra.mxu0 %v5437_v63  ;;  %v3413_v63 = vpop.f32.mrf.mxu1  ;;  %v5762_v9 = vld [vmem:[%s6269_s5 + $0xc8] sm:$0xff] }
 0x4fc   : > { %v5443_v19 = vpop.eup %5442  ;;  %v1898_v1 = vmul.f32 1.442695, %v1838_v20  ;;  %v1900_v28 = vmul.f32 1.442695, %v1839_v15 }
 0x4fd   : > { %2196 = vmatprep.mubr.f32.mxu0 %v5443_v19  ;;  %v1809_v60 = vpop.xlane.xlu1 %1808  ;;  %v8462_v7 = vadd.f32 %v5443_v19, %v5441_v46 }
 0x4fe   : > { %5456 = vpow2.f32 %v1898_v1  ;;  %v1840_v31 = vsub.f32 %v9751_v3, %v1809_v60  ;;  %v1841_v26 = vsub.f32 %v9752_v5, %v1809_v60  ;;  %v4585_v1 = vld [vmem:[%s6936_s9 + $0x328] sm:$0xff]  ;;  %v9757_v60 = vld [vmem:[#allocation81_spill] sm:$0xff] }
 0x4ff   : > { %v5445_v8 = vpop.eup %5444  ;;  %5458 = vpow2.f32 %v1900_v28  ;;  %2197 = vmatmul.mubr.f32.gmra.mxu0 %v5441_v46  ;;  %3710 = vrot.lane.b32.xlu1 %v5760_v24, %s5841_s6  ;;  %v3415_v28 = vpop.f32.mrf.mxu1  ;;  %v4584_v24 = vld [vmem:[%s6936_s9 + $0x320] sm:$0xff] }
 0x500   : > { %v5447_v4 = vpop.eup %5446  ;;  %v1902_v14 = vmul.f32 1.442695, %v1840_v31  ;;  %v1904_v16 = vmul.f32 1.442695, %v1841_v26  ;;  %v9758_v31 = vld [vmem:[#allocation78_spill] sm:$0xff] }
 0x501   : > { %2201 = vmatprep.mubr.f32.mxu0 %v5447_v4  ;;  %v2647_v6 = vpop.xlane.xlu1 %2646  ;;  %v8468_v40 = vadd.f32 %v5447_v4, %v5445_v8 }
 0x502   : > { %5460 = vpow2.f32 %v1902_v14  ;;  %v2693_v62 = vsub.f32 %v9753_v61, %v2647_v6  ;;  %v2694_v17 = vsub.f32 %v9754_v39, %v2647_v6 }
 0x503   : > { %v5449_v47 = vpop.eup %5448  ;;  %5462 = vpow2.f32 %v1904_v16  ;;  %2202 = vmatmul.mubr.f32.gmra.mxu0 %v5445_v8  ;;  %3708 = vrot.lane.b32.xlu1 %v5761_v45, %s5841_s6  ;;  %v8486_v16 = vadd.f32 %v4585_v1, %v3415_v28 }
 0x504   : > { %v5451_v53 = vpop.eup %5450  ;;  %v2725_v33 = vmul.f32 1.442695, %v2693_v62  ;;  %v2727_v25 = vmul.f32 1.442695, %v2694_v17  ;;  %v9759_v62 = vld [vmem:[#allocation83_spill] sm:$0xff]  ;;  %v9760_v17 = vld [vmem:[#allocation80_spill] sm:$0xff] }
 0x505   : > { %2206 = vmatprep.mubr.f32.mxu0 %v5451_v53  ;;  %v2650_v56 = vpop.xlane.xlu0 %2649  ;;  %v8474_v30 = vadd.f32 %v5451_v53, %v5449_v47  ;;  %v8492_v53 = vadd.f32 %v4584_v24, %v3413_v63 }
 0x506   : > { %5464 = vpow2.f32 %v2725_v33  ;;  %v2695_v55 = vsub.f32 %v9755_v58, %v2650_v56  ;;  %v2696_v41 = vsub.f32 %v9756_v43, %v2650_v56 }
 0x507   : > { %v5453_v49 = vpop.eup %5452  ;;  %5466 = vpow2.f32 %v2727_v25  ;;  %2207 = vmatmul.mubr.f32.gmra.mxu0 %v5449_v47  ;;  %3738 = vrot.lane.b32.xlu1 %v5762_v9, %s5841_s6  ;;  %v3502_v58 = vmax.f32 %v8492_v53, %v8486_v16  ;;  %v9762_v9 = vld [vmem:[#allocation82_spill] sm:$0xff] }
 0x508   : > { %v5455_v20 = vpop.eup %5454  ;;  %v2729_v50 = vmul.f32 1.442695, %v2695_v55  ;;  %v2731_v15 = vmul.f32 1.442695, %v2696_v41  ;;  %v9761_v41 = vld [vmem:[#allocation85_spill] sm:$0xff] }
 0x509   : > { %2211 = vmatprep.mubr.f32.mxu0 %v5455_v20  ;;  %v2653_v46 = vpop.xlane.xlu1 %2652  ;;  %v8480_v19 = vadd.f32 %v5455_v20, %v5453_v49 }
 0x50a   : > { %5468 = vpow2.f32 %v2729_v50  ;;  %v2697_v3 = vsub.f32 %v9757_v60, %v2653_v46  ;;  %v2698_v5 = vsub.f32 %v9758_v31, %v2653_v46  ;;  %v9763_v60 = vld [vmem:[#allocation87_spill] sm:$0xff]  ;;  %v9764_v31 = vld [vmem:[#allocation84_spill] sm:$0xff] }
 0x50b   : > { %v5457_v26 = vpop.eup %5456  ;;  %5470 = vpow2.f32 %v2731_v15  ;;  %2212 = vmatmul.mubr.f32.gmra.mxu0 %v5453_v49 }
 0x50c   : > { %v5459_v8 = vpop.eup %5458  ;;  %v2733_v4 = vmul.f32 1.442695, %v2697_v3  ;;  %v2735_v14 = vmul.f32 1.442695, %v2698_v5 }
 0x50d   : > { %2216 = vmatprep.mubr.f32.mxu0 %v5459_v8  ;;  %v2656_v6 = vpop.xlane.xlu0 %2655  ;;  %v8488_v61 = vadd.f32 %v5459_v8, %v5457_v26 }
 0x50e   : > { %5472 = vpow2.f32 %v2733_v4  ;;  %v2699_v39 = vsub.f32 %v9759_v62, %v2656_v6  ;;  %v2700_v47 = vsub.f32 %v9760_v17, %v2656_v6  ;;  %v9765_v62 = vld [vmem:[#allocation89_spill] sm:$0xff]  ;;  %v9766_v17 = vld [vmem:[#allocation86_spill] sm:$0xff] }
 0x50f   : > { %v5461_v45 = vpop.eup %5460  ;;  %5474 = vpow2.f32 %v2735_v14  ;;  %2217 = vmatmul.mubr.f32.gmra.mxu0 %v5457_v26 }
 0x510   : > { %v5463_v33 = vpop.eup %5462  ;;  %v2737_v25 = vmul.f32 1.442695, %v2699_v39  ;;  %v2739_v56 = vmul.f32 1.442695, %v2700_v47 }
 0x511   : > { %2221 = vmatprep.mubr.f32.mxu0 %v5463_v33  ;;  %v2659_v55 = vpop.xlane.xlu1 %2658  ;;  %v8496_v43 = vadd.f32 %v5463_v33, %v5461_v45 }
 0x512   : > { %5476 = vpow2.f32 %v2737_v25  ;;  %v2701_v49 = vsub.f32 %v9761_v41, %v2659_v55  ;;  %v2702_v20 = vsub.f32 %v9762_v9, %v2659_v55  ;;  %v3419_v41 = vpop.f32.mrf.mxu1 }
 0x513   : > { %v5465_v50 = vpop.eup %5464  ;;  %5478 = vpow2.f32 %v2739_v56  ;;  %2222 = vmatmul.mubr.f32.gmra.mxu0 %v5461_v45  ;;  %3503 = vmax.xlane.f32.xlu0 %v3502_v58 }
 0x514   : > { %v5467_v63 = vpop.eup %5466  ;;  %v2741_v15 = vmul.f32 1.442695, %v2701_v49  ;;  %v2743_v46 = vmul.f32 1.442695, %v2702_v20  ;;  %v9767_v49 = vld [vmem:[#allocation91_spill] sm:$0xff]  ;;  %v9768_v20 = vld [vmem:[#allocation88_spill] sm:$0xff] }
 0x515   : > { %2997 = vmatprep.mubr.f32.mxu0 %v5467_v63  ;;  %v2662_v1 = vpop.xlane.xlu1 %2661  ;;  %v8500_v28 = vadd.f32 %v5467_v63, %v5465_v50 }
 0x516   : > { %5480 = vpow2.f32 %v2741_v15  ;;  %v2703_v3 = vsub.f32 %v9763_v60, %v2662_v1  ;;  %v2704_v5 = vsub.f32 %v9764_v31, %v2662_v1  ;;  %v4587_v31 = vld [vmem:[%s6936_s9 + $0x338] sm:$0xff] }
 0x517   : > { %v5469_v26 = vpop.eup %5468  ;;  %5482 = vpow2.f32 %v2743_v46  ;;  %2998 = vmatmul.mubr.f32.vlgmr.msra.gmra.mxu0 %v5465_v50 }
 0x518   : > { %v5471_v8 = vpop.eup %5470  ;;  %v2745_v24 = vmul.f32 1.442695, %v2703_v3  ;;  %v2747_v4 = vmul.f32 1.442695, %v2704_v5  ;;  %v3421_v5 = vpop.f32.mrf.mxu1 }
 0x519   : > { %3002 = vmatprep.mubr.f32.mxu0 %v5471_v8  ;;  %v2665_v14 = vpop.xlane.xlu0 %2664  ;;  %v8504_v6 = vadd.f32 %v5471_v8, %v5469_v26 }
 0x51a   : > { %5484 = vpow2.f32 %v2745_v24  ;;  %v2705_v39 = vsub.f32 %v9765_v62, %v2665_v14  ;;  %v2706_v47 = vsub.f32 %v9766_v17, %v2665_v14  ;;  %v9770_v24 = vld [vmem:[#allocation95_spill] sm:$0xff] }
 0x51b   : > { %v5473_v45 = vpop.eup %5472  ;;  %5486 = vpow2.f32 %v2747_v4  ;;  %3003 = vmatmul.mubr.f32.gmra.mxu0 %v5469_v26  ;;  %v9769_v26 = vld [vmem:[#allocation90_spill] sm:$0xff] }
 0x51c   : > { %v5475_v33 = vpop.eup %5474  ;;  %v2749_v25 = vmul.f32 1.442695, %v2705_v39  ;;  %v2751_v56 = vmul.f32 1.442695, %v2706_v47  ;;  %v4586_v39 = vld [vmem:[%s6936_s9 + $0x330] sm:$0xff] }
 0x51d   : > { %3007 = vmatprep.mubr.f32.mxu0 %v5475_v33  ;;  %v2668_v58 = vpop.xlane.xlu1 %2667  ;;  %v8508_v55 = vadd.f32 %v5475_v33, %v5473_v45 }
 0x51e   : > { %5488 = vpow2.f32 %v2749_v25  ;;  %v2707_v9 = vsub.f32 %v9767_v49, %v2668_v58  ;;  %v2708_v50 = vsub.f32 %v9768_v20, %v2668_v58  ;;  %v9771_v58 = vld [vmem:[#allocation97_spill] sm:$0xff] }
 0x51f   : > { %v5477_v63 = vpop.eup %5476  ;;  %5490 = vpow2.f32 %v2751_v56  ;;  %3008 = vmatmul.mubr.f32.gmra.mxu0 %v5473_v45  ;;  %v8518_v45 = vadd.f32 %v4587_v31, %v3421_v5  ;;  %v5763_v31 = vld [vmem:[%s6269_s5 + $0xd0] sm:$0xff] }
 0x520   : > { %v5479_v15 = vpop.eup %5478  ;;  %v2753_v46 = vmul.f32 1.442695, %v2707_v9  ;;  %v2755_v1 = vmul.f32 1.442695, %v2708_v50  ;;  %v9772_v9 = vld [vmem:[#allocation94_spill] sm:$0xff] }
 0x521   : > { %3012 = vmatprep.mubr.f32.mxu0 %v5479_v15  ;;  %v2671_v60 = vpop.xlane.xlu1 %2670  ;;  %v8512_v3 = vadd.f32 %v5479_v15, %v5477_v63  ;;  %v8524_v15 = vadd.f32 %v4586_v39, %v3419_v41 }
 0x522   : > { %5492 = vpow2.f32 %v2753_v46  ;;  %v2709_v8 = vsub.f32 %v9769_v26, %v2671_v60  ;;  %v2710_v4 = vsub.f32 %v9770_v24, %v2671_v60 }
 0x523   : > { %v5481_v14 = vpop.eup %5480  ;;  %5494 = vpow2.f32 %v2755_v1  ;;  %3013 = vmatmul.mubr.f32.gmra.mxu0 %v5477_v63  ;;  %v3505_v60 = vmax.f32 %v8524_v15, %v8518_v45 }
 0x524   : > { %v5483_v62 = vpop.eup %5482  ;;  %v2757_v17 = vmul.f32 1.442695, %v2709_v8  ;;  %v2759_v47 = vmul.f32 1.442695, %v2710_v4  ;;  %v5764_v4 = vld [vmem:[%s6269_s5 + $0x48] sm:$0xff] }
 0x525   : > { %3017 = vmatprep.mubr.f32.mxu0 %v5483_v62  ;;  %v2674_v33 = vpop.xlane.xlu0 %2673  ;;  %v3749_v25 = vpop.permute.xlu1 %3748  ;;  %v8520_v56 = vadd.f32 %v5483_v62, %v5481_v14 }
 0x526   : > { %5496 = vpow2.f32 %v2757_v17  ;;  %v2711_v49 = vsub.f32 %v9771_v58, %v2674_v33  ;;  %v2712_v20 = vsub.f32 %v9772_v9, %v2674_v33 }
 0x527   : > { %v5485_v50 = vpop.eup %5484  ;;  %5498 = vpow2.f32 %v2759_v47  ;;  %3018 = vmatmul.mubr.f32.gmra.mxu0 %v5481_v14  ;;  %v5765_v47 = vld [vmem:[%s6269_s5 + $0xc0] sm:$0xff] }
 0x528   : > { %v5487_v63 = vpop.eup %5486  ;;  %v2761_v46 = vmul.f32 1.442695, %v2711_v49  ;;  %v2763_v1 = vmul.f32 1.442695, %v2712_v20  ;;  %v5766_v49 = vld [vmem:[%s6269_s5 + $0x40] sm:$0xff] }
 0x529   : > { %3740 = vrot.lane.b32.xlu0 %v5763_v31, %s5841_s6  ;;  %3022 = vmatprep.mubr.f32.mxu0 %v5487_v63  ;;  %v3719_v5 = vpop.permute.xlu0 %3718  ;;  %v3717_v26 = vpop.permute.xlu1 %3716  ;;  %v8530_v8 = vadd.f32 %v5487_v63, %v5485_v50  ;;  %v5767_v63 = vld [vmem:[%s6269_s5 + $0xb8] sm:$0xff]  ;;  %v5770_v31 = vld [vmem:[%s6269_s5 + $0xa8] sm:$0xff] }
 0x52a   : > { %5500 = vpow2.f32 %v2761_v46  ;;  %5163 = vmatpush3.msra.mxu0 %v3719_v5  ;;  %5258 = vmatpush3.msra.mxu1 %v3719_v5  ;;  %v3425_v5 = vpop.f32.mrf.mxu1 }
 0x52b   : > { %v5489_v41 = vpop.eup %5488  ;;  %5502 = vpow2.f32 %v2763_v1  ;;  %3023 = vmatmul.mubr.f32.gmra.mxu0 %v5485_v50  ;;  %3506 = vmax.xlane.f32.xlu1 %v3505_v60  ;;  %v5768_v1 = vld [vmem:[%s6269_s5 + $0x38] sm:$0xff]  ;;  %v5769_v60 = vld [vmem:[%s6269_s5 + $0xb0] sm:$0xff] }
 0x52c   : > { %v5491_v24 = vpop.eup %5490  ;;  %5164 = vmatprep.subr.mxu0 %v3749_v25  ;;  %5243 = vmatprep.subr.mxu1 %v3749_v25 }
 0x52d   : > { %3706 = vrot.lane.b32.xlu0 %v5764_v4, %s5841_s6  ;;  %3027 = vmatprep.mubr.f32.mxu0 %v5491_v24  ;;  %v3747_v14 = vpop.permute.xlu1 %3746  ;;  %v8534_v62 = vadd.f32 %v5491_v24, %v5489_v41  ;;  %v4588_v24 = vld [vmem:[%s6936_s9 + $0x340] sm:$0xff] }
 0x52e   : > { %5165 = vmatpush3.msra.mxu0 %v3717_v26  ;;  %5259 = vmatpush3.msra.mxu1 %v3717_v26  ;;  %v4589_v26 = vld [vmem:[%s6936_s9 + $0x348] sm:$0xff] }
 0x52f   : > { %9773 = vst [vmem:[#allocation103_spill] sm:$0xff] %v8534_v62  ;;  %v5493_v39 = vpop.eup %5492  ;;  %3028 = vmatmul.mubr.f32.gmra.mxu0 %v5489_v41  ;;  %5166 = vmatprep.subr.mxu0 %v3747_v14  ;;  %v3427_v41 = vpop.f32.mrf.mxu1 }
 0x530   : > { %v5495_v17 = vpop.eup %5494  ;;  %5244 = vmatprep.subr.mxu1 %v3747_v14  ;;  %v8556_v4 = vadd.f32 %v4589_v26, %v3427_v41  ;;  %v8558_v14 = vadd.f32 %v4588_v24, %v3425_v5 }
 0x531   : > { %3736 = vrot.lane.b32.xlu0 %v5765_v47, %s5841_s6  ;;  %3032 = vmatprep.mubr.f32.mxu0 %v5495_v17  ;;  %v8538_v33 = vadd.f32 %v5495_v17, %v5493_v39  ;;  %v3431_v47 = vpop.f32.mrf.mxu1 }
 0x532   : > { %9775 = vst [vmem:[#allocation7_spill] sm:$0xff] %v8556_v4  ;;  %9776 = vst [vmem:[#allocation3_spill] sm:$0xff] %v8558_v14 }
 0x533   : > { %v5497_v25 = vpop.eup %5496  ;;  %3033 = vmatmul.mubr.f32.gmra.mxu0 %v5493_v39  ;;  %v3508_v39 = vmax.f32 %v8558_v14, %v8556_v4 }
 0x534   : > { %v5499_v58 = vpop.eup %5498 }
 0x535   : > { %3704 = vrot.lane.b32.xlu0 %v5766_v49, %s5841_s6  ;;  %3037 = vmatprep.mubr.f32.mxu0 %v5499_v58  ;;  %v8542_v9 = vadd.f32 %v5499_v58, %v5497_v25  ;;  %v4591_v49 = vld [vmem:[%s6936_s9 + $0x358] sm:$0xff] }
 0x537   : > { %9774 = vst [vmem:[#allocation5_spill] sm:$0xff] %v8542_v9  ;;  %v5501_v20 = vpop.eup %5500  ;;  %3038 = vmatmul.mubr.f32.gmra.mxu0 %v5497_v25 }
 0x538   : > { %v5503_v50 = vpop.eup %5502 }
 0x539   : > { %3734 = vrot.lane.b32.xlu0 %v5767_v63, %s5841_s6  ;;  %3042 = vmatprep.mubr.f32.mxu0 %v5503_v50  ;;  %v8546_v46 = vadd.f32 %v5503_v50, %v5501_v20 }
 0x53b   : > { %3043 = vmatmul.mubr.f32.gmra.mxu0 %v5501_v20  ;;  %v3433_v20 = vpop.f32.mrf.mxu1 }
 0x53c   : > { %3702 = vrot.lane.b32.xlu1 %v5768_v1, %s5841_s6  ;;  %v4590_v1 = vld [vmem:[%s6936_s9 + $0x350] sm:$0xff]  ;;  %v8568_v5 = vadd.f32 %v4591_v49, %v3433_v20 }
 0x53d   : > { %v8570_v24 = vadd.f32 %v4590_v1, %v3431_v47 }
 0x540   : > { %3732 = vrot.lane.b32.xlu1 %v5769_v60, %s5841_s6 }
 0x544   : > { %3730 = vrot.lane.b32.xlu1 %v5770_v31, %s5841_s6 }
 0x558   : > { %3509 = vmax.xlane.f32.xlu0 %v3508_v39 }
 0x55a   : > { %v8562_v17 = vpop.xlane.xlu0 %3497 }
 0x55e   : > { %v2677_v25 = vpop.xlane.xlu1 %2676  ;;  %v3715_v58 = vpop.permute.xlu0 %3714 }
 0x55f   : > { %v2713_v50 = vsub.f32 %v8318_v22, %v2677_v25  ;;  %v2714_v63 = vsub.f32 %v8312_v38, %v2677_v25  ;;  %5167 = vmatpush3.msra.mxu0 %v3715_v58  ;;  %5260 = vmatpush3.msra.mxu1 %v3715_v58  ;;  %v3511_v38 = vmax.f32 %v8570_v24, %v8568_v5 }
 0x561   : > { %v2765_v60 = vmul.f32 1.442695, %v2713_v50  ;;  %v2767_v31 = vmul.f32 1.442695, %v2714_v63 }
 0x562   : > { %v3745_v26 = vpop.permute.xlu0 %3744 }
 0x563   : > { %5504 = vpow2.f32 %v2765_v60  ;;  %v2680_v41 = vpop.xlane.xlu1 %2679  ;;  %5168 = vmatprep.subr.mxu0 %v3745_v26  ;;  %5245 = vmatprep.subr.mxu1 %v3745_v26 }
 0x564   : > { %5506 = vpow2.f32 %v2767_v31  ;;  %v2715_v39 = vsub.f32 %v8333_v42, %v2680_v41  ;;  %v2716_v22 = vsub.f32 %v8327_v29, %v2680_v41  ;;  %v5771_v41 = vld [vmem:[%s6269_s5 + $0x30] sm:$0xff] }
 0x566   : > { %v2769_v25 = vmul.f32 1.442695, %v2715_v39  ;;  %v2771_v58 = vmul.f32 1.442695, %v2716_v22  ;;  %v3713_v50 = vpop.permute.xlu0 %3712 }
 0x567   : > { %v2683_v49 = vpop.xlane.xlu1 %2682  ;;  %5169 = vmatpush3.msra.mxu0 %v3713_v50  ;;  %5261 = vmatpush3.msra.mxu1 %v3713_v50  ;;  %v5772_v50 = vld [vmem:[%s6269_s5 + $0x28] sm:$0xff] }
 0x568   : > { %5508 = vpow2.f32 %v2769_v25  ;;  %v2717_v20 = vsub.f32 %v8350_v18, %v2683_v49  ;;  %v2718_v47 = vsub.f32 %v8342_v51, %v2683_v49  ;;  %3512 = vmax.xlane.f32.xlu1 %v3511_v38  ;;  %v8582_v51 = vpop.f32.mrf.mxu1 }
 0x569   : > { %5510 = vpow2.f32 %v2771_v58 }
 0x56a   : > { %v2773_v42 = vmul.f32 1.442695, %v2717_v20  ;;  %v2775_v63 = vmul.f32 1.442695, %v2718_v47  ;;  %v3743_v29 = vpop.permute.xlu0 %3742  ;;  %v8590_v20 = vpop.f32.mrf.mxu1  ;;  %v3545_v47 = vsub.f32 %v8304_v35, %v8562_v17 }
 0x56b   : > { %v2686_v1 = vpop.xlane.xlu1 %2685  ;;  %5170 = vmatprep.subr.mxu0 %v3743_v29  ;;  %5246 = vmatprep.subr.mxu1 %v3743_v29 }
 0x56c   : > { %5512 = vpow2.f32 %v2773_v42  ;;  %v2719_v60 = vsub.f32 %v8367_v57, %v2686_v1  ;;  %v2720_v31 = vsub.f32 %v8359_v2, %v2686_v1  ;;  %v3578_v35 = vmul.f32 1.442695, %v3545_v47  ;;  %v5777_v47 = vld [vmem:[%s6269_s5 + $0x98] sm:$0xff] }
 0x56d   : > { %5514 = vpow2.f32 %v2775_v63 }
 0x56e   : > { %v2777_v26 = vmul.f32 1.442695, %v2719_v60  ;;  %v2779_v18 = vmul.f32 1.442695, %v2720_v31  ;;  %3700 = vrot.lane.b32.xlu0 %v5771_v41, %s5841_s6  ;;  %v5773_v31 = vld [vmem:[%s6269_s5 + $0xa0] sm:$0xff] }
 0x56f   : > { %v2689_v39 = vpop.xlane.xlu1 %2688 }
 0x570   : > { %v5505_v22 = vpop.eup %5504  ;;  %5516 = vpow2.f32 %v2777_v26  ;;  %v2721_v38 = vsub.f32 %v8385_v12, %v2689_v39  ;;  %v2722_v25 = vsub.f32 %v8377_v44, %v2689_v39  ;;  %v8598_v26 = vpop.f32.mrf.mxu1 }
 0x571   : > { %v5507_v58 = vpop.eup %5506  ;;  %5518 = vpow2.f32 %v2779_v18 }
 0x572   : > { %v2781_v57 = vmul.f32 1.442695, %v2721_v38  ;;  %v2783_v2 = vmul.f32 1.442695, %v2722_v25  ;;  %3698 = vrot.lane.b32.xlu0 %v5772_v50, %s5841_s6  ;;  %3047 = vmatprep.mubr.f32.mxu0 %v5507_v58  ;;  %v8588_v49 = vadd.f32 %v5507_v58, %v5505_v22  ;;  %v3445_v38 = vpop.f32.mrf.mxu1 }
 0x573   : > { %v2692_v42 = vpop.xlane.xlu1 %2691  ;;  %3048 = vmatmul.mubr.f32.gmra.mxu0 %v5505_v22  ;;  %v5775_v22 = vld [vmem:[%s6269_s5 + $0x20] sm:$0xff] }
 0x574   : > { %9777 = vst [vmem:[#allocation6_spill] sm:$0xff] %v8588_v49  ;;  %5520 = vpow2.f32 %v2781_v57  ;;  %v2723_v44 = vsub.f32 %v8403_v13, %v2692_v42  ;;  %v2724_v12 = vsub.f32 %v8395_v0, %v2692_v42  ;;  %v5774_v13 = vld [vmem:[%s6269_s5 + $0x18] sm:$0xff]  ;;  %v8614_v42 = vpop.f32.mrf.mxu1 }
 0x575   : > { %v5509_v63 = vpop.eup %5508  ;;  %5522 = vpow2.f32 %v2783_v2  ;;  %v5776_v2 = vld [vmem:[%s6269_s5 + $0x90] sm:$0xff] }
 0x576   : > { %v5511_v29 = vpop.eup %5510  ;;  %v2785_v1 = vmul.f32 1.442695, %v2723_v44  ;;  %v2787_v60 = vmul.f32 1.442695, %v2724_v12  ;;  %3728 = vrot.lane.b32.xlu0 %v5773_v31, %s5841_s6 }
 0x577   : > { %3052 = vmatprep.mubr.f32.mxu0 %v5511_v29  ;;  %v8600_v18 = vpop.xlane.xlu1 %3500  ;;  %v8602_v41 = vadd.f32 %v5511_v29, %v5509_v63 }
 0x578   : > { %5524 = vpow2.f32 %v2785_v1  ;;  %3053 = vmatmul.mubr.f32.gmra.mxu0 %v5509_v63  ;;  %v5778_v63 = vld [vmem:[%s6269_s5 + $0x10] sm:$0xff]  ;;  %v8620_v1 = vpop.f32.mrf.mxu1 }
 0x579   : > { %v5513_v0 = vpop.eup %5512  ;;  %5526 = vpow2.f32 %v2787_v60  ;;  %3694 = vrot.lane.b32.xlu1 %v5774_v13, %s5841_s6 }
 0x57a   : > { %v5515_v39 = vpop.eup %5514  ;;  %3696 = vrot.lane.b32.xlu0 %v5775_v22, %s5841_s6  ;;  %5528 = vpow2.f32 %v3578_v35  ;;  %v5779_v35 = vld [vmem:[%s6269_s5 + $0x88] sm:$0xff]  ;;  %v8626_v13 = vpop.f32.mrf.mxu1 }
 0x57b   : > { %3057 = vmatprep.mubr.f32.mxu0 %v5515_v39  ;;  %v3711_v25 = vpop.permute.xlu1 %3710  ;;  %v8608_v58 = vadd.f32 %v5515_v39, %v5513_v0 }
 0x57c   : > { %3058 = vmatmul.mubr.f32.gmra.mxu0 %v5513_v0  ;;  %5262 = vmatpush3.msra.mxu1 %v3711_v25 }
 0x57d   : > { %9778 = vst [vmem:[#allocation4_spill] sm:$0xff] %v8608_v58  ;;  %v5517_v57 = vpop.eup %5516  ;;  %3724 = vrot.lane.b32.xlu1 %v5776_v2, %s5841_s6  ;;  %5171 = vmatpush3.msra.mxu0 %v3711_v25  ;;  %v5780_v25 = vld [vmem:[%s6269_s5 + $0x8] sm:$0xff]  ;;  %v5781_v2 = vld [vmem:[%s6269_s5] sm:$0xff] }
 0x57e   : > { %v5519_v50 = vpop.eup %5518  ;;  %3726 = vrot.lane.b32.xlu0 %v5777_v47, %s5841_s6 }
 0x57f   : > { %3062 = vmatprep.mubr.f32.mxu0 %v5519_v50  ;;  %v8616_v44 = vadd.f32 %v5519_v50, %v5517_v57 }
 0x580   : > { %3063 = vmatmul.mubr.f32.gmra.mxu0 %v5517_v57  ;;  %v3457_v57 = vpop.f32.mrf.mxu1 }
 0x581   : > { %v5521_v12 = vpop.eup %5520  ;;  %3692 = vrot.lane.b32.xlu1 %v5778_v63, %s5841_s6  ;;  %v4592_v63 = vld [vmem:[%s6936_s9 + $0x360] sm:$0xff] }
 0x582   : > { %v5523_v29 = vpop.eup %5522  ;;  %v8637_v50 = vpop.f32.mrf.mxu1 }
 0x583   : > { %3067 = vmatprep.mubr.f32.mxu0 %v5523_v29  ;;  %v8622_v60 = vadd.f32 %v5523_v29, %v5521_v12 }
 0x584   : > { %3068 = vmatmul.mubr.f32.gmra.mxu0 %v5521_v12  ;;  %v8639_v47 = vpop.f32.mrf.mxu1  ;;  %v4593_v12 = vld [vmem:[%s6936_s9 + $0x368] sm:$0xff] }
 0x585   : > { %9779 = vst [vmem:[#allocation8_spill] sm:$0xff] %v8622_v60  ;;  %v5525_v31 = vpop.eup %5524  ;;  %3722 = vrot.lane.b32.xlu1 %v5779_v35, %s5841_s6  ;;  %v8644_v35 = vadd.f32 %v4593_v12, %v8590_v20  ;;  %v3709_v20 = vpop.permute.xlu1 %3708 }
 0x586   : > { %v5527_v0 = vpop.eup %5526 }
 0x587   : > { %3072 = vmatprep.mubr.f32.mxu0 %v5527_v0  ;;  %v8628_v39 = vadd.f32 %v5527_v0, %v5525_v31  ;;  %v8630_v22 = vpop.eup %5528  ;;  %9781 = vst [vmem:[#allocation9_spill] sm:$0xff] %v8644_v35  ;;  %v4595_v0 = vld [vmem:[%s6936_s9 + $0x378] sm:$0xff] }
 0x588   : > { %9780 = vst [vmem:[#allocation10_spill] sm:$0xff] %v8630_v22  ;;  %3073 = vmatmul.mubr.f32.gmra.mxu0 %v5525_v31  ;;  %v8646_v31 = vpop.f32.mrf.mxu1  ;;  %v8657_v49 = vadd.f32 %v4595_v0, %v3445_v38 }
 0x589   : > { %3848 = vmatprep.mubr.f32.mxu0 %v8630_v22  ;;  %3690 = vrot.lane.b32.xlu1 %v5780_v25, %s5841_s6  ;;  %v8650_v25 = vadd.f32 %v4592_v63, %v8582_v51 }
 0x58a   : > { %9783 = vst [vmem:[#allocation104_spill] sm:$0xff] %v8657_v49  ;;  %v8659_v9 = vpop.f32.mrf.mxu1 }
 0x58b   : > { %v3514_v58 = vmax.f32 %v8650_v25, %v8644_v35 }
 0x58d   : > { %3688 = vrot.lane.b32.xlu1 %v5781_v2, %s5841_s6  ;;  %v4594_v2 = vld [vmem:[%s6936_s9 + $0x370] sm:$0xff] }
 0x58e   : > { %v8664_v14 = vadd.f32 %v4594_v2, %v8598_v26  ;;  %v4597_v26 = vld [vmem:[%s6936_s9 + $0x388] sm:$0xff] }
 0x596   : > { %v4906_v29 = vpop.f32.mrf.mxu0 }
 0x598   : > { %v4907_v22 = vpop.f32.mrf.mxu0 }
 0x599   : > { %v8652_v60 = vadd.f32 %v4907_v22, %v4906_v29  ;;  %v3517_v22 = vmax.f32 %v8664_v14, %v8657_v49  ;;  %v8670_v29 = vpop.f32.mrf.mxu1 }
 0x59b   : > { %9782 = vst [vmem:[#allocation12_spill] sm:$0xff] %v8652_v60  ;;  %v4909_v4 = vpop.f32.mrf.mxu0  ;;  %v3739_v60 = vpop.permute.xlu1 %3738 }
 0x59c   : > { %v8661_v12 = vpop.xlane.xlu0 %3503 }
 0x59d   : > { %v4910_v62 = vpop.f32.mrf.mxu0  ;;  %3515 = vmax.xlane.f32.xlu0 %v3514_v58 }
 0x59e   : > { %v8666_v51 = vadd.f32 %v4910_v62, %v4909_v4  ;;  %v8674_v62 = vpop.f32.mrf.mxu1 }
 0x59f   : > { %v4912_v63 = vpop.f32.mrf.mxu0 }
 0x5a0   : > { %9784 = vst [vmem:[#allocation15_spill] sm:$0xff] %v8666_v51  ;;  %v3741_v38 = vpop.permute.xlu0 %3740  ;;  %v3479_v58 = vpop.f32.mrf.mxu1 }
 0x5a1   : > { %v4913_v0 = vpop.f32.mrf.mxu0  ;;  %3518 = vmax.xlane.f32.xlu0 %v3517_v22  ;;  %5172 = vmatprep.subr.mxu0 %v3741_v38  ;;  %v4596_v22 = vld [vmem:[%s6936_s9 + $0x380] sm:$0xff] }
 0x5a2   : > { %v8672_v35 = vadd.f32 %v4913_v0, %v4912_v63  ;;  %5247 = vmatprep.subr.mxu1 %v3741_v38  ;;  %5173 = vmatpush3.msra.mxu0 %v3709_v20  ;;  %v8679_v63 = vadd.f32 %v4597_v26, %v8620_v1  ;;  %v3481_v38 = vpop.f32.mrf.mxu1 }
 0x5a3   : > { %5263 = vmatpush3.msra.mxu1 %v3709_v20  ;;  %5174 = vmatprep.subr.mxu0 %v3739_v60  ;;  %v4599_v20 = vld [vmem:[%s6936_s9 + $0x398] sm:$0xff] }
 0x5a4   : > { %9785 = vst [vmem:[#allocation93_spill] sm:$0xff] %v8672_v35  ;;  %5248 = vmatprep.subr.mxu1 %v3739_v60  ;;  %v3707_v4 = vpop.permute.xlu0 %3706  ;;  %9786 = vst [vmem:[#allocation67_spill] sm:$0xff] %v8679_v63  ;;  %v8683_v60 = vadd.f32 %v4596_v22, %v8614_v42  ;;  %v8688_v51 = vadd.f32 %v4599_v20, %v3457_v57  ;;  %v3485_v1 = vpop.f32.mrf.mxu1  ;;  %v4606_v42 = vld [vmem:[%s6936_s9 + $0x3d0] sm:$0xff]  ;;  %v4601_v57 = vld [vmem:[%s6936_s9 + $0x3a8] sm:$0xff] }
 0x5a5   : > { %5175 = vmatpush3.msra.mxu0 %v3707_v4  ;;  %5264 = vmatpush3.msra.mxu1 %v3707_v4  ;;  %v4598_v4 = vld [vmem:[%s6936_s9 + $0x390] sm:$0xff] }
 0x5a6   : > { %9787 = vst [vmem:[#allocation92_spill] sm:$0xff] %v8683_v60  ;;  %v3520_v35 = vmax.f32 %v8683_v60, %v8679_v63  ;;  %9788 = vst [vmem:[#allocation17_spill] sm:$0xff] %v8688_v51  ;;  %v8692_v49 = vadd.f32 %v4598_v4, %v8626_v13  ;;  %v3487_v20 = vpop.f32.mrf.mxu1  ;;  %v8702_v60 = vadd.f32 %v4606_v42, %v3479_v58  ;;  %v4600_v13 = vld [vmem:[%s6936_s9 + $0x3a0] sm:$0xff] }
 0x5a7   : > { %v4608_v58 = vld [vmem:[%s6936_s9 + $0x3e0] sm:$0xff] }
 0x5a8   : > { %v3737_v2 = vpop.permute.xlu0 %3736  ;;  %9789 = vst [vmem:[#allocation99_spill] sm:$0xff] %v8692_v49  ;;  %v3523_v22 = vmax.f32 %v8692_v49, %v8688_v51  ;;  %9790 = vst [vmem:[#allocation16_spill] sm:$0xff] %v8702_v60  ;;  %v8714_v49 = vadd.f32 %v4600_v13, %v8637_v50  ;;  %v4610_v50 = vld [vmem:[%s6936_s9 + $0x3f0] sm:$0xff] }
 0x5a9   : > { %5176 = vmatprep.subr.mxu0 %v3737_v2  ;;  %5249 = vmatprep.subr.mxu1 %v3737_v2  ;;  %v4607_v2 = vld [vmem:[%s6936_s9 + $0x3d8] sm:$0xff] }
 0x5ac   : > { %v3705_v0 = vpop.permute.xlu0 %3704 }
 0x5ad   : > { %5177 = vmatpush3.msra.mxu0 %v3705_v0  ;;  %5265 = vmatpush3.msra.mxu1 %v3705_v0  ;;  %v8697_v0 = vadd.f32 %v4607_v2, %v3481_v38  ;;  %v4609_v38 = vld [vmem:[%s6936_s9 + $0x3e8] sm:$0xff]  ;;  %v3491_v2 = vpop.f32.mrf.mxu1 }
 0x5ae   : > { %v8719_v42 = vadd.f32 %v4609_v38, %v3487_v20  ;;  %v8729_v20 = vadd.f32 %v4610_v50, %v3491_v2  ;;  %v4604_v38 = vld [vmem:[%s6936_s9 + $0x3c0] sm:$0xff] }
 0x5af   : > { %v3535_v4 = vmax.f32 %v8702_v60, %v8697_v0  ;;  %v8722_v60 = vadd.f32 %v4608_v58, %v3485_v1  ;;  %v4605_v1 = vld [vmem:[%s6936_s9 + $0x3c8] sm:$0xff]  ;;  %v8743_v2 = vadd.f32 %v4604_v38, %v8670_v29 }
 0x5b0   : > { %v3735_v26 = vpop.permute.xlu0 %3734  ;;  %v8738_v58 = vadd.f32 %v4605_v1, %v8674_v62  ;;  %v3544_v1 = vsub.f32 %v8308_v21, %v8562_v17  ;;  %v3549_v17 = vsub.f32 %v8486_v16, %v8661_v12  ;;  %v9793_v16 = vld [vmem:[#allocation7_spill] sm:$0xff] }
 0x5b1   : > { %3521 = vmax.xlane.f32.xlu1 %v3520_v35  ;;  %5178 = vmatprep.subr.mxu0 %v3735_v26  ;;  %v8706_v35 = vadd.f32 %v4601_v57, %v8639_v47  ;;  %v3493_v57 = vpop.f32.mrf.mxu1 }
 0x5b2   : > { %5250 = vmatprep.subr.mxu1 %v3735_v26  ;;  %v5782_v26 = vld [vmem:[%s6269_s5 + $0x80] sm:$0xff]  ;;  %v3576_v21 = vmul.f32 1.442695, %v3544_v1 }
 0x5b3   : > { %v3526_v47 = vmax.f32 %v8714_v49, %v8706_v35 }
 0x5b4   : > { %v8700_v63 = vpop.xlane.xlu1 %3506 }
 0x5b5   : > { %3524 = vmax.xlane.f32.xlu1 %v3523_v22  ;;  %v4611_v22 = vld [vmem:[%s6936_s9 + $0x3f8] sm:$0xff] }
 0x5b6   : > { %v8727_v13 = vadd.f32 %v4611_v22, %v3493_v57  ;;  %v4602_v22 = vld [vmem:[%s6936_s9 + $0x3b0] sm:$0xff] }
 0x5b7   : > { %3720 = vrot.lane.b32.xlu0 %v5782_v26, %s5841_s6 }
 0x5b8   : > { %v3703_v51 = vpop.permute.xlu1 %3702 }
 0x5b9   : > { %3536 = vmax.xlane.f32.xlu1 %v3535_v4  ;;  %5179 = vmatpush3.msra.mxu0 %v3703_v51  ;;  %v3541_v4 = vmax.f32 %v8729_v20, %v8727_v13 }
 0x5ba   : > { %5266 = vmatpush3.msra.mxu1 %v3703_v51  ;;  %v3538_v51 = vmax.f32 %v8722_v60, %v8719_v42 }
 0x5bc   : > { %v3733_v26 = vpop.permute.xlu1 %3732 }
 0x5bd   : > { %3527 = vmax.xlane.f32.xlu1 %v3526_v47  ;;  %5180 = vmatprep.subr.mxu0 %v3733_v26  ;;  %v4603_v47 = vld [vmem:[%s6936_s9 + $0x3b8] sm:$0xff] }
 0x5be   : > { %5251 = vmatprep.subr.mxu1 %v3733_v26  ;;  %v8747_v57 = vadd.f32 %v4603_v47, %v8659_v9  ;;  %v8763_v9 = vpop.f32.mrf.mxu0 }
 0x5c0   : > { %v3731_v29 = vpop.permute.xlu1 %3730 }
 0x5c1   : > { %3539 = vmax.xlane.f32.xlu1 %v3538_v51 }
 0x5c5   : > { %3542 = vmax.xlane.f32.xlu1 %v3541_v4 }
 0x5c9   : > { %1910 = vadd.xlane.f32.xlu1 %v8347_v27  ;;  %v3532_v27 = vmax.f32 %v8743_v2, %v8738_v58 }
 0x5cd   : > { %1916 = vadd.xlane.f32.xlu1 %v8382_v36  ;;  %v8753_v36 = vadd.f32 %v4602_v22, %v8646_v31  ;;  %v8767_v31 = vpop.f32.mrf.mxu0 }
 0x5cf   : > { %v3529_v62 = vmax.f32 %v8753_v36, %v8747_v57 }
 0x5d1   : > { %1922 = vadd.xlane.f32.xlu1 %v8418_v52 }
 0x5d5   : > { %1928 = vadd.xlane.f32.xlu1 %v8442_v32 }
 0x5d6   : > { %3533 = vmax.xlane.f32.xlu0 %v3532_v27 }
 0x5d9   : > { %1934 = vadd.xlane.f32.xlu1 %v8458_v34  ;;  %v8771_v34 = vpop.f32.mrf.mxu0 }
 0x5da   : > { %3530 = vmax.xlane.f32.xlu0 %v3529_v62 }
 0x5dd   : > { %1940 = vadd.xlane.f32.xlu1 %v8468_v40  ;;  %v3546_v40 = vsub.f32 %v8420_v59, %v8600_v18 }
 0x5de   : > { %1907 = vadd.xlane.f32.xlu0 %v8330_v48 }
 0x5e1   : > { %1946 = vadd.xlane.f32.xlu1 %v8480_v19  ;;  %v8761_v52 = vpop.xlane.xlu0 %3509  ;;  %v3547_v19 = vsub.f32 %v8412_v11, %v8600_v18 }
 0x5e2   : > { %1913 = vadd.xlane.f32.xlu0 %v8364_v23 }
 0x5e3   : > { %v3582_v59 = vmul.f32 1.442695, %v3547_v19  ;;  %v9794_v19 = vld [vmem:[#allocation5_spill] sm:$0xff] }
 0x5e5   : > { %1952 = vadd.xlane.f32.xlu1 %v8496_v43  ;;  %v3701_v32 = vpop.permute.xlu0 %3700 }
 0x5e6   : > { %1919 = vadd.xlane.f32.xlu0 %v8400_v10  ;;  %5181 = vmatpush3.msra.mxu0 %v3701_v32  ;;  %v8777_v10 = vpop.f32.mrf.mxu0 }
 0x5e7   : > { %5267 = vmatpush3.msra.mxu1 %v3701_v32  ;;  %5182 = vmatprep.subr.mxu0 %v3731_v29 }
 0x5e8   : > { %5252 = vmatprep.subr.mxu1 %v3731_v29 }
 0x5e9   : > { %2793 = vadd.xlane.f32.xlu1 %v8504_v6  ;;  %v3699_v48 = vpop.permute.xlu0 %3698  ;;  %v8783_v6 = vpop.f32.mrf.mxu0 }
 0x5ea   : > { %1925 = vadd.xlane.f32.xlu0 %v8432_v54  ;;  %5183 = vmatpush3.msra.mxu0 %v3699_v48  ;;  %v3580_v54 = vmul.f32 1.442695, %v3546_v40 }
 0x5eb   : > { %5268 = vmatpush3.msra.mxu1 %v3699_v48 }
 0x5ec   : > { %5530 = vpow2.f32 %v3580_v54 }
 0x5ed   : > { %2799 = vadd.xlane.f32.xlu1 %v8512_v3  ;;  %v3729_v23 = vpop.permute.xlu0 %3728  ;;  %v3550_v3 = vsub.f32 %v8524_v15, %v8700_v63  ;;  %5532 = vpow2.f32 %v3582_v59  ;;  %v9795_v59 = vld [vmem:[#allocation6_spill] sm:$0xff] }
 0x5ee   : > { %1931 = vadd.xlane.f32.xlu0 %v8452_v37  ;;  %5184 = vmatprep.subr.mxu0 %v3729_v23  ;;  %v3551_v37 = vsub.f32 %v8518_v45, %v8700_v63 }
 0x5ef   : > { %5253 = vmatprep.subr.mxu1 %v3729_v23  ;;  %v3588_v18 = vmul.f32 1.442695, %v3550_v3  ;;  %v3586_v23 = vmul.f32 1.442695, %v3549_v17  ;;  %v9799_v17 = vld [vmem:[#allocation9_spill] sm:$0xff] }
 0x5f1   : > { %v3513_v43 = vpop.xlane.xlu1 %3512  ;;  %2805 = vadd.xlane.f32.xlu1 %v8530_v8  ;;  %v3697_v26 = vpop.permute.xlu0 %3696  ;;  %5534 = vpow2.f32 %v3588_v18 }
 0x5f2   : > { %1937 = vadd.xlane.f32.xlu0 %v8462_v7  ;;  %5185 = vmatpush3.msra.mxu0 %v3697_v26  ;;  %v8791_v8 = vpop.f32.mrf.mxu0  ;;  %v3554_v50 = vsub.f32 %v8570_v24, %v3513_v43  ;;  %v3590_v7 = vmul.f32 1.442695, %v3551_v37  ;;  %v3555_v15 = vsub.f32 %v8568_v5, %v3513_v43  ;;  %v9796_v37 = vld [vmem:[#allocation4_spill] sm:$0xff] }
 0x5f3   : > { %5269 = vmatpush3.msra.mxu1 %v3697_v26 }
 0x5f4   : > { %v3596_v63 = vmul.f32 1.442695, %v3554_v50  ;;  %5536 = vpow2.f32 %v3590_v7  ;;  %v9797_v50 = vld [vmem:[#allocation8_spill] sm:$0xff]  ;;  %v9798_v7 = vld [vmem:[#allocation10_spill] sm:$0xff] }
 0x5f5   : > { %2811 = vadd.xlane.f32.xlu1 %v8538_v33  ;;  %v3695_v11 = vpop.permute.xlu1 %3694  ;;  %v3727_v51 = vpop.permute.xlu0 %3726 }
 0x5f6   : > { %1943 = vadd.xlane.f32.xlu0 %v8474_v30  ;;  %5186 = vmatprep.subr.mxu0 %v3727_v51  ;;  %v8797_v33 = vpop.f32.mrf.mxu0  ;;  %v3598_v30 = vmul.f32 1.442695, %v3555_v15  ;;  %5538 = vpow2.f32 %v3596_v63 }
 0x5f7   : > { %5254 = vmatprep.subr.mxu1 %v3727_v51  ;;  %5187 = vmatpush3.msra.mxu0 %v3695_v11 }
 0x5f8   : > { %5270 = vmatpush3.msra.mxu1 %v3695_v11  ;;  %v8801_v24 = vpop.f32.mrf.mxu0  ;;  %5540 = vpow2.f32 %v3598_v30 }
 0x5f9   : > { %2817 = vadd.xlane.f32.xlu1 %v8546_v46  ;;  %v3725_v45 = vpop.permute.xlu1 %3724  ;;  %5542 = vpow2.f32 %v3576_v21 }
 0x5fa   : > { %1949 = vadd.xlane.f32.xlu0 %v8488_v61  ;;  %5188 = vmatprep.subr.mxu0 %v3725_v45  ;;  %v8805_v4 = vpop.f32.mrf.mxu0  ;;  %v8808_v61 = vpop.eup %5530 }
 0x5fb   : > { %5255 = vmatprep.subr.mxu1 %v3725_v45 }
 0x5fc   : > { %v8815_v38 = vpop.f32.mrf.mxu0 }
 0x5fd   : > { %2823 = vadd.xlane.f32.xlu1 %v8602_v41  ;;  %v3693_v5 = vpop.permute.xlu1 %3692  ;;  %v8810_v41 = vpop.eup %5532 }
 0x5fe   : > { %2790 = vadd.xlane.f32.xlu0 %v8500_v28  ;;  %5189 = vmatpush3.msra.mxu0 %v3693_v5  ;;  %v3643_v47 = vadd.f32 %v8810_v41, %v8808_v61 }
 0x5ff   : > { %5271 = vmatpush3.msra.mxu1 %v3693_v5 }
 0x601   : > { %2829 = vadd.xlane.f32.xlu1 %v8616_v44  ;;  %v3723_v46 = vpop.permute.xlu1 %3722  ;;  %v8818_v44 = vpop.eup %5534 }
 0x602   : > { %2796 = vadd.xlane.f32.xlu0 %v8508_v55  ;;  %5190 = vmatprep.subr.mxu0 %v3723_v46  ;;  %v3548_v55 = vsub.f32 %v8492_v53, %v8661_v12  ;;  %v8824_v22 = vpop.eup %5536  ;;  %v9792_v53 = vld [vmem:[#allocation3_spill] sm:$0xff]  ;;  %v3553_v12 = vsub.f32 %v9793_v16, %v8761_v52  ;;  %v9800_v16 = vld [vmem:[#allocation104_spill] sm:$0xff] }
 0x603   : > { %5256 = vmatprep.subr.mxu1 %v3723_v46  ;;  %v8831_v27 = vpop.eup %5538  ;;  %v3552_v32 = vsub.f32 %v9792_v53, %v8761_v52  ;;  %v3649_v29 = vadd.f32 %v8824_v22, %v8818_v44 }
 0x604   : > { %v3584_v62 = vmul.f32 1.442695, %v3548_v55  ;;  %v3594_v3 = vmul.f32 1.442695, %v3553_v12 }
 0x605   : > { %2835 = vadd.xlane.f32.xlu1 %v8628_v39  ;;  %v3691_v28 = vpop.permute.xlu1 %3690  ;;  %v8828_v39 = vpop.f32.mrf.mxu0  ;;  %v3592_v43 = vmul.f32 1.442695, %v3552_v32 }
 0x606   : > { %2802 = vadd.xlane.f32.xlu0 %v8520_v56  ;;  %5191 = vmatpush3.msra.mxu0 %v3691_v28  ;;  %v9791_v56 = vld [vmem:[#allocation103_spill] sm:$0xff]  ;;  %v8837_v48 = vpop.eup %5540  ;;  %5544 = vpow2.f32 %v3584_v62 }
 0x607   : > { %5272 = vmatpush3.msra.mxu1 %v3691_v28  ;;  %v8841_v40 = vpop.f32.mrf.mxu0  ;;  %v3655_v54 = vadd.f32 %v8837_v48, %v8831_v27  ;;  %5546 = vpow2.f32 %v3586_v23  ;;  %v5543_v11 = vpop.eup %5542 }
 0x608   : > { %5548 = vpow2.f32 %v3592_v43  ;;  %v3640_v15 = vadd.f32 %v5543_v11, %v9798_v7 }
 0x609   : > { %3644 = vadd.xlane.f32.xlu1 %v3643_v47  ;;  %v8846_v26 = vpop.f32.mrf.mxu0  ;;  %5550 = vpow2.f32 %v3594_v3 }
 0x60a   : > { %2808 = vadd.xlane.f32.xlu0 %v9791_v56 }
 0x60b   : > { %v8849_v52 = vpop.f32.mrf.mxu0 }
 0x60d   : > { %3650 = vadd.xlane.f32.xlu1 %v3649_v29  ;;  %v8852_v18 = vpop.f32.mrf.mxu0 }
 0x60e   : > { %2814 = vadd.xlane.f32.xlu0 %v9794_v19 }
 0x60f   : > { %v8856_v63 = vpop.f32.mrf.mxu0 }
 0x611   : > { %3656 = vadd.xlane.f32.xlu1 %v3655_v54  ;;  %v8858_v1 = vpop.f32.mrf.mxu0 }
 0x612   : > { %2820 = vadd.xlane.f32.xlu0 %v9795_v59  ;;  %v3689_v59 = vpop.permute.xlu1 %3688 }
 0x613   : > { %v5545_v51 = vpop.eup %5544  ;;  %v8860_v55 = vpop.f32.mrf.mxu0 }
 0x614   : > { %v5547_v45 = vpop.eup %5546 }
 0x615   : > { %v5549_v30 = vpop.eup %5548  ;;  %v3646_v5 = vadd.f32 %v5547_v45, %v5545_v51  ;;  %v8864_v32 = vpop.f32.mrf.mxu0 }
 0x616   : > { %2826 = vadd.xlane.f32.xlu0 %v9796_v37  ;;  %v5551_v46 = vpop.eup %5550 }
 0x617   : > { %v3652_v28 = vadd.f32 %v5551_v46, %v5549_v30  ;;  %v8868_v54 = vpop.f32.mrf.mxu0 }
 0x61a   : > { %2832 = vadd.xlane.f32.xlu0 %v9797_v50 }
 0x61e   : > { %3641 = vadd.xlane.f32.xlu0 %v3640_v15 }
 0x622   : > { %3647 = vadd.xlane.f32.xlu0 %v3646_v5 }
 0x626   : > { %3653 = vadd.xlane.f32.xlu0 %v3652_v28  ;;  %v3516_v47 = vpop.xlane.xlu0 %3515  ;;  %v9801_v28 = vld [vmem:[#allocation92_spill] sm:$0xff] }
 0x627   : > { %v3556_v21 = vsub.f32 %v8650_v25, %v3516_v47  ;;  %v3557_v56 = vsub.f32 %v9799_v17, %v3516_v47  ;;  %v8870_v25 = vpop.f32.mrf.mxu0  ;;  %v9802_v47 = vld [vmem:[#allocation67_spill] sm:$0xff] }
 0x629   : > { %v3600_v62 = vmul.f32 1.442695, %v3556_v21  ;;  %v3602_v53 = vmul.f32 1.442695, %v3557_v56 }
 0x62a   : > { %v3519_v29 = vpop.xlane.xlu0 %3518 }
 0x62b   : > { %5552 = vpow2.f32 %v3600_v62  ;;  %v3558_v23 = vsub.f32 %v8664_v14, %v3519_v29  ;;  %v3559_v12 = vsub.f32 %v9800_v16, %v3519_v29  ;;  %v8874_v14 = vpop.f32.mrf.mxu0  ;;  %v9804_v29 = vld [vmem:[#allocation17_spill] sm:$0xff] }
 0x62c   : > { %5554 = vpow2.f32 %v3602_v53  ;;  %v9803_v53 = vld [vmem:[#allocation99_spill] sm:$0xff] }
 0x62d   : > { %v3604_v19 = vmul.f32 1.442695, %v3558_v23  ;;  %v3606_v43 = vmul.f32 1.442695, %v3559_v12  ;;  %v8876_v7 = vpop.f32.mrf.mxu0 }
 0x62e   : > { %v3721_v3 = vpop.permute.xlu0 %3720 }
 0x62f   : > { %5556 = vpow2.f32 %v3604_v19  ;;  %5192 = vmatprep.subr.mxu0 %v3721_v3  ;;  %5257 = vmatprep.subr.mxu1 %v3721_v3 }
 0x630   : > { %5558 = vpow2.f32 %v3606_v43  ;;  %5193 = vmatpush3.msra.mxu0 %v3689_v59  ;;  %5273 = vmatpush3.msra.mxu1 %v3689_v59 }
 0x631   : > { %3849 = vmatmul.mubr.f32.vlgmr.msra.gmra.mxu0 %v5543_v11 }
 0x632   : > { %3853 = vmatprep.mubr.f32.mxu0 %v8810_v41 }
 0x635   : > { %3854 = vmatmul.mubr.f32.gmra.mxu0 %v8808_v61 }
 0x636   : > { %3858 = vmatprep.mubr.f32.mxu0 %v5547_v45  ;;  %v8882_v45 = vpop.f32.mrf.mxu0 }
 0x638   : > { %v5553_v37 = vpop.eup %5552  ;;  %v8886_v19 = vpop.f32.mrf.mxu0 }
 0x639   : > { %v5555_v50 = vpop.eup %5554  ;;  %3859 = vmatmul.mubr.f32.gmra.mxu0 %v5545_v51 }
 0x63a   : > { %v3522_v15 = vpop.xlane.xlu1 %3521  ;;  %3863 = vmatprep.mubr.f32.mxu0 %v8824_v22  ;;  %v3658_v5 = vadd.f32 %v5555_v50, %v5553_v37 }
 0x63b   : > { %v3560_v11 = vsub.f32 %v9801_v28, %v3522_v15  ;;  %v3561_v21 = vsub.f32 %v9802_v47, %v3522_v15 }
 0x63c   : > { %v5557_v17 = vpop.eup %5556  ;;  %3659 = vadd.xlane.f32.xlu0 %v3658_v5 }
 0x63d   : > { %v5559_v41 = vpop.eup %5558  ;;  %v3608_v61 = vmul.f32 1.442695, %v3560_v11  ;;  %v3610_v56 = vmul.f32 1.442695, %v3561_v21  ;;  %3864 = vmatmul.mubr.f32.gmra.mxu0 %v8818_v44  ;;  %v8892_v44 = vpop.f32.mrf.mxu0 }
 0x63e   : > { %v3525_v51 = vpop.xlane.xlu1 %3524  ;;  %3868 = vmatprep.mubr.f32.mxu0 %v5551_v46  ;;  %v3661_v62 = vadd.f32 %v5559_v41, %v5557_v17 }
 0x63f   : > { %5560 = vpow2.f32 %v3608_v61  ;;  %v3562_v22 = vsub.f32 %v9803_v53, %v3525_v51  ;;  %v3563_v23 = vsub.f32 %v9804_v29, %v3525_v51  ;;  %v8896_v5 = vpop.f32.mrf.mxu0 }
 0x640   : > { %5562 = vpow2.f32 %v3610_v56  ;;  %3662 = vadd.xlane.f32.xlu1 %v3661_v62 }
 0x641   : > { %v3612_v16 = vmul.f32 1.442695, %v3562_v22  ;;  %v3614_v12 = vmul.f32 1.442695, %v3563_v23  ;;  %3869 = vmatmul.mubr.f32.gmra.mxu0 %v5549_v30 }
 0x642   : > { %v8888_v43 = vpop.xlane.xlu1 %3536  ;;  %3873 = vmatprep.mubr.f32.mxu0 %v8837_v48 }
 0x643   : > { %5564 = vpow2.f32 %v3612_v16  ;;  %v3571_v62 = vsub.f32 %v8697_v0, %v8888_v43  ;;  %v9805_v0 = vld [vmem:[#allocation16_spill] sm:$0xff] }
 0x644   : > { %5566 = vpow2.f32 %v3614_v12 }
 0x645   : > { %3874 = vmatmul.mubr.f32.gmra.mxu0 %v8831_v27  ;;  %v8898_v27 = vpop.f32.mrf.mxu0  ;;  %v3630_v23 = vmul.f32 1.442695, %v3571_v62 }
 0x646   : > { %v3528_v46 = vpop.xlane.xlu1 %3527  ;;  %3878 = vmatprep.mubr.f32.mxu0 %v5555_v50 }
 0x647   : > { %v3564_v3 = vsub.f32 %v8714_v49, %v3528_v46  ;;  %v3565_v59 = vsub.f32 %v8706_v35, %v3528_v46  ;;  %v8900_v35 = vpop.f32.mrf.mxu0 }
 0x649   : > { %v3616_v15 = vmul.f32 1.442695, %v3564_v3  ;;  %v3618_v30 = vmul.f32 1.442695, %v3565_v59  ;;  %3879 = vmatmul.mubr.f32.gmra.mxu0 %v5553_v37 }
 0x64a   : > { %3883 = vmatprep.mubr.f32.mxu0 %v5559_v41  ;;  %v3540_v50 = vpop.xlane.xlu1 %3539  ;;  %v8902_v41 = vpop.f32.mrf.mxu0 }
 0x64b   : > { %5568 = vpow2.f32 %v3616_v15  ;;  %v3572_v29 = vsub.f32 %v8722_v60, %v3540_v50  ;;  %v3573_v16 = vsub.f32 %v8719_v42, %v3540_v50 }
 0x64c   : > { %v5561_v48 = vpop.eup %5560  ;;  %5570 = vpow2.f32 %v3618_v30  ;;  %v8904_v56 = vpop.f32.mrf.mxu0  ;;  %v3570_v30 = vsub.f32 %v9805_v0, %v8888_v43 }
 0x64d   : > { %v5563_v28 = vpop.eup %5562  ;;  %3884 = vmatmul.mubr.f32.gmra.mxu0 %v5557_v17  ;;  %5572 = vpow2.f32 %v3630_v23  ;;  %v3634_v60 = vmul.f32 1.442695, %v3573_v16 }
 0x64e   : > { %3888 = vmatprep.mubr.f32.mxu0 %v5563_v28  ;;  %v3664_v11 = vadd.f32 %v5563_v28, %v5561_v48  ;;  %v3543_v21 = vpop.xlane.xlu1 %3542  ;;  %v8910_v22 = vpop.f32.mrf.mxu0  ;;  %v3628_v50 = vmul.f32 1.442695, %v3570_v30 }
 0x64f   : > { %v3575_v43 = vsub.f32 %v8727_v13, %v3543_v21 }
 0x650   : > { %v5565_v47 = vpop.eup %5564  ;;  %3665 = vadd.xlane.f32.xlu0 %v3664_v11  ;;  %v8918_v15 = vpop.f32.mrf.mxu0 }
 0x651   : > { %v5567_v49 = vpop.eup %5566  ;;  %3889 = vmatmul.mubr.f32.gmra.mxu0 %v5561_v48  ;;  %v3632_v48 = vmul.f32 1.442695, %v3572_v29 }
 0x652   : > { %3893 = vmatprep.mubr.f32.mxu0 %v5567_v49  ;;  %v3667_v37 = vadd.f32 %v5567_v49, %v5565_v47  ;;  %v8908_v53 = vpop.xlane.xlu1 %1910 }
 0x654   : > { %3668 = vadd.xlane.f32.xlu1 %v3667_v37 }
 0x655   : > { %3894 = vmatmul.mubr.f32.gmra.mxu0 %v5565_v47 }
 0x656   : > { %v8916_v59 = vpop.xlane.xlu1 %1916 }
 0x658   : > { %v5569_v61 = vpop.eup %5568 }
 0x659   : > { %v5571_v17 = vpop.eup %5570 }
 0x65a   : > { %3898 = vmatprep.mubr.f32.mxu0 %v5571_v17  ;;  %v3670_v51 = vadd.f32 %v5571_v17, %v5569_v61 }
 0x65b   : > { %3899 = vmatmul.mubr.f32.gmra.mxu0 %v5569_v61  ;;  %v1923_v61 = vpop.xlane.xlu1 %1922 }
 0x65c   : > { %3671 = vadd.xlane.f32.xlu0 %v3670_v51  ;;  %v3574_v51 = vsub.f32 %v8729_v20, %v3543_v21 }
 0x65e   : > { %v3636_v29 = vmul.f32 1.442695, %v3574_v51 }
 0x65f   : > { %v3534_v12 = vpop.xlane.xlu0 %3533  ;;  %v1929_v23 = vpop.xlane.xlu1 %1928 }
 0x660   : > { %v3568_v46 = vsub.f32 %v8743_v2, %v3534_v12  ;;  %v3569_v3 = vsub.f32 %v8738_v58, %v3534_v12  ;;  %v8924_v58 = vpop.f32.mrf.mxu0 }
 0x662   : > { %v3624_v28 = vmul.f32 1.442695, %v3568_v46  ;;  %v3626_v11 = vmul.f32 1.442695, %v3569_v3  ;;  %v8928_v62 = vpop.f32.mrf.mxu0  ;;  %v5573_v46 = vpop.eup %5572 }
 0x663   : > { %v3531_v47 = vpop.xlane.xlu0 %3530  ;;  %v1935_v21 = vpop.xlane.xlu1 %1934 }
 0x664   : > { %5574 = vpow2.f32 %v3624_v28  ;;  %v3566_v42 = vsub.f32 %v8753_v36, %v3531_v47  ;;  %v3567_v2 = vsub.f32 %v8747_v57, %v3531_v47  ;;  %v3638_v57 = vmul.f32 1.442695, %v3575_v43  ;;  %v8930_v16 = vpop.f32.mrf.mxu0 }
 0x665   : > { %5576 = vpow2.f32 %v3626_v11 }
 0x666   : > { %5578 = vpow2.f32 %v3632_v48  ;;  %v3620_v49 = vmul.f32 1.442695, %v3566_v42  ;;  %v3622_v37 = vmul.f32 1.442695, %v3567_v2  ;;  %v8932_v0 = vpop.f32.mrf.mxu0 }
 0x667   : > { %5580 = vpow2.f32 %v3634_v60  ;;  %v1908_v17 = vpop.xlane.xlu0 %1907 }
 0x668   : > { %5582 = vpow2.f32 %v3620_v49  ;;  %v8934_v47 = vpop.f32.mrf.mxu0 }
 0x669   : > { %5584 = vpow2.f32 %v3622_v37  ;;  %v1941_v37 = vpop.xlane.xlu1 %1940 }
 0x66a   : > { %5586 = vpow2.f32 %v3628_v50  ;;  %v8936_v43 = vpop.f32.mrf.mxu0 }
 0x66b   : > { %v1914_v36 = vpop.xlane.xlu0 %1913  ;;  %5588 = vpow2.f32 %v3638_v57 }
 0x66c   : > { %5590 = vpow2.f32 %v3636_v29 }
 0x66d   : > { %5592 = vrcp.f32 %v1908_v17 }
 0x66e   : > { %5594 = vrcp.f32 %v8908_v53 }
 0x66f   : > { %v1920_v12 = vpop.xlane.xlu0 %1919  ;;  %5596 = vrcp.f32 %v8916_v59  ;;  %v9808_v59 = vld [vmem:[#allocation12_spill] sm:$0xff] }
 0x670   : > { %5598 = vrcp.f32 %v1923_v61  ;;  %v4917_v61 = vadd.f32 %v8767_v31, %v8763_v9  ;;  %v9810_v31 = vld [vmem:[#allocation93_spill] sm:$0xff] }
 0x671   : > { %v5575_v13 = vpop.eup %5574  ;;  %5600 = vrcp.f32 %v1914_v36 }
 0x672   : > { %v5577_v3 = vpop.eup %5576  ;;  %5602 = vrcp.f32 %v1929_v23 }
 0x673   : > { %v5579_v20 = vpop.eup %5578  ;;  %3908 = vmatprep.mubr.f32.mxu1 %v5577_v3  ;;  %v1926_v30 = vpop.xlane.xlu0 %1925  ;;  %v3676_v48 = vadd.f32 %v5577_v3, %v5575_v13  ;;  %5604 = vrcp.f32 %v1920_v12 }
 0x674   : > { %v5581_v28 = vpop.eup %5580  ;;  %3909 = vmatmul.mubr.f32.vlgmr.msra.gmra.mxu1 %v5575_v13  ;;  %v8938_v13 = vpop.f32.mrf.mxu0  ;;  %5606 = vrcp.f32 %v1935_v21 }
 0x675   : > { %v5583_v11 = vpop.eup %5582  ;;  %3913 = vmatprep.mubr.f32.mxu1 %v5573_v46  ;;  %3677 = vadd.xlane.f32.xlu0 %v3676_v48  ;;  %v3682_v2 = vadd.f32 %v5581_v28, %v5579_v20  ;;  %9806 = vst [vmem:[#allocation96_spill] sm:$0xff] %v8938_v13  ;;  %v1947_v48 = vpop.xlane.xlu1 %1946  ;;  %5608 = vrcp.f32 %v1926_v30 }
 0x676   : > { %v5585_v60 = vpop.eup %5584  ;;  %5610 = vrcp.f32 %v1941_v37 }
 0x677   : > { %v5587_v42 = vpop.eup %5586  ;;  %3903 = vmatprep.mubr.f32.mxu0 %v5585_v60  ;;  %v3673_v50 = vadd.f32 %v5585_v60, %v5583_v11  ;;  %v1932_v49 = vpop.xlane.xlu0 %1931 }
 0x678   : > { %3904 = vmatmul.mubr.f32.gmra.mxu0 %v5583_v11  ;;  %3914 = vmatmul.mubr.f32.gmra.mxu1 %v5587_v42  ;;  %v5589_v51 = vpop.eup %5588  ;;  %v3679_v57 = vadd.f32 %v5587_v42, %v5573_v46  ;;  %5612 = vrcp.f32 %v1932_v49 }
 0x679   : > { %3918 = vmatprep.mubr.f32.mxu1 %v5581_v28  ;;  %3683 = vadd.xlane.f32.xlu0 %v3682_v2  ;;  %v5591_v29 = vpop.eup %5590  ;;  %v8942_v28 = vpop.f32.mrf.mxu0  ;;  %5614 = vrcp.f32 %v1947_v48 }
 0x67a   : > { %3674 = vadd.xlane.f32.xlu1 %v3673_v50  ;;  %v3685_v11 = vadd.f32 %v5591_v29, %v5589_v51  ;;  %v1953_v46 = vpop.xlane.xlu1 %1952  ;;  %v5593_v60 = vpop.eup %5592 }
 0x67b   : > { %v1938_v3 = vpop.xlane.xlu0 %1937  ;;  %v8944_v17 = vpop.f32.mrf.mxu0 }
 0x67c   : > { %3919 = vmatmul.mubr.f32.gmra.mxu1 %v5579_v20  ;;  %v5595_v50 = vpop.eup %5594  ;;  %5616 = vrcp.f32 %v1938_v3 }
 0x67d   : > { %3923 = vmatprep.mubr.f32.mxu1 %v5589_v51  ;;  %v8946_v42 = vpop.f32.mrf.mxu0  ;;  %v2243_v51 = vmul.f32 %v5593_v60, %v9808_v59  ;;  %v4923_v60 = vadd.f32 %v8791_v8, %v8783_v6  ;;  %v4929_v6 = vadd.f32 %v8815_v38, %v8805_v4  ;;  %5618 = vrcp.f32 %v1953_v46 }
 0x67e   : > { %3680 = vadd.xlane.f32.xlu1 %v3679_v57  ;;  %9807 = vst [vmem:[#allocation64_spill] sm:$0xff] %v8946_v42  ;;  %v2794_v53 = vpop.xlane.xlu1 %2793  ;;  %v5597_v57 = vpop.eup %5596 }
 0x67f   : > { %v1944_v20 = vpop.xlane.xlu0 %1943  ;;  %v5599_v23 = vpop.eup %5598  ;;  %v2246_v42 = vmul.f32 %v5597_v57, %v4917_v61  ;;  %v4920_v57 = vadd.f32 %v8777_v10, %v8771_v34  ;;  %v4935_v34 = vadd.f32 %v8849_v52, %v8846_v26 }
 0x680   : > { %3924 = vmatmul.mubr.f32.gmra.mxu1 %v5591_v29  ;;  %v8949_v29 = vpop.f32.mrf.mxu0  ;;  %v5601_v30 = vpop.eup %5600  ;;  %v2248_v59 = vmul.f32 %v5599_v23, %v4923_v60  ;;  %5620 = vrcp.f32 %v1944_v20 }
 0x681   : > { %v5603_v9 = vpop.eup %5602  ;;  %v2245_v37 = vmul.f32 %v5601_v30, %v9810_v31  ;;  %5622 = vrcp.f32 %v2794_v53  ;;  %v4938_v31 = vadd.f32 %v8856_v63, %v8852_v18  ;;  %v4953_v18 = vadd.f32 %v8892_v44, %v8886_v19 }
 0x682   : > { %3686 = vadd.xlane.f32.xlu1 %v3685_v11  ;;  %v2800_v12 = vpop.xlane.xlu1 %2799  ;;  %v9809_v11 = vld [vmem:[#allocation15_spill] sm:$0xff]  ;;  %v8955_v13 = vpop.f32.mrf.mxu0  ;;  %v2250_v61 = vmul.f32 %v5603_v9, %v4929_v6 }
 0x683   : > { %v1950_v2 = vpop.xlane.xlu0 %1949  ;;  %v2244_v21 = vmul.f32 %v5595_v50, %v9809_v11  ;;  %v5605_v49 = vpop.eup %5604  ;;  %v4926_v11 = vadd.f32 %v8801_v24, %v8797_v33  ;;  %v4932_v33 = vadd.f32 %v8841_v40, %v8828_v39  ;;  %v4941_v24 = vadd.f32 %v8860_v55, %v8858_v1 }
 0x684   : > { %v5607_v3 = vpop.eup %5606  ;;  %5624 = vrcp.f32 %v1950_v2  ;;  %v4947_v39 = vadd.f32 %v8874_v14, %v8870_v25 }
 0x685   : > { %v5609_v23 = vpop.eup %5608  ;;  %5626 = vrcp.f32 %v2800_v12 }
 0x686   : > { %v2806_v8 = vpop.xlane.xlu1 %2805  ;;  %v5611_v38 = vpop.eup %5610  ;;  %v2249_v20 = vmul.f32 %v5609_v23, %v4926_v11  ;;  %v5052_v23 = vadd.f32 %v8898_v27, %v8896_v5  ;;  %v5067_v5 = vadd.f32 %v8934_v47, %v8932_v0 }
 0x687   : > { %v2791_v36 = vpop.xlane.xlu0 %2790  ;;  %v5613_v30 = vpop.eup %5612  ;;  %v2254_v2 = vmul.f32 %v5611_v38, %v4941_v24  ;;  %v5058_v38 = vadd.f32 %v8910_v22, %v8904_v56  ;;  %v5073_v56 = vadd.f32 %v8944_v17, %v8942_v28 }
 0x688   : > { %v5615_v52 = vpop.eup %5614  ;;  %5628 = vrcp.f32 %v2791_v36  ;;  %v2251_v53 = vmul.f32 %v5613_v30, %v4932_v33  ;;  %v5064_v33 = vadd.f32 %v8930_v16, %v8928_v62 }
 0x689   : > { %v5617_v60 = vpop.eup %5616  ;;  %5630 = vrcp.f32 %v2806_v8  ;;  %v2256_v12 = vmul.f32 %v5615_v52, %v4947_v39  ;;  %v9812_v39 = vld [vmem:[#allocation64_spill] sm:$0xff] }
 0x68a   : > { %v2812_v46 = vpop.xlane.xlu1 %2811  ;;  %v5619_v55 = vpop.eup %5618  ;;  %v2253_v36 = vmul.f32 %v5617_v60, %v4938_v31 }
 0x68b   : > { %v2797_v50 = vpop.xlane.xlu0 %2796 }
 0x68c   : > { %5632 = vrcp.f32 %v2797_v50 }
 0x68d   : > { %5634 = vrcp.f32 %v2812_v46 }
 0x68e   : > { %v2818_v40 = vpop.xlane.xlu1 %2817 }
 0x68f   : > { %3977 = vrot.lane.b32.xlu0 %v2243_v51, %s5842_s15  ;;  %v8962_v51 = vpop.f32.mrf.mxu0  ;;  %v2803_v4 = vpop.xlane.xlu0 %2802 }
 0x690   : > { %5636 = vrcp.f32 %v2803_v4  ;;  %v5079_v62 = vadd.f32 %v8962_v51, %v8955_v13 }
 0x691   : > { %v8970_v48 = vpop.f32.mrf.mxu0  ;;  %5638 = vrcp.f32 %v2818_v40  ;;  %v5076_v40 = vadd.f32 %v8949_v29, %v9812_v39 }
 0x693   : > { %3979 = vrot.lane.b32.xlu1 %v2244_v21, %s5842_s15  ;;  %3983 = vrot.lane.b32.xlu0 %v2246_v42, %s5842_s15  ;;  %v2247_v42 = vmul.f32 %v5605_v49, %v4920_v57  ;;  %v8978_v10 = vpop.f32.mrf.mxu0  ;;  %v2252_v21 = vmul.f32 %v5607_v3, %v4935_v34  ;;  %v2809_v9 = vpop.xlane.xlu0 %2808  ;;  %v2258_v57 = vmul.f32 %v5619_v55, %v4953_v18 }
 0x694   : > { %v2824_v49 = vpop.xlane.xlu1 %2823  ;;  %5640 = vrcp.f32 %v2809_v9 }
 0x695   : > { %v8986_v26 = vpop.f32.mrf.mxu0  ;;  %5642 = vrcp.f32 %v2824_v49 }
 0x697   : > { %3981 = vrot.lane.b32.xlu1 %v2245_v37, %s5842_s15  ;;  %3987 = vrot.lane.b32.xlu0 %v2248_v59, %s5842_s15  ;;  %v8994_v1 = vpop.f32.mrf.mxu0  ;;  %v5621_v37 = vpop.eup %5620  ;;  %v4944_v59 = vadd.f32 %v8868_v54, %v8864_v32  ;;  %v4950_v32 = vadd.f32 %v8882_v45, %v8876_v7  ;;  %v5055_v54 = vadd.f32 %v8902_v41, %v8900_v35 }
 0x698   : > { %v2815_v25 = vpop.xlane.xlu0 %2814  ;;  %v5623_v14 = vpop.eup %5622  ;;  %v5061_v7 = vadd.f32 %v8924_v58, %v8918_v15  ;;  %v5085_v55 = vadd.f32 %v8994_v1, %v8986_v26 }
 0x699   : > { %v9002_v63 = vpop.f32.mrf.mxu0  ;;  %v2255_v50 = vmul.f32 %v5621_v37, %v4944_v59  ;;  %v5625_v6 = vpop.eup %5624  ;;  %v3095_v3 = vmul.f32 %v5623_v14, %v5055_v54  ;;  %5644 = vrcp.f32 %v2815_v25  ;;  %v5082_v37 = vadd.f32 %v8978_v10, %v8970_v48 }
 0x69a   : > { %v5627_v44 = vpop.eup %5626  ;;  %v2257_v8 = vmul.f32 %v5625_v6, %v4950_v32  ;;  %v2830_v45 = vpop.xlane.xlu1 %2829 }
 0x69b   : > { %3985 = vrot.lane.b32.xlu1 %v2247_v42, %s5842_s15  ;;  %3991 = vrot.lane.b32.xlu0 %v2250_v61, %s5842_s15  ;;  %v9010_v19 = vpop.f32.mrf.mxu0  ;;  %v5629_v42 = vpop.eup %5628  ;;  %v3097_v34 = vmul.f32 %v5627_v44, %v5061_v7  ;;  %5646 = vrcp.f32 %v2830_v45 }
 0x69c   : > { %v2821_v61 = vpop.xlane.xlu0 %2820  ;;  %v5631_v41 = vpop.eup %5630  ;;  %v3094_v11 = vmul.f32 %v5629_v42, %v5052_v23  ;;  %v5088_v14 = vadd.f32 %v9010_v19, %v9002_v63 }
 0x69d   : > { %v5089_v35 = vpop.f32.mrf.mxu0  ;;  %v5633_v4 = vpop.eup %5632  ;;  %5648 = vrcp.f32 %v2821_v61 }
 0x69e   : > { %v5635_v58 = vpop.eup %5634  ;;  %v2836_v46 = vpop.xlane.xlu1 %2835 }
 0x69f   : > { %3989 = vrot.lane.b32.xlu1 %v2249_v20, %s5842_s15  ;;  %3995 = vrot.lane.b32.xlu0 %v2252_v21, %s5842_s15  ;;  %v5090_v27 = vpop.f32.mrf.mxu0  ;;  %v3096_v20 = vmul.f32 %v5633_v4, %v5058_v38  ;;  %v3099_v21 = vmul.f32 %v5631_v41, %v5067_v5  ;;  %v5637_v30 = vpop.eup %5636  ;;  %5650 = vrcp.f32 %v2836_v46  ;;  %v3101_v24 = vmul.f32 %v5635_v58, %v5073_v56  ;;  %v9813_v38 = vld [vmem:[#allocation43_spill] sm:$0xff] }
 0x6a0   : > { %v2827_v15 = vpop.xlane.xlu0 %2826  ;;  %v5639_v0 = vpop.eup %5638  ;;  %v3098_v47 = vmul.f32 %v5637_v30, %v5064_v33  ;;  %v5091_v59 = vadd.f32 %v5090_v27, %v5089_v35  ;;  %v9814_v30 = vld [vmem:[#allocation47_spill] sm:$0xff] }
 0x6a1   : > { %v5092_v22 = vpop.f32.mrf.mxu0  ;;  %5652 = vrcp.f32 %v2827_v15  ;;  %v5641_v52 = vpop.eup %5640  ;;  %v3103_v9 = vmul.f32 %v5639_v0, %v5079_v62  ;;  %v9815_v56 = vld [vmem:[#allocation39_spill] sm:$0xff]  ;;  %v9817_v62 = vld [vmem:[#allocation41_spill] sm:$0xff] }
 0x6a2   : > { %v5643_v28 = vpop.eup %5642  ;;  %v3645_v63 = vpop.xlane.xlu1 %3644 }
 0x6a3   : > { %3993 = vrot.lane.b32.xlu1 %v2251_v53, %s5842_s15  ;;  %3999 = vrot.lane.b32.xlu0 %v2254_v2, %s5842_s15  ;;  %v9811_v2 = vld [vmem:[#allocation96_spill] sm:$0xff]  ;;  %v5093_v16 = vpop.f32.mrf.mxu0 }
 0x6a4   : > { %v2833_v53 = vpop.xlane.xlu0 %2832  ;;  %v5070_v60 = vadd.f32 %v9811_v2, %v8936_v43  ;;  %v9816_v2 = vld [vmem:[#allocation51_spill] sm:$0xff] }
 0x6a5   : > { %5654 = vrcp.f32 %v2833_v53  ;;  %v5095_v43 = vpop.f32.mrf.mxu0 }
 0x6a6   : > { %v3100_v17 = vmul.f32 %v5641_v52, %v5070_v60  ;;  %v5645_v31 = vpop.eup %5644  ;;  %v3651_v44 = vpop.xlane.xlu1 %3650 }
 0x6a7   : > { %3997 = vrot.lane.b32.xlu1 %v2253_v36, %s5842_s15  ;;  %4003 = vrot.lane.b32.xlu0 %v2256_v12, %s5842_s15  ;;  %v3102_v51 = vmul.f32 %v5645_v31, %v5076_v40  ;;  %v3105_v36 = vmul.f32 %v5643_v28, %v5085_v55  ;;  %v5096_v29 = vpop.f32.mrf.mxu0  ;;  %v9818_v40 = vld [vmem:[#allocation50_spill] sm:$0xff] }
 0x6a8   : > { %v5647_v13 = vpop.eup %5646  ;;  %v5097_v49 = vadd.f32 %v5096_v29, %v5095_v43  ;;  %v3642_v32 = vpop.xlane.xlu0 %3641 }
 0x6a9   : > { %v3107_v1 = vmul.f32 %v5647_v13, %v5091_v59  ;;  %5656 = vrcp.f32 %v3642_v32  ;;  %v9819_v13 = vld [vmem:[#allocation45_spill] sm:$0xff]  ;;  %v9824_v32 = vld [vmem:[#allocation26_spill] sm:$0xff] }
 0x6aa   : > { %v5649_v12 = vpop.eup %5648  ;;  %5658 = vrcp.f32 %v3645_v63  ;;  %v3657_v41 = vpop.xlane.xlu1 %3656 }
 0x6ab   : > { %4001 = vrot.lane.b32.xlu1 %v2255_v50, %s5842_s15  ;;  %4007 = vrot.lane.b32.xlu0 %v2258_v57, %s5842_s15  ;;  %v3104_v26 = vmul.f32 %v5649_v12, %v5082_v37  ;;  %v5094_v57 = vadd.f32 %v5093_v16, %v5092_v22  ;;  %v9820_v12 = vld [vmem:[#allocation23_spill] sm:$0xff] }
 0x6ac   : > { %v5651_v18 = vpop.eup %5650  ;;  %v3648_v54 = vpop.xlane.xlu0 %3647  ;;  %v9821_v37 = vld [vmem:[#allocation27_spill] sm:$0xff] }
 0x6ad   : > { %v3109_v48 = vmul.f32 %v5651_v18, %v5097_v49  ;;  %5660 = vrcp.f32 %v3648_v54  ;;  %v4773_v59 = vadd.f32 %v9821_v37, %v9820_v12  ;;  %v9825_v54 = vld [vmem:[#allocation31_spill] sm:$0xff] }
 0x6ae   : > { %v5653_v25 = vpop.eup %5652  ;;  %5662 = vrcp.f32 %v3651_v44  ;;  %v4779_v63 = vadd.f32 %v9825_v54, %v9824_v32  ;;  %v9840_v54 = vld [vmem:[#allocation44_spill] sm:$0xff] }
 0x6af   : > { %4005 = vrot.lane.b32.xlu1 %v2257_v8, %s5842_s15  ;;  %4043 = vrot.lane.b32.xlu0 %v3095_v3, %s5843_s10  ;;  %v3106_v50 = vmul.f32 %v5653_v25, %v5088_v14  ;;  %v9822_v25 = vld [vmem:[#allocation52_spill] sm:$0xff] }
 0x6b0   : > { %v3654_v19 = vpop.xlane.xlu0 %3653 }
 0x6b1   : > { %5664 = vrcp.f32 %v3654_v19 }
 0x6b2   : > { %v5655_v10 = vpop.eup %5654  ;;  %5666 = vrcp.f32 %v9813_v38 }
 0x6b3   : > { %4041 = vrot.lane.b32.xlu1 %v3094_v11, %s5843_s10  ;;  %4047 = vrot.lane.b32.xlu0 %v3097_v34, %s5843_s10  ;;  %v3108_v6 = vmul.f32 %v5655_v10, %v5094_v57  ;;  %5668 = vrcp.f32 %v3657_v41 }
 0x6b4   : > { %5670 = vrcp.f32 %v9814_v30 }
 0x6b5   : > { %5672 = vrcp.f32 %v9815_v56  ;;  %v9832_v56 = vld [vmem:[#allocation22_spill] sm:$0xff] }
 0x6b6   : > { %v5657_v23 = vpop.eup %5656 }
 0x6b7   : > { %4045 = vrot.lane.b32.xlu1 %v3096_v20, %s5843_s10  ;;  %4051 = vrot.lane.b32.xlu0 %v3099_v21, %s5843_s10  ;;  %v5659_v4 = vpop.eup %5658 }
 0x6ba   : > { %v5661_v21 = vpop.eup %5660 }
 0x6bb   : > { %4049 = vrot.lane.b32.xlu1 %v3098_v47, %s5843_s10  ;;  %4055 = vrot.lane.b32.xlu0 %v3101_v24, %s5843_s10  ;;  %v5663_v53 = vpop.eup %5662 }
 0x6be   : > { %v5665_v39 = vpop.eup %5664 }
 0x6bf   : > { %4053 = vrot.lane.b32.xlu1 %v3100_v17, %s5843_s10  ;;  %4059 = vrot.lane.b32.xlu0 %v3103_v9, %s5843_s10  ;;  %v5667_v43 = vpop.eup %5666 }
 0x6c0   : > { %v1363_v49 = vmul.f32 %v5667_v43, %v4773_v59  ;;  %v9836_v43 = vld [vmem:[#allocation38_spill] sm:$0xff] }
 0x6c3   : > { %4057 = vrot.lane.b32.xlu1 %v3102_v51, %s5843_s10  ;;  %4063 = vrot.lane.b32.xlu0 %v3105_v36, %s5843_s10 }
 0x6c5   : > { %v3660_v3 = vpop.xlane.xlu0 %3659 }
 0x6c6   : > { %5674 = vrcp.f32 %v3660_v3  ;;  %v9826_v3 = vld [vmem:[#allocation20_spill] sm:$0xff] }
 0x6c7   : > { %4061 = vrot.lane.b32.xlu1 %v3104_v26, %s5843_s10  ;;  %4067 = vrot.lane.b32.xlu0 %v3107_v1, %s5843_s10  ;;  %5676 = vrcp.f32 %v9816_v2  ;;  %v5669_v1 = vpop.eup %5668  ;;  %v9834_v2 = vld [vmem:[#allocation55_spill] sm:$0xff] }
 0x6c8   : > { %5678 = vrcp.f32 %v9817_v62 }
 0x6c9   : > { %v3663_v58 = vpop.xlane.xlu1 %3662 }
 0x6ca   : > { %5680 = vrcp.f32 %v3663_v58  ;;  %v9830_v58 = vld [vmem:[#allocation35_spill] sm:$0xff] }
 0x6cb   : > { %4065 = vrot.lane.b32.xlu1 %v3106_v50, %s5843_s10  ;;  %4071 = vrot.lane.b32.xlu0 %v3109_v48, %s5843_s10  ;;  %5682 = vrcp.f32 %v9818_v40  ;;  %v5671_v50 = vpop.eup %5670  ;;  %v9823_v48 = vld [vmem:[#allocation49_spill] sm:$0xff] }
 0x6cc   : > { %5684 = vrcp.f32 %v9819_v13 }
 0x6cf   : > { %4069 = vrot.lane.b32.xlu1 %v3108_v6, %s5843_s10  ;;  %v5673_v6 = vpop.eup %5672 }
 0x6d9   : > { %v3666_v45 = vpop.xlane.xlu0 %3665 }
 0x6da   : > { %5686 = vrcp.f32 %v3666_v45 }
 0x6db   : > { %5688 = vrcp.f32 %v9822_v25 }
 0x6dc   : > { %5690 = vrcp.f32 %v9823_v48 }
 0x6dd   : > { %v3669_v47 = vpop.xlane.xlu1 %3668 }
 0x6de   : > { %5692 = vrcp.f32 %v3669_v47 }
 0x6e5   : > { %v9055_v27 = vpop.xlane.xlu0 %3671 }
 0x6f1   : > { %v5194_v8 = vpop.f32.mrf.mxu0 }
 0x6f3   : > { %v5195_v42 = vpop.f32.mrf.mxu0 }
 0x6f4   : > { %v5196_v61 = vadd.f32 %v5195_v42, %v5194_v8  ;;  %v9827_v42 = vld [vmem:[#allocation21_spill] sm:$0xff] }
 0x6f5   : > { %v5197_v7 = vpop.f32.mrf.mxu0 }
 0x6f6   : > { %v3945_v35 = vmul.f32 %v5657_v23, %v5196_v61  ;;  %v4767_v61 = vadd.f32 %v9827_v42, %v9826_v3 }
 0x6f7   : > { %v5198_v11 = vpop.f32.mrf.mxu0 }
 0x6f8   : > { %v5199_v34 = vadd.f32 %v5198_v11, %v5197_v7  ;;  %4105 = vrot.lane.b32.xlu1 %v3945_v35, %s5844_s11  ;;  %v5675_v7 = vpop.eup %5674  ;;  %v1365_v35 = vmul.f32 %v5671_v50, %v4779_v63  ;;  %v9828_v11 = vld [vmem:[#allocation48_spill] sm:$0xff]  ;;  %v9841_v63 = vld [vmem:[#allocation46_spill] sm:$0xff] }
 0x6f9   : > { %v5200_v5 = vpop.f32.mrf.mxu0  ;;  %v5677_v41 = vpop.eup %5676  ;;  %5694 = vrcp.f32 %v9828_v11 }
 0x6fa   : > { %v3946_v15 = vmul.f32 %v5659_v4, %v5199_v34  ;;  %v1361_v4 = vmul.f32 %v5673_v6, %v4767_v61 }
 0x6fb   : > { %v5201_v46 = vpop.f32.mrf.mxu0 }
 0x6fc   : > { %v5202_v20 = vadd.f32 %v5201_v46, %v5200_v5  ;;  %4107 = vrot.lane.b32.xlu0 %v3946_v15, %s5844_s11  ;;  %v5679_v5 = vpop.eup %5678  ;;  %v9829_v15 = vld [vmem:[#allocation30_spill] sm:$0xff] }
 0x6fd   : > { %v5203_v33 = vpop.f32.mrf.mxu0  ;;  %v4785_v46 = vadd.f32 %v9830_v58, %v9829_v15 }
 0x6fe   : > { %v3947_v22 = vmul.f32 %v5661_v21, %v5202_v20  ;;  %v9060_v0 = vpop.xlane.xlu0 %3677  ;;  %v9831_v20 = vld [vmem:[#allocation59_spill] sm:$0xff] }
 0x6ff   : > { %v5204_v24 = vpop.f32.mrf.mxu0  ;;  %5696 = vrcp.f32 %v9831_v20  ;;  %v1367_v62 = vmul.f32 %v5677_v41, %v4785_v46 }
 0x700   : > { %v5205_v52 = vadd.f32 %v5204_v24, %v5203_v33  ;;  %4109 = vrot.lane.b32.xlu1 %v3947_v22, %s5844_s11  ;;  %v9833_v22 = vld [vmem:[#allocation25_spill] sm:$0xff]  ;;  %5698 = vrcp.f32 %v9834_v2  ;;  %v9848_v2 = vld [vmem:[#allocation14_spill] sm:$0xff] }
 0x701   : > { %v5206_v60 = vpop.f32.mrf.mxu0  ;;  %v4770_v47 = vadd.f32 %v9833_v22, %v9832_v56  ;;  %5700 = vrcp.f32 %v9055_v27  ;;  %v9845_v56 = vld [vmem:[#allocation32_spill] sm:$0xff]  ;;  %v9846_v22 = vld [vmem:[#allocation34_spill] sm:$0xff] }
 0x702   : > { %v3948_v16 = vmul.f32 %v5663_v53, %v5205_v52  ;;  %v9065_v28 = vpop.xlane.xlu0 %3683  ;;  %v5681_v53 = vpop.eup %5680 }
 0x703   : > { %v9067_v17 = vpop.xlane.xlu1 %3674  ;;  %v5207_v9 = vpop.f32.mrf.mxu0 }
 0x704   : > { %v5208_v31 = vadd.f32 %v5207_v9, %v5206_v60  ;;  %4111 = vrot.lane.b32.xlu0 %v3948_v16, %s5844_s11  ;;  %v5683_v16 = vpop.eup %5682 }
 0x705   : > { %v5209_v55 = vpop.f32.mrf.mxu0  ;;  %v5685_v40 = vpop.eup %5684 }
 0x706   : > { %v3949_v51 = vmul.f32 %v5665_v39, %v5208_v31  ;;  %v9072_v36 = vpop.permute.xlu0 %3977  ;;  %v1362_v31 = vmul.f32 %v5679_v5, %v4770_v47  ;;  %v4788_v47 = vadd.f32 %v9846_v22, %v9845_v56 }
 0x707   : > { %v9076_v29 = vpop.xlane.xlu1 %3680  ;;  %v5210_v18 = vpop.f32.mrf.mxu0 }
 0x708   : > { %v5211_v26 = vadd.f32 %v5210_v18, %v5209_v55  ;;  %4113 = vrot.lane.b32.xlu1 %v3949_v51, %s5844_s11  ;;  %v9835_v55 = vld [vmem:[#allocation36_spill] sm:$0xff]  ;;  %v9837_v51 = vld [vmem:[#allocation54_spill] sm:$0xff] }
 0x709   : > { %v5212_v14 = vpop.f32.mrf.mxu0  ;;  %v4791_v13 = vadd.f32 %v9836_v43, %v9835_v55  ;;  %5702 = vrcp.f32 %v9837_v51  ;;  %v9838_v18 = vld [vmem:[#allocation24_spill] sm:$0xff] }
 0x70a   : > { %v3950_v10 = vmul.f32 %v5669_v1, %v5211_v26  ;;  %v3984_v57 = vpop.permute.xlu0 %3983  ;;  %v9839_v26 = vld [vmem:[#allocation29_spill] sm:$0xff]  ;;  %v9849_v51 = vld [vmem:[#allocation40_spill] sm:$0xff] }
 0x70b   : > { %v9083_v19 = vpop.xlane.xlu1 %3686  ;;  %v9086_v44 = vsel %vm701_vm0, %v1363_v49, %v3984_v57  ;;  %v5213_v8 = vpop.f32.mrf.mxu0  ;;  %v4776_v1 = vadd.f32 %v9839_v26, %v9838_v18  ;;  %v1369_v50 = vmul.f32 %v5683_v16, %v4791_v13 }
 0x70c   : > { %v5214_v23 = vadd.f32 %v5213_v8, %v5212_v14  ;;  %4115 = vrot.lane.b32.xlu0 %v3950_v10, %s5844_s11  ;;  %v5687_v14 = vpop.eup %5686  ;;  %v4797_v8 = vadd.f32 %v9841_v63, %v9840_v54 }
 0x70d   : > { %v5215_v45 = vpop.f32.mrf.mxu0  ;;  %v5689_v48 = vpop.eup %5688  ;;  %v1364_v57 = vmul.f32 %v5685_v40, %v4776_v1  ;;  %v9851_v1 = vld [vmem:[#allocation58_spill] sm:$0xff] }
 0x70e   : > { %v3951_v34 = vmul.f32 %v5675_v7, %v5214_v23  ;;  %v3988_v38 = vpop.permute.xlu0 %3987  ;;  %v5691_v32 = vpop.eup %5690  ;;  %v9842_v23 = vld [vmem:[#allocation28_spill] sm:$0xff]  ;;  %v9843_v7 = vld [vmem:[#allocation33_spill] sm:$0xff] }
 0x70f   : > { %v3980_v21 = vpop.permute.xlu1 %3979  ;;  %v9096_v30 = vsel %vm701_vm0, %v1365_v35, %v3988_v38  ;;  %v5216_v33 = vpop.f32.mrf.mxu0  ;;  %v9844_v35 = vld [vmem:[#allocation57_spill] sm:$0xff] }
 0x710   : > { %v9101_v24 = vsel %vm701_vm0, %v1361_v4, %v3980_v21  ;;  %v5217_v52 = vadd.f32 %v5216_v33, %v5215_v45  ;;  %4117 = vrot.lane.b32.xlu1 %v3951_v34, %s5844_s11  ;;  %v4782_v45 = vadd.f32 %v9843_v7, %v9842_v23  ;;  %5704 = vrcp.f32 %v9844_v35  ;;  %v5693_v34 = vpop.eup %5692 }
 0x711   : > { %v5218_v60 = vpop.f32.mrf.mxu0  ;;  %v1371_v4 = vmul.f32 %v5689_v48, %v4797_v8  ;;  %v5695_v58 = vpop.eup %5694 }
 0x712   : > { %v3952_v9 = vmul.f32 %v5681_v53, %v5217_v52  ;;  %v3992_v39 = vpop.permute.xlu0 %3991  ;;  %v1366_v5 = vmul.f32 %v5691_v32, %v4782_v45  ;;  %v5697_v33 = vpop.eup %5696  ;;  %v9847_v52 = vld [vmem:[#allocation56_spill] sm:$0xff] }
 0x713   : > { %v3982_v12 = vpop.permute.xlu1 %3981  ;;  %v9110_v37 = vsel %vm701_vm0, %v1367_v62, %v3992_v39  ;;  %v5219_v59 = vpop.f32.mrf.mxu0  ;;  %5706 = vrcp.f32 %v9847_v52 }
 0x714   : > { %v9115_v25 = vsel %vm701_vm0, %v1362_v31, %v3982_v12  ;;  %v5220_v27 = vadd.f32 %v5219_v59, %v5218_v60  ;;  %4119 = vrot.lane.b32.xlu0 %v3952_v9, %s5844_s11  ;;  %v1373_v60 = vmul.f32 %v5697_v33, %v9848_v2  ;;  %v5699_v16 = vpop.eup %5698  ;;  %v1368_v31 = vmul.f32 %v5695_v58, %v4788_v47  ;;  %v9850_v12 = vld [vmem:[#allocation42_spill] sm:$0xff] }
 0x715   : > { %v5221_v49 = vpop.f32.mrf.mxu0  ;;  %v5701_v40 = vpop.eup %5700  ;;  %v4794_v59 = vadd.f32 %v9850_v12, %v9849_v51  ;;  %5708 = vrcp.f32 %v9060_v0 }
 0x716   : > { %v3953_v10 = vmul.f32 %v5687_v14, %v5220_v27  ;;  %v3996_v6 = vpop.permute.xlu0 %3995  ;;  %v5703_v13 = vpop.eup %5702  ;;  %5710 = vrcp.f32 %v9067_v17 }
 0x717   : > { %v3986_v3 = vpop.permute.xlu1 %3985  ;;  %v9121_v42 = vsel %vm701_vm0, %v1369_v50, %v3996_v6  ;;  %v5222_v61 = vpop.f32.mrf.mxu0  ;;  %v1375_v27 = vmul.f32 %v5703_v13, %v9851_v1  ;;  %v1370_v14 = vmul.f32 %v5699_v16, %v4794_v59  ;;  %v9852_v6 = vld [vmem:[#allocation53_spill] sm:$0xff]  ;;  %5712 = vrcp.f32 %v9065_v28 }
 0x718   : > { %v9127_v41 = vsel %vm701_vm0, %v1364_v57, %v3986_v3  ;;  %v5223_v11 = vadd.f32 %v5222_v61, %v5221_v49  ;;  %4121 = vrot.lane.b32.xlu1 %v3953_v10, %s5844_s11  ;;  %v9853_v61 = vld [vmem:[#allocation61_spill] sm:$0xff]  ;;  %5714 = vrcp.f32 %v9076_v29 }
 0x719   : > { %5716 = vrcp.f32 %v9083_v19 }
 0x71a   : > { %v3954_v38 = vmul.f32 %v5693_v34, %v5223_v11  ;;  %v4000_v15 = vpop.permute.xlu0 %3999 }
 0x71b   : > { %v3990_v46 = vpop.permute.xlu1 %3989  ;;  %v9131_v20 = vsel %vm701_vm0, %v1371_v4, %v4000_v15  ;;  %v5224_v21 = vpop.f32.mrf.mxu0 }
 0x71c   : > { %v9137_v53 = vsel %vm701_vm0, %v1366_v5, %v3990_v46  ;;  %4123 = vrot.lane.b32.xlu0 %v3954_v38, %s5844_s11 }
 0x71d   : > { %v5225_v62 = vpop.f32.mrf.mxu0  ;;  %v5705_v57 = vpop.eup %5704 }
 0x71e   : > { %v5226_v9 = vadd.f32 %v5225_v62, %v5224_v21  ;;  %v4004_v39 = vpop.permute.xlu0 %4003  ;;  %v1372_v32 = vmul.f32 %v5705_v57, %v9852_v6 }
 0x71f   : > { %v3994_v55 = vpop.permute.xlu1 %3993  ;;  %v4166_v43 = vsel %vm701_vm0, %v1373_v60, %v4004_v39 }
 0x720   : > { %v3955_v18 = vmul.f32 %v5701_v40, %v5226_v9  ;;  %v9145_v26 = vsel %vm701_vm0, %v1368_v31, %v3994_v55  ;;  %v5707_v3 = vpop.eup %5706 }
 0x721   : > { %v1374_v23 = vmul.f32 %v5707_v3, %v9853_v61  ;;  %v9854_v3 = vld [vmem:[#allocation37_spill] sm:$0xff] }
 0x722   : > { %4125 = vrot.lane.b32.xlu1 %v3955_v18, %s5844_s11  ;;  %v4008_v49 = vpop.permute.xlu0 %4007  ;;  %v5709_v21 = vpop.eup %5708  ;;  %5718 = vrcp.f32 %v9854_v3 }
 0x723   : > { %v3998_v50 = vpop.permute.xlu1 %3997  ;;  %v4168_v48 = vsel %vm701_vm0, %v1375_v27, %v4008_v49  ;;  %v5711_v2 = vpop.eup %5710 }
 0x724   : > { %v9151_v10 = vsel %vm701_vm0, %v1370_v14, %v3998_v50  ;;  %v5713_v31 = vpop.eup %5712 }
 0x725   : > { %v5715_v13 = vpop.eup %5714 }
 0x726   : > { %v9154_v54 = vpop.permute.xlu0 %4043  ;;  %v5717_v49 = vpop.eup %5716 }
 0x727   : > { %v4002_v63 = vpop.permute.xlu1 %4001 }
 0x728   : > { %v4165_v8 = vsel %vm701_vm0, %v1372_v32, %v4002_v63 }
 0x72a   : > { %v9158_v7 = vpop.permute.xlu0 %4047 }
 0x72b   : > { %v4006_v45 = vpop.permute.xlu1 %4005 }
 0x72c   : > { %v4167_v35 = vsel %vm701_vm0, %v1374_v23, %v4006_v45  ;;  %v9855_v23 = vld [vmem:[#allocation18_spill] sm:$0xff]  ;;  %v9856_v45 = vld [vmem:[#allocation19_spill] sm:$0xff] }
 0x72e   : > { %v9162_v11 = vpop.permute.xlu0 %4051 }
 0x72f   : > { %v4042_v34 = vpop.permute.xlu1 %4041  ;;  %v5719_v61 = vpop.eup %5718 }
 0x732   : > { %v9166_v4 = vpop.permute.xlu0 %4055 }
 0x733   : > { %v9169_v38 = vpop.permute.xlu1 %4045 }
 0x734   : > { %v5230_v5 = vpop.f32.mrf.mxu1 }
 0x736   : > { %v5231_v15 = vpop.f32.mrf.mxu1  ;;  %v9171_v58 = vpop.permute.xlu0 %4059 }
 0x737   : > { %v5232_v0 = vadd.f32 %v5231_v15, %v5230_v5  ;;  %v9174_v46 = vpop.permute.xlu1 %4049  ;;  %v4764_v5 = vadd.f32 %v9856_v45, %v9855_v23 }
 0x738   : > { %v5227_v17 = vpop.f32.mrf.mxu0  ;;  %v5233_v33 = vpop.f32.mrf.mxu1 }
 0x739   : > { %v3957_v56 = vmul.f32 %v5709_v21, %v5232_v0  ;;  %v1360_v15 = vmul.f32 %v5719_v61, %v4764_v5 }
 0x73a   : > { %v5228_v28 = vpop.f32.mrf.mxu0  ;;  %v5234_v22 = vpop.f32.mrf.mxu1 }
 0x73b   : > { %v5229_v47 = vadd.f32 %v5228_v28, %v5227_v17  ;;  %v9176_v29 = vpop.permute.xlu1 %4053  ;;  %v4064_v52 = vpop.permute.xlu0 %4063  ;;  %4129 = vrot.lane.b32.xlu1 %v3957_v56, %s5844_s11  ;;  %v5235_v16 = vadd.f32 %v5234_v22, %v5233_v33 }
 0x73c   : > { %v9181_v19 = vsel %vm4169_vm1, %v9131_v20, %v4064_v52  ;;  %v5236_v60 = vpop.f32.mrf.mxu1 }
 0x73d   : > { %v3956_v62 = vmul.f32 %v5711_v2, %v5229_v47  ;;  %v3958_v59 = vmul.f32 %v5715_v13, %v5235_v16 }
 0x73e   : > { %v5237_v9 = vpop.f32.mrf.mxu1 }
 0x73f   : > { %v5238_v39 = vadd.f32 %v5237_v9, %v5236_v60  ;;  %v9183_v40 = vpop.permute.xlu1 %4057  ;;  %v4068_v55 = vpop.permute.xlu0 %4067  ;;  %4127 = vrot.lane.b32.xlu0 %v3956_v62, %s5844_s11 }
 0x740   : > { %v9187_v51 = vsel %vm4169_vm1, %v4166_v43, %v4068_v55  ;;  %v5239_v12 = vpop.f32.mrf.mxu1 }
 0x741   : > { %v3959_v18 = vmul.f32 %v5713_v31, %v5238_v39 }
 0x742   : > { %v5240_v20 = vpop.f32.mrf.mxu1 }
 0x743   : > { %v5241_v1 = vadd.f32 %v5240_v20, %v5239_v12  ;;  %v4062_v27 = vpop.permute.xlu1 %4061  ;;  %v4072_v14 = vpop.permute.xlu0 %4071  ;;  %4131 = vrot.lane.b32.xlu0 %v3958_v59, %s5844_s11  ;;  %4133 = vrot.lane.b32.xlu1 %v3959_v18, %s5844_s11 }
 0x744   : > { %v9192_v50 = vsel %vm4169_vm1, %v4168_v48, %v4072_v14  ;;  %v4153_v48 = vsel %vm701_vm0, %v1360_v15, %v9072_v36  ;;  %v4171_v36 = vsel %vm4169_vm1, %v9101_v24, %v9154_v54  ;;  %v4173_v24 = vsel %vm4169_vm1, %v9086_v44, %v9158_v7 }
 0x745   : > { %v3960_v57 = vmul.f32 %v5717_v49, %v5241_v1  ;;  %v4175_v44 = vsel %vm4169_vm1, %v9096_v30, %v9162_v11  ;;  %v4177_v30 = vsel %vm4169_vm1, %v9110_v37, %v9166_v4  ;;  %v4179_v37 = vsel %vm4169_vm1, %v9121_v42, %v9171_v58 }
 0x747   : > { %v4066_v6 = vpop.permute.xlu1 %4065  ;;  %4135 = vrot.lane.b32.xlu0 %v3960_v57, %s5844_s11 }
 0x748   : > { %v4182_v43 = vsel %vm4169_vm1, %v4165_v8, %v4066_v6  ;;  %v4170_v8 = vsel %vm4169_vm1, %v4153_v48, %v4042_v34  ;;  %v4172_v34 = vsel %vm4169_vm1, %v9115_v25, %v9169_v38  ;;  %v4174_v25 = vsel %vm4169_vm1, %v9127_v41, %v9174_v46 }
 0x749   : > { %v4176_v41 = vsel %vm4169_vm1, %v9137_v53, %v9176_v29  ;;  %v4178_v53 = vsel %vm4169_vm1, %v9145_v26, %v9183_v40  ;;  %v4180_v26 = vsel %vm4169_vm1, %v9151_v10, %v4062_v27 }
 0x74b   : > { %v4070_v32 = vpop.permute.xlu1 %4069 }
 0x74c   : > { %v4184_v63 = vsel %vm4169_vm1, %v4167_v35, %v4070_v32 }
 0x76a   : > { %v4106_v35 = vpop.permute.xlu1 %4105 }
 0x76b   : > { %v4187_v0 = vsel %vm4186_vm2, %v4170_v8, %v4106_v35 }
 0x76c   : > { %4204 = vst.msk [vmem:[%s9207_s14] sm:$0xff] %vm4203_vm3, %v4187_v0 }
 0x76e   : > { %v4108_v21 = vpop.permute.xlu0 %4107 }
 0x76f   : > { %v4188_v17 = vsel %vm4186_vm2, %v4171_v36, %v4108_v21 }
 0x770   : > { %4205 = vst.msk [vmem:[%s9207_s14 + $0x8] sm:$0xff] %vm4203_vm3, %v4188_v17 }
 0x772   : > { %v4110_v33 = vpop.permute.xlu1 %4109 }
 0x773   : > { %v4189_v56 = vsel %vm4186_vm2, %v4172_v34, %v4110_v33 }
 0x774   : > { %4206 = vst.msk [vmem:[%s9207_s14 + $0x10] sm:$0xff] %vm4203_vm3, %v4189_v56 }
 0x776   : > { %v4112_v54 = vpop.permute.xlu0 %4111 }
 0x777   : > { %v4190_v28 = vsel %vm4186_vm2, %v4173_v24, %v4112_v54 }
 0x778   : > { %4207 = vst.msk [vmem:[%s9207_s14 + $0x18] sm:$0xff] %vm4203_vm3, %v4190_v28 }
 0x77a   : > { %v4114_v38 = vpop.permute.xlu1 %4113 }
 0x77b   : > { %v4191_v22 = vsel %vm4186_vm2, %v4174_v25, %v4114_v38 }
 0x77c   : > { %4208 = vst.msk [vmem:[%s9207_s14 + $0x20] sm:$0xff] %vm4203_vm3, %v4191_v22 }
 0x77e   : > { %v4116_v7 = vpop.permute.xlu0 %4115 }
 0x77f   : > { %v4192_v47 = vsel %vm4186_vm2, %v4175_v44, %v4116_v7 }
 0x780   : > { %4209 = vst.msk [vmem:[%s9207_s14 + $0x28] sm:$0xff] %vm4203_vm3, %v4192_v47 }
 0x782   : > { %v4118_v46 = vpop.permute.xlu1 %4117 }
 0x783   : > { %v4193_v52 = vsel %vm4186_vm2, %v4176_v41, %v4118_v46 }
 0x784   : > { %4210 = vst.msk [vmem:[%s9207_s14 + $0x30] sm:$0xff] %vm4203_vm3, %v4193_v52 }
 0x786   : > { %v4120_v11 = vpop.permute.xlu0 %4119 }
 0x787   : > { %v4194_v2 = vsel %vm4186_vm2, %v4177_v30, %v4120_v11 }
 0x788   : > { %4211 = vst.msk [vmem:[%s9207_s14 + $0x38] sm:$0xff] %vm4203_vm3, %v4194_v2 }
 0x78a   : > { %v4122_v29 = vpop.permute.xlu1 %4121 }
 0x78b   : > { %v4195_v60 = vsel %vm4186_vm2, %v4178_v53, %v4122_v29 }
 0x78c   : > { %4212 = vst.msk [vmem:[%s9207_s14 + $0x40] sm:$0xff] %vm4203_vm3, %v4195_v60 }
 0x78e   : > { %v4124_v4 = vpop.permute.xlu0 %4123 }
 0x78f   : > { %v4196_v62 = vsel %vm4186_vm2, %v4179_v37, %v4124_v4 }
 0x790   : > { %4213 = vst.msk [vmem:[%s9207_s14 + $0x48] sm:$0xff] %vm4203_vm3, %v4196_v62 }
 0x794   : > { %v4126_v16 = vpop.permute.xlu1 %4125 }
 0x795   : > { %v4197_v9 = vsel %vm4186_vm2, %v4180_v26, %v4126_v16 }
 0x796   : > { %4214 = vst.msk [vmem:[%s9207_s14 + $0x50] sm:$0xff] %vm4203_vm3, %v4197_v9 }
 0x7ad   : > { %v4130_v31 = vpop.permute.xlu1 %4129 }
 0x7ae   : > { %v4199_v39 = vsel %vm4186_vm2, %v4182_v43, %v4130_v31 }
 0x7af   : > { %4216 = vst.msk [vmem:[%s9207_s14 + $0x60] sm:$0xff] %vm4203_vm3, %v4199_v39 }
 0x7b1   : > { %v4128_v42 = vpop.permute.xlu0 %4127 }
 0x7b2   : > { %v4198_v58 = vsel %vm4186_vm2, %v9181_v19, %v4128_v42 }
 0x7b3   : > { %4215 = vst.msk [vmem:[%s9207_s14 + $0x58] sm:$0xff] %vm4203_vm3, %v4198_v58 }
 0x7b5   : > { %v4134_v40 = vpop.permute.xlu1 %4133  ;;  %v4132_v55 = vpop.permute.xlu0 %4131 }
 0x7b6   : > { %v4201_v10 = vsel %vm4186_vm2, %v4184_v63, %v4134_v40  ;;  %v4200_v13 = vsel %vm4186_vm2, %v9187_v51, %v4132_v55 }
 0x7b7   : > { %4218 = vst.msk [vmem:[%s9207_s14 + $0x70] sm:$0xff] %vm4203_vm3, %v4201_v10  ;;  %4217 = vst.msk [vmem:[%s9207_s14 + $0x68] sm:$0xff] %vm4203_vm3, %v4200_v13 }
 0x7b9   : > { %v4136_v12 = vpop.permute.xlu0 %4135 }
 0x7ba   : > { %v4202_v59 = vsel %vm4186_vm2, %v9192_v50, %v4136_v12 }
 0x7bb   : > { %4219 = vst.msk [vmem:[%s9207_s14 + $0x78] sm:$0xff] %vm4203_vm3, %v4202_v59 }
 0x7bc PF: > { %s14_s21 = sadd.s32 1, %s5837_s21   ;;  %s9857_s15 = smov %s5817_s16 }
 0x7bd   : > { %p11_p12 = scmp.ge.s32.totalorder %s14_s21, 6   ;;  %s9858_s16 = smov %s5919_s26 }
 0x7be   : > { %s9859_s17 = smov %s5829_s19  ;;  %s9860_s18 = smov %s5833_s20 }
 0x7bf   : > { %s9861_s19 = smov %s9864_s22  ;;  %s9862_s20 = smov %s9868_s23 }
 0x7c0   :  { %13 = sbr.rel (!%p11_p12) target bundleno = 4 (0x4), region = 106 }

</bundles_post_ra>
